<compile_context>
chip_gen: v6e
topology: v6e:2x2x1
jax: 0.10.0
libtpu: 0.0.40
codegen_flags: <defaults>
</compile_context>

<pallas_src>
import functools

import jax
import jax.numpy as jnp
from jax.experimental import pallas as pl
from jax.experimental.pallas import tpu as pltpu

_TILE = 512              # row & contraction tile (mem-bound kernels hit ~85% roofline at 512)
_MIB = 1024 * 1024


def _ceil_to(n, m):
    return ((n + m - 1) // m) * m


@functools.lru_cache(maxsize=None)
def _vmem_limit_bytes():
    """Per-generation scoped-VMEM budget: ~96 MiB of 128 on v5e/v6e, ~48 MiB of 64 on v7x."""
    try:
        cap = pltpu.get_tpu_info().vmem_capacity_bytes
    except Exception:
        cap = 64 * _MIB
    return int(min(96 * _MIB, cap * 3 // 4))


@functools.lru_cache(maxsize=None)
def _hidden_pad_multiple():
    """256-aligned hidden padding for the 2x256x256 MXU (v6e/v7x); 128 suffices on <= v5."""
    try:
        kind = jax.devices()[0].device_kind.lower()
    except Exception:
        return 256
    for old in ("v2", "v3", "v4", "v5"):
        if old in kind:
            return 128
    return 256


def _pad2(x, rows, cols, dtype):
    out = jnp.zeros((rows, cols), dtype)
    return out.at[: x.shape[0], : x.shape[1]].set(x.astype(dtype))


def _cp(sem):
    return pltpu.CompilerParams(dimension_semantics=sem,
                                vmem_limit_bytes=_vmem_limit_bytes())


# ---------------------------------------------------------------------------
# Kernels
# ---------------------------------------------------------------------------

def _bond_init_kernel(a_ab_ref, atom_x_ref, bond_e_ref, wi_x_ref, wi_e_ref, h0_ref, acc_ref):
    """h_0 = ReLU(x_src @ Wi_x + e @ Wi_e); A_ab streamed as (TILE, TILE) int8 K-tiles."""
    f32 = jnp.float32
    k = pl.program_id(1)

    @pl.when(k == 0)
    def _():
        acc_ref[...] = jnp.zeros_like(acc_ref)

    # x_src partial sum (int8 0/1 structure cast to bf16 on the VPU, hidden under the DMA).
    acc_ref[...] += jnp.dot(a_ab_ref[...].astype(jnp.bfloat16), atom_x_ref[...],
                            preferred_element_type=f32)

    @pl.when(k == pl.num_programs(1) - 1)
    def _():
        h0 = jnp.dot(acc_ref[...].astype(jnp.bfloat16), wi_x_ref[...],
                     preferred_element_type=f32)
        h0 += jnp.dot(bond_e_ref[...], wi_e_ref[...], preferred_element_type=f32)
        h0_ref[...] = jnp.maximum(h0, 0.0).astype(h0_ref.dtype)


def _message_kernel(a_bb_ref, h_ref, h0_ref, wh_ref, out_ref, acc_ref, *, tk, h_resident):
    """h(t+1) = ReLU(h_0 + (A_bb @ h(t)) @ W_h); A_bb streamed int8, h VMEM-resident if it fits."""
    f32 = jnp.float32
    k = pl.program_id(1)

    @pl.when(k == 0)
    def _():
        acc_ref[...] = jnp.zeros_like(acc_ref)

    if h_resident:
        h_blk = h_ref[pl.ds(pl.multiple_of(k * tk, tk), tk), :]
    else:
        h_blk = h_ref[...]
    acc_ref[...] += jnp.dot(a_bb_ref[...].astype(jnp.bfloat16), h_blk,
                            preferred_element_type=f32)

    @pl.when(k == pl.num_programs(1) - 1)
    def _():
        m = acc_ref[...].astype(jnp.bfloat16)
        h_new = h0_ref[...].astype(f32) + jnp.dot(m, wh_ref[...], preferred_element_type=f32)
        out_ref[...] = jnp.maximum(h_new, 0.0).astype(out_ref.dtype)


def _atom_readout_kernel(a_ba_ref, h_ref, atom_x_ref, wo_x_ref, wo_m_ref, bo_ref,
                         hv_ref, acc_ref, *, tk, h_resident):
    """h_v = ReLU(x_v @ Wo_x + (A_ba @ h) @ Wo_m + b_o); A_ba streamed int8."""
    f32 = jnp.float32
    k = pl.program_id(1)

    @pl.when(k == 0)
    def _():
        acc_ref[...] = jnp.zeros_like(acc_ref)

    if h_resident:
        h_blk = h_ref[pl.ds(pl.multiple_of(k * tk, tk), tk), :]
    else:
        h_blk = h_ref[...]
    acc_ref[...] += jnp.dot(a_ba_ref[...].astype(jnp.bfloat16), h_blk,
                            preferred_element_type=f32)

    @pl.when(k == pl.num_programs(1) - 1)
    def _():
        hv = jnp.dot(atom_x_ref[...], wo_x_ref[...], preferred_element_type=f32)
        hv += jnp.dot(acc_ref[...].astype(jnp.bfloat16), wo_m_ref[...],
                      preferred_element_type=f32)
        hv += bo_ref[...]
        hv_ref[...] = jnp.maximum(hv, 0.0).astype(hv_ref.dtype)


# ---------------------------------------------------------------------------
# One-time preparation (hoisted out of the per-call path)
# ---------------------------------------------------------------------------

def prepare_graph(atom_x, bond_e, a_ab, a_bb, a_ba):
    """Pad + cast the static graph once per graph (int8 structure, bf16 features)."""
    na, af = atom_x.shape
    nb, bf = bond_e.shape
    afp = _ceil_to(af, 128)
    bfp = _ceil_to(bf, 128)
    nap = _ceil_to(na, _TILE)
    nbp = _ceil_to(nb, _TILE)
    bf16 = jnp.bfloat16
    return {
        "atom_x": _pad2(atom_x, nap, afp, bf16),
        "bond_e": _pad2(bond_e, nbp, bfp, bf16),
        "a_ab": _pad2(a_ab, nbp, nap, jnp.int8),
        "a_bb": _pad2(a_bb, nbp, nbp, jnp.int8),
        "a_ba": _pad2(a_ba, nap, nbp, jnp.int8),
    }


def prepare_params(params, atom_fdim, bond_fdim):
    """Pad + split the weights once per checkpoint (fused concats -> two MXU calls)."""
    hidden = params["W_h"].shape[0]
    afp = _ceil_to(atom_fdim, 128)
    bfp = _ceil_to(bond_fdim, 128)
    hp = _ceil_to(hidden, _hidden_pad_multiple())
    bf16, f32 = jnp.bfloat16, jnp.float32
    wi, wh, wo, bo = params["W_i"], params["W_h"], params["W_o"], params["b_o"]
    return {
        "wi_x": _pad2(wi[:atom_fdim], afp, hp, bf16),
        "wi_e": _pad2(wi[atom_fdim:], bfp, hp, bf16),
        "wh": _pad2(wh, hp, hp, bf16),
        "wo_x": _pad2(wo[:atom_fdim], afp, hp, bf16),
        "wo_m": _pad2(wo[atom_fdim:], hp, hp, bf16),
        "bo": _pad2(bo.reshape(1, -1), 1, hp, f32),
    }


# ---------------------------------------------------------------------------
# Jitted forward
# ---------------------------------------------------------------------------

@functools.partial(jax.jit, static_argnames=("depth",))
def mpnn_encode(graph, params, pool, *, depth=3):
    if depth < 3:
        raise ValueError(f"MPNN depth must be >= 3. Your choice {depth} is < 3.")

    atom_x, bond_e = graph["atom_x"], graph["bond_e"]
    a_ab, a_bb, a_ba = graph["a_ab"], graph["a_bb"], graph["a_ba"]
    nap, afp = atom_x.shape
    nbp, bfp = bond_e.shape
    hp = params["wh"].shape[0]
    bf16, f32 = jnp.bfloat16, jnp.float32

    nbt = nbp // _TILE   # bond row tiles
    nbk = nbp // _TILE   # bond contraction tiles
    nat = nap // _TILE   # atom row tiles
    nak = nap // _TILE   # atom contraction tiles (bond-init K axis)

    # Keep h (incl. its pipeline buffers) VMEM-resident when it fits; else stream tiles.
    h_resident = (2 * nbp * hp * 2) <= (_vmem_limit_bytes() // 3)
    if h_resident:
        h_spec = pl.BlockSpec((nbp, hp), lambda i, k: (0, 0))
    else:
        h_spec = pl.BlockSpec((_TILE, hp), lambda i, k: (k, 0))
    # TODO(synk): on v7x, tag the constant-index operands (resident h, W_i/W_h/W_o, b_o) with
    # pipeline_mode=pl.Buffered(1) to drop their second pipeline buffer once VMEM gets tight.

    # --- Step 1: bond hidden-state init --------------------------------------------------
    h0 = pl.pallas_call(
        _bond_init_kernel,
        out_shape=jax.ShapeDtypeStruct((nbp, hp), bf16),
        grid=(nbt, nak),
        in_specs=[
            pl.BlockSpec((_TILE, _TILE), lambda i, k: (i, k)),   # A_ab int8 tile (streamed)
            pl.BlockSpec((_TILE, afp), lambda i, k: (k, 0)),     # atom_x K tile
            pl.BlockSpec((_TILE, bfp), lambda i, k: (i, 0)),     # bond features
            pl.BlockSpec((afp, hp), lambda i, k: (0, 0)),        # Wi_x
            pl.BlockSpec((bfp, hp), lambda i, k: (0, 0)),        # Wi_e
        ],
        out_specs=pl.BlockSpec((_TILE, hp), lambda i, k: (i, 0)),
        scratch_shapes=[pltpu.VMEM((_TILE, afp), f32)],
        compiler_params=_cp(("parallel", "arbitrary")),
    )(a_ab, atom_x, bond_e, params["wi_x"], params["wi_e"])

    # --- Step 2: (depth - 2) message-passing rounds (statically unrolled) ----------------
    msg_kernel = functools.partial(_message_kernel, tk=_TILE, h_resident=h_resident)

    def message_round(h_cur):
        return pl.pallas_call(
            msg_kernel,
            out_shape=jax.ShapeDtypeStruct((nbp, hp), bf16),
            grid=(nbt, nbk),
            in_specs=[
                pl.BlockSpec((_TILE, _TILE), lambda i, k: (i, k)),  # A_bb int8 tile (streamed)
                h_spec,                                             # h (resident or streamed)
                pl.BlockSpec((_TILE, hp), lambda i, k: (i, 0)),     # h0 (residual)
                pl.BlockSpec((hp, hp), lambda i, k: (0, 0)),        # W_h
            ],
            out_specs=pl.BlockSpec((_TILE, hp), lambda i, k: (i, 0)),
            scratch_shapes=[pltpu.VMEM((_TILE, hp), f32)],
            compiler_params=_cp(("parallel", "arbitrary")),
        )(a_bb, h_cur, h0, params["wh"])

    h = h0
    for _ in range(depth - 2):
        h = message_round(h)

    # --- Step 3: atom readout --------------------------------------------------------------
    ro_kernel = functools.partial(_atom_readout_kernel, tk=_TILE, h_resident=h_resident)
    h_v = pl.pallas_call(
        ro_kernel,
        out_shape=jax.ShapeDtypeStruct((nap, hp), f32),
        grid=(nat, nbk),
        in_specs=[
            pl.BlockSpec((_TILE, _TILE), lambda i, k: (i, k)),     # A_ba int8 tile (streamed)
            h_spec,                                                # h (resident or streamed)
            pl.BlockSpec((_TILE, afp), lambda i, k: (i, 0)),       # atom features
            pl.BlockSpec((afp, hp), lambda i, k: (0, 0)),          # Wo_x
            pl.BlockSpec((hp, hp), lambda i, k: (0, 0)),           # Wo_m
            pl.BlockSpec((1, hp), lambda i, k: (0, 0)),            # b_o
        ],
        out_specs=pl.BlockSpec((_TILE, hp), lambda i, k: (i, 0)),
        scratch_shapes=[pltpu.VMEM((_TILE, hp), f32)],
        compiler_params=_cp(("parallel", "arbitrary")),
    )(a_ba, h, atom_x, params["wo_x"], params["wo_m"], params["bo"])

    # --- Step 4: mean pooling per molecule: tiny (NM, NA) matmul left to plain XLA ----------
    na = pool.shape[1]
    return jnp.dot(pool.astype(f32), h_v[:na], preferred_element_type=f32)


def mpnn_encoder(atom_x, bond_e, a_ab, a_bb, a_ba, pool, params, *, depth=3):
    """Convenience wrapper (pads per call). For repeated forwards on the same graph,
    call prepare_graph / prepare_params once and reuse them with mpnn_encode."""
    graph = prepare_graph(atom_x, bond_e, a_ab, a_bb, a_ba)
    pparams = prepare_params(params, atom_x.shape[1], bond_e.shape[1])
    hidden = params["W_h"].shape[0]
    return mpnn_encode(graph, pparams, pool, depth=depth)[:, :hidden]


# ---------------------------------------------------------------------------
# Pure-JAX f32 reference (module semantics)
# ---------------------------------------------------------------------------

def _reference(atom_x, bond_e, a_ab, a_bb, a_ba, pool, params, *, depth=3):
    wi, wh, wo, bo = params["W_i"], params["W_h"], params["W_o"], params["b_o"]
    x_b = a_ab @ atom_x
    h0 = jnp.maximum(jnp.concatenate([x_b, bond_e], axis=1) @ wi, 0.0)
    h = h0
    for _ in range(depth - 2):
        m = a_bb @ h
        h = jnp.maximum(h0 + m @ wh, 0.0)
    m_v = a_ba @ h
    h_v = jnp.maximum(jnp.concatenate([atom_x, m_v], axis=1) @ wo + bo, 0.0)
    return pool @ h_v


if __name__ == "__main__":
    key = jax.random.PRNGKey(0)
    NA, NB, AF, BF, H, NM, DEPTH = 16, 32, 16, 16, 32, 2, 3

    k = jax.random.split(key, 10)
    atom_x = jax.random.normal(k[0], (NA, AF), dtype=jnp.float32)
    bond_e = jax.random.normal(k[1], (NB, BF), dtype=jnp.float32)

    # Deterministic synthetic graph structure.
    src_atom = jax.random.randint(k[2], (NB,), 0, NA)          # atom that 'starts' each bond
    dst_atom = jax.random.randint(k[3], (NB,), 0, NA)          # atom each bond 'starts_at'
    a_ab = jax.nn.one_hot(src_atom, NA, dtype=jnp.float32)     # (NB, NA)
    a_ba = jax.nn.one_hot(dst_atom, NA, dtype=jnp.float32).T   # (NA, NB)
    a_bb = (jax.random.uniform(k[4], (NB, NB)) < 0.2).astype(jnp.float32)
    a_bb = a_bb * (1.0 - jnp.eye(NB, dtype=jnp.float32))       # (NB, NB), no self loops

    # Two molecules: atoms [0:8) -> mol 0, [8:16) -> mol 1; mean pooling rows.
    mol_id = jnp.concatenate([jnp.zeros(NA // 2, jnp.int32), jnp.ones(NA // 2, jnp.int32)])
    pool = jax.nn.one_hot(mol_id, NM, dtype=jnp.float32).T
    pool = pool / jnp.sum(pool, axis=1, keepdims=True)         # (NM, NA)

    # Deterministic parameter init (synthetic, not a checkpoint load).
    params = {
        "W_i": jax.random.normal(k[5], (AF + BF, H), dtype=jnp.float32) * 0.1,
        "W_h": jax.random.normal(k[6], (H, H), dtype=jnp.float32) * 0.1,
        "W_o": jax.random.normal(k[7], (AF + H, H), dtype=jnp.float32) * 0.1,
        "b_o": jax.random.normal(k[8], (H,), dtype=jnp.float32) * 0.1,
    }

    # Hoisted preparation (done once per graph / checkpoint), then the jitted forward.
    graph_p = prepare_graph(atom_x, bond_e, a_ab, a_bb, a_ba)
    params_p = prepare_params(params, AF, BF)
    out = mpnn_encode(graph_p, params_p, pool, depth=DEPTH)[:, :H]
    out = jax.block_until_ready(out)

    ref = _reference(atom_x, bond_e, a_ab, a_bb, a_ba, pool, params, depth=DEPTH)
    assert out.shape == (NM, H)
    # bf16 storage of features/weights (f32 accumulation) introduces ~1e-3..1e-2-level error
    # vs. the pure-f32 reference; int8/bf16 structure matrices are exact.
    assert jnp.allclose(out, ref, atol=2e-2, rtol=2e-2), "Pallas output mismatch vs reference"

    print("KERNEL_OK")
</pallas_src>

<mosaic_0001>
module attributes {stable_mosaic.version = 11 : i64} {
  func.func @_message_kernel(%arg0: i32, %arg1: i32, %arg2: memref<512x512xi8, #tpu.memory_space<vmem>>, %arg3: memref<512x256xbf16, #tpu.memory_space<vmem>>, %arg4: memref<512x256xbf16, #tpu.memory_space<vmem>>, %arg5: memref<256x256xbf16, #tpu.memory_space<vmem>>, %arg6: memref<512x256xbf16, #tpu.memory_space<vmem>>, %arg7: memref<512x256xf32, #tpu.memory_space<vmem>>) attributes {dimension_semantics = [#tpu.dimension_semantics<parallel>, #tpu.dimension_semantics<arbitrary>], iteration_bounds = array<i64: 1, 1>, scalar_prefetch = 0 : i64, scratch_operands = 1 : i64, tpu.core_type = #tpu.core_type<tc>, window_params = [{transform_indices = @transform_0, window_bounds = array<i64: 512, 512>}, {pipeline_mode = #tpu.pipeline_mode<synchronous>, transform_indices = @transform_1, window_bounds = array<i64: 512, 256>}, {transform_indices = @transform_2, window_bounds = array<i64: 512, 256>}, {pipeline_mode = #tpu.pipeline_mode<synchronous>, transform_indices = @transform_3, window_bounds = array<i64: 256, 256>}, {transform_indices = @transform_4, window_bounds = array<i64: 512, 256>}]} {
    %c0_i32 = arith.constant 0 : i32
    %0 = arith.cmpi eq, %arg1, %c0_i32 : i32
    %1 = arith.extui %0 : i1 to i32
    %c0_i32_0 = arith.constant 0 : i32
    %2 = arith.cmpi ne, %1, %c0_i32_0 : i32
    scf.if %2 {
      %cst_9 = arith.constant 0.000000e+00 : f32
      %16 = vector.broadcast %cst_9 : f32 to vector<512x256xf32>
      %c0_10 = arith.constant 0 : index
      %c0_11 = arith.constant 0 : index
      %17 = vector.load %arg7[%c0_10, %c0_11] : memref<512x256xf32, #tpu.memory_space<vmem>>, vector<512x256xf32>
      tpu.vector_store %arg7[%c0_10, %c0_11], %16 {strides = array<i32>} : memref<512x256xf32, #tpu.memory_space<vmem>>, vector<512x256xf32>,
    } else {
    }
    %c512_i32 = arith.constant 512 : i32
    %3 = arith.muli %arg1, %c512_i32 : i32
    %4 = tpu.assume_multiple %3, 512 : i32
    %5 = arith.index_cast %4 : i32 to index
    %c0 = arith.constant 0 : index
    %6 = vector.load %arg3[%5, %c0] : memref<512x256xbf16, #tpu.memory_space<vmem>>, vector<512x256xbf16>
    %c0_1 = arith.constant 0 : index
    %c0_2 = arith.constant 0 : index
    %7 = vector.load %arg7[%c0_1, %c0_2] : memref<512x256xf32, #tpu.memory_space<vmem>>, vector<512x256xf32>
    %c0_3 = arith.constant 0 : index
    %c0_4 = arith.constant 0 : index
    %8 = vector.load %arg2[%c0_3, %c0_4] : memref<512x512xi8, #tpu.memory_space<vmem>>, vector<512x512xi8>
    %9 = arith.sitofp %8 : vector<512x512xi8> to vector<512x512xbf16>
    %cst = arith.constant dense<0.000000e+00> : vector<512x256xf32>
    %10 = tpu.matmul %9, %6, %cst {dimension_numbers = #tpu.dot_dimension_numbers<[1], [0], [0], [1], [0, 0, 1, 1], [], []>} : vector<512x512xbf16>, vector<512x256xbf16>, vector<512x256xf32> -> vector<512x256xf32>
    %11 = arith.addf %7, %10 : vector<512x256xf32>
    %c0_5 = arith.constant 0 : index
    %c0_6 = arith.constant 0 : index
    %12 = vector.load %arg7[%c0_5, %c0_6] : memref<512x256xf32, #tpu.memory_space<vmem>>, vector<512x256xf32>
    tpu.vector_store %arg7[%c0_5, %c0_6], %11 {strides = array<i32>} : memref<512x256xf32, #tpu.memory_space<vmem>>, vector<512x256xf32>,
    %c0_i32_7 = arith.constant 0 : i32
    %13 = arith.cmpi eq, %arg1, %c0_i32_7 : i32
    %14 = arith.extui %13 : i1 to i32
    %c0_i32_8 = arith.constant 0 : i32
    %15 = arith.cmpi ne, %14, %c0_i32_8 : i32
    scf.if %15 {
      %c0_9 = arith.constant 0 : index
      %c0_10 = arith.constant 0 : index
      %16 = vector.load %arg7[%c0_9, %c0_10] : memref<512x256xf32, #tpu.memory_space<vmem>>, vector<512x256xf32>
      %17 = arith.truncf %16 : vector<512x256xf32> to vector<512x256xbf16>
      %c0_11 = arith.constant 0 : index
      %c0_12 = arith.constant 0 : index
      %18 = vector.load %arg4[%c0_11, %c0_12] : memref<512x256xbf16, #tpu.memory_space<vmem>>, vector<512x256xbf16>
      %19 = arith.extf %18 : vector<512x256xbf16> to vector<512x256xf32>
      %c0_13 = arith.constant 0 : index
      %c0_14 = arith.constant 0 : index
      %20 = vector.load %arg5[%c0_13, %c0_14] : memref<256x256xbf16, #tpu.memory_space<vmem>>, vector<256x256xbf16>
      %cst_15 = arith.constant dense<0.000000e+00> : vector<512x256xf32>
      %21 = tpu.matmul %17, %20, %cst_15 {dimension_numbers = #tpu.dot_dimension_numbers<[1], [0], [0], [1], [0, 0, 1, 1], [], []>} : vector<512x256xbf16>, vector<256x256xbf16>, vector<512x256xf32> -> vector<512x256xf32>
      %22 = arith.addf %19, %21 : vector<512x256xf32>
      %cst_16 = arith.constant 0.000000e+00 : f32
      %23 = vector.broadcast %cst_16 : f32 to vector<512x256xf32>
      %24 = arith.maximumf %22, %23 : vector<512x256xf32>
      %25 = arith.truncf %24 : vector<512x256xf32> to vector<512x256xbf16>
      %c0_17 = arith.constant 0 : index
      %c0_18 = arith.constant 0 : index
      %26 = vector.load %arg6[%c0_17, %c0_18] : memref<512x256xbf16, #tpu.memory_space<vmem>>, vector<512x256xbf16>
      tpu.vector_store %arg6[%c0_17, %c0_18], %25 {strides = array<i32>} : memref<512x256xbf16, #tpu.memory_space<vmem>>, vector<512x256xbf16>,
    } else {
    }
    return
  }
  func.func @transform_0(%arg0: i32, %arg1: i32) -> (i32, i32) {
    %c0_i32 = arith.constant 0 : i32
    return %arg0, %arg1 : i32, i32
  }
  func.func @transform_1(%arg0: i32, %arg1: i32) -> (i32, i32) {
    %c0_i32 = arith.constant 0 : i32
    %c0_i32_0 = arith.constant 0 : i32
    %c0_i32_1 = arith.constant 0 : i32
    return %c0_i32, %c0_i32_0 : i32, i32
  }
  func.func @transform_2(%arg0: i32, %arg1: i32) -> (i32, i32) {
    %c0_i32 = arith.constant 0 : i32
    %c0_i32_0 = arith.constant 0 : i32
    return %arg0, %c0_i32 : i32, i32
  }
  func.func @transform_3(%arg0: i32, %arg1: i32) -> (i32, i32) {
    %c0_i32 = arith.constant 0 : i32
    %c0_i32_0 = arith.constant 0 : i32
    %c0_i32_1 = arith.constant 0 : i32
    return %c0_i32, %c0_i32_0 : i32, i32
  }
  func.func @transform_4(%arg0: i32, %arg1: i32) -> (i32, i32) {
    %c0_i32 = arith.constant 0 : i32
    %c0_i32_0 = arith.constant 0 : i32
    return %arg0, %c0_i32 : i32, i32
  }
}

module attributes {stable_mosaic.version = 11 : i64} {
  func.func @_atom_readout_kernel(%arg0: i32, %arg1: i32, %arg2: memref<512x512xi8, #tpu.memory_space<vmem>>, %arg3: memref<512x256xbf16, #tpu.memory_space<vmem>>, %arg4: memref<512x128xbf16, #tpu.memory_space<vmem>>, %arg5: memref<128x256xbf16, #tpu.memory_space<vmem>>, %arg6: memref<256x256xbf16, #tpu.memory_space<vmem>>, %arg7: memref<1x256xf32, #tpu.memory_space<vmem>>, %arg8: memref<512x256xf32, #tpu.memory_space<vmem>>, %arg9: memref<512x256xf32, #tpu.memory_space<vmem>>) attributes {dimension_semantics = [#tpu.dimension_semantics<parallel>, #tpu.dimension_semantics<arbitrary>], iteration_bounds = array<i64: 1, 1>, scalar_prefetch = 0 : i64, scratch_operands = 1 : i64, tpu.core_type = #tpu.core_type<tc>, window_params = [{transform_indices = @transform_0, window_bounds = array<i64: 512, 512>}, {pipeline_mode = #tpu.pipeline_mode<synchronous>, transform_indices = @transform_1, window_bounds = array<i64: 512, 256>}, {transform_indices = @transform_2, window_bounds = array<i64: 512, 128>}, {pipeline_mode = #tpu.pipeline_mode<synchronous>, transform_indices = @transform_3, window_bounds = array<i64: 128, 256>}, {pipeline_mode = #tpu.pipeline_mode<synchronous>, transform_indices = @transform_4, window_bounds = array<i64: 256, 256>}, {pipeline_mode = #tpu.pipeline_mode<synchronous>, transform_indices = @transform_5, window_bounds = array<i64: 1, 256>}, {transform_indices = @transform_6, window_bounds = array<i64: 512, 256>}]} {
    %c0_i32 = arith.constant 0 : i32
    %0 = arith.cmpi eq, %arg1, %c0_i32 : i32
    %1 = arith.extui %0 : i1 to i32
    %c0_i32_0 = arith.constant 0 : i32
    %2 = arith.cmpi ne, %1, %c0_i32_0 : i32
    scf.if %2 {
      %cst_9 = arith.constant 0.000000e+00 : f32
      %16 = vector.broadcast %cst_9 : f32 to vector<512x256xf32>
      %c0_10 = arith.constant 0 : index
      %c0_11 = arith.constant 0 : index
      %17 = vector.load %arg9[%c0_10, %c0_11] : memref<512x256xf32, #tpu.memory_space<vmem>>, vector<512x256xf32>
      tpu.vector_store %arg9[%c0_10, %c0_11], %16 {strides = array<i32>} : memref<512x256xf32, #tpu.memory_space<vmem>>, vector<512x256xf32>,
    } else {
    }
    %c512_i32 = arith.constant 512 : i32
    %3 = arith.muli %arg1, %c512_i32 : i32
    %4 = tpu.assume_multiple %3, 512 : i32
    %5 = arith.index_cast %4 : i32 to index
    %c0 = arith.constant 0 : index
    %6 = vector.load %arg3[%5, %c0] : memref<512x256xbf16, #tpu.memory_space<vmem>>, vector<512x256xbf16>
    %c0_1 = arith.constant 0 : index
    %c0_2 = arith.constant 0 : index
    %7 = vector.load %arg9[%c0_1, %c0_2] : memref<512x256xf32, #tpu.memory_space<vmem>>, vector<512x256xf32>
    %c0_3 = arith.constant 0 : index
    %c0_4 = arith.constant 0 : index
    %8 = vector.load %arg2[%c0_3, %c0_4] : memref<512x512xi8, #tpu.memory_space<vmem>>, vector<512x512xi8>
    %9 = arith.sitofp %8 : vector<512x512xi8> to vector<512x512xbf16>
    %cst = arith.constant dense<0.000000e+00> : vector<512x256xf32>
    %10 = tpu.matmul %9, %6, %cst {dimension_numbers = #tpu.dot_dimension_numbers<[1], [0], [0], [1], [0, 0, 1, 1], [], []>} : vector<512x512xbf16>, vector<512x256xbf16>, vector<512x256xf32> -> vector<512x256xf32>
    %11 = arith.addf %7, %10 : vector<512x256xf32>
    %c0_5 = arith.constant 0 : index
    %c0_6 = arith.constant 0 : index
    %12 = vector.load %arg9[%c0_5, %c0_6] : memref<512x256xf32, #tpu.memory_space<vmem>>, vector<512x256xf32>
    tpu.vector_store %arg9[%c0_5, %c0_6], %11 {strides = array<i32>} : memref<512x256xf32, #tpu.memory_space<vmem>>, vector<512x256xf32>,
    %c0_i32_7 = arith.constant 0 : i32
    %13 = arith.cmpi eq, %arg1, %c0_i32_7 : i32
    %14 = arith.extui %13 : i1 to i32
    %c0_i32_8 = arith.constant 0 : i32
    %15 = arith.cmpi ne, %14, %c0_i32_8 : i32
    scf.if %15 {
      %c0_9 = arith.constant 0 : index
      %c0_10 = arith.constant 0 : index
      %16 = vector.load %arg4[%c0_9, %c0_10] : memref<512x128xbf16, #tpu.memory_space<vmem>>, vector<512x128xbf16>
      %c0_11 = arith.constant 0 : index
      %c0_12 = arith.constant 0 : index
      %17 = vector.load %arg5[%c0_11, %c0_12] : memref<128x256xbf16, #tpu.memory_space<vmem>>, vector<128x256xbf16>
      %cst_13 = arith.constant dense<0.000000e+00> : vector<512x256xf32>
      %18 = tpu.matmul %16, %17, %cst_13 {dimension_numbers = #tpu.dot_dimension_numbers<[1], [0], [0], [1], [0, 0, 1, 1], [], []>} : vector<512x128xbf16>, vector<128x256xbf16>, vector<512x256xf32> -> vector<512x256xf32>
      %c0_14 = arith.constant 0 : index
      %c0_15 = arith.constant 0 : index
      %19 = vector.load %arg9[%c0_14, %c0_15] : memref<512x256xf32, #tpu.memory_space<vmem>>, vector<512x256xf32>
      %20 = arith.truncf %19 : vector<512x256xf32> to vector<512x256xbf16>
      %c0_16 = arith.constant 0 : index
      %c0_17 = arith.constant 0 : index
      %21 = vector.load %arg6[%c0_16, %c0_17] : memref<256x256xbf16, #tpu.memory_space<vmem>>, vector<256x256xbf16>
      %cst_18 = arith.constant dense<0.000000e+00> : vector<512x256xf32>
      %22 = tpu.matmul %20, %21, %cst_18 {dimension_numbers = #tpu.dot_dimension_numbers<[1], [0], [0], [1], [0, 0, 1, 1], [], []>} : vector<512x256xbf16>, vector<256x256xbf16>, vector<512x256xf32> -> vector<512x256xf32>
      %23 = arith.addf %18, %22 : vector<512x256xf32>
      %c0_19 = arith.constant 0 : index
      %c0_20 = arith.constant 0 : index
      %24 = vector.load %arg7[%c0_19, %c0_20] : memref<1x256xf32, #tpu.memory_space<vmem>>, vector<1x256xf32>
      %25 = vector.broadcast %24 : vector<1x256xf32> to vector<512x256xf32>
      %26 = arith.addf %23, %25 : vector<512x256xf32>
      %cst_21 = arith.constant 0.000000e+00 : f32
      %27 = vector.broadcast %cst_21 : f32 to vector<512x256xf32>
      %28 = arith.maximumf %26, %27 : vector<512x256xf32>
      %c0_22 = arith.constant 0 : index
      %c0_23 = arith.constant 0 : index
      %29 = vector.load %arg8[%c0_22, %c0_23] : memref<512x256xf32, #tpu.memory_space<vmem>>, vector<512x256xf32>
      tpu.vector_store %arg8[%c0_22, %c0_23], %28 {strides = array<i32>} : memref<512x256xf32, #tpu.memory_space<vmem>>, vector<512x256xf32>,
    } else {
    }
    return
  }
  func.func @transform_0(%arg0: i32, %arg1: i32) -> (i32, i32) {
    %c0_i32 = arith.constant 0 : i32
    return %arg0, %arg1 : i32, i32
  }
  func.func @transform_1(%arg0: i32, %arg1: i32) -> (i32, i32) {
    %c0_i32 = arith.constant 0 : i32
    %c0_i32_0 = arith.constant 0 : i32
    %c0_i32_1 = arith.constant 0 : i32
    return %c0_i32, %c0_i32_0 : i32, i32
  }
  func.func @transform_2(%arg0: i32, %arg1: i32) -> (i32, i32) {
    %c0_i32 = arith.constant 0 : i32
    %c0_i32_0 = arith.constant 0 : i32
    return %arg0, %c0_i32 : i32, i32
  }
  func.func @transform_3(%arg0: i32, %arg1: i32) -> (i32, i32) {
    %c0_i32 = arith.constant 0 : i32
    %c0_i32_0 = arith.constant 0 : i32
    %c0_i32_1 = arith.constant 0 : i32
    return %c0_i32, %c0_i32_0 : i32, i32
  }
  func.func @transform_4(%arg0: i32, %arg1: i32) -> (i32, i32) {
    %c0_i32 = arith.constant 0 : i32
    %c0_i32_0 = arith.constant 0 : i32
    %c0_i32_1 = arith.constant 0 : i32
    return %c0_i32, %c0_i32_0 : i32, i32
  }
  func.func @transform_5(%arg0: i32, %arg1: i32) -> (i32, i32) {
    %c0_i32 = arith.constant 0 : i32
    %c0_i32_0 = arith.constant 0 : i32
    %c0_i32_1 = arith.constant 0 : i32
    return %c0_i32, %c0_i32_0 : i32, i32
  }
  func.func @transform_6(%arg0: i32, %arg1: i32) -> (i32, i32) {
    %c0_i32 = arith.constant 0 : i32
    %c0_i32_0 = arith.constant 0 : i32
    return %arg0, %c0_i32 : i32, i32
  }
}

module attributes {stable_mosaic.version = 11 : i64} {
  func.func @_bond_init_kernel(%arg0: i32, %arg1: i32, %arg2: memref<512x512xi8, #tpu.memory_space<vmem>>, %arg3: memref<512x128xbf16, #tpu.memory_space<vmem>>, %arg4: memref<512x128xbf16, #tpu.memory_space<vmem>>, %arg5: memref<128x256xbf16, #tpu.memory_space<vmem>>, %arg6: memref<128x256xbf16, #tpu.memory_space<vmem>>, %arg7: memref<512x256xbf16, #tpu.memory_space<vmem>>, %arg8: memref<512x128xf32, #tpu.memory_space<vmem>>) attributes {dimension_semantics = [#tpu.dimension_semantics<parallel>, #tpu.dimension_semantics<arbitrary>], iteration_bounds = array<i64: 1, 1>, scalar_prefetch = 0 : i64, scratch_operands = 1 : i64, tpu.core_type = #tpu.core_type<tc>, window_params = [{transform_indices = @transform_0, window_bounds = array<i64: 512, 512>}, {transform_indices = @transform_1, window_bounds = array<i64: 512, 128>}, {transform_indices = @transform_2, window_bounds = array<i64: 512, 128>}, {pipeline_mode = #tpu.pipeline_mode<synchronous>, transform_indices = @transform_3, window_bounds = array<i64: 128, 256>}, {pipeline_mode = #tpu.pipeline_mode<synchronous>, transform_indices = @transform_4, window_bounds = array<i64: 128, 256>}, {transform_indices = @transform_5, window_bounds = array<i64: 512, 256>}]} {
    %c0_i32 = arith.constant 0 : i32
    %0 = arith.cmpi eq, %arg1, %c0_i32 : i32
    %1 = arith.extui %0 : i1 to i32
    %c0_i32_0 = arith.constant 0 : i32
    %2 = arith.cmpi ne, %1, %c0_i32_0 : i32
    scf.if %2 {
      %cst_10 = arith.constant 0.000000e+00 : f32
      %13 = vector.broadcast %cst_10 : f32 to vector<512x128xf32>
      %c0_11 = arith.constant 0 : index
      %c0_12 = arith.constant 0 : index
      %14 = vector.load %arg8[%c0_11, %c0_12] : memref<512x128xf32, #tpu.memory_space<vmem>>, vector<512x128xf32>
      tpu.vector_store %arg8[%c0_11, %c0_12], %13 {strides = array<i32>} : memref<512x128xf32, #tpu.memory_space<vmem>>, vector<512x128xf32>,
    } else {
    }
    %c0 = arith.constant 0 : index
    %c0_1 = arith.constant 0 : index
    %3 = vector.load %arg8[%c0, %c0_1] : memref<512x128xf32, #tpu.memory_space<vmem>>, vector<512x128xf32>
    %c0_2 = arith.constant 0 : index
    %c0_3 = arith.constant 0 : index
    %4 = vector.load %arg2[%c0_2, %c0_3] : memref<512x512xi8, #tpu.memory_space<vmem>>, vector<512x512xi8>
    %5 = arith.sitofp %4 : vector<512x512xi8> to vector<512x512xbf16>
    %c0_4 = arith.constant 0 : index
    %c0_5 = arith.constant 0 : index
    %6 = vector.load %arg3[%c0_4, %c0_5] : memref<512x128xbf16, #tpu.memory_space<vmem>>, vector<512x128xbf16>
    %cst = arith.constant dense<0.000000e+00> : vector<512x128xf32>
    %7 = tpu.matmul %5, %6, %cst {dimension_numbers = #tpu.dot_dimension_numbers<[1], [0], [0], [1], [0, 0, 1, 1], [], []>} : vector<512x512xbf16>, vector<512x128xbf16>, vector<512x128xf32> -> vector<512x128xf32>
    %8 = arith.addf %3, %7 : vector<512x128xf32>
    %c0_6 = arith.constant 0 : index
    %c0_7 = arith.constant 0 : index
    %9 = vector.load %arg8[%c0_6, %c0_7] : memref<512x128xf32, #tpu.memory_space<vmem>>, vector<512x128xf32>
    tpu.vector_store %arg8[%c0_6, %c0_7], %8 {strides = array<i32>} : memref<512x128xf32, #tpu.memory_space<vmem>>, vector<512x128xf32>,
    %c0_i32_8 = arith.constant 0 : i32
    %10 = arith.cmpi eq, %arg1, %c0_i32_8 : i32
    %11 = arith.extui %10 : i1 to i32
    %c0_i32_9 = arith.constant 0 : i32
    %12 = arith.cmpi ne, %11, %c0_i32_9 : i32
    scf.if %12 {
      %c0_10 = arith.constant 0 : index
      %c0_11 = arith.constant 0 : index
      %13 = vector.load %arg8[%c0_10, %c0_11] : memref<512x128xf32, #tpu.memory_space<vmem>>, vector<512x128xf32>
      %14 = arith.truncf %13 : vector<512x128xf32> to vector<512x128xbf16>
      %c0_12 = arith.constant 0 : index
      %c0_13 = arith.constant 0 : index
      %15 = vector.load %arg5[%c0_12, %c0_13] : memref<128x256xbf16, #tpu.memory_space<vmem>>, vector<128x256xbf16>
      %cst_14 = arith.constant dense<0.000000e+00> : vector<512x256xf32>
      %16 = tpu.matmul %14, %15, %cst_14 {dimension_numbers = #tpu.dot_dimension_numbers<[1], [0], [0], [1], [0, 0, 1, 1], [], []>} : vector<512x128xbf16>, vector<128x256xbf16>, vector<512x256xf32> -> vector<512x256xf32>
      %c0_15 = arith.constant 0 : index
      %c0_16 = arith.constant 0 : index
      %17 = vector.load %arg4[%c0_15, %c0_16] : memref<512x128xbf16, #tpu.memory_space<vmem>>, vector<512x128xbf16>
      %c0_17 = arith.constant 0 : index
      %c0_18 = arith.constant 0 : index
      %18 = vector.load %arg6[%c0_17, %c0_18] : memref<128x256xbf16, #tpu.memory_space<vmem>>, vector<128x256xbf16>
      %cst_19 = arith.constant dense<0.000000e+00> : vector<512x256xf32>
      %19 = tpu.matmul %17, %18, %cst_19 {dimension_numbers = #tpu.dot_dimension_numbers<[1], [0], [0], [1], [0, 0, 1, 1], [], []>} : vector<512x128xbf16>, vector<128x256xbf16>, vector<512x256xf32> -> vector<512x256xf32>
      %20 = arith.addf %16, %19 : vector<512x256xf32>
      %cst_20 = arith.constant 0.000000e+00 : f32
      %21 = vector.broadcast %cst_20 : f32 to vector<512x256xf32>
      %22 = arith.maximumf %20, %21 : vector<512x256xf32>
      %23 = arith.truncf %22 : vector<512x256xf32> to vector<512x256xbf16>
      %c0_21 = arith.constant 0 : index
      %c0_22 = arith.constant 0 : index
      %24 = vector.load %arg7[%c0_21, %c0_22] : memref<512x256xbf16, #tpu.memory_space<vmem>>, vector<512x256xbf16>
      tpu.vector_store %arg7[%c0_21, %c0_22], %23 {strides = array<i32>} : memref<512x256xbf16, #tpu.memory_space<vmem>>, vector<512x256xbf16>,
    } else {
    }
    return
  }
  func.func @transform_0(%arg0: i32, %arg1: i32) -> (i32, i32) {
    %c0_i32 = arith.constant 0 : i32
    return %arg0, %arg1 : i32, i32
  }
  func.func @transform_1(%arg0: i32, %arg1: i32) -> (i32, i32) {
    %c0_i32 = arith.constant 0 : i32
    %c0_i32_0 = arith.constant 0 : i32
    return %arg1, %c0_i32 : i32, i32
  }
  func.func @transform_2(%arg0: i32, %arg1: i32) -> (i32, i32) {
    %c0_i32 = arith.constant 0 : i32
    %c0_i32_0 = arith.constant 0 : i32
    return %arg0, %c0_i32 : i32, i32
  }
  func.func @transform_3(%arg0: i32, %arg1: i32) -> (i32, i32) {
    %c0_i32 = arith.constant 0 : i32
    %c0_i32_0 = arith.constant 0 : i32
    %c0_i32_1 = arith.constant 0 : i32
    return %c0_i32, %c0_i32_0 : i32, i32
  }
  func.func @transform_4(%arg0: i32, %arg1: i32) -> (i32, i32) {
    %c0_i32 = arith.constant 0 : i32
    %c0_i32_0 = arith.constant 0 : i32
    %c0_i32_1 = arith.constant 0 : i32
    return %c0_i32, %c0_i32_0 : i32, i32
  }
  func.func @transform_5(%arg0: i32, %arg1: i32) -> (i32, i32) {
    %c0_i32 = arith.constant 0 : i32
    %c0_i32_0 = arith.constant 0 : i32
    return %arg0, %c0_i32 : i32, i32
  }
}

</mosaic_0001>

<bundles_post_ra>
// kernel: mpnn_encode.3
= control target key start
LH: loop header
LB: loop body
LE: loop exit
PB: predicated region body
PF: predicated region fallthrough
CT: control target
= control target key end

     0   :  { %10 = vsyncpa [#allocation4], 0  ;;  %s4414_s0 = inlined_call_operand.hbm [shape: s8[512,512], index: 0, kind: input, shape index: {}]   ;;  %s4415_s1 = inlined_call_operand.hbm [shape: bf16[512,128], index: 1, kind: input, shape index: {}]   ;;  %s4416_s2 = inlined_call_operand.hbm [shape: bf16[512,128], index: 2, kind: input, shape index: {}]   ;;  %s4417_s3 = inlined_call_operand.hbm [shape: bf16[128,256], index: 3, kind: input, shape index: {}]   ;;  %s4418_s4 = inlined_call_operand.hbm [shape: bf16[128,256], index: 4, kind: input, shape index: {}]   ;;  %s4419_s5 = inlined_call_operand.vmem [shape: bf16[512,256], index: 5, kind: output, shape index: {}]  }
   0x1   :  { %11 = vsyncpa [#allocation6], 0 }
   0x2   :  { %12 = vsyncpa [#allocation9], 0  ;;  %s3665_s18 = smov [#allocation5]  }
   0x3   :  { %s30_s19 = sshll.u32 %s3665_s18, 4  ;;  %s31_s19 = int_to_ptr.vmem [resolvable:$true] %s30_s19 }
   0x4   :  { %s3567_s20 = scalar_lea.vmem %s31_s19, 4096  ;;  %p3572_p1 = scmp.lt.s32.totalorder %s31_s19, %s31_s19 }
   0x5   :  { %p3568_p0 = scmp.ne.s32.totalorder %s31_s19, %s3567_s20  ;;  %p3573_p2 = scmp.lt.s32.totalorder %s3567_s20, %s3567_s20 }
   0x7   :  { %p3574_p3 = por %p3573_p2, %p3572_p1 }
   0x9   :  { %p3575_p4 = pnand %p3574_p3, %p3568_p0 }
   0xb   :  { %3578 = shalt.err (!%p3575_p4)
}
   0xc   :  { %s3666_s21 = smov 64   ;;  %s3667_s22 = smov 4  }
   0xd   :  { %36 = dma.hbm_to_vmem [thread:$0]  %s4415_s1, 4096, %s31_s19, [#allocation6], %s3666_s21, %s3666_s21, %s3667_s22  }
   0xe   :  { %s3668_s25 = smov [#allocation8]  }
   0xf   :  { %s54_s26 = sshll.u32 %s3668_s25, 4  ;;  %s55_s26 = int_to_ptr.vmem [resolvable:$true] %s54_s26 }
  0x10   :  { %s3587_s27 = scalar_lea.vmem %s55_s26, 2048  ;;  %p3592_p6 = scmp.lt.s32.totalorder %s55_s26, %s55_s26 }
  0x11   :  { %p3588_p5 = scmp.ne.s32.totalorder %s55_s26, %s3587_s27  ;;  %p3593_p7 = scmp.lt.s32.totalorder %s3587_s27, %s3587_s27 }
  0x13   :  { %p3594_p8 = por %p3593_p7, %p3592_p6 }
  0x15   :  { %p3595_p9 = pnand %p3594_p8, %p3588_p5 }
  0x17   :  { %3598 = shalt.err (!%p3595_p9)
}
  0x18   :  { %s3669_s28 = smov 128   ;;  %s3670_s29 = smov 8  }
  0x19   :  { %60 = dma.hbm_to_vmem [thread:$0]  %s4417_s3, 2048, %s55_s26, [#allocation9], %s3669_s28, %s3669_s28, %s3670_s29  }
  0x1a   :  { %s3671_s1 = smov [#allocation3]  }
  0x1b   :  { %s18_s7 = sshll.u32 %s3671_s1, 4  ;;  %s19_s7 = int_to_ptr.vmem [resolvable:$true] %s18_s7 }
  0x1c   :  { %s3607_s8 = scalar_lea.vmem %s19_s7, 8192  ;;  %p3612_p11 = scmp.lt.s32.totalorder %s19_s7, %s19_s7 }
  0x1d   :  { %p3608_p10 = scmp.ne.s32.totalorder %s19_s7, %s3607_s8  ;;  %p3613_p12 = scmp.lt.s32.totalorder %s3607_s8, %s3607_s8 }
  0x1f   :  { %p3614_p13 = por %p3613_p12, %p3612_p11 }
  0x21   :  { %p3615_p0 = pnand %p3614_p13, %p3608_p10 }
  0x23   :  { %3618 = shalt.err (!%p3615_p0)
}
  0x24   :  { %s3672_s9 = smov 512   ;;  %s3673_s10 = smov 32  }
  0x25   :  { %24 = dma.hbm_to_vmem [thread:$0]  %s4414_s0, 8192, %s19_s7, [#allocation4], %s3672_s9, %s3672_s9, %s3673_s10  }
  0x26   :  { %s3674_s13 = smov [#allocation7]   ;;  %s3675_s3 = smov [#allocation10]  }
  0x27   :  { %s42_s14 = sshll.u32 %s3674_s13, 4  ;;  %s66_s15 = sshll.u32 %s3675_s3, 4  ;;  %s43_s14 = int_to_ptr.vmem [resolvable:$true] %s42_s14  ;;  %s67_s15 = int_to_ptr.vmem [resolvable:$true] %s66_s15 }
  0x28   :  { %s3627_s16 = scalar_lea.vmem %s43_s14, 4096  ;;  %p3632_p2 = scmp.lt.s32.totalorder %s43_s14, %s43_s14 }
  0x29   :  { %p3628_p1 = scmp.ne.s32.totalorder %s43_s14, %s3627_s16  ;;  %p3633_p3 = scmp.lt.s32.totalorder %s3627_s16, %s3627_s16 }
  0x2b   :  { %p3634_p4 = por %p3633_p3, %p3632_p2 }
  0x2d   :  { %p3635_p5 = pnand %p3634_p4, %p3628_p1 }
  0x2f   :  { %3638 = shalt.err (!%p3635_p5)
}
  0x30   :  { %48 = dma.hbm_to_vmem [thread:$0]  %s4416_s2, 4096, %s43_s14, [#allocation6], %s3666_s21, %s3666_s21, %s3667_s22  }
  0x31   :  { %s3647_s0 = scalar_lea.vmem %s67_s15, 2048  ;;  %p3652_p7 = scmp.lt.s32.totalorder %s67_s15, %s67_s15 }
  0x32   :  { %p3648_p6 = scmp.ne.s32.totalorder %s67_s15, %s3647_s0  ;;  %p3653_p8 = scmp.lt.s32.totalorder %s3647_s0, %s3647_s0 }
  0x34   :  { %p3654_p9 = por %p3653_p8, %p3652_p7 }
  0x36   :  { %p3655_p10 = pnand %p3654_p9, %p3648_p6 }
  0x38   :  { %3658 = shalt.err (!%p3655_p10)
}
  0x39   :  { %72 = dma.hbm_to_vmem [thread:$0]  %s4418_s4, 2048, %s67_s15, [#allocation9], %s3669_s28, %s3669_s28, %s3670_s29  }
  0x3a   :  { %3659 = dma.done.wait [#allocation4], 8192  }
  0x3b   :  { %3660 = vsyncadd [#allocation4], 4294959104 }
  0x3c   :  { %3661 = dma.done.wait [#allocation6], 8192  }
  0x3d   :  { %3662 = vsyncadd [#allocation6], 4294959104 }
  0x3e   :  { %3663 = dma.done.wait [#allocation9], 4096  }
  0x3f   :  { %3664 = vsyncadd [#allocation9], 4294963200  ;;  %v3676_v0 = vmov 0   ;;  %v3447_v1 = vld [vmem:[#allocation5 + $0x38] sm:$0xff]   ;;  %v3449_v3 = vld [vmem:[#allocation5 + $0x30] sm:$0xff]  }
  0x40   :  { %669 = vmatprep.subr.bf16.mxu0 %v3676_v0  ;;  %958 = vmatprep.subr.bf16.mxu1 %v3676_v0  ;;  %v3448_v2 = vld [vmem:[#allocation5 + $0xb8] sm:$0xff]   ;;  %v3450_v4 = vld [vmem:[#allocation5 + $0xb0] sm:$0xff]   ;;  %v3451_v5 = vld [vmem:[#allocation5 + $0x28] sm:$0xff]  }
  0x41   :  { %670 = vmatpush1.bf16.msra.mxu0 %v3447_v1  ;;  %959 = vmatpush1.bf16.msra.mxu1 %v3448_v2  ;;  %v3452_v6 = vld [vmem:[#allocation5 + $0xa8] sm:$0xff]   ;;  %v3453_v7 = vld [vmem:[#allocation5 + $0x20] sm:$0xff]   ;;  %v3455_v9 = vld [vmem:[#allocation5 + $0x18] sm:$0xff]  }
  0x42   :  { %671 = vmatprep.subr.bf16.mxu0 %v3676_v0  ;;  %960 = vmatprep.subr.bf16.mxu1 %v3676_v0  ;;  %v3454_v8 = vld [vmem:[#allocation5 + $0xa0] sm:$0xff]   ;;  %v3456_v10 = vld [vmem:[#allocation5 + $0x98] sm:$0xff]   ;;  %v3457_v11 = vld [vmem:[#allocation5 + $0x10] sm:$0xff]  }
  0x43   :  { %v3458_v12 = vld [vmem:[#allocation5 + $0x90] sm:$0xff]   ;;  %v3459_v13 = vld [vmem:[#allocation5 + $0x8] sm:$0xff]   ;;  %v3461_v15 = vld [vmem:[#allocation5] sm:$0xff]  }
  0x44   :  { %v3460_v14 = vld [vmem:[#allocation5 + $0x88] sm:$0xff]   ;;  %v3462_v16 = vld [vmem:[#allocation5 + $0x80] sm:$0xff]   ;;  %v3463_v17 = vld [vmem:[#allocation5 + $0x78] sm:$0xff]  }
  0x45   :  { %672 = vmatpush1.bf16.msra.mxu0 %v3449_v3  ;;  %961 = vmatpush1.bf16.msra.mxu1 %v3450_v4  ;;  %v3464_v18 = vld [vmem:[#allocation5 + $0xf8] sm:$0xff]   ;;  %v3752_v19 = vld [vmem:[#allocation3 + $0x8] sm:$0xff]  ;;  %v3465_v23 = vld [vmem:[#allocation5 + $0x70] sm:$0xff]  }
  0x46   :  { %673 = vmatprep.subr.bf16.mxu0 %v3676_v0  ;;  %962 = vmatprep.subr.bf16.mxu1 %v3676_v0  ;;  %v3754_v20 = vld [vmem:[#allocation3 + $0x18] sm:$0xff]  ;;  %v286_v21 = vunpack.c.l.s8.bf16 %v3752_v19  ;;  %v3466_v24 = vld [vmem:[#allocation5 + $0xf0] sm:$0xff]   ;;  %v3467_v25 = vld [vmem:[#allocation5 + $0x68] sm:$0xff]   ;;  %v290_v46 = vunpack.c.h.s8.bf16 %v3752_v19 }
  0x47   :  { %v288_v22 = vunpack.c.l.s8.bf16 %v3754_v20  ;;  %v3468_v26 = vld [vmem:[#allocation5 + $0xe8] sm:$0xff]   ;;  %v3469_v27 = vld [vmem:[#allocation5 + $0x60] sm:$0xff]   ;;  %v3471_v29 = vld [vmem:[#allocation5 + $0x58] sm:$0xff]   ;;  %v292_v48 = vunpack.c.h.s8.bf16 %v3754_v20 }
  0x48   :  { %701 = vmatprep.mubr.bf16.mxu0 %v286_v21  ;;  %v3470_v28 = vld [vmem:[#allocation5 + $0xe0] sm:$0xff]   ;;  %v3472_v30 = vld [vmem:[#allocation5 + $0xd8] sm:$0xff]   ;;  %v3473_v31 = vld [vmem:[#allocation5 + $0x50] sm:$0xff]  }
  0x49   :  { %674 = vmatpush1.bf16.msra.mxu0 %v3451_v5  ;;  %963 = vmatpush1.bf16.msra.mxu1 %v3452_v6  ;;  %v3474_v32 = vld [vmem:[#allocation5 + $0xd0] sm:$0xff]   ;;  %v3475_v33 = vld [vmem:[#allocation5 + $0x48] sm:$0xff]   ;;  %v3477_v35 = vld [vmem:[#allocation5 + $0x40] sm:$0xff]  }
  0x4a   :  { %675 = vmatprep.subr.bf16.mxu0 %v3676_v0  ;;  %964 = vmatprep.subr.bf16.mxu1 %v3676_v0  ;;  %v3476_v34 = vld [vmem:[#allocation5 + $0xc8] sm:$0xff]   ;;  %v221_v36 = vld [vmem:[#allocation3] sm:$0xff]  ;;  %v223_v38 = vld [vmem:[#allocation3 + $0x10] sm:$0xff] }
  0x4b   :  { %990 = vmatprep.mubr.bf16.mxu1 %v288_v22  ;;  %v3478_v37 = vld [vmem:[#allocation5 + $0xc0] sm:$0xff]   ;;  %v3481_v39 = vld [vmem:[#allocation10 + $0x74] ss:$8 sps:$4 sm:$0xff]   ;;  %v3479_v41 = vld [vmem:[#allocation10 + $0x70] ss:$8 sps:$4 sm:$0xff]   ;;  %v285_v42 = vunpack.c.l.s8.bf16 %v221_v36  ;;  %v287_v44 = vunpack.c.l.s8.bf16 %v223_v38  ;;  %v289_v55 = vunpack.c.h.s8.bf16 %v221_v36  ;;  %v291_v57 = vunpack.c.h.s8.bf16 %v223_v38 }
  0x4c   :  { %v3484_v40 = vld [vmem:[#allocation8 + $0x74] ss:$8 sps:$4 sm:$0xff]   ;;  %v3482_v43 = vld [vmem:[#allocation8 + $0x70] ss:$8 sps:$4 sm:$0xff]   ;;  %v3487_v45 = vld [vmem:[#allocation10 + $0x64] ss:$8 sps:$4 sm:$0xff]  }
  0x4d   :  { %676 = vmatpush1.bf16.msra.mxu0 %v3453_v7  ;;  %965 = vmatpush1.bf16.msra.mxu1 %v3454_v8  ;;  %v3490_v47 = vld [vmem:[#allocation8 + $0x64] ss:$8 sps:$4 sm:$0xff]   ;;  %v228_v50 = vld [vmem:[#allocation3 + $0x38] sm:$0xff]  ;;  %v3485_v51 = vld [vmem:[#allocation10 + $0x60] ss:$8 sps:$4 sm:$0xff]  }
  0x4e   :  { %677 = vmatprep.subr.bf16.mxu0 %v3676_v0  ;;  %966 = vmatprep.subr.bf16.mxu1 %v3676_v0  ;;  %v226_v49 = vld [vmem:[#allocation3 + $0x28] sm:$0xff]  ;;  %v3493_v53 = vld [vmem:[#allocation10 + $0x54] ss:$8 sps:$4 sm:$0xff]   ;;  %v3491_v56 = vld [vmem:[#allocation10 + $0x50] ss:$8 sps:$4 sm:$0xff]   ;;  %v296_v61 = vunpack.c.l.s8.bf16 %v228_v50 }
  0x4f   :  { %v3488_v52 = vld [vmem:[#allocation8 + $0x60] ss:$8 sps:$4 sm:$0xff]   ;;  %v3496_v54 = vld [vmem:[#allocation8 + $0x54] ss:$8 sps:$4 sm:$0xff]   ;;  %v294_v58 = vunpack.c.l.s8.bf16 %v226_v49  ;;  %v3494_v59 = vld [vmem:[#allocation8 + $0x50] ss:$8 sps:$4 sm:$0xff]  }
  0x50   :  { %v3499_v60 = vld [vmem:[#allocation10 + $0x44] ss:$8 sps:$4 sm:$0xff]   ;;  %v227_v1 = vld [vmem:[#allocation3 + $0x30] sm:$0xff]  ;;  %v3497_v2 = vld [vmem:[#allocation10 + $0x40] ss:$8 sps:$4 sm:$0xff]  }
  0x51   :  { %678 = vmatpush1.bf16.msra.mxu0 %v3455_v9  ;;  %967 = vmatpush1.bf16.msra.mxu1 %v3456_v10  ;;  %v3502_v62 = vld [vmem:[#allocation8 + $0x44] ss:$8 sps:$4 sm:$0xff]   ;;  %v3500_v3 = vld [vmem:[#allocation8 + $0x40] ss:$8 sps:$4 sm:$0xff]   ;;  %v3505_v4 = vld [vmem:[#allocation10 + $0x34] ss:$8 sps:$4 sm:$0xff]   ;;  %v295_v8 = vunpack.c.l.s8.bf16 %v227_v1  ;;  %v298_v9 = vunpack.c.h.s8.bf16 %v226_v49  ;;  %v300_v10 = vunpack.c.h.s8.bf16 %v228_v50 }
  0x52   :  { %679 = vmatprep.subr.bf16.mxu0 %v3676_v0  ;;  %968 = vmatprep.subr.bf16.mxu1 %v3676_v0  ;;  %v225_v63 = vld [vmem:[#allocation3 + $0x20] sm:$0xff]  ;;  %v3508_v5 = vld [vmem:[#allocation8 + $0x34] ss:$8 sps:$4 sm:$0xff]   ;;  %v3503_v7 = vld [vmem:[#allocation10 + $0x30] ss:$8 sps:$4 sm:$0xff]  }
  0x53   :  { %v293_v6 = vunpack.c.l.s8.bf16 %v225_v63  ;;  %v231_v19 = vld [vmem:[#allocation3 + $0x50] sm:$0xff] }
  0x54   :  { %v303_v21 = vunpack.c.l.s8.bf16 %v231_v19 }
  0x55   :  { %680 = vmatpush1.bf16.msra.mxu0 %v3457_v11  ;;  %969 = vmatpush1.bf16.msra.mxu1 %v3458_v12  ;;  %v3506_v11 = vld [vmem:[#allocation8 + $0x30] ss:$8 sps:$4 sm:$0xff]   ;;  %v230_v12 = vld [vmem:[#allocation3 + $0x48] sm:$0xff] }
  0x56   :  { %681 = vmatprep.subr.bf16.mxu0 %v3676_v0  ;;  %970 = vmatprep.subr.bf16.mxu1 %v3676_v0  ;;  %v306_v22 = vunpack.c.h.s8.bf16 %v230_v12 }
  0x59   :  { %682 = vmatpush1.bf16.msra.mxu0 %v3459_v13  ;;  %971 = vmatpush1.bf16.msra.mxu1 %v3460_v14  ;;  %v232_v13 = vld [vmem:[#allocation3 + $0x58] sm:$0xff]  ;;  %v297_v14 = vunpack.c.h.s8.bf16 %v225_v63  ;;  %v243_v63 = vld [vmem:[#allocation3 + $0xb0] sm:$0xff] }
  0x5a   :  { %683 = vmatprep.subr.bf16.mxu0 %v3676_v0  ;;  %972 = vmatprep.subr.bf16.mxu1 %v3676_v0 }
  0x5d   :  { %684 = vmatpush1.bf16.msra.mxu0 %v3461_v15  ;;  %973 = vmatpush1.bf16.msra.mxu1 %v3462_v16  ;;  %v299_v15 = vunpack.c.h.s8.bf16 %v227_v1  ;;  %v302_v16 = vunpack.c.l.s8.bf16 %v230_v12  ;;  %v247_v12 = vld [vmem:[#allocation3 + $0xd0] sm:$0xff] }
  0x5e   :  { %685 = vmatprep.subr.bf16.mxu0 %v3676_v0  ;;  %974 = vmatprep.subr.bf16.mxu1 %v3676_v0 }
  0x61   :  { %686 = vmatpush2.bf16.msra.mxu0 %v3463_v17  ;;  %975 = vmatpush2.bf16.msra.mxu1 %v3464_v18  ;;  %v304_v17 = vunpack.c.l.s8.bf16 %v232_v13  ;;  %v229_v18 = vld [vmem:[#allocation3 + $0x40] sm:$0xff] }
  0x62   :  { %687 = vmatprep.subr.bf16.mxu0 %v3676_v0  ;;  %976 = vmatprep.subr.bf16.mxu1 %v3676_v0  ;;  %v301_v20 = vunpack.c.l.s8.bf16 %v229_v18 }
  0x65   :  { %688 = vmatpush2.bf16.msra.mxu0 %v3465_v23  ;;  %977 = vmatpush2.bf16.msra.mxu1 %v3466_v24  ;;  %v308_v23 = vunpack.c.h.s8.bf16 %v232_v13  ;;  %v3509_v24 = vld [vmem:[#allocation10 + $0x20] ss:$8 sps:$4 sm:$0xff]  }
  0x66   :  { %689 = vmatprep.subr.bf16.mxu0 %v3676_v0  ;;  %978 = vmatprep.subr.bf16.mxu1 %v3676_v0 }
  0x69   :  { %690 = vmatpush2.bf16.msra.mxu0 %v3467_v25  ;;  %979 = vmatpush2.bf16.msra.mxu1 %v3468_v26  ;;  %v3511_v25 = vld [vmem:[#allocation10 + $0x24] ss:$8 sps:$4 sm:$0xff]   ;;  %v3512_v26 = vld [vmem:[#allocation8 + $0x20] ss:$8 sps:$4 sm:$0xff]  }
  0x6a   :  { %691 = vmatprep.subr.bf16.mxu0 %v3676_v0  ;;  %980 = vmatprep.subr.bf16.mxu1 %v3676_v0 }
  0x6d   :  { %692 = vmatpush2.bf16.msra.mxu0 %v3469_v27  ;;  %981 = vmatpush2.bf16.msra.mxu1 %v3470_v28  ;;  %v234_v27 = vld [vmem:[#allocation3 + $0x68] sm:$0xff] }
  0x6e   :  { %693 = vmatprep.subr.bf16.mxu0 %v3676_v0  ;;  %982 = vmatprep.subr.bf16.mxu1 %v3676_v0  ;;  %v3514_v28 = vld [vmem:[#allocation8 + $0x24] ss:$8 sps:$4 sm:$0xff]   ;;  %v314_v38 = vunpack.c.h.s8.bf16 %v234_v27 }
  0x71   :  { %694 = vmatpush2.bf16.msra.mxu0 %v3471_v29  ;;  %983 = vmatpush2.bf16.msra.mxu1 %v3472_v30  ;;  %v236_v29 = vld [vmem:[#allocation3 + $0x78] sm:$0xff]  ;;  %v305_v30 = vunpack.c.h.s8.bf16 %v229_v18  ;;  %v3521_v18 = vld [vmem:[#allocation10] ss:$8 sps:$4 sm:$0xff]  }
  0x72   :  { %695 = vmatprep.subr.bf16.mxu0 %v3676_v0  ;;  %984 = vmatprep.subr.bf16.mxu1 %v3676_v0 }
  0x75   :  { %696 = vmatpush2.bf16.msra.mxu0 %v3473_v31  ;;  %985 = vmatpush2.bf16.msra.mxu1 %v3474_v32  ;;  %v307_v31 = vunpack.c.h.s8.bf16 %v231_v19  ;;  %v310_v32 = vunpack.c.l.s8.bf16 %v234_v27  ;;  %v3523_v19 = vld [vmem:[#allocation10 + $0x4] ss:$8 sps:$4 sm:$0xff]  }
  0x76   :  { %697 = vmatprep.subr.bf16.mxu0 %v3676_v0  ;;  %986 = vmatprep.subr.bf16.mxu1 %v3676_v0  ;;  %v249_v27 = vld [vmem:[#allocation3 + $0xe0] sm:$0xff] }
  0x79   :  { %698 = vmatpush2.bf16.msra.mxu0 %v3475_v33  ;;  %987 = vmatpush2.bf16.msra.mxu1 %v3476_v34  ;;  %v312_v33 = vunpack.c.l.s8.bf16 %v236_v29  ;;  %v233_v34 = vld [vmem:[#allocation3 + $0x60] sm:$0xff] }
  0x7a   :  { %699 = vmatprep.subr.bf16.mxu0 %v3676_v0  ;;  %988 = vmatprep.subr.bf16.mxu1 %v3676_v0  ;;  %v309_v36 = vunpack.c.l.s8.bf16 %v233_v34 }
  0x7d   :  { %700 = vmatpush2.bf16.msra.mxu0 %v3477_v35  ;;  %989 = vmatpush2.bf16.msra.mxu1 %v3478_v37  ;;  %v235_v35 = vld [vmem:[#allocation3 + $0x70] sm:$0xff] }
  0x7e   :  { %1842 = vmatprep.subr.bf16.mxu0 %v3481_v39  ;;  %2275 = vmatprep.subr.bf16.mxu1 %v3484_v40  ;;  %v311_v37 = vunpack.c.l.s8.bf16 %v235_v35  ;;  %v316_v39 = vunpack.c.h.s8.bf16 %v236_v29  ;;  %v238_v40 = vld [vmem:[#allocation3 + $0x88] sm:$0xff]  ;;  %v341_v29 = vunpack.c.l.s8.bf16 %v249_v27 }
  0x7f   :  { %v322_v50 = vunpack.c.h.s8.bf16 %v238_v40 }
  0x80   :  { %702 = vmatmul.mubr.bf16.vlgmr.msra.gmra.mxu0 %v285_v42  ;;  %991 = vmatmul.mubr.bf16.vlgmr.msra.gmra.mxu1 %v287_v44  ;;  %v313_v42 = vunpack.c.h.s8.bf16 %v233_v34  ;;  %v318_v44 = vunpack.c.l.s8.bf16 %v238_v40  ;;  %v256_v34 = vld [vmem:[#allocation3 + $0x118] sm:$0xff]  ;;  %v255_v40 = vld [vmem:[#allocation3 + $0x110] sm:$0xff] }
  0x81   :  { %1843 = vmatpush1.bf16.msra.mxu0 %v3479_v41  ;;  %2276 = vmatpush1.bf16.msra.mxu1 %v3482_v43  ;;  %v240_v41 = vld [vmem:[#allocation3 + $0x98] sm:$0xff]  ;;  %v315_v43 = vunpack.c.h.s8.bf16 %v235_v35  ;;  %v345_v35 = vunpack.c.h.s8.bf16 %v249_v27 }
  0x82   :  { %709 = vmatprep.mubr.bf16.mxu0 %v290_v46  ;;  %998 = vmatprep.mubr.bf16.mxu1 %v292_v48  ;;  %v237_v46 = vld [vmem:[#allocation3 + $0x80] sm:$0xff] }
  0x83   :  { %1844 = vmatprep.subr.bf16.mxu0 %v3487_v45  ;;  %2277 = vmatprep.subr.bf16.mxu1 %v3490_v47  ;;  %v320_v45 = vunpack.c.l.s8.bf16 %v240_v41  ;;  %v239_v47 = vld [vmem:[#allocation3 + $0x90] sm:$0xff]  ;;  %v317_v48 = vunpack.c.l.s8.bf16 %v237_v46 }
  0x84   :  { %v319_v49 = vunpack.c.l.s8.bf16 %v239_v47 }
  0x85   :  { %1845 = vmatpush1.bf16.msra.mxu0 %v3485_v51  ;;  %2278 = vmatpush1.bf16.msra.mxu1 %v3488_v52  ;;  %v324_v51 = vunpack.c.h.s8.bf16 %v240_v41  ;;  %v242_v52 = vld [vmem:[#allocation3 + $0xa8] sm:$0xff] }
  0x86   :  { %1846 = vmatprep.subr.bf16.mxu0 %v3493_v53  ;;  %2279 = vmatprep.subr.bf16.mxu1 %v3496_v54  ;;  %v3515_v53 = vld [vmem:[#allocation10 + $0x10] ss:$8 sps:$4 sm:$0xff]   ;;  %v3517_v54 = vld [vmem:[#allocation10 + $0x14] ss:$8 sps:$4 sm:$0xff]  }
  0x88   :  { %710 = vmatmul.mubr.bf16.gmra.mxu0 %v289_v55  ;;  %999 = vmatmul.mubr.bf16.gmra.mxu1 %v291_v57  ;;  %v3518_v55 = vld [vmem:[#allocation8 + $0x10] ss:$8 sps:$4 sm:$0xff]   ;;  %v3520_v57 = vld [vmem:[#allocation8 + $0x14] ss:$8 sps:$4 sm:$0xff]  }
  0x89   :  { %717 = vmatprep.mubr.bf16.mxu0 %v294_v58  ;;  %1006 = vmatprep.mubr.bf16.mxu1 %v296_v61  ;;  %v321_v58 = vunpack.c.h.s8.bf16 %v237_v46  ;;  %v260_v46 = vld [vmem:[#allocation3 + $0x138] sm:$0xff] }
  0x8a   :  { %1847 = vmatpush1.bf16.msra.mxu0 %v3491_v56  ;;  %2280 = vmatpush1.bf16.msra.mxu1 %v3494_v59  ;;  %v244_v56 = vld [vmem:[#allocation3 + $0xb8] sm:$0xff]  ;;  %v323_v59 = vunpack.c.h.s8.bf16 %v239_v47 }
  0x8b   :  { %1848 = vmatprep.subr.bf16.mxu0 %v3499_v60  ;;  %2281 = vmatprep.subr.bf16.mxu1 %v3502_v62  ;;  %v326_v60 = vunpack.c.l.s8.bf16 %v242_v52  ;;  %v328_v61 = vunpack.c.l.s8.bf16 %v244_v56  ;;  %v241_v62 = vld [vmem:[#allocation3 + $0xa0] sm:$0xff] }
  0x8c   :  { %v325_v1 = vunpack.c.l.s8.bf16 %v241_v62 }
  0x8e   :  { %1849 = vmatpush1.bf16.msra.mxu0 %v3497_v2  ;;  %2282 = vmatpush1.bf16.msra.mxu1 %v3500_v3  ;;  %v327_v2 = vunpack.c.l.s8.bf16 %v243_v63  ;;  %v330_v3 = vunpack.c.h.s8.bf16 %v242_v52  ;;  %v259_v52 = vld [vmem:[#allocation3 + $0x130] sm:$0xff] }
  0x8f   :  { %1850 = vmatprep.subr.bf16.mxu0 %v3505_v4  ;;  %2283 = vmatprep.subr.bf16.mxu1 %v3508_v5  ;;  %v332_v4 = vunpack.c.h.s8.bf16 %v244_v56  ;;  %v246_v5 = vld [vmem:[#allocation3 + $0xc8] sm:$0xff]  ;;  %v364_v56 = vunpack.c.h.s8.bf16 %v260_v46 }
  0x90   :  { %718 = vmatmul.mubr.bf16.gmra.mxu0 %v293_v6  ;;  %1007 = vmatmul.mubr.bf16.gmra.mxu1 %v295_v8  ;;  %v248_v6 = vld [vmem:[#allocation3 + $0xd8] sm:$0xff]  ;;  %v331_v8 = vunpack.c.h.s8.bf16 %v243_v63  ;;  %v261_v63 = vld [vmem:[#allocation3 + $0x140] sm:$0xff] }
  0x91   :  { %725 = vmatprep.mubr.bf16.mxu0 %v298_v9  ;;  %1014 = vmatprep.mubr.bf16.mxu1 %v300_v10  ;;  %v334_v9 = vunpack.c.l.s8.bf16 %v246_v5  ;;  %v336_v10 = vunpack.c.l.s8.bf16 %v248_v6 }
  0x92   :  { %1851 = vmatpush1.bf16.msra.mxu0 %v3503_v7  ;;  %2284 = vmatpush1.bf16.msra.mxu1 %v3506_v11  ;;  %v329_v7 = vunpack.c.h.s8.bf16 %v241_v62  ;;  %v245_v11 = vld [vmem:[#allocation3 + $0xc0] sm:$0xff] }
  0x93   :  { %1852 = vmatprep.subr.bf16.mxu0 %v3511_v25  ;;  %2285 = vmatprep.subr.bf16.mxu1 %v3514_v28  ;;  %v333_v13 = vunpack.c.l.s8.bf16 %v245_v11  ;;  %v251_v28 = vld [vmem:[#allocation3 + $0xf0] sm:$0xff] }
  0x96   :  { %1853 = vmatpush1.bf16.msra.mxu0 %v3509_v24  ;;  %2286 = vmatpush1.bf16.msra.mxu1 %v3512_v26  ;;  %v339_v24 = vunpack.c.h.s8.bf16 %v247_v12 }
  0x97   :  { %1854 = vmatprep.subr.bf16.mxu0 %v3517_v54  ;;  %2287 = vmatprep.subr.bf16.mxu1 %v3520_v57  ;;  %v359_v54 = vunpack.c.l.s8.bf16 %v259_v52  ;;  %v262_v57 = vld [vmem:[#allocation3 + $0x148] sm:$0xff] }
  0x98   :  { %726 = vmatmul.mubr.bf16.gmra.mxu0 %v297_v14  ;;  %1015 = vmatmul.mubr.bf16.gmra.mxu1 %v299_v15  ;;  %v335_v14 = vunpack.c.l.s8.bf16 %v247_v12  ;;  %v338_v15 = vunpack.c.h.s8.bf16 %v246_v5  ;;  %v265_v12 = vld [vmem:[#allocation3 + $0x160] sm:$0xff] }
  0x99   :  { %733 = vmatprep.mubr.bf16.mxu0 %v302_v16  ;;  %1022 = vmatprep.mubr.bf16.mxu1 %v304_v17  ;;  %v340_v16 = vunpack.c.h.s8.bf16 %v248_v6  ;;  %v250_v17 = vld [vmem:[#allocation3 + $0xe8] sm:$0xff] }
  0x9a   :  { %1855 = vmatpush1.bf16.msra.mxu0 %v3515_v53  ;;  %2288 = vmatpush1.bf16.msra.mxu1 %v3518_v55  ;;  %v342_v25 = vunpack.c.l.s8.bf16 %v250_v17  ;;  %v266_v6 = vld [vmem:[#allocation3 + $0x168] sm:$0xff] }
  0x9b   :  { %1856 = vmatprep.subr.bf16.mxu0 %v3523_v19  ;;  %v272_v19 = vld [vmem:[#allocation3 + $0x198] sm:$0xff] }
  0x9e   :  { %1857 = vmatpush1.bf16.msra.mxu0 %v3521_v18  ;;  %v270_v18 = vld [vmem:[#allocation3 + $0x188] sm:$0xff] }
  0xa0   :  { %734 = vmatmul.mubr.bf16.gmra.mxu0 %v301_v20  ;;  %1023 = vmatmul.mubr.bf16.gmra.mxu1 %v303_v21  ;;  %v3524_v20 = vld [vmem:[#allocation8] ss:$8 sps:$4 sm:$0xff]   ;;  %v252_v21 = vld [vmem:[#allocation3 + $0xf8] sm:$0xff] }
  0xa1   :  { %741 = vmatprep.mubr.bf16.mxu0 %v306_v22  ;;  %1030 = vmatprep.mubr.bf16.mxu1 %v308_v23  ;;  %v3526_v22 = vld [vmem:[#allocation8 + $0x4] ss:$8 sps:$4 sm:$0xff]   ;;  %v337_v23 = vunpack.c.h.s8.bf16 %v245_v11  ;;  %v344_v26 = vunpack.c.l.s8.bf16 %v252_v21 }
  0xa2   :  { %2289 = vmatprep.subr.bf16.mxu1 %v3526_v22  ;;  %v382_v22 = vunpack.c.l.s8.bf16 %v270_v18 }
  0xa3   :  { %2290 = vmatpush1.bf16.msra.mxu1 %v3524_v20  ;;  %v377_v20 = vunpack.c.h.s8.bf16 %v265_v12 }
  0xa8   :  { %742 = vmatmul.mubr.bf16.gmra.mxu0 %v305_v30  ;;  %1031 = vmatmul.mubr.bf16.gmra.mxu1 %v307_v31  ;;  %v343_v30 = vunpack.c.l.s8.bf16 %v251_v28  ;;  %v346_v31 = vunpack.c.h.s8.bf16 %v250_v17 }
  0xa9   :  { %749 = vmatprep.mubr.bf16.mxu0 %v310_v32  ;;  %1038 = vmatprep.mubr.bf16.mxu1 %v312_v33  ;;  %v348_v32 = vunpack.c.h.s8.bf16 %v252_v21  ;;  %v254_v33 = vld [vmem:[#allocation3 + $0x108] sm:$0xff] }
  0xb0   :  { %750 = vmatmul.mubr.bf16.gmra.mxu0 %v309_v36  ;;  %1039 = vmatmul.mubr.bf16.gmra.mxu1 %v311_v37  ;;  %v347_v36 = vunpack.c.h.s8.bf16 %v251_v28  ;;  %v350_v37 = vunpack.c.l.s8.bf16 %v254_v33  ;;  %v386_v28 = vunpack.c.h.s8.bf16 %v270_v18 }
  0xb1   :  { %757 = vmatprep.mubr.bf16.mxu0 %v314_v38  ;;  %1046 = vmatprep.mubr.bf16.mxu1 %v316_v39  ;;  %v352_v38 = vunpack.c.l.s8.bf16 %v256_v34  ;;  %v253_v39 = vld [vmem:[#allocation3 + $0x100] sm:$0xff] }
  0xb2   :  { %v349_v41 = vunpack.c.l.s8.bf16 %v253_v39  ;;  %v353_v47 = vunpack.c.h.s8.bf16 %v253_v39 }
  0xb8   :  { %758 = vmatmul.mubr.bf16.gmra.mxu0 %v313_v42  ;;  %1047 = vmatmul.mubr.bf16.gmra.mxu1 %v315_v43  ;;  %v351_v42 = vunpack.c.l.s8.bf16 %v255_v40  ;;  %v354_v43 = vunpack.c.h.s8.bf16 %v254_v33  ;;  %v274_v33 = vld [vmem:[#allocation3 + $0x1a8] sm:$0xff] }
  0xb9   :  { %765 = vmatprep.mubr.bf16.mxu0 %v318_v44  ;;  %1054 = vmatprep.mubr.bf16.mxu1 %v320_v45  ;;  %v356_v44 = vunpack.c.h.s8.bf16 %v256_v34  ;;  %v258_v45 = vld [vmem:[#allocation3 + $0x128] sm:$0xff] }
  0xba   :  { %v362_v55 = vunpack.c.h.s8.bf16 %v258_v45 }
  0xc0   :  { %766 = vmatmul.mubr.bf16.gmra.mxu0 %v317_v48  ;;  %1055 = vmatmul.mubr.bf16.gmra.mxu1 %v319_v49  ;;  %v355_v48 = vunpack.c.h.s8.bf16 %v255_v40  ;;  %v358_v49 = vunpack.c.l.s8.bf16 %v258_v45  ;;  %v390_v40 = vunpack.c.l.s8.bf16 %v274_v33 }
  0xc1   :  { %773 = vmatprep.mubr.bf16.mxu0 %v322_v50  ;;  %1062 = vmatprep.mubr.bf16.mxu1 %v324_v51  ;;  %v360_v50 = vunpack.c.l.s8.bf16 %v260_v46  ;;  %v257_v51 = vld [vmem:[#allocation3 + $0x120] sm:$0xff] }
  0xc2   :  { %v357_v53 = vunpack.c.l.s8.bf16 %v257_v51  ;;  %v273_v46 = vld [vmem:[#allocation3 + $0x1a0] sm:$0xff] }
  0xc8   :  { %774 = vmatmul.mubr.bf16.gmra.mxu0 %v321_v58  ;;  %1063 = vmatmul.mubr.bf16.gmra.mxu1 %v323_v59  ;;  %v264_v58 = vld [vmem:[#allocation3 + $0x158] sm:$0xff]  ;;  %v361_v59 = vunpack.c.h.s8.bf16 %v257_v51  ;;  %v389_v51 = vunpack.c.l.s8.bf16 %v273_v46 }
  0xc9   :  { %781 = vmatprep.mubr.bf16.mxu0 %v326_v60  ;;  %1070 = vmatprep.mubr.bf16.mxu1 %v328_v61  ;;  %v363_v60 = vunpack.c.h.s8.bf16 %v259_v52  ;;  %v366_v61 = vunpack.c.l.s8.bf16 %v262_v57  ;;  %v368_v62 = vunpack.c.l.s8.bf16 %v264_v58  ;;  %v372_v5 = vunpack.c.h.s8.bf16 %v264_v58 }
  0xd0   :  { %782 = vmatmul.mubr.bf16.gmra.mxu0 %v325_v1  ;;  %1071 = vmatmul.mubr.bf16.gmra.mxu1 %v327_v2  ;;  %v263_v1 = vld [vmem:[#allocation3 + $0x150] sm:$0xff]  ;;  %v365_v2 = vunpack.c.l.s8.bf16 %v261_v63 }
  0xd1   :  { %789 = vmatprep.mubr.bf16.mxu0 %v330_v3  ;;  %1078 = vmatprep.mubr.bf16.mxu1 %v332_v4  ;;  %v367_v3 = vunpack.c.l.s8.bf16 %v263_v1  ;;  %v370_v4 = vunpack.c.h.s8.bf16 %v262_v57 }
  0xd8   :  { %790 = vmatmul.mubr.bf16.gmra.mxu0 %v329_v7  ;;  %1079 = vmatmul.mubr.bf16.gmra.mxu1 %v331_v8  ;;  %v268_v7 = vld [vmem:[#allocation3 + $0x178] sm:$0xff]  ;;  %v369_v8 = vunpack.c.h.s8.bf16 %v261_v63 }
  0xd9   :  { %797 = vmatprep.mubr.bf16.mxu0 %v334_v9  ;;  %1086 = vmatprep.mubr.bf16.mxu1 %v336_v10  ;;  %v371_v9 = vunpack.c.h.s8.bf16 %v263_v1  ;;  %v374_v10 = vunpack.c.l.s8.bf16 %v266_v6  ;;  %v376_v11 = vunpack.c.l.s8.bf16 %v268_v7  ;;  %v380_v17 = vunpack.c.h.s8.bf16 %v268_v7  ;;  %v280_v63 = vld [vmem:[#allocation3 + $0x1d8] sm:$0xff] }
  0xda   :  { %v400_v7 = vunpack.c.l.s8.bf16 %v280_v63 }
  0xe0   :  { %798 = vmatmul.mubr.bf16.gmra.mxu0 %v333_v13  ;;  %1087 = vmatmul.mubr.bf16.gmra.mxu1 %v335_v14  ;;  %v267_v13 = vld [vmem:[#allocation3 + $0x170] sm:$0xff]  ;;  %v373_v14 = vunpack.c.l.s8.bf16 %v265_v12 }
  0xe1   :  { %805 = vmatprep.mubr.bf16.mxu0 %v338_v15  ;;  %1094 = vmatprep.mubr.bf16.mxu1 %v340_v16  ;;  %v375_v15 = vunpack.c.l.s8.bf16 %v267_v13  ;;  %v378_v16 = vunpack.c.h.s8.bf16 %v266_v6  ;;  %v379_v21 = vunpack.c.h.s8.bf16 %v267_v13  ;;  %v279_v13 = vld [vmem:[#allocation3 + $0x1d0] sm:$0xff] }
  0xe2   :  { %v399_v18 = vunpack.c.l.s8.bf16 %v279_v13 }
  0xe8   :  { %806 = vmatmul.mubr.bf16.gmra.mxu0 %v337_v23  ;;  %1095 = vmatmul.mubr.bf16.gmra.mxu1 %v339_v24  ;;  %v384_v23 = vunpack.c.l.s8.bf16 %v272_v19  ;;  %v269_v24 = vld [vmem:[#allocation3 + $0x180] sm:$0xff] }
  0xe9   :  { %813 = vmatprep.mubr.bf16.mxu0 %v342_v25  ;;  %1102 = vmatprep.mubr.bf16.mxu1 %v344_v26  ;;  %v271_v25 = vld [vmem:[#allocation3 + $0x190] sm:$0xff]  ;;  %v381_v26 = vunpack.c.l.s8.bf16 %v269_v24 }
  0xea   :  { %v383_v27 = vunpack.c.l.s8.bf16 %v271_v25  ;;  %v387_v39 = vunpack.c.h.s8.bf16 %v271_v25 }
  0xf0   :  { %814 = vmatmul.mubr.bf16.gmra.mxu0 %v341_v29  ;;  %1103 = vmatmul.mubr.bf16.gmra.mxu1 %v343_v30  ;;  %v388_v29 = vunpack.c.h.s8.bf16 %v272_v19 }
  0xf1   :  { %821 = vmatprep.mubr.bf16.mxu0 %v346_v31  ;;  %1110 = vmatprep.mubr.bf16.mxu1 %v348_v32 }
  0xf8   :  { %822 = vmatmul.mubr.bf16.gmra.mxu0 %v345_v35  ;;  %1111 = vmatmul.mubr.bf16.gmra.mxu1 %v347_v36  ;;  %v276_v35 = vld [vmem:[#allocation3 + $0x1b8] sm:$0xff] }
  0xf9   :  { %829 = vmatprep.mubr.bf16.mxu0 %v350_v37  ;;  %1118 = vmatprep.mubr.bf16.mxu1 %v352_v38  ;;  %v385_v37 = vunpack.c.h.s8.bf16 %v269_v24 }
 0x100   :  { %830 = vmatmul.mubr.bf16.gmra.mxu0 %v349_v41  ;;  %1119 = vmatmul.mubr.bf16.gmra.mxu1 %v351_v42  ;;  %v392_v42 = vunpack.c.l.s8.bf16 %v276_v35 }
 0x101   :  { %837 = vmatprep.mubr.bf16.mxu0 %v354_v43  ;;  %1126 = vmatprep.mubr.bf16.mxu1 %v356_v44 }
 0x108   :  { %838 = vmatmul.mubr.bf16.gmra.mxu0 %v353_v47  ;;  %1127 = vmatmul.mubr.bf16.gmra.mxu1 %v355_v48  ;;  %v275_v48 = vld [vmem:[#allocation3 + $0x1b0] sm:$0xff] }
 0x109   :  { %845 = vmatprep.mubr.bf16.mxu0 %v358_v49  ;;  %1134 = vmatprep.mubr.bf16.mxu1 %v360_v50 }
 0x110   :  { %846 = vmatmul.mubr.bf16.gmra.mxu0 %v357_v53  ;;  %1135 = vmatmul.mubr.bf16.gmra.mxu1 %v359_v54  ;;  %v391_v53 = vunpack.c.l.s8.bf16 %v275_v48  ;;  %v394_v54 = vunpack.c.h.s8.bf16 %v274_v33 }
 0x111   :  { %853 = vmatprep.mubr.bf16.mxu0 %v362_v55  ;;  %1142 = vmatprep.mubr.bf16.mxu1 %v364_v56  ;;  %v396_v56 = vunpack.c.h.s8.bf16 %v276_v35 }
 0x118   :  { %854 = vmatmul.mubr.bf16.gmra.mxu0 %v361_v59  ;;  %1143 = vmatmul.mubr.bf16.gmra.mxu1 %v363_v60 }
 0x119   :  { %861 = vmatprep.mubr.bf16.mxu0 %v366_v61  ;;  %1150 = vmatprep.mubr.bf16.mxu1 %v368_v62  ;;  %v278_v61 = vld [vmem:[#allocation3 + $0x1c8] sm:$0xff] }
 0x11a   :  { %v402_v19 = vunpack.c.h.s8.bf16 %v278_v61 }
 0x120   :  { %862 = vmatmul.mubr.bf16.gmra.mxu0 %v365_v2  ;;  %1151 = vmatmul.mubr.bf16.gmra.mxu1 %v367_v3  ;;  %v393_v2 = vunpack.c.h.s8.bf16 %v273_v46 }
 0x121   :  { %869 = vmatprep.mubr.bf16.mxu0 %v370_v4  ;;  %1158 = vmatprep.mubr.bf16.mxu1 %v372_v5  ;;  %v395_v4 = vunpack.c.h.s8.bf16 %v275_v48  ;;  %v398_v5 = vunpack.c.l.s8.bf16 %v278_v61 }
 0x128   :  { %870 = vmatmul.mubr.bf16.gmra.mxu0 %v369_v8  ;;  %1159 = vmatmul.mubr.bf16.gmra.mxu1 %v371_v9 }
 0x129   :  { %877 = vmatprep.mubr.bf16.mxu0 %v374_v10  ;;  %1166 = vmatprep.mubr.bf16.mxu1 %v376_v11  ;;  %v277_v11 = vld [vmem:[#allocation3 + $0x1c0] sm:$0xff] }
 0x130   :  { %878 = vmatmul.mubr.bf16.gmra.mxu0 %v373_v14  ;;  %1167 = vmatmul.mubr.bf16.gmra.mxu1 %v375_v15 }
 0x131   :  { %885 = vmatprep.mubr.bf16.mxu0 %v378_v16  ;;  %1174 = vmatprep.mubr.bf16.mxu1 %v380_v17  ;;  %v397_v16 = vunpack.c.l.s8.bf16 %v277_v11 }
 0x138   :  { %886 = vmatmul.mubr.bf16.gmra.mxu0 %v377_v20  ;;  %1175 = vmatmul.mubr.bf16.gmra.mxu1 %v379_v21  ;;  %v404_v21 = vunpack.c.h.s8.bf16 %v280_v63 }
 0x139   :  { %893 = vmatprep.mubr.bf16.mxu0 %v382_v22  ;;  %1182 = vmatprep.mubr.bf16.mxu1 %v384_v23 }
 0x140   :  { %v3774_v30 = vpop.f32.mrf.mxu0  ;;  %894 = vmatmul.mubr.bf16.gmra.mxu0 %v381_v26  ;;  %v3776_v31 = vpop.f32.mrf.mxu1  ;;  %1183 = vmatmul.mubr.bf16.gmra.mxu1 %v383_v27  ;;  %v282_v26 = vld [vmem:[#allocation3 + $0x1e8] sm:$0xff] }
 0x141   :  { %901 = vmatprep.mubr.bf16.mxu0 %v386_v28  ;;  %1190 = vmatprep.mubr.bf16.mxu1 %v388_v29  ;;  %v284_v28 = vld [vmem:[#allocation3 + $0x1f8] sm:$0xff]  ;;  %v406_v35 = vunpack.c.l.s8.bf16 %v282_v26 }
 0x142   :  { %v705_v32 = vpop.f32.mrf.mxu0  ;;  %v994_v34 = vpop.f32.mrf.mxu1 }
 0x143   :  { %v401_v32 = vunpack.c.h.s8.bf16 %v277_v11  ;;  %v403_v34 = vunpack.c.h.s8.bf16 %v279_v13 }
 0x144   :  { %v3778_v36 = vpop.f32.mrf.mxu0  ;;  %v3780_v38 = vpop.f32.mrf.mxu1 }
 0x146   :  { %v708_v41 = vpop.f32.mrf.mxu0  ;;  %v997_v43 = vpop.f32.mrf.mxu1 }
 0x147   :  { %v281_v43 = vld [vmem:[#allocation3 + $0x1e0] sm:$0xff] }
 0x148   :  { %v3782_v44 = vpop.f32.mrf.mxu0  ;;  %902 = vmatmul.mubr.bf16.gmra.mxu0 %v385_v37  ;;  %v3784_v45 = vpop.f32.mrf.mxu1  ;;  %1191 = vmatmul.mubr.bf16.gmra.mxu1 %v387_v39  ;;  %v408_v39 = vunpack.c.l.s8.bf16 %v284_v28 }
 0x149   :  { %909 = vmatprep.mubr.bf16.mxu0 %v390_v40  ;;  %1198 = vmatprep.mubr.bf16.mxu1 %v392_v42 }
 0x14a   :  { %v713_v47 = vpop.f32.mrf.mxu0  ;;  %v1002_v49 = vpop.f32.mrf.mxu1 }
 0x14b   :  { %v283_v47 = vld [vmem:[#allocation3 + $0x1f0] sm:$0xff] }
 0x14c   :  { %v3786_v50 = vpop.f32.mrf.mxu0  ;;  %v3788_v52 = vpop.f32.mrf.mxu1 }
 0x14e   :  { %v716_v55 = vpop.f32.mrf.mxu0  ;;  %v1005_v57 = vpop.f32.mrf.mxu1 }
 0x14f   :  { %v410_v55 = vunpack.c.h.s8.bf16 %v282_v26  ;;  %v412_v57 = vunpack.c.h.s8.bf16 %v284_v28 }
 0x150   :  { %v3790_v58 = vpop.f32.mrf.mxu0  ;;  %910 = vmatmul.mubr.bf16.gmra.mxu0 %v389_v51  ;;  %v3792_v59 = vpop.f32.mrf.mxu1  ;;  %1199 = vmatmul.mubr.bf16.gmra.mxu1 %v391_v53  ;;  %v405_v51 = vunpack.c.l.s8.bf16 %v281_v43 }
 0x151   :  { %917 = vmatprep.mubr.bf16.mxu0 %v394_v54  ;;  %1206 = vmatprep.mubr.bf16.mxu1 %v396_v56  ;;  %v407_v54 = vunpack.c.l.s8.bf16 %v283_v47 }
 0x152   :  { %v721_v60 = vpop.f32.mrf.mxu0  ;;  %v1010_v62 = vpop.f32.mrf.mxu1 }
 0x154   :  { %v3794_v1 = vpop.f32.mrf.mxu0  ;;  %v3796_v3 = vpop.f32.mrf.mxu1 }
 0x156   :  { %v724_v6 = vpop.f32.mrf.mxu0  ;;  %v1013_v8 = vpop.f32.mrf.mxu1 }
 0x158   :  { %v3798_v9 = vpop.f32.mrf.mxu0  ;;  %918 = vmatmul.mubr.bf16.gmra.mxu0 %v393_v2  ;;  %v3800_v10 = vpop.f32.mrf.mxu1  ;;  %1207 = vmatmul.mubr.bf16.gmra.mxu1 %v395_v4 }
 0x159   :  { %925 = vmatprep.mubr.bf16.mxu0 %v398_v5  ;;  %1214 = vmatprep.mubr.bf16.mxu1 %v400_v7  ;;  %v409_v5 = vunpack.c.h.s8.bf16 %v281_v43  ;;  %v411_v7 = vunpack.c.h.s8.bf16 %v283_v47 }
 0x15a   :  { %v729_v12 = vpop.f32.mrf.mxu0  ;;  %v1018_v14 = vpop.f32.mrf.mxu1 }
 0x15c   :  { %v3802_v15 = vpop.f32.mrf.mxu0  ;;  %v3804_v17 = vpop.f32.mrf.mxu1 }
 0x15e   :  { %v732_v20 = vpop.f32.mrf.mxu0  ;;  %v1021_v22 = vpop.f32.mrf.mxu1 }
 0x15f   :  { %v3527_v20 = vld [vmem:[#allocation7] sm:$0xff]  }
 0x160   :  { %v3806_v23 = vpop.f32.mrf.mxu0  ;;  %926 = vmatmul.mubr.bf16.gmra.mxu0 %v397_v16  ;;  %v3808_v24 = vpop.f32.mrf.mxu1  ;;  %1215 = vmatmul.mubr.bf16.gmra.mxu1 %v399_v18  ;;  %v996_v16 = vadd.f32 %v3780_v38, %v3778_v36  ;;  %v1004_v38 = vadd.f32 %v3788_v52, %v3786_v50  ;;  %v1012_v52 = vadd.f32 %v3796_v3, %v3794_v1 }
 0x161   :  { %933 = vmatprep.mubr.bf16.mxu0 %v402_v19  ;;  %1222 = vmatprep.mubr.bf16.mxu1 %v404_v21  ;;  %v993_v21 = vadd.f32 %v3776_v31, %v3774_v30  ;;  %v1020_v3 = vadd.f32 %v3804_v17, %v3802_v15 }
 0x162   :  { %v737_v25 = vpop.f32.mrf.mxu0  ;;  %v1026_v27 = vpop.f32.mrf.mxu1 }
 0x163   :  { %v1442_v26 = vpack.c.bf16 %v996_v16, %v993_v21  ;;  %v1025_v21 = vadd.f32 %v3808_v24, %v3806_v23 }
 0x164   :  { %v3810_v29 = vpop.f32.mrf.mxu0  ;;  %v3812_v33 = vpop.f32.mrf.mxu1 }
 0x165   :  { %v1028_v17 = vadd.f32 %v3812_v33, %v3810_v29 }
 0x166   :  { %v740_v37 = vpop.f32.mrf.mxu0  ;;  %v1029_v40 = vpop.f32.mrf.mxu1 }
 0x168   :  { %v3814_v41 = vpop.f32.mrf.mxu0  ;;  %934 = vmatmul.mubr.bf16.gmra.mxu0 %v401_v32  ;;  %v3816_v42 = vpop.f32.mrf.mxu1  ;;  %1223 = vmatmul.mubr.bf16.gmra.mxu1 %v403_v34  ;;  %v3528_v34 = vld [vmem:[#allocation7 + $0x8] sm:$0xff]  }
 0x169   :  { %941 = vmatprep.mubr.bf16.mxu0 %v406_v35  ;;  %1230 = vmatprep.mubr.bf16.mxu1 %v408_v39  ;;  %v1001_v35 = vadd.f32 %v3784_v45, %v3782_v44 }
 0x16a   :  { %v745_v46 = vpop.f32.mrf.mxu0  ;;  %v1034_v48 = vpop.f32.mrf.mxu1 }
 0x16b   :  { %v1443_v40 = vpack.c.bf16 %v1004_v38, %v1001_v35  ;;  %v3529_v48 = vld [vmem:[#allocation7 + $0x10] sm:$0xff]   ;;  %v1033_v35 = vadd.f32 %v3816_v42, %v3814_v41 }
 0x16c   :  { %v3818_v49 = vpop.f32.mrf.mxu0  ;;  %v3820_v53 = vpop.f32.mrf.mxu1 }
 0x16d   :  { %v1036_v33 = vadd.f32 %v3820_v53, %v3818_v49 }
 0x16e   :  { %v748_v56 = vpop.f32.mrf.mxu0  ;;  %v1037_v60 = vpop.f32.mrf.mxu1 }
 0x170   :  { %v3822_v61 = vpop.f32.mrf.mxu0  ;;  %942 = vmatmul.mubr.bf16.gmra.mxu0 %v405_v51  ;;  %v3824_v62 = vpop.f32.mrf.mxu1  ;;  %1231 = vmatmul.mubr.bf16.gmra.mxu1 %v407_v54  ;;  %v1009_v51 = vadd.f32 %v3792_v59, %v3790_v58 }
 0x171   :  { %949 = vmatprep.mubr.bf16.mxu0 %v410_v55  ;;  %1238 = vmatprep.mubr.bf16.mxu1 %v412_v57 }
 0x172   :  { %v753_v63 = vpop.f32.mrf.mxu0  ;;  %v1042_v2 = vpop.f32.mrf.mxu1  ;;  %v1444_v56 = vpack.c.bf16 %v1012_v52, %v1009_v51  ;;  %v1041_v51 = vadd.f32 %v3824_v62, %v3822_v61 }
 0x173   :  { %v3530_v2 = vld [vmem:[#allocation7 + $0x18] sm:$0xff]  }
 0x174   :  { %v3826_v4 = vpop.f32.mrf.mxu0  ;;  %v3828_v6 = vpop.f32.mrf.mxu1 }
 0x175   :  { %v1044_v53 = vadd.f32 %v3828_v6, %v3826_v4 }
 0x176   :  { %v756_v8 = vpop.f32.mrf.mxu0  ;;  %v1045_v11 = vpop.f32.mrf.mxu1 }
 0x178   :  { %v3830_v12 = vpop.f32.mrf.mxu0  ;;  %950 = vmatmul.mubr.bf16.gmra.mxu0 %v409_v5  ;;  %v3832_v13 = vpop.f32.mrf.mxu1  ;;  %1239 = vmatmul.mubr.bf16.gmra.mxu1 %v411_v7  ;;  %v1017_v5 = vadd.f32 %v3800_v10, %v3798_v9 }
 0x179   :  { %1874 = vmatprep.mubr.bf16.mxu0 %v3676_v0  ;;  %2307 = vmatprep.mubr.bf16.mxu1 %v3676_v0 }
 0x17a   :  { %v761_v14 = vpop.f32.mrf.mxu0  ;;  %v1050_v18 = vpop.f32.mrf.mxu1  ;;  %v1445_v11 = vpack.c.bf16 %v1020_v3, %v1017_v5  ;;  %v1049_v5 = vadd.f32 %v3832_v13, %v3830_v12 }
 0x17c   :  { %v3838_v19 = vpop.f32.mrf.mxu0  ;;  %v3842_v22 = vpop.f32.mrf.mxu1 }
 0x17d   :  { %v1052_v6 = vadd.f32 %v3842_v22, %v3838_v19 }
 0x17e   :  { %v764_v25 = vpop.f32.mrf.mxu0  ;;  %v1053_v27 = vpop.f32.mrf.mxu1 }
 0x17f   :  { %v1446_v27 = vpack.c.bf16 %v1028_v17, %v1025_v21 }
 0x180   :  { %v3844_v28 = vpop.f32.mrf.mxu0  ;;  %1875 = vmatmul.mubr.bf16.vlgmr.msra.gmra.mxu0 %v3527_v20  ;;  %v3846_v32 = vpop.f32.mrf.mxu1  ;;  %2308 = vmatmul.mubr.bf16.vlgmr.msra.gmra.mxu1 %v1442_v26  ;;  %v3531_v20 = vld [vmem:[#allocation7 + $0x20] sm:$0xff]  }
 0x181   :  { %1884 = vmatprep.mubr.bf16.mxu0 %v3676_v0  ;;  %2317 = vmatprep.mubr.bf16.mxu1 %v3676_v0  ;;  %v1057_v21 = vadd.f32 %v3846_v32, %v3844_v28 }
 0x182   :  { %v769_v36 = vpop.f32.mrf.mxu0  ;;  %v1058_v30 = vpop.f32.mrf.mxu1 }
 0x184   :  { %v3852_v31 = vpop.f32.mrf.mxu0  ;;  %v3856_v37 = vpop.f32.mrf.mxu1 }
 0x185   :  { %v1060_v22 = vadd.f32 %v3856_v37, %v3852_v31 }
 0x186   :  { %v772_v39 = vpop.f32.mrf.mxu0  ;;  %v1061_v43 = vpop.f32.mrf.mxu1 }
 0x187   :  { %v1447_v43 = vpack.c.bf16 %v1036_v33, %v1033_v35 }
 0x188   :  { %v3858_v46 = vpop.f32.mrf.mxu0  ;;  %1885 = vmatmul.mubr.bf16.gmra.mxu0 %v3528_v34  ;;  %v3860_v47 = vpop.f32.mrf.mxu1  ;;  %2318 = vmatmul.mubr.bf16.gmra.mxu1 %v1443_v40  ;;  %v3532_v34 = vld [vmem:[#allocation7 + $0x28] sm:$0xff]  }
 0x189   :  { %1894 = vmatprep.mubr.bf16.mxu0 %v3676_v0  ;;  %2327 = vmatprep.mubr.bf16.mxu1 %v3676_v0  ;;  %v1065_v35 = vadd.f32 %v3860_v47, %v3858_v46 }
 0x18a   :  { %v777_v50 = vpop.f32.mrf.mxu0  ;;  %v1066_v44 = vpop.f32.mrf.mxu1 }
 0x18c   :  { %v3866_v45 = vpop.f32.mrf.mxu0  ;;  %v3870_v54 = vpop.f32.mrf.mxu1 }
 0x18d   :  { %v1068_v37 = vadd.f32 %v3870_v54, %v3866_v45 }
 0x18e   :  { %v780_v55 = vpop.f32.mrf.mxu0  ;;  %v1069_v57 = vpop.f32.mrf.mxu1 }
 0x18f   :  { %v1448_v57 = vpack.c.bf16 %v1044_v53, %v1041_v51 }
 0x190   :  { %v3872_v60 = vpop.f32.mrf.mxu0  ;;  %1895 = vmatmul.mubr.bf16.gmra.mxu0 %v3529_v48  ;;  %v3874_v63 = vpop.f32.mrf.mxu1  ;;  %2328 = vmatmul.mubr.bf16.gmra.mxu1 %v1444_v56  ;;  %v3533_v48 = vld [vmem:[#allocation7 + $0x30] sm:$0xff]  }
 0x191   :  { %1904 = vmatprep.mubr.bf16.mxu0 %v3676_v0  ;;  %2337 = vmatprep.mubr.bf16.mxu1 %v3676_v0  ;;  %v1073_v51 = vadd.f32 %v3874_v63, %v3872_v60 }
 0x192   :  { %v785_v1 = vpop.f32.mrf.mxu0  ;;  %v1074_v58 = vpop.f32.mrf.mxu1 }
 0x194   :  { %v3880_v59 = vpop.f32.mrf.mxu0  ;;  %v3884_v7 = vpop.f32.mrf.mxu1 }
 0x195   :  { %v1076_v54 = vadd.f32 %v3884_v7, %v3880_v59 }
 0x196   :  { %v788_v8 = vpop.f32.mrf.mxu0  ;;  %v1077_v14 = vpop.f32.mrf.mxu1 }
 0x197   :  { %v1449_v14 = vpack.c.bf16 %v1052_v6, %v1049_v5 }
 0x198   :  { %v3886_v16 = vpop.f32.mrf.mxu0  ;;  %1905 = vmatmul.mubr.bf16.gmra.mxu0 %v3530_v2  ;;  %v3888_v18 = vpop.f32.mrf.mxu1  ;;  %2338 = vmatmul.mubr.bf16.gmra.mxu1 %v1445_v11  ;;  %v3534_v2 = vld [vmem:[#allocation7 + $0x38] sm:$0xff]  }
 0x199   :  { %1914 = vmatprep.mubr.bf16.mxu0 %v3676_v0  ;;  %2347 = vmatprep.mubr.bf16.mxu1 %v3676_v0  ;;  %v1081_v5 = vadd.f32 %v3888_v18, %v3886_v16 }
 0x19a   :  { %v793_v15 = vpop.f32.mrf.mxu0  ;;  %v1082_v9 = vpop.f32.mrf.mxu1 }
 0x19c   :  { %v3894_v10 = vpop.f32.mrf.mxu0  ;;  %v3898_v25 = vpop.f32.mrf.mxu1 }
 0x19d   :  { %v1084_v7 = vadd.f32 %v3898_v25, %v3894_v10 }
 0x19e   :  { %v796_v26 = vpop.f32.mrf.mxu0  ;;  %v1085_v36 = vpop.f32.mrf.mxu1 }
 0x19f   :  { %v1450_v36 = vpack.c.bf16 %v1060_v22, %v1057_v21 }
 0x1a0   :  { %v3900_v38 = vpop.f32.mrf.mxu0  ;;  %1915 = vmatmul.mubr.bf16.gmra.mxu0 %v3531_v20  ;;  %v3902_v30 = vpop.f32.mrf.mxu1  ;;  %2348 = vmatmul.mubr.bf16.gmra.mxu1 %v1446_v27  ;;  %v3535_v20 = vld [vmem:[#allocation7 + $0x40] sm:$0xff]  }
 0x1a1   :  { %1924 = vmatprep.mubr.bf16.mxu0 %v3676_v0  ;;  %2357 = vmatprep.mubr.bf16.mxu1 %v3676_v0  ;;  %v1089_v21 = vadd.f32 %v3902_v30, %v3900_v38 }
 0x1a2   :  { %v801_v29 = vpop.f32.mrf.mxu0  ;;  %v1090_v23 = vpop.f32.mrf.mxu1 }
 0x1a4   :  { %v3908_v24 = vpop.f32.mrf.mxu0  ;;  %v3912_v39 = vpop.f32.mrf.mxu1 }
 0x1a5   :  { %v1092_v25 = vadd.f32 %v3912_v39, %v3908_v24 }
 0x1a6   :  { %v804_v40 = vpop.f32.mrf.mxu0  ;;  %v1093_v50 = vpop.f32.mrf.mxu1 }
 0x1a7   :  { %v1451_v50 = vpack.c.bf16 %v1068_v37, %v1065_v35 }
 0x1a8   :  { %v3914_v52 = vpop.f32.mrf.mxu0  ;;  %1925 = vmatmul.mubr.bf16.gmra.mxu0 %v3532_v34  ;;  %v3916_v44 = vpop.f32.mrf.mxu1  ;;  %2358 = vmatmul.mubr.bf16.gmra.mxu1 %v1447_v43  ;;  %v3536_v34 = vld [vmem:[#allocation7 + $0x48] sm:$0xff]  }
 0x1a9   :  { %1934 = vmatprep.mubr.bf16.mxu0 %v3676_v0  ;;  %2367 = vmatprep.mubr.bf16.mxu1 %v3676_v0  ;;  %v1097_v35 = vadd.f32 %v3916_v44, %v3914_v52 }
 0x1aa   :  { %v809_v49 = vpop.f32.mrf.mxu0  ;;  %v1098_v41 = vpop.f32.mrf.mxu1 }
 0x1ac   :  { %v3922_v42 = vpop.f32.mrf.mxu0  ;;  %v3926_v55 = vpop.f32.mrf.mxu1 }
 0x1ad   :  { %v1100_v39 = vadd.f32 %v3926_v55, %v3922_v42 }
 0x1ae   :  { %v812_v56 = vpop.f32.mrf.mxu0  ;;  %v1101_v1 = vpop.f32.mrf.mxu1 }
 0x1af   :  { %v1452_v1 = vpack.c.bf16 %v1076_v54, %v1073_v51 }
 0x1b0   :  { %v3928_v3 = vpop.f32.mrf.mxu0  ;;  %1935 = vmatmul.mubr.bf16.gmra.mxu0 %v3533_v48  ;;  %v3930_v58 = vpop.f32.mrf.mxu1  ;;  %2368 = vmatmul.mubr.bf16.gmra.mxu1 %v1448_v57  ;;  %v3537_v48 = vld [vmem:[#allocation7 + $0x50] sm:$0xff]  }
 0x1b1   :  { %1944 = vmatprep.mubr.bf16.mxu0 %v3676_v0  ;;  %2377 = vmatprep.mubr.bf16.mxu1 %v3676_v0  ;;  %v1105_v51 = vadd.f32 %v3930_v58, %v3928_v3 }
 0x1b2   :  { %v817_v4 = vpop.f32.mrf.mxu0  ;;  %v1106_v61 = vpop.f32.mrf.mxu1 }
 0x1b4   :  { %v3936_v62 = vpop.f32.mrf.mxu0  ;;  %v3940_v8 = vpop.f32.mrf.mxu1 }
 0x1b5   :  { %v1108_v55 = vadd.f32 %v3940_v8, %v3936_v62 }
 0x1b6   :  { %v820_v11 = vpop.f32.mrf.mxu0  ;;  %v1109_v15 = vpop.f32.mrf.mxu1 }
 0x1b7   :  { %v1453_v15 = vpack.c.bf16 %v1084_v7, %v1081_v5 }
 0x1b8   :  { %v3942_v17 = vpop.f32.mrf.mxu0  ;;  %1945 = vmatmul.mubr.bf16.gmra.mxu0 %v3534_v2  ;;  %v3944_v9 = vpop.f32.mrf.mxu1  ;;  %2378 = vmatmul.mubr.bf16.gmra.mxu1 %v1449_v14  ;;  %v3538_v2 = vld [vmem:[#allocation7 + $0x58] sm:$0xff]  }
 0x1b9   :  { %1954 = vmatprep.mubr.bf16.mxu0 %v3676_v0  ;;  %2387 = vmatprep.mubr.bf16.mxu1 %v3676_v0  ;;  %v1113_v5 = vadd.f32 %v3944_v9, %v3942_v17 }
 0x1ba   :  { %v825_v19 = vpop.f32.mrf.mxu0  ;;  %v1114_v12 = vpop.f32.mrf.mxu1 }
 0x1bc   :  { %v3950_v13 = vpop.f32.mrf.mxu0  ;;  %v3954_v26 = vpop.f32.mrf.mxu1 }
 0x1bd   :  { %v1116_v8 = vadd.f32 %v3954_v26, %v3950_v13 }
 0x1be   :  { %v828_v27 = vpop.f32.mrf.mxu0  ;;  %v1117_v29 = vpop.f32.mrf.mxu1 }
 0x1bf   :  { %v1454_v29 = vpack.c.bf16 %v1092_v25, %v1089_v21 }
 0x1c0   :  { %v3956_v33 = vpop.f32.mrf.mxu0  ;;  %1955 = vmatmul.mubr.bf16.gmra.mxu0 %v3535_v20  ;;  %v3958_v23 = vpop.f32.mrf.mxu1  ;;  %2388 = vmatmul.mubr.bf16.gmra.mxu1 %v1450_v36  ;;  %v3539_v20 = vld [vmem:[#allocation7 + $0x60] sm:$0xff]  }
 0x1c1   :  { %1964 = vmatprep.mubr.bf16.mxu0 %v3676_v0  ;;  %2397 = vmatprep.mubr.bf16.mxu1 %v3676_v0  ;;  %v1121_v21 = vadd.f32 %v3958_v23, %v3956_v33 }
 0x1c2   :  { %v833_v31 = vpop.f32.mrf.mxu0  ;;  %v1122_v28 = vpop.f32.mrf.mxu1 }
 0x1c4   :  { %v3964_v32 = vpop.f32.mrf.mxu0  ;;  %v3968_v40 = vpop.f32.mrf.mxu1 }
 0x1c5   :  { %v1124_v26 = vadd.f32 %v3968_v40, %v3964_v32 }
 0x1c6   :  { %v836_v43 = vpop.f32.mrf.mxu0  ;;  %v1125_v49 = vpop.f32.mrf.mxu1 }
 0x1c7   :  { %v1455_v49 = vpack.c.bf16 %v1100_v39, %v1097_v35 }
 0x1c8   :  { %v3970_v53 = vpop.f32.mrf.mxu0  ;;  %1965 = vmatmul.mubr.bf16.gmra.mxu0 %v3536_v34  ;;  %v3972_v41 = vpop.f32.mrf.mxu1  ;;  %2398 = vmatmul.mubr.bf16.gmra.mxu1 %v1451_v50  ;;  %v3540_v34 = vld [vmem:[#allocation7 + $0x68] sm:$0xff]  }
 0x1c9   :  { %1974 = vmatprep.mubr.bf16.mxu0 %v3676_v0  ;;  %2407 = vmatprep.mubr.bf16.mxu1 %v3676_v0  ;;  %v1129_v35 = vadd.f32 %v3972_v41, %v3970_v53 }
 0x1ca   :  { %v841_v45 = vpop.f32.mrf.mxu0  ;;  %v1130_v46 = vpop.f32.mrf.mxu1 }
 0x1cc   :  { %v3978_v47 = vpop.f32.mrf.mxu0  ;;  %v3982_v56 = vpop.f32.mrf.mxu1 }
 0x1cd   :  { %v1132_v40 = vadd.f32 %v3982_v56, %v3978_v47 }
 0x1ce   :  { %v844_v57 = vpop.f32.mrf.mxu0  ;;  %v1133_v4 = vpop.f32.mrf.mxu1 }
 0x1cf   :  { %v1456_v4 = vpack.c.bf16 %v1108_v55, %v1105_v51 }
 0x1d0   :  { %v3984_v6 = vpop.f32.mrf.mxu0  ;;  %1975 = vmatmul.mubr.bf16.gmra.mxu0 %v3537_v48  ;;  %v3986_v61 = vpop.f32.mrf.mxu1  ;;  %2408 = vmatmul.mubr.bf16.gmra.mxu1 %v1452_v1  ;;  %v3541_v48 = vld [vmem:[#allocation7 + $0x70] sm:$0xff]  }
 0x1d1   :  { %1984 = vmatprep.mubr.bf16.mxu0 %v3676_v0  ;;  %2417 = vmatprep.mubr.bf16.mxu1 %v3676_v0  ;;  %v1137_v51 = vadd.f32 %v3986_v61, %v3984_v6 }
 0x1d2   :  { %v849_v59 = vpop.f32.mrf.mxu0  ;;  %v1138_v60 = vpop.f32.mrf.mxu1 }
 0x1d4   :  { %v3992_v63 = vpop.f32.mrf.mxu0  ;;  %v3996_v11 = vpop.f32.mrf.mxu1 }
 0x1d5   :  { %v1140_v56 = vadd.f32 %v3996_v11, %v3992_v63 }
 0x1d6   :  { %v852_v14 = vpop.f32.mrf.mxu0  ;;  %v1141_v19 = vpop.f32.mrf.mxu1 }
 0x1d7   :  { %v1457_v19 = vpack.c.bf16 %v1116_v8, %v1113_v5 }
 0x1d8   :  { %v3998_v22 = vpop.f32.mrf.mxu0  ;;  %1985 = vmatmul.mubr.bf16.gmra.mxu0 %v3538_v2  ;;  %v4000_v12 = vpop.f32.mrf.mxu1  ;;  %2418 = vmatmul.mubr.bf16.gmra.mxu1 %v1453_v15  ;;  %v3542_v2 = vld [vmem:[#allocation7 + $0x78] sm:$0xff]  }
 0x1d9   :  { %1994 = vmatprep.mubr.bf16.mxu0 %v3676_v0  ;;  %2427 = vmatprep.mubr.bf16.mxu1 %v3676_v0  ;;  %v1145_v5 = vadd.f32 %v4000_v12, %v3998_v22 }
 0x1da   :  { %v857_v10 = vpop.f32.mrf.mxu0  ;;  %v1146_v16 = vpop.f32.mrf.mxu1 }
 0x1dc   :  { %v4006_v18 = vpop.f32.mrf.mxu0  ;;  %v4010_v27 = vpop.f32.mrf.mxu1 }
 0x1dd   :  { %v1148_v11 = vadd.f32 %v4010_v27, %v4006_v18 }
 0x1de   :  { %v860_v36 = vpop.f32.mrf.mxu0  ;;  %v1149_v31 = vpop.f32.mrf.mxu1 }
 0x1df   :  { %v1458_v31 = vpack.c.bf16 %v1124_v26, %v1121_v21 }
 0x1e0   :  { %v4012_v37 = vpop.f32.mrf.mxu0  ;;  %1995 = vmatmul.mubr.bf16.gmra.mxu0 %v3539_v20  ;;  %v4014_v28 = vpop.f32.mrf.mxu1  ;;  %2428 = vmatmul.mubr.bf16.gmra.mxu1 %v1454_v29  ;;  %v3543_v20 = vld [vmem:[#allocation7 + $0x80] sm:$0xff]  }
 0x1e1   :  { %2004 = vmatprep.mubr.bf16.mxu0 %v3676_v0  ;;  %2437 = vmatprep.mubr.bf16.mxu1 %v3676_v0  ;;  %v1153_v21 = vadd.f32 %v4014_v28, %v4012_v37 }
 0x1e2   :  { %v865_v24 = vpop.f32.mrf.mxu0  ;;  %v1154_v38 = vpop.f32.mrf.mxu1 }
 0x1e4   :  { %v4020_v30 = vpop.f32.mrf.mxu0  ;;  %v4024_v43 = vpop.f32.mrf.mxu1 }
 0x1e5   :  { %v1156_v27 = vadd.f32 %v4024_v43, %v4020_v30 }
 0x1e6   :  { %v868_v50 = vpop.f32.mrf.mxu0  ;;  %v1157_v45 = vpop.f32.mrf.mxu1 }
 0x1e7   :  { %v1459_v45 = vpack.c.bf16 %v1132_v40, %v1129_v35 }
 0x1e8   :  { %v4026_v54 = vpop.f32.mrf.mxu0  ;;  %2005 = vmatmul.mubr.bf16.gmra.mxu0 %v3540_v34  ;;  %v4028_v46 = vpop.f32.mrf.mxu1  ;;  %2438 = vmatmul.mubr.bf16.gmra.mxu1 %v1455_v49  ;;  %v3544_v34 = vld [vmem:[#allocation7 + $0x88] sm:$0xff]  }
 0x1e9   :  { %2014 = vmatprep.mubr.bf16.mxu0 %v3676_v0  ;;  %2447 = vmatprep.mubr.bf16.mxu1 %v3676_v0  ;;  %v1161_v35 = vadd.f32 %v4028_v46, %v4026_v54 }
 0x1ea   :  { %v873_v42 = vpop.f32.mrf.mxu0  ;;  %v1162_v52 = vpop.f32.mrf.mxu1 }
 0x1ec   :  { %v4034_v44 = vpop.f32.mrf.mxu0  ;;  %v4038_v57 = vpop.f32.mrf.mxu1 }
 0x1ed   :  { %v1164_v43 = vadd.f32 %v4038_v57, %v4034_v44 }
 0x1ee   :  { %v876_v1 = vpop.f32.mrf.mxu0  ;;  %v1165_v59 = vpop.f32.mrf.mxu1 }
 0x1ef   :  { %v1460_v59 = vpack.c.bf16 %v1140_v56, %v1137_v51 }
 0x1f0   :  { %v4040_v7 = vpop.f32.mrf.mxu0  ;;  %2015 = vmatmul.mubr.bf16.gmra.mxu0 %v3541_v48  ;;  %v4042_v60 = vpop.f32.mrf.mxu1  ;;  %2448 = vmatmul.mubr.bf16.gmra.mxu1 %v1456_v4  ;;  %v3545_v48 = vld [vmem:[#allocation7 + $0x90] sm:$0xff]  }
 0x1f1   :  { %2024 = vmatprep.mubr.bf16.mxu0 %v3676_v0  ;;  %2457 = vmatprep.mubr.bf16.mxu1 %v3676_v0  ;;  %v1169_v51 = vadd.f32 %v4042_v60, %v4040_v7 }
 0x1f2   :  { %v881_v62 = vpop.f32.mrf.mxu0  ;;  %v1170_v3 = vpop.f32.mrf.mxu1 }
 0x1f4   :  { %v4048_v58 = vpop.f32.mrf.mxu0  ;;  %v4052_v14 = vpop.f32.mrf.mxu1 }
 0x1f5   :  { %v1172_v57 = vadd.f32 %v4052_v14, %v4048_v58 }
 0x1f6   :  { %v884_v15 = vpop.f32.mrf.mxu0  ;;  %v1173_v10 = vpop.f32.mrf.mxu1 }
 0x1f7   :  { %v1461_v10 = vpack.c.bf16 %v1148_v11, %v1145_v5 }
 0x1f8   :  { %v4054_v25 = vpop.f32.mrf.mxu0  ;;  %2025 = vmatmul.mubr.bf16.gmra.mxu0 %v3542_v2  ;;  %v4056_v16 = vpop.f32.mrf.mxu1  ;;  %2458 = vmatmul.mubr.bf16.gmra.mxu1 %v1457_v19  ;;  %v3546_v2 = vld [vmem:[#allocation7 + $0x98] sm:$0xff]  }
 0x1f9   :  { %2034 = vmatprep.mubr.bf16.mxu0 %v3676_v0  ;;  %2467 = vmatprep.mubr.bf16.mxu1 %v3676_v0  ;;  %v1177_v5 = vadd.f32 %v4056_v16, %v4054_v25 }
 0x1fa   :  { %v889_v13 = vpop.f32.mrf.mxu0  ;;  %v1178_v17 = vpop.f32.mrf.mxu1 }
 0x1fc   :  { %v4062_v9 = vpop.f32.mrf.mxu0  ;;  %v4066_v36 = vpop.f32.mrf.mxu1 }
 0x1fd   :  { %v1180_v14 = vadd.f32 %v4066_v36, %v4062_v9 }
 0x1fe   :  { %v892_v29 = vpop.f32.mrf.mxu0  ;;  %v1181_v24 = vpop.f32.mrf.mxu1 }
 0x1ff   :  { %v1462_v24 = vpack.c.bf16 %v1156_v27, %v1153_v21 }
 0x200   :  { %v4068_v39 = vpop.f32.mrf.mxu0  ;;  %2035 = vmatmul.mubr.bf16.gmra.mxu0 %v3543_v20  ;;  %v4070_v38 = vpop.f32.mrf.mxu1  ;;  %2468 = vmatmul.mubr.bf16.gmra.mxu1 %v1458_v31  ;;  %v3547_v20 = vld [vmem:[#allocation7 + $0xa0] sm:$0xff]  }
 0x201   :  { %2044 = vmatprep.mubr.bf16.mxu0 %v3676_v0  ;;  %2477 = vmatprep.mubr.bf16.mxu1 %v3676_v0  ;;  %v1185_v21 = vadd.f32 %v4070_v38, %v4068_v39 }
 0x202   :  { %v897_v32 = vpop.f32.mrf.mxu0  ;;  %v1186_v33 = vpop.f32.mrf.mxu1 }
 0x204   :  { %v4076_v23 = vpop.f32.mrf.mxu0  ;;  %v4080_v50 = vpop.f32.mrf.mxu1 }
 0x205   :  { %v1188_v36 = vadd.f32 %v4080_v50, %v4076_v23 }
 0x206   :  { %v900_v49 = vpop.f32.mrf.mxu0  ;;  %v1189_v42 = vpop.f32.mrf.mxu1 }
 0x207   :  { %v1463_v42 = vpack.c.bf16 %v1164_v43, %v1161_v35 }
 0x208   :  { %v4082_v55 = vpop.f32.mrf.mxu0  ;;  %2045 = vmatmul.mubr.bf16.gmra.mxu0 %v3544_v34  ;;  %v4084_v52 = vpop.f32.mrf.mxu1  ;;  %2478 = vmatmul.mubr.bf16.gmra.mxu1 %v1459_v45  ;;  %v3548_v34 = vld [vmem:[#allocation7 + $0xa8] sm:$0xff]  }
 0x209   :  { %2054 = vmatprep.mubr.bf16.mxu0 %v3676_v0  ;;  %2487 = vmatprep.mubr.bf16.mxu1 %v3676_v0 }
 0x20a   :  { %v905_v47 = vpop.f32.mrf.mxu0  ;;  %v1194_v53 = vpop.f32.mrf.mxu1 }
 0x20c   :  { %v4090_v41 = vpop.f32.mrf.mxu0  ;;  %v4094_v1 = vpop.f32.mrf.mxu1 }
 0x20d   :  { %v1196_v50 = vadd.f32 %v4094_v1, %v4090_v41 }
 0x20e   :  { %v908_v4 = vpop.f32.mrf.mxu0  ;;  %v1197_v62 = vpop.f32.mrf.mxu1 }
 0x20f   :  { %v1464_v62 = vpack.c.bf16 %v1172_v57, %v1169_v51 }
 0x210   :  { %v4096_v8 = vpop.f32.mrf.mxu0  ;;  %2055 = vmatmul.mubr.bf16.gmra.mxu0 %v3545_v48  ;;  %v4098_v3 = vpop.f32.mrf.mxu1  ;;  %2488 = vmatmul.mubr.bf16.gmra.mxu1 %v1460_v59  ;;  %v3549_v48 = vld [vmem:[#allocation7 + $0xb0] sm:$0xff]  }
 0x211   :  { %2064 = vmatprep.mubr.bf16.mxu0 %v3676_v0  ;;  %2497 = vmatprep.mubr.bf16.mxu1 %v3676_v0 }
 0x212   :  { %v913_v63 = vpop.f32.mrf.mxu0  ;;  %v1202_v6 = vpop.f32.mrf.mxu1 }
 0x214   :  { %v4104_v61 = vpop.f32.mrf.mxu0  ;;  %v4108_v15 = vpop.f32.mrf.mxu1 }
 0x216   :  { %v916_v19 = vpop.f32.mrf.mxu0  ;;  %v1205_v13 = vpop.f32.mrf.mxu1 }
 0x217   :  { %v1465_v13 = vpack.c.bf16 %v1180_v14, %v1177_v5 }
 0x218   :  { %v4110_v26 = vpop.f32.mrf.mxu0  ;;  %2065 = vmatmul.mubr.bf16.gmra.mxu0 %v3546_v2  ;;  %v4112_v17 = vpop.f32.mrf.mxu1  ;;  %2498 = vmatmul.mubr.bf16.gmra.mxu1 %v1461_v10  ;;  %v3550_v2 = vld [vmem:[#allocation7 + $0xb8] sm:$0xff]  }
 0x219   :  { %2074 = vmatprep.mubr.bf16.mxu0 %v3676_v0  ;;  %2507 = vmatprep.mubr.bf16.mxu1 %v3676_v0 }
 0x21a   :  { %v921_v18 = vpop.f32.mrf.mxu0  ;;  %v1210_v22 = vpop.f32.mrf.mxu1 }
 0x21c   :  { %v4118_v12 = vpop.f32.mrf.mxu0  ;;  %v4122_v29 = vpop.f32.mrf.mxu1 }
 0x21e   :  { %v924_v31 = vpop.f32.mrf.mxu0  ;;  %v1213_v32 = vpop.f32.mrf.mxu1 }
 0x21f   :  { %v1466_v32 = vpack.c.bf16 %v1188_v36, %v1185_v21 }
 0x220   :  { %v4124_v40 = vpop.f32.mrf.mxu0  ;;  %2075 = vmatmul.mubr.bf16.gmra.mxu0 %v3547_v20  ;;  %v4126_v33 = vpop.f32.mrf.mxu1  ;;  %2508 = vmatmul.mubr.bf16.gmra.mxu1 %v1462_v24  ;;  %v3551_v20 = vld [vmem:[#allocation7 + $0xc0] sm:$0xff]  }
 0x221   :  { %2084 = vmatprep.mubr.bf16.mxu0 %v3676_v0  ;;  %2517 = vmatprep.mubr.bf16.mxu1 %v3676_v0 }
 0x222   :  { %v929_v30 = vpop.f32.mrf.mxu0  ;;  %v1218_v37 = vpop.f32.mrf.mxu1 }
 0x224   :  { %v4132_v28 = vpop.f32.mrf.mxu0  ;;  %v4136_v49 = vpop.f32.mrf.mxu1 }
 0x226   :  { %v932_v45 = vpop.f32.mrf.mxu0  ;;  %v1221_v47 = vpop.f32.mrf.mxu1 }
 0x227   :  { %v3552_v45 = vld [vmem:[#allocation7 + $0xc8] sm:$0xff]  }
 0x228   :  { %v4138_v56 = vpop.f32.mrf.mxu0  ;;  %2085 = vmatmul.mubr.bf16.gmra.mxu0 %v3548_v34  ;;  %v4140_v53 = vpop.f32.mrf.mxu1  ;;  %2518 = vmatmul.mubr.bf16.gmra.mxu1 %v1463_v42  ;;  %v1193_v42 = vadd.f32 %v4084_v52, %v4082_v55 }
 0x229   :  { %2094 = vmatprep.mubr.bf16.mxu0 %v3676_v0  ;;  %2527 = vmatprep.mubr.bf16.mxu1 %v3676_v0 }
 0x22a   :  { %v937_v44 = vpop.f32.mrf.mxu0  ;;  %v1226_v54 = vpop.f32.mrf.mxu1  ;;  %v1467_v51 = vpack.c.bf16 %v1196_v50, %v1193_v42  ;;  %v1212_v50 = vadd.f32 %v4122_v29, %v4118_v12  ;;  %v3554_v42 = vld [vmem:[#allocation7 + $0xd8] sm:$0xff]  }
 0x22c   :  { %v4146_v46 = vpop.f32.mrf.mxu0  ;;  %v4150_v4 = vpop.f32.mrf.mxu1 }
 0x22e   :  { %v940_v59 = vpop.f32.mrf.mxu0  ;;  %v1229_v63 = vpop.f32.mrf.mxu1 }
 0x230   :  { %v4152_v11 = vpop.f32.mrf.mxu0  ;;  %2095 = vmatmul.mubr.bf16.gmra.mxu0 %v3549_v48  ;;  %v4154_v6 = vpop.f32.mrf.mxu1  ;;  %2528 = vmatmul.mubr.bf16.gmra.mxu1 %v1464_v62 }
 0x231   :  { %2104 = vmatprep.mubr.bf16.mxu0 %v3676_v0  ;;  %2537 = vmatprep.mubr.bf16.mxu1 %v3676_v0 }
 0x232   :  { %v945_v58 = vpop.f32.mrf.mxu0  ;;  %v1234_v7 = vpop.f32.mrf.mxu1 }
 0x233   :  { %v1204_v7 = vadd.f32 %v4108_v15, %v4104_v61 }
 0x234   :  { %v4160_v60 = vpop.f32.mrf.mxu0  ;;  %v4164_v19 = vpop.f32.mrf.mxu1 }
 0x236   :  { %v948_v10 = vpop.f32.mrf.mxu0  ;;  %v1237_v18 = vpop.f32.mrf.mxu1 }
 0x237   :  { %v3553_v18 = vld [vmem:[#allocation7 + $0xd0] sm:$0xff]  }
 0x238   :  { %v4166_v27 = vpop.f32.mrf.mxu0  ;;  %2105 = vmatmul.mubr.bf16.gmra.mxu0 %v3550_v2  ;;  %v4168_v22 = vpop.f32.mrf.mxu1  ;;  %2538 = vmatmul.mubr.bf16.gmra.mxu1 %v1465_v13 }
 0x239   :  { %2114 = vmatprep.mubr.bf16.mxu0 %v3676_v0  ;;  %2547 = vmatprep.mubr.bf16.mxu1 %v3676_v0 }
 0x23a   :  { %v953_v9 = vpop.f32.mrf.mxu0  ;;  %v1242_v25 = vpop.f32.mrf.mxu1 }
 0x23b   :  { %v1201_v9 = vadd.f32 %v4098_v3, %v4096_v8 }
 0x23c   :  { %v4174_v16 = vpop.f32.mrf.mxu0  ;;  %v4178_v31 = vpop.f32.mrf.mxu1 }
 0x23e   :  { %v956_v24 = vpop.f32.mrf.mxu0  ;;  %v1245_v30 = vpop.f32.mrf.mxu1 }
 0x240   :  { %v1876_v43 = vpop.f32.mrf.mxu0  ;;  %2115 = vmatmul.mubr.bf16.gmra.mxu0 %v3551_v20  ;;  %v2309_v37 = vpop.f32.mrf.mxu1  ;;  %2548 = vmatmul.mubr.bf16.gmra.mxu1 %v1466_v32  ;;  %v1468_v32 = vpack.c.bf16 %v1204_v7, %v1201_v9 }
 0x241   :  { %2124 = vmatprep.mubr.bf16.mxu0 %v3676_v0  ;;  %v2310_v34 = vadd.f32 %v2309_v37, %v1876_v43  ;;  %2557 = vmatprep.mubr.bf16.mxu1 %v3676_v0 }
 0x242   :  { %v1878_v23 = vpop.f32.mrf.mxu0  ;;  %v2311_v35 = vpop.f32.mrf.mxu1 }
 0x243   :  { %v2312_v39 = vadd.f32 %v2311_v35, %v1878_v23  ;;  %v2628_v44 = vmax.f32 %v2310_v34, 0.0 }
 0x244   :  { %v1880_v38 = vpop.f32.mrf.mxu0  ;;  %v2313_v47 = vpop.f32.mrf.mxu1 }
 0x245   :  { %v2629_v57 = vmax.f32 %v2312_v39, 0.0  ;;  %v2314_v54 = vadd.f32 %v2313_v47, %v1880_v38  ;;  %v1209_v47 = vadd.f32 %v4112_v17, %v4110_v26 }
 0x246   :  { %v1882_v48 = vpop.f32.mrf.mxu0  ;;  %v2315_v59 = vpop.f32.mrf.mxu1 }
 0x247   :  { %v3371_v62 = vpack.c.bf16 %v2629_v57, %v2628_v44  ;;  %v2316_v63 = vadd.f32 %v2315_v59, %v1882_v48  ;;  %v2630_v55 = vmax.f32 %v2314_v54, 0.0  ;;  %v1469_v59 = vpack.c.bf16 %v1212_v50, %v1209_v47 }
 0x248   :  { %v1886_v58 = vpop.f32.mrf.mxu0  ;;  %2125 = vmatmul.mubr.bf16.gmra.mxu0 %v3552_v45  ;;  %v2319_v14 = vpop.f32.mrf.mxu1  ;;  %2558 = vmatmul.mubr.bf16.gmra.mxu1 %v1467_v51 }
 0x249   :  { %2134 = vmatprep.mubr.bf16.mxu0 %v3676_v0  ;;  %3140 = vst [vmem:[%s4419_s5] sm:$0xff] %v3371_v62  ;;  %v2631_v52 = vmax.f32 %v2316_v63, 0.0  ;;  %v2320_v41 = vadd.f32 %v2319_v14, %v1886_v58  ;;  %2567 = vmatprep.mubr.bf16.mxu1 %v3676_v0 }
 0x24a   :  { %v1888_v1 = vpop.f32.mrf.mxu0  ;;  %v2321_v2 = vpop.f32.mrf.mxu1 }
 0x24b   :  { %v3372_v5 = vpack.c.bf16 %v2631_v52, %v2630_v55  ;;  %v2322_v10 = vadd.f32 %v2321_v2, %v1888_v1  ;;  %v2632_v25 = vmax.f32 %v2320_v41, 0.0  ;;  %v1220_v52 = vadd.f32 %v4136_v49, %v4132_v28 }
 0x24c   :  { %v1890_v13 = vpop.f32.mrf.mxu0  ;;  %v2323_v36 = vpop.f32.mrf.mxu1 }
 0x24d   :  { %3141 = vst [vmem:[%s4419_s5 + $0x8] sm:$0xff] %v3372_v5  ;;  %v2633_v20 = vmax.f32 %v2322_v10, 0.0  ;;  %v2324_v21 = vadd.f32 %v2323_v36, %v1890_v13  ;;  %v3555_v5 = vld [vmem:[#allocation7 + $0xe0] sm:$0xff]   ;;  %v1217_v10 = vadd.f32 %v4126_v33, %v4124_v40 }
 0x24e   :  { %v1892_v24 = vpop.f32.mrf.mxu0  ;;  %v2325_v30 = vpop.f32.mrf.mxu1 }
 0x24f   :  { %v3373_v61 = vpack.c.bf16 %v2633_v20, %v2632_v25  ;;  %v2326_v15 = vadd.f32 %v2325_v30, %v1892_v24  ;;  %v2634_v8 = vmax.f32 %v2324_v21, 0.0  ;;  %v1470_v20 = vpack.c.bf16 %v1220_v52, %v1217_v10 }
 0x250   :  { %v1896_v43 = vpop.f32.mrf.mxu0  ;;  %2135 = vmatmul.mubr.bf16.gmra.mxu0 %v3553_v18  ;;  %v2329_v37 = vpop.f32.mrf.mxu1  ;;  %2568 = vmatmul.mubr.bf16.gmra.mxu1 %v1468_v32 }
 0x251   :  { %2144 = vmatprep.mubr.bf16.mxu0 %v3676_v0  ;;  %3142 = vst [vmem:[%s4419_s5 + $0x10] sm:$0xff] %v3373_v61  ;;  %v2635_v3 = vmax.f32 %v2326_v15, 0.0  ;;  %v2330_v34 = vadd.f32 %v2329_v37, %v1896_v43  ;;  %2577 = vmatprep.mubr.bf16.mxu1 %v3676_v0  ;;  %v1228_v15 = vadd.f32 %v4150_v4, %v4146_v46 }
 0x252   :  { %v1898_v23 = vpop.f32.mrf.mxu0  ;;  %v2331_v35 = vpop.f32.mrf.mxu1 }
 0x253   :  { %v3374_v39 = vpack.c.bf16 %v2635_v3, %v2634_v8  ;;  %v2332_v38 = vadd.f32 %v2331_v35, %v1898_v23  ;;  %v2636_v57 = vmax.f32 %v2330_v34, 0.0  ;;  %v3556_v34 = vld [vmem:[#allocation7 + $0xe8] sm:$0xff]   ;;  %v1225_v23 = vadd.f32 %v4140_v53, %v4138_v56 }
 0x254   :  { %v1900_v45 = vpop.f32.mrf.mxu0  ;;  %v2333_v44 = vpop.f32.mrf.mxu1 }
 0x255   :  { %3143 = vst [vmem:[%s4419_s5 + $0x18] sm:$0xff] %v3374_v39  ;;  %v2637_v54 = vmax.f32 %v2332_v38, 0.0  ;;  %v2334_v48 = vadd.f32 %v2333_v44, %v1900_v45 }
 0x256   :  { %v1902_v51 = vpop.f32.mrf.mxu0  ;;  %v2335_v62 = vpop.f32.mrf.mxu1 }
 0x257   :  { %v3375_v12 = vpack.c.bf16 %v2637_v54, %v2636_v57  ;;  %v2336_v29 = vadd.f32 %v2335_v62, %v1902_v51  ;;  %v2638_v26 = vmax.f32 %v2334_v48, 0.0  ;;  %v1236_v51 = vadd.f32 %v4164_v19, %v4160_v60 }
 0x258   :  { %v1906_v63 = vpop.f32.mrf.mxu0  ;;  %2145 = vmatmul.mubr.bf16.gmra.mxu0 %v3554_v42  ;;  %v2339_v58 = vpop.f32.mrf.mxu1  ;;  %2578 = vmatmul.mubr.bf16.gmra.mxu1 %v1469_v59  ;;  %v1471_v42 = vpack.c.bf16 %v1228_v15, %v1225_v23 }
 0x259   :  { %2154 = vmatprep.mubr.bf16.mxu0 %v3676_v0  ;;  %3144 = vst [vmem:[%s4419_s5 + $0x20] sm:$0xff] %v3375_v12  ;;  %v2639_v17 = vmax.f32 %v2336_v29, 0.0  ;;  %v2340_v14 = vadd.f32 %v2339_v58, %v1906_v63  ;;  %2587 = vmatprep.mubr.bf16.mxu1 %v3676_v0  ;;  %v3557_v63 = vld [vmem:[#allocation7 + $0xf0] sm:$0xff]   ;;  %v1233_v58 = vadd.f32 %v4154_v6, %v4152_v11 }
 0x25a   :  { %v1908_v55 = vpop.f32.mrf.mxu0  ;;  %v2341_v41 = vpop.f32.mrf.mxu1 }
 0x25b   :  { %v3376_v1 = vpack.c.bf16 %v2639_v17, %v2638_v26  ;;  %v2342_v7 = vadd.f32 %v2341_v41, %v1908_v55  ;;  %v2640_v18 = vmax.f32 %v2340_v14, 0.0  ;;  %v1472_v41 = vpack.c.bf16 %v1236_v51, %v1233_v58 }
 0x25c   :  { %v1910_v2 = vpop.f32.mrf.mxu0  ;;  %v2343_v13 = vpop.f32.mrf.mxu1 }
 0x25d   :  { %3145 = vst [vmem:[%s4419_s5 + $0x28] sm:$0xff] %v3376_v1  ;;  %v2641_v9 = vmax.f32 %v2342_v7, 0.0  ;;  %v2344_v36 = vadd.f32 %v2343_v13, %v1910_v2  ;;  %v1244_v13 = vadd.f32 %v4178_v31, %v4174_v16 }
 0x25e   :  { %v1912_v25 = vpop.f32.mrf.mxu0  ;;  %v2345_v21 = vpop.f32.mrf.mxu1 }
 0x25f   :  { %v3377_v28 = vpack.c.bf16 %v2641_v9, %v2640_v18  ;;  %v2346_v49 = vadd.f32 %v2345_v21, %v1912_v25  ;;  %v2642_v40 = vmax.f32 %v2344_v36, 0.0  ;;  %v1241_v21 = vadd.f32 %v4168_v22, %v4166_v27 }
 0x260   :  { %v1916_v24 = vpop.f32.mrf.mxu0  ;;  %2155 = vmatmul.mubr.bf16.gmra.mxu0 %v3555_v5  ;;  %v2349_v32 = vpop.f32.mrf.mxu1  ;;  %2588 = vmatmul.mubr.bf16.gmra.mxu1 %v1470_v20  ;;  %v3558_v20 = vld [vmem:[#allocation7 + $0xf8] sm:$0xff]  }
 0x261   :  { %2164 = vmatprep.mubr.bf16.mxu0 %v3676_v0  ;;  %3146 = vst [vmem:[%s4419_s5 + $0x30] sm:$0xff] %v3377_v28  ;;  %v2643_v33 = vmax.f32 %v2346_v49, 0.0  ;;  %v2350_v30 = vadd.f32 %v2349_v32, %v1916_v24  ;;  %2597 = vmatprep.mubr.bf16.mxu1 %v3676_v0 }
 0x262   :  { %v1918_v61 = vpop.f32.mrf.mxu0  ;;  %v2351_v43 = vpop.f32.mrf.mxu1 }
 0x263   :  { %v3378_v37 = vpack.c.bf16 %v2643_v33, %v2642_v40  ;;  %v2352_v8 = vadd.f32 %v2351_v43, %v1918_v61  ;;  %v2644_v35 = vmax.f32 %v2350_v30, 0.0  ;;  %v1473_v40 = vpack.c.bf16 %v1244_v13, %v1241_v21 }
 0x264   :  { %v1920_v3 = vpop.f32.mrf.mxu0  ;;  %v2353_v50 = vpop.f32.mrf.mxu1 }
 0x265   :  { %3147 = vst [vmem:[%s4419_s5 + $0x38] sm:$0xff] %v3378_v37  ;;  %v2645_v39 = vmax.f32 %v2352_v8, 0.0  ;;  %v2354_v38 = vadd.f32 %v2353_v50, %v1920_v3 }
 0x266   :  { %v1922_v45 = vpop.f32.mrf.mxu0  ;;  %v2355_v47 = vpop.f32.mrf.mxu1 }
 0x267   :  { %v3379_v46 = vpack.c.bf16 %v2645_v39, %v2644_v35  ;;  %v2356_v4 = vadd.f32 %v2355_v47, %v1922_v45  ;;  %v2646_v56 = vmax.f32 %v2354_v38, 0.0 }
 0x268   :  { %v1926_v44 = vpop.f32.mrf.mxu0  ;;  %2165 = vmatmul.mubr.bf16.gmra.mxu0 %v3556_v34  ;;  %v2359_v57 = vpop.f32.mrf.mxu1  ;;  %2598 = vmatmul.mubr.bf16.gmra.mxu1 %v1471_v42 }
 0x269   :  { %2174 = vmatprep.mubr.bf16.mxu0 %v3676_v0  ;;  %3148 = vst [vmem:[%s4419_s5 + $0x40] sm:$0xff] %v3379_v46  ;;  %v2647_v53 = vmax.f32 %v2356_v4, 0.0  ;;  %v2360_v54 = vadd.f32 %v2359_v57, %v1926_v44  ;;  %2607 = vmatprep.mubr.bf16.mxu1 %v3676_v0 }
 0x26a   :  { %v1928_v48 = vpop.f32.mrf.mxu0  ;;  %v2361_v59 = vpop.f32.mrf.mxu1 }
 0x26b   :  { %v3380_v62 = vpack.c.bf16 %v2647_v53, %v2646_v56  ;;  %v2362_v12 = vadd.f32 %v2361_v59, %v1928_v48  ;;  %v2648_v17 = vmax.f32 %v2360_v54, 0.0 }
 0x26c   :  { %v1930_v29 = vpop.f32.mrf.mxu0  ;;  %v2363_v26 = vpop.f32.mrf.mxu1 }
 0x26d   :  { %3149 = vst [vmem:[%s4419_s5 + $0x48] sm:$0xff] %v3380_v62  ;;  %v2649_v14 = vmax.f32 %v2362_v12, 0.0  ;;  %v2364_v55 = vadd.f32 %v2363_v26, %v1930_v29 }
 0x26e   :  { %v1932_v52 = vpop.f32.mrf.mxu0  ;;  %v2365_v1 = vpop.f32.mrf.mxu1 }
 0x26f   :  { %v3381_v60 = vpack.c.bf16 %v2649_v14, %v2648_v17  ;;  %v2366_v19 = vadd.f32 %v2365_v1, %v1932_v52  ;;  %v2650_v11 = vmax.f32 %v2364_v55, 0.0 }
 0x270   :  { %v1936_v7 = vpop.f32.mrf.mxu0  ;;  %2175 = vmatmul.mubr.bf16.gmra.mxu0 %v3557_v63  ;;  %v2369_v2 = vpop.f32.mrf.mxu1  ;;  %2608 = vmatmul.mubr.bf16.gmra.mxu1 %v1472_v41 }
 0x271   :  { %2184 = vmatprep.mubr.bf16.mxu0 %v3676_v0  ;;  %3150 = vst [vmem:[%s4419_s5 + $0x50] sm:$0xff] %v3381_v60  ;;  %v2651_v6 = vmax.f32 %v2366_v19, 0.0  ;;  %v2370_v5 = vadd.f32 %v2369_v2, %v1936_v7  ;;  %2617 = vmatprep.mubr.bf16.mxu1 %v3676_v0 }
 0x272   :  { %v1938_v10 = vpop.f32.mrf.mxu0  ;;  %v2371_v18 = vpop.f32.mrf.mxu1 }
 0x273   :  { %v3382_v9 = vpack.c.bf16 %v2651_v6, %v2650_v11  ;;  %v2372_v36 = vadd.f32 %v2371_v18, %v1938_v10  ;;  %v2652_v49 = vmax.f32 %v2370_v5, 0.0 }
 0x274   :  { %v1940_v25 = vpop.f32.mrf.mxu0  ;;  %v2373_v28 = vpop.f32.mrf.mxu1 }
 0x275   :  { %3151 = vst [vmem:[%s4419_s5 + $0x58] sm:$0xff] %v3382_v9  ;;  %v2653_v24 = vmax.f32 %v2372_v36, 0.0  ;;  %v2374_v32 = vadd.f32 %v2373_v28, %v1940_v25 }
 0x276   :  { %v1942_v0 = vpop.f32.mrf.mxu0  ;;  %v2375_v33 = vpop.f32.mrf.mxu1 }
 0x277   :  { %v3383_v16 = vpack.c.bf16 %v2653_v24, %v2652_v49  ;;  %v2376_v31 = vadd.f32 %v2375_v33, %v1942_v0  ;;  %v2654_v27 = vmax.f32 %v2374_v32, 0.0 }
 0x278   :  { %v1946_v30 = vpop.f32.mrf.mxu0  ;;  %2185 = vmatmul.mubr.bf16.gmra.mxu0 %v3558_v20  ;;  %v2379_v61 = vpop.f32.mrf.mxu1  ;;  %2618 = vmatmul.mubr.bf16.gmra.mxu1 %v1473_v40 }
 0x279   :  { %3152 = vst [vmem:[%s4419_s5 + $0x60] sm:$0xff] %v3383_v16  ;;  %v2655_v22 = vmax.f32 %v2376_v31, 0.0  ;;  %v2380_v15 = vadd.f32 %v2379_v61, %v1946_v30 }
 0x27a   :  { %v1948_v43 = vpop.f32.mrf.mxu0  ;;  %v2381_v37 = vpop.f32.mrf.mxu1 }
 0x27b   :  { %v3384_v8 = vpack.c.bf16 %v2655_v22, %v2654_v27  ;;  %v2382_v3 = vadd.f32 %v2381_v37, %v1948_v43  ;;  %v2656_v50 = vmax.f32 %v2380_v15, 0.0 }
 0x27c   :  { %v1950_v34 = vpop.f32.mrf.mxu0  ;;  %v2383_v23 = vpop.f32.mrf.mxu1 }
 0x27d   :  { %3153 = vst [vmem:[%s4419_s5 + $0x68] sm:$0xff] %v3384_v8  ;;  %v2657_v35 = vmax.f32 %v2382_v3, 0.0  ;;  %v2384_v39 = vadd.f32 %v2383_v23, %v1950_v34 }
 0x27e   :  { %v1952_v38 = vpop.f32.mrf.mxu0  ;;  %v2385_v45 = vpop.f32.mrf.mxu1 }
 0x27f   :  { %v3385_v42 = vpack.c.bf16 %v2657_v35, %v2656_v50  ;;  %v2386_v47 = vadd.f32 %v2385_v45, %v1952_v38  ;;  %v2658_v44 = vmax.f32 %v2384_v39, 0.0 }
 0x280   :  { %v1956_v46 = vpop.f32.mrf.mxu0  ;;  %v2389_v4 = vpop.f32.mrf.mxu1 }
 0x281   :  { %3154 = vst [vmem:[%s4419_s5 + $0x70] sm:$0xff] %v3385_v42  ;;  %v2659_v57 = vmax.f32 %v2386_v47, 0.0  ;;  %v2390_v56 = vadd.f32 %v2389_v4, %v1956_v46 }
 0x282   :  { %v1958_v53 = vpop.f32.mrf.mxu0  ;;  %v2391_v54 = vpop.f32.mrf.mxu1 }
 0x283   :  { %v3386_v48 = vpack.c.bf16 %v2659_v57, %v2658_v44  ;;  %v2392_v51 = vadd.f32 %v2391_v54, %v1958_v53  ;;  %v2660_v12 = vmax.f32 %v2390_v56, 0.0 }
 0x284   :  { %v1960_v59 = vpop.f32.mrf.mxu0  ;;  %v2393_v62 = vpop.f32.mrf.mxu1 }
 0x285   :  { %3155 = vst [vmem:[%s4419_s5 + $0x78] sm:$0xff] %v3386_v48  ;;  %v2661_v29 = vmax.f32 %v2392_v51, 0.0  ;;  %v2394_v63 = vadd.f32 %v2393_v62, %v1960_v59 }
 0x286   :  { %v1962_v58 = vpop.f32.mrf.mxu0  ;;  %v2395_v26 = vpop.f32.mrf.mxu1 }
 0x287   :  { %v3387_v17 = vpack.c.bf16 %v2661_v29, %v2660_v12  ;;  %v2396_v14 = vadd.f32 %v2395_v26, %v1962_v58  ;;  %v2662_v41 = vmax.f32 %v2394_v63, 0.0 }
 0x288   :  { %v1966_v55 = vpop.f32.mrf.mxu0  ;;  %v2399_v52 = vpop.f32.mrf.mxu1 }
 0x289   :  { %3156 = vst [vmem:[%s4419_s5 + $0x80] sm:$0xff] %v3387_v17  ;;  %v2663_v1 = vmax.f32 %v2396_v14, 0.0  ;;  %v2400_v60 = vadd.f32 %v2399_v52, %v1966_v55 }
 0x28a   :  { %v1968_v19 = vpop.f32.mrf.mxu0  ;;  %v2401_v7 = vpop.f32.mrf.mxu1 }
 0x28b   :  { %v3388_v2 = vpack.c.bf16 %v2663_v1, %v2662_v41  ;;  %v2402_v11 = vadd.f32 %v2401_v7, %v1968_v19  ;;  %v2664_v10 = vmax.f32 %v2400_v60, 0.0 }
 0x28c   :  { %v1970_v6 = vpop.f32.mrf.mxu0  ;;  %v2403_v5 = vpop.f32.mrf.mxu1 }
 0x28d   :  { %3157 = vst [vmem:[%s4419_s5 + $0x88] sm:$0xff] %v3388_v2  ;;  %v2665_v13 = vmax.f32 %v2402_v11, 0.0  ;;  %v2404_v18 = vadd.f32 %v2403_v5, %v1970_v6 }
 0x28e   :  { %v1972_v9 = vpop.f32.mrf.mxu0  ;;  %v2405_v36 = vpop.f32.mrf.mxu1 }
 0x28f   :  { %v3389_v25 = vpack.c.bf16 %v2665_v13, %v2664_v10  ;;  %v2406_v20 = vadd.f32 %v2405_v36, %v1972_v9  ;;  %v2666_v49 = vmax.f32 %v2404_v18, 0.0 }
 0x290   :  { %v1976_v21 = vpop.f32.mrf.mxu0  ;;  %v2409_v28 = vpop.f32.mrf.mxu1 }
 0x291   :  { %3158 = vst [vmem:[%s4419_s5 + $0x90] sm:$0xff] %v3389_v25  ;;  %v2667_v24 = vmax.f32 %v2406_v20, 0.0  ;;  %v2410_v32 = vadd.f32 %v2409_v28, %v1976_v21 }
 0x292   :  { %v1978_v0 = vpop.f32.mrf.mxu0  ;;  %v2411_v40 = vpop.f32.mrf.mxu1 }
 0x293   :  { %v3390_v33 = vpack.c.bf16 %v2667_v24, %v2666_v49  ;;  %v2412_v16 = vadd.f32 %v2411_v40, %v1978_v0  ;;  %v2668_v61 = vmax.f32 %v2410_v32, 0.0 }
 0x294   :  { %v1980_v31 = vpop.f32.mrf.mxu0  ;;  %v2413_v30 = vpop.f32.mrf.mxu1 }
 0x295   :  { %3159 = vst [vmem:[%s4419_s5 + $0x98] sm:$0xff] %v3390_v33  ;;  %v2669_v27 = vmax.f32 %v2412_v16, 0.0  ;;  %v2414_v22 = vadd.f32 %v2413_v30, %v1980_v31 }
 0x296   :  { %v1982_v15 = vpop.f32.mrf.mxu0  ;;  %v2415_v43 = vpop.f32.mrf.mxu1 }
 0x297   :  { %v3391_v37 = vpack.c.bf16 %v2669_v27, %v2668_v61  ;;  %v2416_v8 = vadd.f32 %v2415_v43, %v1982_v15  ;;  %v2670_v23 = vmax.f32 %v2414_v22, 0.0 }
 0x298   :  { %v1986_v3 = vpop.f32.mrf.mxu0  ;;  %v2419_v34 = vpop.f32.mrf.mxu1 }
 0x299   :  { %3160 = vst [vmem:[%s4419_s5 + $0xa0] sm:$0xff] %v3391_v37  ;;  %v2671_v50 = vmax.f32 %v2416_v8, 0.0  ;;  %v2420_v35 = vadd.f32 %v2419_v34, %v1986_v3 }
 0x29a   :  { %v1988_v39 = vpop.f32.mrf.mxu0  ;;  %v2421_v38 = vpop.f32.mrf.mxu1 }
 0x29b   :  { %v3392_v45 = vpack.c.bf16 %v2671_v50, %v2670_v23  ;;  %v2422_v42 = vadd.f32 %v2421_v38, %v1988_v39  ;;  %v2672_v4 = vmax.f32 %v2420_v35, 0.0 }
 0x29c   :  { %v1990_v47 = vpop.f32.mrf.mxu0  ;;  %v2423_v46 = vpop.f32.mrf.mxu1 }
 0x29d   :  { %3161 = vst [vmem:[%s4419_s5 + $0xa8] sm:$0xff] %v3392_v45  ;;  %v2673_v44 = vmax.f32 %v2422_v42, 0.0  ;;  %v2424_v57 = vadd.f32 %v2423_v46, %v1990_v47 }
 0x29e   :  { %v1992_v56 = vpop.f32.mrf.mxu0  ;;  %v2425_v53 = vpop.f32.mrf.mxu1 }
 0x29f   :  { %v3393_v54 = vpack.c.bf16 %v2673_v44, %v2672_v4  ;;  %v2426_v48 = vadd.f32 %v2425_v53, %v1992_v56  ;;  %v2674_v62 = vmax.f32 %v2424_v57, 0.0 }
 0x2a0   :  { %v1996_v51 = vpop.f32.mrf.mxu0  ;;  %v2429_v59 = vpop.f32.mrf.mxu1 }
 0x2a1   :  { %3162 = vst [vmem:[%s4419_s5 + $0xb0] sm:$0xff] %v3393_v54  ;;  %v2675_v12 = vmax.f32 %v2426_v48, 0.0  ;;  %v2430_v29 = vadd.f32 %v2429_v59, %v1996_v51 }
 0x2a2   :  { %v1998_v63 = vpop.f32.mrf.mxu0  ;;  %v2431_v58 = vpop.f32.mrf.mxu1 }
 0x2a3   :  { %v3394_v26 = vpack.c.bf16 %v2675_v12, %v2674_v62  ;;  %v2432_v17 = vadd.f32 %v2431_v58, %v1998_v63  ;;  %v2676_v52 = vmax.f32 %v2430_v29, 0.0 }
 0x2a4   :  { %v2000_v14 = vpop.f32.mrf.mxu0  ;;  %v2433_v55 = vpop.f32.mrf.mxu1 }
 0x2a5   :  { %3163 = vst [vmem:[%s4419_s5 + $0xb8] sm:$0xff] %v3394_v26  ;;  %v2677_v41 = vmax.f32 %v2432_v17, 0.0  ;;  %v2434_v1 = vadd.f32 %v2433_v55, %v2000_v14 }
 0x2a6   :  { %v2002_v60 = vpop.f32.mrf.mxu0  ;;  %v2435_v19 = vpop.f32.mrf.mxu1 }
 0x2a7   :  { %v3395_v7 = vpack.c.bf16 %v2677_v41, %v2676_v52  ;;  %v2436_v2 = vadd.f32 %v2435_v19, %v2002_v60  ;;  %v2678_v5 = vmax.f32 %v2434_v1, 0.0 }
 0x2a8   :  { %v2006_v11 = vpop.f32.mrf.mxu0  ;;  %v2439_v6 = vpop.f32.mrf.mxu1 }
 0x2a9   :  { %3164 = vst [vmem:[%s4419_s5 + $0xc0] sm:$0xff] %v3395_v7  ;;  %v2679_v10 = vmax.f32 %v2436_v2, 0.0  ;;  %v2440_v13 = vadd.f32 %v2439_v6, %v2006_v11 }
 0x2aa   :  { %v2008_v18 = vpop.f32.mrf.mxu0  ;;  %v2441_v9 = vpop.f32.mrf.mxu1 }
 0x2ab   :  { %v3396_v36 = vpack.c.bf16 %v2679_v10, %v2678_v5  ;;  %v2442_v25 = vadd.f32 %v2441_v9, %v2008_v18  ;;  %v2680_v28 = vmax.f32 %v2440_v13, 0.0 }
 0x2ac   :  { %v2010_v20 = vpop.f32.mrf.mxu0  ;;  %v2443_v21 = vpop.f32.mrf.mxu1 }
 0x2ad   :  { %3165 = vst [vmem:[%s4419_s5 + $0xc8] sm:$0xff] %v3396_v36  ;;  %v2681_v49 = vmax.f32 %v2442_v25, 0.0  ;;  %v2444_v24 = vadd.f32 %v2443_v21, %v2010_v20 }
 0x2ae   :  { %v2012_v32 = vpop.f32.mrf.mxu0  ;;  %v2445_v0 = vpop.f32.mrf.mxu1 }
 0x2af   :  { %v3397_v40 = vpack.c.bf16 %v2681_v49, %v2680_v28  ;;  %v2446_v33 = vadd.f32 %v2445_v0, %v2012_v32  ;;  %v2682_v30 = vmax.f32 %v2444_v24, 0.0 }
 0x2b0   :  { %v2016_v16 = vpop.f32.mrf.mxu0  ;;  %v2449_v31 = vpop.f32.mrf.mxu1 }
 0x2b1   :  { %3166 = vst [vmem:[%s4419_s5 + $0xd0] sm:$0xff] %v3397_v40  ;;  %v2683_v61 = vmax.f32 %v2446_v33, 0.0  ;;  %v2450_v27 = vadd.f32 %v2449_v31, %v2016_v16 }
 0x2b2   :  { %v2018_v22 = vpop.f32.mrf.mxu0  ;;  %v2451_v15 = vpop.f32.mrf.mxu1 }
 0x2b3   :  { %v3398_v43 = vpack.c.bf16 %v2683_v61, %v2682_v30  ;;  %v2452_v37 = vadd.f32 %v2451_v15, %v2018_v22  ;;  %v2684_v34 = vmax.f32 %v2450_v27, 0.0 }
 0x2b4   :  { %v2020_v8 = vpop.f32.mrf.mxu0  ;;  %v2453_v3 = vpop.f32.mrf.mxu1 }
 0x2b5   :  { %3167 = vst [vmem:[%s4419_s5 + $0xd8] sm:$0xff] %v3398_v43  ;;  %v2685_v23 = vmax.f32 %v2452_v37, 0.0  ;;  %v2454_v50 = vadd.f32 %v2453_v3, %v2020_v8 }
 0x2b6   :  { %v2022_v35 = vpop.f32.mrf.mxu0  ;;  %v2455_v39 = vpop.f32.mrf.mxu1 }
 0x2b7   :  { %v3399_v38 = vpack.c.bf16 %v2685_v23, %v2684_v34  ;;  %v2456_v45 = vadd.f32 %v2455_v39, %v2022_v35  ;;  %v2686_v46 = vmax.f32 %v2454_v50, 0.0 }
 0x2b8   :  { %v2026_v42 = vpop.f32.mrf.mxu0  ;;  %v2459_v47 = vpop.f32.mrf.mxu1 }
 0x2b9   :  { %3168 = vst [vmem:[%s4419_s5 + $0xe0] sm:$0xff] %v3399_v38  ;;  %v2687_v4 = vmax.f32 %v2456_v45, 0.0  ;;  %v2460_v44 = vadd.f32 %v2459_v47, %v2026_v42 }
 0x2ba   :  { %v2028_v57 = vpop.f32.mrf.mxu0  ;;  %v2461_v56 = vpop.f32.mrf.mxu1 }
 0x2bb   :  { %v3400_v53 = vpack.c.bf16 %v2687_v4, %v2686_v46  ;;  %v2462_v54 = vadd.f32 %v2461_v56, %v2028_v57  ;;  %v2688_v59 = vmax.f32 %v2460_v44, 0.0 }
 0x2bc   :  { %v2030_v48 = vpop.f32.mrf.mxu0  ;;  %v2463_v51 = vpop.f32.mrf.mxu1 }
 0x2bd   :  { %3169 = vst [vmem:[%s4419_s5 + $0xe8] sm:$0xff] %v3400_v53  ;;  %v2689_v62 = vmax.f32 %v2462_v54, 0.0  ;;  %v2464_v12 = vadd.f32 %v2463_v51, %v2030_v48 }
 0x2be   :  { %v2032_v29 = vpop.f32.mrf.mxu0  ;;  %v2465_v63 = vpop.f32.mrf.mxu1 }
 0x2bf   :  { %v3401_v58 = vpack.c.bf16 %v2689_v62, %v2688_v59  ;;  %v2466_v26 = vadd.f32 %v2465_v63, %v2032_v29  ;;  %v2690_v55 = vmax.f32 %v2464_v12, 0.0 }
 0x2c0   :  { %v2036_v17 = vpop.f32.mrf.mxu0  ;;  %v2469_v14 = vpop.f32.mrf.mxu1 }
 0x2c1   :  { %3170 = vst [vmem:[%s4419_s5 + $0xf0] sm:$0xff] %v3401_v58  ;;  %v2691_v52 = vmax.f32 %v2466_v26, 0.0  ;;  %v2470_v41 = vadd.f32 %v2469_v14, %v2036_v17 }
 0x2c2   :  { %v2038_v1 = vpop.f32.mrf.mxu0  ;;  %v2471_v60 = vpop.f32.mrf.mxu1 }
 0x2c3   :  { %v3402_v19 = vpack.c.bf16 %v2691_v52, %v2690_v55  ;;  %v2472_v7 = vadd.f32 %v2471_v60, %v2038_v1  ;;  %v2692_v6 = vmax.f32 %v2470_v41, 0.0 }
 0x2c4   :  { %v2040_v2 = vpop.f32.mrf.mxu0  ;;  %v2473_v11 = vpop.f32.mrf.mxu1 }
 0x2c5   :  { %3171 = vst [vmem:[%s4419_s5 + $0xf8] sm:$0xff] %v3402_v19  ;;  %v2693_v5 = vmax.f32 %v2472_v7, 0.0  ;;  %v2474_v10 = vadd.f32 %v2473_v11, %v2040_v2 }
 0x2c6   :  { %v2042_v13 = vpop.f32.mrf.mxu0  ;;  %v2475_v18 = vpop.f32.mrf.mxu1 }
 0x2c7   :  { %v3403_v9 = vpack.c.bf16 %v2693_v5, %v2692_v6  ;;  %v2476_v36 = vadd.f32 %v2475_v18, %v2042_v13  ;;  %v2694_v21 = vmax.f32 %v2474_v10, 0.0 }
 0x2c8   :  { %v2046_v25 = vpop.f32.mrf.mxu0  ;;  %v2479_v20 = vpop.f32.mrf.mxu1 }
 0x2c9   :  { %3172 = vst [vmem:[%s4419_s5 + $0x100] sm:$0xff] %v3403_v9  ;;  %v2695_v28 = vmax.f32 %v2476_v36, 0.0  ;;  %v2480_v49 = vadd.f32 %v2479_v20, %v2046_v25 }
 0x2ca   :  { %v2048_v24 = vpop.f32.mrf.mxu0  ;;  %v2481_v32 = vpop.f32.mrf.mxu1 }
 0x2cb   :  { %v3404_v0 = vpack.c.bf16 %v2695_v28, %v2694_v21  ;;  %v2482_v40 = vadd.f32 %v2481_v32, %v2048_v24  ;;  %v2696_v31 = vmax.f32 %v2480_v49, 0.0 }
 0x2cc   :  { %v2050_v33 = vpop.f32.mrf.mxu0  ;;  %v2483_v16 = vpop.f32.mrf.mxu1 }
 0x2cd   :  { %3173 = vst [vmem:[%s4419_s5 + $0x108] sm:$0xff] %v3404_v0  ;;  %v2697_v30 = vmax.f32 %v2482_v40, 0.0  ;;  %v2484_v61 = vadd.f32 %v2483_v16, %v2050_v33 }
 0x2ce   :  { %v2052_v27 = vpop.f32.mrf.mxu0  ;;  %v2485_v22 = vpop.f32.mrf.mxu1 }
 0x2cf   :  { %v3405_v15 = vpack.c.bf16 %v2697_v30, %v2696_v31  ;;  %v2486_v43 = vadd.f32 %v2485_v22, %v2052_v27  ;;  %v2698_v3 = vmax.f32 %v2484_v61, 0.0 }
 0x2d0   :  { %v2056_v37 = vpop.f32.mrf.mxu0  ;;  %v2489_v8 = vpop.f32.mrf.mxu1 }
 0x2d1   :  { %3174 = vst [vmem:[%s4419_s5 + $0x110] sm:$0xff] %v3405_v15  ;;  %v2699_v34 = vmax.f32 %v2486_v43, 0.0  ;;  %v2490_v23 = vadd.f32 %v2489_v8, %v2056_v37 }
 0x2d2   :  { %v2058_v50 = vpop.f32.mrf.mxu0  ;;  %v2491_v35 = vpop.f32.mrf.mxu1 }
 0x2d3   :  { %v3406_v39 = vpack.c.bf16 %v2699_v34, %v2698_v3  ;;  %v2492_v38 = vadd.f32 %v2491_v35, %v2058_v50  ;;  %v2700_v47 = vmax.f32 %v2490_v23, 0.0 }
 0x2d4   :  { %v2060_v45 = vpop.f32.mrf.mxu0  ;;  %v2493_v42 = vpop.f32.mrf.mxu1 }
 0x2d5   :  { %3175 = vst [vmem:[%s4419_s5 + $0x118] sm:$0xff] %v3406_v39  ;;  %v2701_v46 = vmax.f32 %v2492_v38, 0.0  ;;  %v2494_v4 = vadd.f32 %v2493_v42, %v2060_v45 }
 0x2d6   :  { %v2062_v44 = vpop.f32.mrf.mxu0  ;;  %v2495_v57 = vpop.f32.mrf.mxu1 }
 0x2d7   :  { %v3407_v56 = vpack.c.bf16 %v2701_v46, %v2700_v47  ;;  %v2496_v53 = vadd.f32 %v2495_v57, %v2062_v44  ;;  %v2702_v51 = vmax.f32 %v2494_v4, 0.0 }
 0x2d8   :  { %v2066_v54 = vpop.f32.mrf.mxu0  ;;  %v2499_v48 = vpop.f32.mrf.mxu1 }
 0x2d9   :  { %3176 = vst [vmem:[%s4419_s5 + $0x120] sm:$0xff] %v3407_v56  ;;  %v2703_v59 = vmax.f32 %v2496_v53, 0.0  ;;  %v2500_v62 = vadd.f32 %v2499_v48, %v2066_v54 }
 0x2da   :  { %v2068_v12 = vpop.f32.mrf.mxu0  ;;  %v2501_v29 = vpop.f32.mrf.mxu1 }
 0x2db   :  { %v3408_v63 = vpack.c.bf16 %v2703_v59, %v2702_v51  ;;  %v2502_v58 = vadd.f32 %v2501_v29, %v2068_v12  ;;  %v2704_v14 = vmax.f32 %v2500_v62, 0.0 }
 0x2dc   :  { %v2070_v26 = vpop.f32.mrf.mxu0  ;;  %v2503_v17 = vpop.f32.mrf.mxu1 }
 0x2dd   :  { %3177 = vst [vmem:[%s4419_s5 + $0x128] sm:$0xff] %v3408_v63  ;;  %v2705_v55 = vmax.f32 %v2502_v58, 0.0  ;;  %v2504_v52 = vadd.f32 %v2503_v17, %v2070_v26 }
 0x2de   :  { %v2072_v41 = vpop.f32.mrf.mxu0  ;;  %v2505_v1 = vpop.f32.mrf.mxu1 }
 0x2df   :  { %v3409_v60 = vpack.c.bf16 %v2705_v55, %v2704_v14  ;;  %v2506_v19 = vadd.f32 %v2505_v1, %v2072_v41  ;;  %v2706_v11 = vmax.f32 %v2504_v52, 0.0 }
 0x2e0   :  { %v2076_v7 = vpop.f32.mrf.mxu0  ;;  %v2509_v2 = vpop.f32.mrf.mxu1 }
 0x2e1   :  { %3178 = vst [vmem:[%s4419_s5 + $0x130] sm:$0xff] %v3409_v60  ;;  %v2707_v6 = vmax.f32 %v2506_v19, 0.0  ;;  %v2510_v5 = vadd.f32 %v2509_v2, %v2076_v7 }
 0x2e2   :  { %v2078_v10 = vpop.f32.mrf.mxu0  ;;  %v2511_v13 = vpop.f32.mrf.mxu1 }
 0x2e3   :  { %v3410_v18 = vpack.c.bf16 %v2707_v6, %v2706_v11  ;;  %v2512_v9 = vadd.f32 %v2511_v13, %v2078_v10  ;;  %v2708_v20 = vmax.f32 %v2510_v5, 0.0 }
 0x2e4   :  { %v2080_v36 = vpop.f32.mrf.mxu0  ;;  %v2513_v25 = vpop.f32.mrf.mxu1 }
 0x2e5   :  { %3179 = vst [vmem:[%s4419_s5 + $0x138] sm:$0xff] %v3410_v18  ;;  %v2709_v21 = vmax.f32 %v2512_v9, 0.0  ;;  %v2514_v28 = vadd.f32 %v2513_v25, %v2080_v36 }
 0x2e6   :  { %v2082_v49 = vpop.f32.mrf.mxu0  ;;  %v2515_v24 = vpop.f32.mrf.mxu1 }
 0x2e7   :  { %v3411_v32 = vpack.c.bf16 %v2709_v21, %v2708_v20  ;;  %v2516_v0 = vadd.f32 %v2515_v24, %v2082_v49  ;;  %v2710_v16 = vmax.f32 %v2514_v28, 0.0 }
 0x2e8   :  { %v2086_v40 = vpop.f32.mrf.mxu0  ;;  %v2519_v33 = vpop.f32.mrf.mxu1 }
 0x2e9   :  { %3180 = vst [vmem:[%s4419_s5 + $0x140] sm:$0xff] %v3411_v32  ;;  %v2711_v31 = vmax.f32 %v2516_v0, 0.0  ;;  %v2520_v30 = vadd.f32 %v2519_v33, %v2086_v40 }
 0x2ea   :  { %v2088_v61 = vpop.f32.mrf.mxu0  ;;  %v2521_v27 = vpop.f32.mrf.mxu1 }
 0x2eb   :  { %v3412_v22 = vpack.c.bf16 %v2711_v31, %v2710_v16  ;;  %v2522_v15 = vadd.f32 %v2521_v27, %v2088_v61  ;;  %v2712_v8 = vmax.f32 %v2520_v30, 0.0 }
 0x2ec   :  { %v2090_v43 = vpop.f32.mrf.mxu0  ;;  %v2523_v37 = vpop.f32.mrf.mxu1 }
 0x2ed   :  { %3181 = vst [vmem:[%s4419_s5 + $0x148] sm:$0xff] %v3412_v22  ;;  %v2713_v3 = vmax.f32 %v2522_v15, 0.0  ;;  %v2524_v34 = vadd.f32 %v2523_v37, %v2090_v43 }
 0x2ee   :  { %v2092_v23 = vpop.f32.mrf.mxu0  ;;  %v2525_v50 = vpop.f32.mrf.mxu1 }
 0x2ef   :  { %v3413_v35 = vpack.c.bf16 %v2713_v3, %v2712_v8  ;;  %v2526_v39 = vadd.f32 %v2525_v50, %v2092_v23  ;;  %v2714_v42 = vmax.f32 %v2524_v34, 0.0 }
 0x2f0   :  { %v2096_v38 = vpop.f32.mrf.mxu0  ;;  %v2529_v45 = vpop.f32.mrf.mxu1 }
 0x2f1   :  { %3182 = vst [vmem:[%s4419_s5 + $0x150] sm:$0xff] %v3413_v35  ;;  %v2715_v47 = vmax.f32 %v2526_v39, 0.0  ;;  %v2530_v46 = vadd.f32 %v2529_v45, %v2096_v38 }
 0x2f2   :  { %v2098_v4 = vpop.f32.mrf.mxu0  ;;  %v2531_v44 = vpop.f32.mrf.mxu1 }
 0x2f3   :  { %v3414_v57 = vpack.c.bf16 %v2715_v47, %v2714_v42  ;;  %v2532_v56 = vadd.f32 %v2531_v44, %v2098_v4  ;;  %v2716_v48 = vmax.f32 %v2530_v46, 0.0 }
 0x2f4   :  { %v2100_v53 = vpop.f32.mrf.mxu0  ;;  %v2533_v54 = vpop.f32.mrf.mxu1 }
 0x2f5   :  { %3183 = vst [vmem:[%s4419_s5 + $0x158] sm:$0xff] %v3414_v57  ;;  %v2717_v51 = vmax.f32 %v2532_v56, 0.0  ;;  %v2534_v59 = vadd.f32 %v2533_v54, %v2100_v53 }
 0x2f6   :  { %v2102_v62 = vpop.f32.mrf.mxu0  ;;  %v2535_v12 = vpop.f32.mrf.mxu1 }
 0x2f7   :  { %v3415_v29 = vpack.c.bf16 %v2717_v51, %v2716_v48  ;;  %v2536_v63 = vadd.f32 %v2535_v12, %v2102_v62  ;;  %v2718_v17 = vmax.f32 %v2534_v59, 0.0 }
 0x2f8   :  { %v2106_v58 = vpop.f32.mrf.mxu0  ;;  %v2539_v26 = vpop.f32.mrf.mxu1 }
 0x2f9   :  { %3184 = vst [vmem:[%s4419_s5 + $0x160] sm:$0xff] %v3415_v29  ;;  %v2719_v14 = vmax.f32 %v2536_v63, 0.0  ;;  %v2540_v55 = vadd.f32 %v2539_v26, %v2106_v58 }
 0x2fa   :  { %v2108_v52 = vpop.f32.mrf.mxu0  ;;  %v2541_v41 = vpop.f32.mrf.mxu1 }
 0x2fb   :  { %v3416_v1 = vpack.c.bf16 %v2719_v14, %v2718_v17  ;;  %v2542_v60 = vadd.f32 %v2541_v41, %v2108_v52  ;;  %v2720_v2 = vmax.f32 %v2540_v55, 0.0 }
 0x2fc   :  { %v2110_v19 = vpop.f32.mrf.mxu0  ;;  %v2543_v7 = vpop.f32.mrf.mxu1 }
 0x2fd   :  { %3185 = vst [vmem:[%s4419_s5 + $0x168] sm:$0xff] %v3416_v1  ;;  %v2721_v11 = vmax.f32 %v2542_v60, 0.0  ;;  %v2544_v6 = vadd.f32 %v2543_v7, %v2110_v19 }
 0x2fe   :  { %v2112_v5 = vpop.f32.mrf.mxu0  ;;  %v2545_v10 = vpop.f32.mrf.mxu1 }
 0x2ff   :  { %v3417_v13 = vpack.c.bf16 %v2721_v11, %v2720_v2  ;;  %v2546_v18 = vadd.f32 %v2545_v10, %v2112_v5  ;;  %v2722_v25 = vmax.f32 %v2544_v6, 0.0 }
 0x300   :  { %v2116_v9 = vpop.f32.mrf.mxu0  ;;  %v2549_v36 = vpop.f32.mrf.mxu1 }
 0x301   :  { %3186 = vst [vmem:[%s4419_s5 + $0x170] sm:$0xff] %v3417_v13  ;;  %v2723_v20 = vmax.f32 %v2546_v18, 0.0  ;;  %v2550_v21 = vadd.f32 %v2549_v36, %v2116_v9 }
 0x302   :  { %v2118_v28 = vpop.f32.mrf.mxu0  ;;  %v2551_v49 = vpop.f32.mrf.mxu1 }
 0x303   :  { %v3418_v24 = vpack.c.bf16 %v2723_v20, %v2722_v25  ;;  %v2552_v32 = vadd.f32 %v2551_v49, %v2118_v28  ;;  %v2724_v33 = vmax.f32 %v2550_v21, 0.0 }
 0x304   :  { %v2120_v0 = vpop.f32.mrf.mxu0  ;;  %v2553_v40 = vpop.f32.mrf.mxu1 }
 0x305   :  { %3187 = vst [vmem:[%s4419_s5 + $0x178] sm:$0xff] %v3418_v24  ;;  %v2725_v16 = vmax.f32 %v2552_v32, 0.0  ;;  %v2554_v31 = vadd.f32 %v2553_v40, %v2120_v0 }
 0x306   :  { %v2122_v30 = vpop.f32.mrf.mxu0  ;;  %v2555_v61 = vpop.f32.mrf.mxu1 }
 0x307   :  { %v3419_v27 = vpack.c.bf16 %v2725_v16, %v2724_v33  ;;  %v2556_v22 = vadd.f32 %v2555_v61, %v2122_v30  ;;  %v2726_v37 = vmax.f32 %v2554_v31, 0.0 }
 0x308   :  { %v2126_v15 = vpop.f32.mrf.mxu0  ;;  %v2559_v43 = vpop.f32.mrf.mxu1 }
 0x309   :  { %3188 = vst [vmem:[%s4419_s5 + $0x180] sm:$0xff] %v3419_v27  ;;  %v2727_v8 = vmax.f32 %v2556_v22, 0.0  ;;  %v2560_v3 = vadd.f32 %v2559_v43, %v2126_v15 }
 0x30a   :  { %v2128_v34 = vpop.f32.mrf.mxu0  ;;  %v2561_v23 = vpop.f32.mrf.mxu1 }
 0x30b   :  { %v3420_v50 = vpack.c.bf16 %v2727_v8, %v2726_v37  ;;  %v2562_v35 = vadd.f32 %v2561_v23, %v2128_v34  ;;  %v2728_v45 = vmax.f32 %v2560_v3, 0.0 }
 0x30c   :  { %v2130_v39 = vpop.f32.mrf.mxu0  ;;  %v2563_v38 = vpop.f32.mrf.mxu1 }
 0x30d   :  { %3189 = vst [vmem:[%s4419_s5 + $0x188] sm:$0xff] %v3420_v50  ;;  %v2729_v42 = vmax.f32 %v2562_v35, 0.0  ;;  %v2564_v47 = vadd.f32 %v2563_v38, %v2130_v39 }
 0x30e   :  { %v2132_v46 = vpop.f32.mrf.mxu0  ;;  %v2565_v4 = vpop.f32.mrf.mxu1 }
 0x30f   :  { %v3421_v44 = vpack.c.bf16 %v2729_v42, %v2728_v45  ;;  %v2566_v57 = vadd.f32 %v2565_v4, %v2132_v46  ;;  %v2730_v54 = vmax.f32 %v2564_v47, 0.0 }
 0x310   :  { %v2136_v56 = vpop.f32.mrf.mxu0  ;;  %v2569_v53 = vpop.f32.mrf.mxu1 }
 0x311   :  { %3190 = vst [vmem:[%s4419_s5 + $0x190] sm:$0xff] %v3421_v44  ;;  %v2731_v48 = vmax.f32 %v2566_v57, 0.0  ;;  %v2570_v51 = vadd.f32 %v2569_v53, %v2136_v56 }
 0x312   :  { %v2138_v59 = vpop.f32.mrf.mxu0  ;;  %v2571_v62 = vpop.f32.mrf.mxu1 }
 0x313   :  { %v3422_v12 = vpack.c.bf16 %v2731_v48, %v2730_v54  ;;  %v2572_v29 = vadd.f32 %v2571_v62, %v2138_v59  ;;  %v2732_v26 = vmax.f32 %v2570_v51, 0.0 }
 0x314   :  { %v2140_v63 = vpop.f32.mrf.mxu0  ;;  %v2573_v58 = vpop.f32.mrf.mxu1 }
 0x315   :  { %3191 = vst [vmem:[%s4419_s5 + $0x198] sm:$0xff] %v3422_v12  ;;  %v2733_v17 = vmax.f32 %v2572_v29, 0.0  ;;  %v2574_v14 = vadd.f32 %v2573_v58, %v2140_v63 }
 0x316   :  { %v2142_v55 = vpop.f32.mrf.mxu0  ;;  %v2575_v52 = vpop.f32.mrf.mxu1 }
 0x317   :  { %v3423_v41 = vpack.c.bf16 %v2733_v17, %v2732_v26  ;;  %v2576_v1 = vadd.f32 %v2575_v52, %v2142_v55  ;;  %v2734_v7 = vmax.f32 %v2574_v14, 0.0 }
 0x318   :  { %v2146_v60 = vpop.f32.mrf.mxu0  ;;  %v2579_v19 = vpop.f32.mrf.mxu1 }
 0x319   :  { %3192 = vst [vmem:[%s4419_s5 + $0x1a0] sm:$0xff] %v3423_v41  ;;  %v2735_v2 = vmax.f32 %v2576_v1, 0.0  ;;  %v2580_v11 = vadd.f32 %v2579_v19, %v2146_v60 }
 0x31a   :  { %v2148_v6 = vpop.f32.mrf.mxu0  ;;  %v2581_v5 = vpop.f32.mrf.mxu1 }
 0x31b   :  { %v3424_v10 = vpack.c.bf16 %v2735_v2, %v2734_v7  ;;  %v2582_v13 = vadd.f32 %v2581_v5, %v2148_v6  ;;  %v2736_v36 = vmax.f32 %v2580_v11, 0.0 }
 0x31c   :  { %v2150_v18 = vpop.f32.mrf.mxu0  ;;  %v2583_v9 = vpop.f32.mrf.mxu1 }
 0x31d   :  { %3193 = vst [vmem:[%s4419_s5 + $0x1a8] sm:$0xff] %v3424_v10  ;;  %v2737_v25 = vmax.f32 %v2582_v13, 0.0  ;;  %v2584_v20 = vadd.f32 %v2583_v9, %v2150_v18 }
 0x31e   :  { %v2152_v21 = vpop.f32.mrf.mxu0  ;;  %v2585_v28 = vpop.f32.mrf.mxu1 }
 0x31f   :  { %v3425_v49 = vpack.c.bf16 %v2737_v25, %v2736_v36  ;;  %v2586_v24 = vadd.f32 %v2585_v28, %v2152_v21  ;;  %v2738_v40 = vmax.f32 %v2584_v20, 0.0 }
 0x320   :  { %v2156_v32 = vpop.f32.mrf.mxu0  ;;  %v2589_v0 = vpop.f32.mrf.mxu1 }
 0x321   :  { %3194 = vst [vmem:[%s4419_s5 + $0x1b0] sm:$0xff] %v3425_v49  ;;  %v2739_v33 = vmax.f32 %v2586_v24, 0.0  ;;  %v2590_v16 = vadd.f32 %v2589_v0, %v2156_v32 }
 0x322   :  { %v2158_v31 = vpop.f32.mrf.mxu0  ;;  %v2591_v30 = vpop.f32.mrf.mxu1 }
 0x323   :  { %v3426_v61 = vpack.c.bf16 %v2739_v33, %v2738_v40  ;;  %v2592_v27 = vadd.f32 %v2591_v30, %v2158_v31  ;;  %v2740_v43 = vmax.f32 %v2590_v16, 0.0 }
 0x324   :  { %v2160_v22 = vpop.f32.mrf.mxu0  ;;  %v2593_v15 = vpop.f32.mrf.mxu1 }
 0x325   :  { %3195 = vst [vmem:[%s4419_s5 + $0x1b8] sm:$0xff] %v3426_v61  ;;  %v2741_v37 = vmax.f32 %v2592_v27, 0.0  ;;  %v2594_v8 = vadd.f32 %v2593_v15, %v2160_v22 }
 0x326   :  { %v2162_v3 = vpop.f32.mrf.mxu0  ;;  %v2595_v34 = vpop.f32.mrf.mxu1 }
 0x327   :  { %v3427_v23 = vpack.c.bf16 %v2741_v37, %v2740_v43  ;;  %v2596_v50 = vadd.f32 %v2595_v34, %v2162_v3  ;;  %v2742_v38 = vmax.f32 %v2594_v8, 0.0 }
 0x328   :  { %v2166_v35 = vpop.f32.mrf.mxu0  ;;  %v2599_v39 = vpop.f32.mrf.mxu1 }
 0x329   :  { %3196 = vst [vmem:[%s4419_s5 + $0x1c0] sm:$0xff] %v3427_v23  ;;  %v2743_v45 = vmax.f32 %v2596_v50, 0.0  ;;  %v2600_v42 = vadd.f32 %v2599_v39, %v2166_v35 }
 0x32a   :  { %v2168_v47 = vpop.f32.mrf.mxu0  ;;  %v2601_v46 = vpop.f32.mrf.mxu1 }
 0x32b   :  { %v3428_v4 = vpack.c.bf16 %v2743_v45, %v2742_v38  ;;  %v2602_v44 = vadd.f32 %v2601_v46, %v2168_v47  ;;  %v2744_v53 = vmax.f32 %v2600_v42, 0.0 }
 0x32c   :  { %v2170_v57 = vpop.f32.mrf.mxu0  ;;  %v2603_v56 = vpop.f32.mrf.mxu1 }
 0x32d   :  { %3197 = vst [vmem:[%s4419_s5 + $0x1c8] sm:$0xff] %v3428_v4  ;;  %v2745_v54 = vmax.f32 %v2602_v44, 0.0  ;;  %v2604_v48 = vadd.f32 %v2603_v56, %v2170_v57 }
 0x32e   :  { %v2172_v51 = vpop.f32.mrf.mxu0  ;;  %v2605_v59 = vpop.f32.mrf.mxu1 }
 0x32f   :  { %v3429_v62 = vpack.c.bf16 %v2745_v54, %v2744_v53  ;;  %v2606_v12 = vadd.f32 %v2605_v59, %v2172_v51  ;;  %v2746_v58 = vmax.f32 %v2604_v48, 0.0 }
 0x330   :  { %v2176_v29 = vpop.f32.mrf.mxu0  ;;  %v2609_v63 = vpop.f32.mrf.mxu1 }
 0x331   :  { %3198 = vst [vmem:[%s4419_s5 + $0x1d0] sm:$0xff] %v3429_v62  ;;  %v2747_v26 = vmax.f32 %v2606_v12, 0.0  ;;  %v2610_v17 = vadd.f32 %v2609_v63, %v2176_v29 }
 0x332   :  { %v2178_v14 = vpop.f32.mrf.mxu0  ;;  %v2611_v55 = vpop.f32.mrf.mxu1 }
 0x333   :  { %v3430_v52 = vpack.c.bf16 %v2747_v26, %v2746_v58  ;;  %v2612_v41 = vadd.f32 %v2611_v55, %v2178_v14  ;;  %v2748_v19 = vmax.f32 %v2610_v17, 0.0 }
 0x334   :  { %v2180_v1 = vpop.f32.mrf.mxu0  ;;  %v2613_v60 = vpop.f32.mrf.mxu1 }
 0x335   :  { %3199 = vst [vmem:[%s4419_s5 + $0x1d8] sm:$0xff] %v3430_v52  ;;  %v2749_v7 = vmax.f32 %v2612_v41, 0.0  ;;  %v2614_v2 = vadd.f32 %v2613_v60, %v2180_v1 }
 0x336   :  { %v2182_v11 = vpop.f32.mrf.mxu0  ;;  %v2615_v6 = vpop.f32.mrf.mxu1 }
 0x337   :  { %v3431_v5 = vpack.c.bf16 %v2749_v7, %v2748_v19  ;;  %v2616_v10 = vadd.f32 %v2615_v6, %v2182_v11  ;;  %v2750_v9 = vmax.f32 %v2614_v2, 0.0 }
 0x338   :  { %v2186_v13 = vpop.f32.mrf.mxu0  ;;  %v2619_v18 = vpop.f32.mrf.mxu1 }
 0x339   :  { %3200 = vst [vmem:[%s4419_s5 + $0x1e0] sm:$0xff] %v3431_v5  ;;  %v2751_v36 = vmax.f32 %v2616_v10, 0.0  ;;  %v2620_v25 = vadd.f32 %v2619_v18, %v2186_v13 }
 0x33a   :  { %v2188_v20 = vpop.f32.mrf.mxu0  ;;  %v2621_v21 = vpop.f32.mrf.mxu1 }
 0x33b   :  { %v3432_v28 = vpack.c.bf16 %v2751_v36, %v2750_v9  ;;  %v2622_v49 = vadd.f32 %v2621_v21, %v2188_v20  ;;  %v2752_v0 = vmax.f32 %v2620_v25, 0.0 }
 0x33c   :  { %v2190_v24 = vpop.f32.mrf.mxu0  ;;  %v2623_v32 = vpop.f32.mrf.mxu1 }
 0x33d   :  { %3201 = vst [vmem:[%s4419_s5 + $0x1e8] sm:$0xff] %v3432_v28  ;;  %v2753_v40 = vmax.f32 %v2622_v49, 0.0  ;;  %v2624_v33 = vadd.f32 %v2623_v32, %v2190_v24 }
 0x33e   :  { %v2192_v16 = vpop.f32.mrf.mxu0  ;;  %v2625_v31 = vpop.f32.mrf.mxu1 }
 0x33f   :  { %v3433_v30 = vpack.c.bf16 %v2753_v40, %v2752_v0  ;;  %v2626_v61 = vadd.f32 %v2625_v31, %v2192_v16  ;;  %v2754_v27 = vmax.f32 %v2624_v33, 0.0 }
 0x341   :  { %3202 = vst [vmem:[%s4419_s5 + $0x1f0] sm:$0xff] %v3433_v30  ;;  %v2755_v22 = vmax.f32 %v2626_v61, 0.0 }
 0x343   :  { %v3434_v15 = vpack.c.bf16 %v2755_v22, %v2754_v27 }
 0x345   :  { %3203 = vst [vmem:[%s4419_s5 + $0x1f8] sm:$0xff] %v3434_v15 }
 0x346   :  { %3208 = vsyncpa [#allocation4], 1 }
 0x347   :  { %3209 = vsyncpa [#allocation6], 1 }
 0x348   :  { %3210 = vsyncpa [#allocation9], 1 }

// kernel: mpnn_encode.5
= control target key start
LH: loop header
LB: loop body
LE: loop exit
PB: predicated region body
PF: predicated region fallthrough
CT: control target
= control target key end

     0   :  { %s6007_s1 = inlined_call_operand.vmem [shape: bf16[512,256], index: 1, kind: input, shape index: {}]   ;;  %s6008_s0 = inlined_call_operand.vmem [shape: s8[512,512], index: 0, kind: input, shape index: {}]   ;;  %s6009_s4 = inlined_call_operand.vmem [shape: bf16[256,256], index: 4, kind: input, shape index: {}]   ;;  %s6010_s3 = inlined_call_operand.vmem [shape: bf16[128,256], index: 3, kind: input, shape index: {}]   ;;  %s6011_s2 = inlined_call_operand.vmem [shape: bf16[512,128], index: 2, kind: input, shape index: {}]   ;;  %s6012_s5 = inlined_call_operand.vmem [shape: f32[1,256], index: 5, kind: input, shape index: {}]   ;;  %s6013_s6 = inlined_call_operand.vmem [shape: f32[512,256], index: 6, kind: output, shape index: {}]  }
   0x1   :  { %v3820_v0 = vld [vmem:[%s6007_s1 + $0x74] ss:$8 sps:$4 sm:$0xff]   ;;  %v3824_v2 = vld [vmem:[%s6007_s1 + $0x70] ss:$8 sps:$4 sm:$0xff]   ;;  %v3826_v4 = vld [vmem:[%s6007_s1 + $0x64] ss:$8 sps:$4 sm:$0xff]  }
   0x2   :  { %v3822_v1 = vld [vmem:[%s6007_s1 + $0x174] ss:$8 sps:$4 sm:$0xff]   ;;  %866 = vmatprep.subr.bf16.mxu0 %v3820_v0  ;;  %v3825_v3 = vld [vmem:[%s6007_s1 + $0x170] ss:$8 sps:$4 sm:$0xff]   ;;  %v3828_v5 = vld [vmem:[%s6007_s1 + $0x164] ss:$8 sps:$4 sm:$0xff]  }
   0x3   :  { %1219 = vmatprep.subr.bf16.mxu1 %v3822_v1  ;;  %867 = vmatpush1.bf16.msra.mxu0 %v3824_v2  ;;  %v3830_v6 = vld [vmem:[%s6007_s1 + $0x60] ss:$8 sps:$4 sm:$0xff]   ;;  %v3832_v8 = vld [vmem:[%s6007_s1 + $0x54] ss:$8 sps:$4 sm:$0xff]   ;;  %v3836_v10 = vld [vmem:[%s6007_s1 + $0x50] ss:$8 sps:$4 sm:$0xff]  }
   0x4   :  { %1220 = vmatpush1.bf16.msra.mxu1 %v3825_v3  ;;  %868 = vmatprep.subr.bf16.mxu0 %v3826_v4  ;;  %v3831_v7 = vld [vmem:[%s6007_s1 + $0x160] ss:$8 sps:$4 sm:$0xff]   ;;  %v3834_v9 = vld [vmem:[%s6007_s1 + $0x154] ss:$8 sps:$4 sm:$0xff]   ;;  %v3837_v11 = vld [vmem:[%s6007_s1 + $0x150] ss:$8 sps:$4 sm:$0xff]  }
   0x5   :  { %1221 = vmatprep.subr.bf16.mxu1 %v3828_v5  ;;  %v3838_v12 = vld [vmem:[%s6007_s1 + $0x44] ss:$8 sps:$4 sm:$0xff]   ;;  %v3842_v14 = vld [vmem:[%s6007_s1 + $0x40] ss:$8 sps:$4 sm:$0xff]   ;;  %v3844_v16 = vld [vmem:[%s6007_s1 + $0x34] ss:$8 sps:$4 sm:$0xff]  }
   0x6   :  { %v3840_v13 = vld [vmem:[%s6007_s1 + $0x144] ss:$8 sps:$4 sm:$0xff]   ;;  %v3843_v15 = vld [vmem:[%s6007_s1 + $0x140] ss:$8 sps:$4 sm:$0xff]   ;;  %v3846_v17 = vld [vmem:[%s6007_s1 + $0x134] ss:$8 sps:$4 sm:$0xff]  }
   0x7   :  { %869 = vmatpush1.bf16.msra.mxu0 %v3830_v6  ;;  %v3848_v18 = vld [vmem:[%s6007_s1 + $0x30] ss:$8 sps:$4 sm:$0xff]   ;;  %v3850_v20 = vld [vmem:[%s6007_s1 + $0x24] ss:$8 sps:$4 sm:$0xff]   ;;  %v3854_v22 = vld [vmem:[%s6007_s1 + $0x20] ss:$8 sps:$4 sm:$0xff]  }
   0x8   :  { %1222 = vmatpush1.bf16.msra.mxu1 %v3831_v7  ;;  %870 = vmatprep.subr.bf16.mxu0 %v3832_v8  ;;  %v3849_v19 = vld [vmem:[%s6007_s1 + $0x130] ss:$8 sps:$4 sm:$0xff]   ;;  %v3852_v21 = vld [vmem:[%s6007_s1 + $0x124] ss:$8 sps:$4 sm:$0xff]   ;;  %v3855_v23 = vld [vmem:[%s6007_s1 + $0x120] ss:$8 sps:$4 sm:$0xff]  }
   0x9   :  { %1223 = vmatprep.subr.bf16.mxu1 %v3834_v9  ;;  %v3856_v24 = vld [vmem:[%s6007_s1 + $0x14] ss:$8 sps:$4 sm:$0xff]   ;;  %v3860_v26 = vld [vmem:[%s6007_s1 + $0x10] ss:$8 sps:$4 sm:$0xff]   ;;  %v3862_v28 = vld [vmem:[%s6007_s1 + $0x4] ss:$8 sps:$4 sm:$0xff]  }
   0xa   :  { %v3858_v25 = vld [vmem:[%s6007_s1 + $0x114] ss:$8 sps:$4 sm:$0xff]   ;;  %v3861_v27 = vld [vmem:[%s6007_s1 + $0x110] ss:$8 sps:$4 sm:$0xff]   ;;  %v3864_v29 = vld [vmem:[%s6007_s1 + $0x104] ss:$8 sps:$4 sm:$0xff]  }
   0xb   :  { %871 = vmatpush1.bf16.msra.mxu0 %v3836_v10  ;;  %v3866_v30 = vld [vmem:[%s6007_s1] ss:$8 sps:$4 sm:$0xff]   ;;  %v3868_v32 = vld [vmem:[%s6007_s1 + $0xf4] ss:$8 sps:$4 sm:$0xff]   ;;  %v3872_v34 = vld [vmem:[%s6007_s1 + $0xf0] ss:$8 sps:$4 sm:$0xff]  }
   0xc   :  { %1224 = vmatpush1.bf16.msra.mxu1 %v3837_v11  ;;  %872 = vmatprep.subr.bf16.mxu0 %v3838_v12  ;;  %v3867_v31 = vld [vmem:[%s6007_s1 + $0x100] ss:$8 sps:$4 sm:$0xff]   ;;  %v3870_v33 = vld [vmem:[%s6007_s1 + $0x1f4] ss:$8 sps:$4 sm:$0xff]   ;;  %v3873_v35 = vld [vmem:[%s6007_s1 + $0x1f0] ss:$8 sps:$4 sm:$0xff]  }
   0xd   :  { %1225 = vmatprep.subr.bf16.mxu1 %v3840_v13  ;;  %v3874_v36 = vld [vmem:[%s6007_s1 + $0xe4] ss:$8 sps:$4 sm:$0xff]   ;;  %v3878_v38 = vld [vmem:[%s6007_s1 + $0xe0] ss:$8 sps:$4 sm:$0xff]   ;;  %v3880_v40 = vld [vmem:[%s6007_s1 + $0xd4] ss:$8 sps:$4 sm:$0xff]  }
   0xe   :  { %v3876_v37 = vld [vmem:[%s6007_s1 + $0x1e4] ss:$8 sps:$4 sm:$0xff]   ;;  %v3879_v39 = vld [vmem:[%s6007_s1 + $0x1e0] ss:$8 sps:$4 sm:$0xff]   ;;  %v3882_v41 = vld [vmem:[%s6007_s1 + $0x1d4] ss:$8 sps:$4 sm:$0xff]  }
   0xf   :  { %873 = vmatpush1.bf16.msra.mxu0 %v3842_v14  ;;  %v3884_v42 = vld [vmem:[%s6007_s1 + $0xd0] ss:$8 sps:$4 sm:$0xff]   ;;  %v3886_v44 = vld [vmem:[%s6007_s1 + $0xc4] ss:$8 sps:$4 sm:$0xff]   ;;  %v3890_v47 = vld [vmem:[%s6007_s1 + $0xc0] ss:$8 sps:$4 sm:$0xff]  }
  0x10   :  { %1226 = vmatpush1.bf16.msra.mxu1 %v3843_v15  ;;  %874 = vmatprep.subr.bf16.mxu0 %v3844_v16  ;;  %v3885_v43 = vld [vmem:[%s6007_s1 + $0x1d0] ss:$8 sps:$4 sm:$0xff]   ;;  %v3888_v45 = vld [vmem:[%s6007_s1 + $0x1c4] ss:$8 sps:$4 sm:$0xff]   ;;  %v3891_v48 = vld [vmem:[%s6007_s1 + $0x1c0] ss:$8 sps:$4 sm:$0xff]  }
  0x11   :  { %1227 = vmatprep.subr.bf16.mxu1 %v3846_v17  ;;  %v4197_v46 = vld [vmem:[%s6008_s0 + $0x8] sm:$0xff]  ;;  %v4209_v50 = vld [vmem:[%s6008_s0 + $0x18] sm:$0xff]  ;;  %v354_v4 = vld [vmem:[%s6008_s0] sm:$0xff] }
  0x12   :  { %v419_v49 = vunpack.c.l.s8.bf16 %v4197_v46  ;;  %v3892_v51 = vld [vmem:[%s6007_s1 + $0xb4] ss:$8 sps:$4 sm:$0xff]   ;;  %v421_v52 = vunpack.c.l.s8.bf16 %v4209_v50  ;;  %v3896_v54 = vld [vmem:[%s6007_s1 + $0xb0] ss:$8 sps:$4 sm:$0xff]   ;;  %v3898_v56 = vld [vmem:[%s6007_s1 + $0xa4] ss:$8 sps:$4 sm:$0xff]   ;;  %v418_v8 = vunpack.c.l.s8.bf16 %v354_v4  ;;  %v423_v12 = vunpack.c.h.s8.bf16 %v4197_v46 }
  0x13   :  { %875 = vmatpush1.bf16.msra.mxu0 %v3848_v18  ;;  %v3894_v53 = vld [vmem:[%s6007_s1 + $0x1b4] ss:$8 sps:$4 sm:$0xff]   ;;  %v3897_v55 = vld [vmem:[%s6007_s1 + $0x1b0] ss:$8 sps:$4 sm:$0xff]   ;;  %v3900_v57 = vld [vmem:[%s6007_s1 + $0x1a4] ss:$8 sps:$4 sm:$0xff]   ;;  %v425_v13 = vunpack.c.h.s8.bf16 %v4209_v50 }
  0x14   :  { %1228 = vmatpush1.bf16.msra.mxu1 %v3849_v19  ;;  %876 = vmatprep.subr.bf16.mxu0 %v3850_v20  ;;  %v3902_v58 = vld [vmem:[%s6007_s1 + $0xa0] ss:$8 sps:$4 sm:$0xff]   ;;  %v3904_v60 = vld [vmem:[%s6007_s1 + $0x94] ss:$8 sps:$4 sm:$0xff]   ;;  %v3908_v62 = vld [vmem:[%s6007_s1 + $0x90] ss:$8 sps:$4 sm:$0xff]  }
  0x15   :  { %1229 = vmatprep.subr.bf16.mxu1 %v3852_v21  ;;  %898 = vmatprep.mubr.bf16.mxu0 %v419_v49  ;;  %v3903_v59 = vld [vmem:[%s6007_s1 + $0x1a0] ss:$8 sps:$4 sm:$0xff]   ;;  %v3906_v61 = vld [vmem:[%s6007_s1 + $0x194] ss:$8 sps:$4 sm:$0xff]   ;;  %v3909_v63 = vld [vmem:[%s6007_s1 + $0x190] ss:$8 sps:$4 sm:$0xff]  }
  0x16   :  { %1251 = vmatprep.mubr.bf16.mxu1 %v421_v52  ;;  %v3910_v0 = vld [vmem:[%s6007_s1 + $0x84] ss:$8 sps:$4 sm:$0xff]   ;;  %v3914_v2 = vld [vmem:[%s6007_s1 + $0x80] ss:$8 sps:$4 sm:$0xff]   ;;  %v356_v5 = vld [vmem:[%s6008_s0 + $0x10] sm:$0xff] }
  0x17   :  { %877 = vmatpush1.bf16.msra.mxu0 %v3854_v22  ;;  %v3912_v1 = vld [vmem:[%s6007_s1 + $0x184] ss:$8 sps:$4 sm:$0xff]   ;;  %v3915_v3 = vld [vmem:[%s6007_s1 + $0x180] ss:$8 sps:$4 sm:$0xff]   ;;  %v3918_v6 = vld [vmem:[%s6009_s4 + $0x74] ss:$8 sps:$4 sm:$0xff]   ;;  %v420_v9 = vunpack.c.l.s8.bf16 %v356_v5  ;;  %v422_v22 = vunpack.c.h.s8.bf16 %v354_v4 }
  0x18   :  { %1230 = vmatpush1.bf16.msra.mxu1 %v3855_v23  ;;  %878 = vmatprep.subr.bf16.mxu0 %v3856_v24  ;;  %v3921_v7 = vld [vmem:[%s6010_s3 + $0x74] ss:$8 sps:$4 sm:$0xff]   ;;  %v3916_v10 = vld [vmem:[%s6009_s4 + $0x70] ss:$8 sps:$4 sm:$0xff]   ;;  %v3924_v14 = vld [vmem:[%s6009_s4 + $0x64] ss:$8 sps:$4 sm:$0xff]   ;;  %v424_v23 = vunpack.c.h.s8.bf16 %v356_v5 }
  0x19   :  { %1231 = vmatprep.subr.bf16.mxu1 %v3858_v25  ;;  %v3919_v11 = vld [vmem:[%s6010_s3 + $0x70] ss:$8 sps:$4 sm:$0xff]   ;;  %v3930_v15 = vld [vmem:[%s6010_s3 + $0x64] ss:$8 sps:$4 sm:$0xff]   ;;  %v3922_v17 = vld [vmem:[%s6009_s4 + $0x60] ss:$8 sps:$4 sm:$0xff]  }
  0x1a   :  { %v359_v16 = vld [vmem:[%s6008_s0 + $0x28] sm:$0xff]  ;;  %v361_v19 = vld [vmem:[%s6008_s0 + $0x38] sm:$0xff] }
  0x1b   :  { %879 = vmatpush1.bf16.msra.mxu0 %v3860_v26  ;;  %v3928_v18 = vld [vmem:[%s6010_s3 + $0x60] ss:$8 sps:$4 sm:$0xff]   ;;  %v3927_v20 = vld [vmem:[%s6009_s4 + $0x54] ss:$8 sps:$4 sm:$0xff]   ;;  %v3925_v24 = vld [vmem:[%s6009_s4 + $0x50] ss:$8 sps:$4 sm:$0xff]   ;;  %v427_v25 = vunpack.c.l.s8.bf16 %v359_v16  ;;  %v429_v26 = vunpack.c.l.s8.bf16 %v361_v19 }
  0x1c   :  { %1232 = vmatpush1.bf16.msra.mxu1 %v3861_v27  ;;  %880 = vmatprep.subr.bf16.mxu0 %v3862_v28  ;;  %v3939_v21 = vld [vmem:[%s6010_s3 + $0x54] ss:$8 sps:$4 sm:$0xff]   ;;  %v3933_v27 = vld [vmem:[%s6009_s4 + $0x44] ss:$8 sps:$4 sm:$0xff]   ;;  %v3937_v28 = vld [vmem:[%s6010_s3 + $0x50] ss:$8 sps:$4 sm:$0xff]  }
  0x1d   :  { %1233 = vmatprep.subr.bf16.mxu1 %v3864_v29  ;;  %v3948_v29 = vld [vmem:[%s6010_s3 + $0x44] ss:$8 sps:$4 sm:$0xff]   ;;  %v3945_v46 = vld [vmem:[%s6009_s4 + $0x14] ss:$8 sps:$4 sm:$0xff]  }
  0x1e   :  { %v3951_v52 = vld [vmem:[%s6009_s4 + $0x4] ss:$8 sps:$4 sm:$0xff]   ;;  %v3963_v4 = vld [vmem:[%s6009_s4 + $0xd4] ss:$8 sps:$4 sm:$0xff]  }
  0x1f   :  { %881 = vmatpush1.bf16.msra.mxu0 %v3866_v30  ;;  %v358_v30 = vld [vmem:[%s6008_s0 + $0x20] sm:$0xff] }
  0x20   :  { %1234 = vmatpush1.bf16.msra.mxu1 %v3867_v31  ;;  %882 = vmatprep.subr.bf16.mxu0 %v3868_v32  ;;  %v360_v31 = vld [vmem:[%s6008_s0 + $0x30] sm:$0xff]  ;;  %v3931_v32 = vld [vmem:[%s6009_s4 + $0x40] ss:$8 sps:$4 sm:$0xff]  }
  0x21   :  { %1235 = vmatprep.subr.bf16.mxu1 %v3870_v33  ;;  %v3936_v33 = vld [vmem:[%s6009_s4 + $0x34] ss:$8 sps:$4 sm:$0xff]  }
  0x23   :  { %883 = vmatpush2.bf16.msra.mxu0 %v3872_v34  ;;  %v3946_v34 = vld [vmem:[%s6010_s3 + $0x40] ss:$8 sps:$4 sm:$0xff]  }
  0x24   :  { %1236 = vmatpush2.bf16.msra.mxu1 %v3873_v35  ;;  %884 = vmatprep.subr.bf16.mxu0 %v3874_v36  ;;  %v3957_v35 = vld [vmem:[%s6010_s3 + $0x34] ss:$8 sps:$4 sm:$0xff]   ;;  %v426_v36 = vunpack.c.l.s8.bf16 %v358_v30 }
  0x25   :  { %1237 = vmatprep.subr.bf16.mxu1 %v3876_v37  ;;  %v428_v37 = vunpack.c.l.s8.bf16 %v360_v31 }
  0x27   :  { %885 = vmatpush2.bf16.msra.mxu0 %v3878_v38  ;;  %v431_v38 = vunpack.c.h.s8.bf16 %v359_v16  ;;  %v3967_v16 = vld [vmem:[%s6009_s4 + $0xc0] ss:$8 sps:$4 sm:$0xff]  }
  0x28   :  { %1238 = vmatpush2.bf16.msra.mxu1 %v3879_v39  ;;  %886 = vmatprep.subr.bf16.mxu0 %v3880_v40  ;;  %v433_v39 = vunpack.c.h.s8.bf16 %v361_v19  ;;  %v3934_v40 = vld [vmem:[%s6009_s4 + $0x30] ss:$8 sps:$4 sm:$0xff]  }
  0x29   :  { %1239 = vmatprep.subr.bf16.mxu1 %v3882_v41  ;;  %v3955_v41 = vld [vmem:[%s6010_s3 + $0x30] ss:$8 sps:$4 sm:$0xff]  }
  0x2a   :  { %v373_v19 = vld [vmem:[%s6008_s0 + $0x98] sm:$0xff] }
  0x2b   :  { %887 = vmatpush2.bf16.msra.mxu0 %v3884_v42  ;;  %v3942_v42 = vld [vmem:[%s6009_s4 + $0x24] ss:$8 sps:$4 sm:$0xff]  }
  0x2c   :  { %1240 = vmatpush2.bf16.msra.mxu1 %v3885_v43  ;;  %888 = vmatprep.subr.bf16.mxu0 %v3886_v44  ;;  %v363_v43 = vld [vmem:[%s6008_s0 + $0x48] sm:$0xff]  ;;  %v365_v44 = vld [vmem:[%s6008_s0 + $0x58] sm:$0xff] }
  0x2d   :  { %1241 = vmatprep.subr.bf16.mxu1 %v3888_v45  ;;  %v3940_v45 = vld [vmem:[%s6009_s4 + $0x20] ss:$8 sps:$4 sm:$0xff]   ;;  %v435_v49 = vunpack.c.l.s8.bf16 %v363_v43  ;;  %v437_v50 = vunpack.c.l.s8.bf16 %v365_v44 }
  0x2f   :  { %889 = vmatpush2.bf16.msra.mxu0 %v3890_v47  ;;  %v430_v47 = vunpack.c.h.s8.bf16 %v358_v30  ;;  %v3970_v30 = vld [vmem:[%s6009_s4 + $0xb0] ss:$8 sps:$4 sm:$0xff]  }
  0x30   :  { %1242 = vmatpush2.bf16.msra.mxu1 %v3891_v48  ;;  %890 = vmatprep.subr.bf16.mxu0 %v3892_v51  ;;  %v432_v48 = vunpack.c.h.s8.bf16 %v360_v31  ;;  %v3943_v51 = vld [vmem:[%s6009_s4 + $0x10] ss:$8 sps:$4 sm:$0xff]   ;;  %v3972_v31 = vld [vmem:[%s6009_s4 + $0xb4] ss:$8 sps:$4 sm:$0xff]  }
  0x31   :  { %1243 = vmatprep.subr.bf16.mxu1 %v3894_v53  ;;  %v362_v53 = vld [vmem:[%s6008_s0 + $0x40] sm:$0xff] }
  0x32   :  { %v438_v5 = vunpack.c.h.s8.bf16 %v362_v53 }
  0x33   :  { %891 = vmatpush2.bf16.msra.mxu0 %v3896_v54  ;;  %v364_v54 = vld [vmem:[%s6008_s0 + $0x50] sm:$0xff] }
  0x34   :  { %1244 = vmatpush2.bf16.msra.mxu1 %v3897_v55  ;;  %892 = vmatprep.subr.bf16.mxu0 %v3898_v56  ;;  %v3949_v55 = vld [vmem:[%s6009_s4] ss:$8 sps:$4 sm:$0xff]   ;;  %v3954_v56 = vld [vmem:[%s6009_s4 + $0xf4] ss:$8 sps:$4 sm:$0xff]  }
  0x35   :  { %1245 = vmatprep.subr.bf16.mxu1 %v3900_v57  ;;  %v434_v57 = vunpack.c.l.s8.bf16 %v362_v53 }
  0x37   :  { %893 = vmatpush2.bf16.msra.mxu0 %v3902_v58  ;;  %v436_v58 = vunpack.c.l.s8.bf16 %v364_v54 }
  0x38   :  { %1246 = vmatpush2.bf16.msra.mxu1 %v3903_v59  ;;  %894 = vmatprep.subr.bf16.mxu0 %v3904_v60  ;;  %v439_v59 = vunpack.c.h.s8.bf16 %v363_v43  ;;  %v441_v60 = vunpack.c.h.s8.bf16 %v365_v44 }
  0x39   :  { %1247 = vmatprep.subr.bf16.mxu1 %v3906_v61  ;;  %v3952_v61 = vld [vmem:[%s6009_s4 + $0xf0] ss:$8 sps:$4 sm:$0xff]  }
  0x3b   :  { %895 = vmatpush2.bf16.msra.mxu0 %v3908_v62  ;;  %v3960_v62 = vld [vmem:[%s6009_s4 + $0xe4] ss:$8 sps:$4 sm:$0xff]  }
  0x3c   :  { %1248 = vmatpush2.bf16.msra.mxu1 %v3909_v63  ;;  %896 = vmatprep.subr.bf16.mxu0 %v3910_v0  ;;  %v3964_v63 = vld [vmem:[%s6010_s3 + $0x20] ss:$8 sps:$4 sm:$0xff]   ;;  %v3966_v0 = vld [vmem:[%s6010_s3 + $0x24] ss:$8 sps:$4 sm:$0xff]  }
  0x3d   :  { %1249 = vmatprep.subr.bf16.mxu1 %v3912_v1  ;;  %v367_v1 = vld [vmem:[%s6008_s0 + $0x68] sm:$0xff] }
  0x3f   :  { %897 = vmatpush2.bf16.msra.mxu0 %v3914_v2  ;;  %v369_v2 = vld [vmem:[%s6008_s0 + $0x78] sm:$0xff] }
  0x40   :  { %1250 = vmatpush2.bf16.msra.mxu1 %v3915_v3  ;;  %2295 = vmatprep.subr.bf16.mxu0 %v3918_v6  ;;  %v3958_v3 = vld [vmem:[%s6009_s4 + $0xe0] ss:$8 sps:$4 sm:$0xff]   ;;  %v440_v6 = vunpack.c.h.s8.bf16 %v364_v54 }
  0x41   :  { %2920 = vmatprep.subr.bf16.mxu1 %v3921_v7  ;;  %v443_v7 = vunpack.c.l.s8.bf16 %v367_v1  ;;  %v378_v54 = vld [vmem:[%s6008_s0 + $0xc0] sm:$0xff] }
  0x42   :  { %899 = vmatmul.mubr.bf16.vlgmr.msra.gmra.mxu0 %v418_v8  ;;  %v445_v8 = vunpack.c.l.s8.bf16 %v369_v2 }
  0x43   :  { %1252 = vmatmul.mubr.bf16.vlgmr.msra.gmra.mxu1 %v420_v9  ;;  %2296 = vmatpush1.bf16.msra.mxu0 %v3916_v10  ;;  %v3961_v9 = vld [vmem:[%s6009_s4 + $0xd0] ss:$8 sps:$4 sm:$0xff]   ;;  %v366_v10 = vld [vmem:[%s6008_s0 + $0x60] sm:$0xff] }
  0x44   :  { %2921 = vmatpush1.bf16.msra.mxu1 %v3919_v11  ;;  %908 = vmatprep.mubr.bf16.mxu0 %v423_v12  ;;  %v368_v11 = vld [vmem:[%s6008_s0 + $0x70] sm:$0xff]  ;;  %v442_v12 = vunpack.c.l.s8.bf16 %v366_v10 }
  0x45   :  { %1261 = vmatprep.mubr.bf16.mxu1 %v425_v13  ;;  %2297 = vmatprep.subr.bf16.mxu0 %v3924_v14  ;;  %v444_v13 = vunpack.c.l.s8.bf16 %v368_v11  ;;  %v447_v14 = vunpack.c.h.s8.bf16 %v367_v1  ;;  %v3984_v1 = vld [vmem:[%s6010_s3 + $0x4] ss:$8 sps:$4 sm:$0xff]  }
  0x46   :  { %2922 = vmatprep.subr.bf16.mxu1 %v3930_v15  ;;  %v449_v15 = vunpack.c.h.s8.bf16 %v369_v2  ;;  %v470_v2 = vunpack.c.h.s8.bf16 %v378_v54 }
  0x47   :  { %2298 = vmatpush1.bf16.msra.mxu0 %v3922_v17  ;;  %v3969_v17 = vld [vmem:[%s6009_s4 + $0xc4] ss:$8 sps:$4 sm:$0xff]  }
  0x48   :  { %2923 = vmatpush1.bf16.msra.mxu1 %v3928_v18  ;;  %2299 = vmatprep.subr.bf16.mxu0 %v3927_v20  ;;  %v371_v18 = vld [vmem:[%s6008_s0 + $0x88] sm:$0xff]  ;;  %v446_v20 = vunpack.c.h.s8.bf16 %v366_v10 }
  0x49   :  { %2924 = vmatprep.subr.bf16.mxu1 %v3939_v21  ;;  %v448_v21 = vunpack.c.h.s8.bf16 %v368_v11 }
  0x4a   :  { %909 = vmatmul.mubr.bf16.gmra.mxu0 %v422_v22  ;;  %v451_v22 = vunpack.c.l.s8.bf16 %v371_v18 }
  0x4b   :  { %1262 = vmatmul.mubr.bf16.gmra.mxu1 %v424_v23  ;;  %918 = vmatprep.mubr.bf16.mxu0 %v427_v25  ;;  %v453_v23 = vunpack.c.l.s8.bf16 %v373_v19  ;;  %v372_v25 = vld [vmem:[%s6008_s0 + $0x90] sm:$0xff] }
  0x4c   :  { %1271 = vmatprep.mubr.bf16.mxu1 %v429_v26  ;;  %2300 = vmatpush1.bf16.msra.mxu0 %v3925_v24  ;;  %v370_v24 = vld [vmem:[%s6008_s0 + $0x80] sm:$0xff] }
  0x4d   :  { %2925 = vmatpush1.bf16.msra.mxu1 %v3937_v28  ;;  %2301 = vmatprep.subr.bf16.mxu0 %v3933_v27  ;;  %v450_v26 = vunpack.c.l.s8.bf16 %v370_v24  ;;  %v452_v27 = vunpack.c.l.s8.bf16 %v372_v25  ;;  %v455_v28 = vunpack.c.h.s8.bf16 %v371_v18 }
  0x4e   :  { %2926 = vmatprep.subr.bf16.mxu1 %v3948_v29  ;;  %v457_v29 = vunpack.c.h.s8.bf16 %v373_v19 }
  0x50   :  { %2302 = vmatpush1.bf16.msra.mxu0 %v3931_v32  ;;  %v3973_v32 = vld [vmem:[%s6010_s3 + $0x10] ss:$8 sps:$4 sm:$0xff]  }
  0x51   :  { %2927 = vmatpush1.bf16.msra.mxu1 %v3946_v34  ;;  %2303 = vmatprep.subr.bf16.mxu0 %v3936_v33  ;;  %v375_v33 = vld [vmem:[%s6008_s0 + $0xa8] sm:$0xff]  ;;  %v377_v34 = vld [vmem:[%s6008_s0 + $0xb8] sm:$0xff] }
  0x52   :  { %2928 = vmatprep.subr.bf16.mxu1 %v3957_v35  ;;  %919 = vmatmul.mubr.bf16.gmra.mxu0 %v426_v36  ;;  %v3975_v35 = vld [vmem:[%s6010_s3 + $0x14] ss:$8 sps:$4 sm:$0xff]   ;;  %v454_v36 = vunpack.c.h.s8.bf16 %v370_v24  ;;  %v463_v44 = vunpack.c.h.s8.bf16 %v375_v33 }
  0x53   :  { %1272 = vmatmul.mubr.bf16.gmra.mxu1 %v428_v37  ;;  %928 = vmatprep.mubr.bf16.mxu0 %v431_v38  ;;  %v456_v37 = vunpack.c.h.s8.bf16 %v372_v25  ;;  %v459_v38 = vunpack.c.l.s8.bf16 %v375_v33  ;;  %v392_v33 = vld [vmem:[%s6008_s0 + $0x130] sm:$0xff] }
  0x54   :  { %1281 = vmatprep.mubr.bf16.mxu1 %v433_v39  ;;  %2304 = vmatpush1.bf16.msra.mxu0 %v3934_v40  ;;  %v461_v39 = vunpack.c.l.s8.bf16 %v377_v34  ;;  %v374_v40 = vld [vmem:[%s6008_s0 + $0xa0] sm:$0xff] }
  0x55   :  { %2929 = vmatpush1.bf16.msra.mxu1 %v3955_v41  ;;  %2305 = vmatprep.subr.bf16.mxu0 %v3942_v42  ;;  %v376_v41 = vld [vmem:[%s6008_s0 + $0xb0] sm:$0xff]  ;;  %v458_v42 = vunpack.c.l.s8.bf16 %v374_v40 }
  0x56   :  { %2930 = vmatprep.subr.bf16.mxu1 %v3966_v0  ;;  %v460_v43 = vunpack.c.l.s8.bf16 %v376_v41  ;;  %v385_v0 = vld [vmem:[%s6008_s0 + $0xf8] sm:$0xff] }
  0x57   :  { %v481_v11 = vunpack.c.h.s8.bf16 %v385_v0 }
  0x58   :  { %2306 = vmatpush1.bf16.msra.mxu0 %v3940_v45  ;;  %v465_v45 = vunpack.c.h.s8.bf16 %v377_v34 }
  0x59   :  { %2307 = vmatprep.subr.bf16.mxu0 %v3945_v46  ;;  %2931 = vmatpush1.bf16.msra.mxu1 %v3964_v63  ;;  %v3976_v46 = vld [vmem:[%s6009_s4 + $0xa0] ss:$8 sps:$4 sm:$0xff]  }
  0x5a   :  { %929 = vmatmul.mubr.bf16.gmra.mxu0 %v430_v47  ;;  %2932 = vmatprep.subr.bf16.mxu1 %v3975_v35  ;;  %v3978_v47 = vld [vmem:[%s6009_s4 + $0xa4] ss:$8 sps:$4 sm:$0xff]   ;;  %v492_v35 = vunpack.c.l.s8.bf16 %v392_v33 }
  0x5b   :  { %1282 = vmatmul.mubr.bf16.gmra.mxu1 %v432_v48  ;;  %938 = vmatprep.mubr.bf16.mxu0 %v435_v49  ;;  %v379_v48 = vld [vmem:[%s6008_s0 + $0xc8] sm:$0xff]  ;;  %v381_v49 = vld [vmem:[%s6008_s0 + $0xd8] sm:$0xff] }
  0x5c   :  { %1291 = vmatprep.mubr.bf16.mxu1 %v437_v50  ;;  %2308 = vmatpush1.bf16.msra.mxu0 %v3943_v51  ;;  %v462_v50 = vunpack.c.h.s8.bf16 %v374_v40  ;;  %v464_v51 = vunpack.c.h.s8.bf16 %v376_v41  ;;  %v469_v53 = vunpack.c.l.s8.bf16 %v381_v49  ;;  %v383_v63 = vld [vmem:[%s6008_s0 + $0xe8] sm:$0xff]  ;;  %v496_v41 = vunpack.c.h.s8.bf16 %v392_v33 }
  0x5d   :  { %2309 = vmatprep.subr.bf16.mxu0 %v3951_v52  ;;  %2933 = vmatpush1.bf16.msra.mxu1 %v3973_v32  ;;  %v467_v52 = vunpack.c.l.s8.bf16 %v379_v48  ;;  %v479_v10 = vunpack.c.h.s8.bf16 %v383_v63  ;;  %v390_v32 = vld [vmem:[%s6008_s0 + $0x120] sm:$0xff] }
  0x5e   :  { %2934 = vmatprep.subr.bf16.mxu1 %v3984_v1  ;;  %v490_v34 = vunpack.c.l.s8.bf16 %v390_v32  ;;  %v494_v40 = vunpack.c.h.s8.bf16 %v390_v32 }
  0x60   :  { %2310 = vmatpush1.bf16.msra.mxu0 %v3949_v55  ;;  %v380_v55 = vld [vmem:[%s6008_s0 + $0xd0] sm:$0xff] }
  0x61   :  { %2311 = vmatprep.subr.bf16.mxu0 %v3954_v56  ;;  %v466_v56 = vunpack.c.l.s8.bf16 %v378_v54 }
  0x62   :  { %939 = vmatmul.mubr.bf16.gmra.mxu0 %v434_v57  ;;  %v468_v57 = vunpack.c.l.s8.bf16 %v380_v55 }
  0x63   :  { %1292 = vmatmul.mubr.bf16.gmra.mxu1 %v436_v58  ;;  %948 = vmatprep.mubr.bf16.mxu0 %v439_v59  ;;  %v471_v58 = vunpack.c.h.s8.bf16 %v379_v48  ;;  %v473_v59 = vunpack.c.h.s8.bf16 %v381_v49 }
  0x64   :  { %1301 = vmatprep.mubr.bf16.mxu1 %v441_v60  ;;  %2312 = vmatpush2.bf16.msra.mxu0 %v3952_v61  ;;  %v3979_v60 = vld [vmem:[%s6009_s4 + $0x90] ss:$8 sps:$4 sm:$0xff]   ;;  %v3981_v61 = vld [vmem:[%s6009_s4 + $0x94] ss:$8 sps:$4 sm:$0xff]  }
  0x65   :  { %2313 = vmatprep.subr.bf16.mxu0 %v3960_v62  ;;  %v3982_v62 = vld [vmem:[%s6010_s3] ss:$8 sps:$4 sm:$0xff]  }
  0x66   :  { %2935 = vmatpush1.bf16.msra.mxu1 %v3982_v62  ;;  %v403_v62 = vld [vmem:[%s6008_s0 + $0x188] sm:$0xff] }
  0x68   :  { %2314 = vmatpush2.bf16.msra.mxu0 %v3958_v3  ;;  %v472_v3 = vunpack.c.h.s8.bf16 %v380_v55 }
  0x69   :  { %2315 = vmatprep.subr.bf16.mxu0 %v3963_v4  ;;  %v475_v4 = vunpack.c.l.s8.bf16 %v383_v63  ;;  %v405_v63 = vld [vmem:[%s6008_s0 + $0x198] sm:$0xff] }
  0x6a   :  { %949 = vmatmul.mubr.bf16.gmra.mxu0 %v438_v5  ;;  %v477_v5 = vunpack.c.l.s8.bf16 %v385_v0 }
  0x6b   :  { %1302 = vmatmul.mubr.bf16.gmra.mxu1 %v440_v6  ;;  %958 = vmatprep.mubr.bf16.mxu0 %v443_v7  ;;  %v382_v6 = vld [vmem:[%s6008_s0 + $0xe0] sm:$0xff]  ;;  %v384_v7 = vld [vmem:[%s6008_s0 + $0xf0] sm:$0xff] }
  0x6c   :  { %1311 = vmatprep.mubr.bf16.mxu1 %v445_v8  ;;  %2316 = vmatpush2.bf16.msra.mxu0 %v3961_v9  ;;  %v474_v8 = vunpack.c.l.s8.bf16 %v382_v6  ;;  %v476_v9 = vunpack.c.l.s8.bf16 %v384_v7 }
  0x6d   :  { %2317 = vmatprep.subr.bf16.mxu0 %v3969_v17  ;;  %v480_v17 = vunpack.c.h.s8.bf16 %v384_v7 }
  0x70   :  { %2318 = vmatpush2.bf16.msra.mxu0 %v3967_v16  ;;  %v478_v16 = vunpack.c.h.s8.bf16 %v382_v6 }
  0x71   :  { %2319 = vmatprep.subr.bf16.mxu0 %v3972_v31 }
  0x72   :  { %959 = vmatmul.mubr.bf16.gmra.mxu0 %v442_v12  ;;  %v3985_v12 = vld [vmem:[%s6009_s4 + $0x80] ss:$8 sps:$4 sm:$0xff]  }
  0x73   :  { %1312 = vmatmul.mubr.bf16.gmra.mxu1 %v444_v13  ;;  %968 = vmatprep.mubr.bf16.mxu0 %v447_v14  ;;  %v3987_v13 = vld [vmem:[%s6009_s4 + $0x84] ss:$8 sps:$4 sm:$0xff]  }
  0x74   :  { %1321 = vmatprep.mubr.bf16.mxu1 %v449_v15  ;;  %2320 = vmatpush2.bf16.msra.mxu0 %v3970_v30  ;;  %v387_v14 = vld [vmem:[%s6008_s0 + $0x108] sm:$0xff]  ;;  %v389_v15 = vld [vmem:[%s6008_s0 + $0x118] sm:$0xff] }
  0x75   :  { %2321 = vmatprep.subr.bf16.mxu0 %v3978_v47  ;;  %v483_v18 = vunpack.c.l.s8.bf16 %v387_v14  ;;  %v485_v19 = vunpack.c.l.s8.bf16 %v389_v15  ;;  %v487_v24 = vunpack.c.h.s8.bf16 %v387_v14  ;;  %v489_v25 = vunpack.c.h.s8.bf16 %v389_v15  ;;  %v407_v14 = vld [vmem:[%s6008_s0 + $0x1a8] sm:$0xff]  ;;  %v409_v15 = vld [vmem:[%s6008_s0 + $0x1b8] sm:$0xff] }
  0x78   :  { %2322 = vmatpush2.bf16.msra.mxu0 %v3976_v46 }
  0x79   :  { %2323 = vmatprep.subr.bf16.mxu0 %v3981_v61 }
  0x7a   :  { %969 = vmatmul.mubr.bf16.gmra.mxu0 %v446_v20  ;;  %v386_v20 = vld [vmem:[%s6008_s0 + $0x100] sm:$0xff] }
  0x7b   :  { %1322 = vmatmul.mubr.bf16.gmra.mxu1 %v448_v21  ;;  %978 = vmatprep.mubr.bf16.mxu0 %v451_v22  ;;  %v388_v21 = vld [vmem:[%s6008_s0 + $0x110] sm:$0xff]  ;;  %v482_v22 = vunpack.c.l.s8.bf16 %v386_v20 }
  0x7c   :  { %1331 = vmatprep.mubr.bf16.mxu1 %v453_v23  ;;  %2324 = vmatpush2.bf16.msra.mxu0 %v3979_v60  ;;  %v484_v23 = vunpack.c.l.s8.bf16 %v388_v21 }
  0x7d   :  { %2325 = vmatprep.subr.bf16.mxu0 %v3987_v13 }
  0x80   :  { %2326 = vmatpush2.bf16.msra.mxu0 %v3985_v12 }
  0x82   :  { %979 = vmatmul.mubr.bf16.gmra.mxu0 %v450_v26  ;;  %v391_v26 = vld [vmem:[%s6008_s0 + $0x128] sm:$0xff] }
  0x83   :  { %1332 = vmatmul.mubr.bf16.gmra.mxu1 %v452_v27  ;;  %988 = vmatprep.mubr.bf16.mxu0 %v455_v28  ;;  %v393_v27 = vld [vmem:[%s6008_s0 + $0x138] sm:$0xff]  ;;  %v486_v28 = vunpack.c.h.s8.bf16 %v386_v20  ;;  %v491_v30 = vunpack.c.l.s8.bf16 %v391_v26  ;;  %v523_v20 = vunpack.c.l.s8.bf16 %v407_v14 }
  0x84   :  { %1341 = vmatprep.mubr.bf16.mxu1 %v457_v29  ;;  %v488_v29 = vunpack.c.h.s8.bf16 %v388_v21  ;;  %v493_v31 = vunpack.c.l.s8.bf16 %v393_v27  ;;  %v525_v21 = vunpack.c.l.s8.bf16 %v409_v15 }
  0x8a   :  { %989 = vmatmul.mubr.bf16.gmra.mxu0 %v454_v36  ;;  %v495_v36 = vunpack.c.h.s8.bf16 %v391_v26  ;;  %v406_v26 = vld [vmem:[%s6008_s0 + $0x1a0] sm:$0xff] }
  0x8b   :  { %1342 = vmatmul.mubr.bf16.gmra.mxu1 %v456_v37  ;;  %998 = vmatprep.mubr.bf16.mxu0 %v459_v38  ;;  %v497_v37 = vunpack.c.h.s8.bf16 %v393_v27  ;;  %v395_v38 = vld [vmem:[%s6008_s0 + $0x148] sm:$0xff]  ;;  %v408_v27 = vld [vmem:[%s6008_s0 + $0x1b0] sm:$0xff]  ;;  %v522_v32 = vunpack.c.l.s8.bf16 %v406_v26 }
  0x8c   :  { %1351 = vmatprep.mubr.bf16.mxu1 %v461_v39  ;;  %v397_v39 = vld [vmem:[%s6008_s0 + $0x158] sm:$0xff]  ;;  %v503_v48 = vunpack.c.h.s8.bf16 %v395_v38  ;;  %v524_v33 = vunpack.c.l.s8.bf16 %v408_v27 }
  0x8d   :  { %v505_v49 = vunpack.c.h.s8.bf16 %v397_v39 }
  0x92   :  { %999 = vmatmul.mubr.bf16.gmra.mxu0 %v458_v42  ;;  %v499_v42 = vunpack.c.l.s8.bf16 %v395_v38 }
  0x93   :  { %1352 = vmatmul.mubr.bf16.gmra.mxu1 %v460_v43  ;;  %1008 = vmatprep.mubr.bf16.mxu0 %v463_v44  ;;  %v501_v43 = vunpack.c.l.s8.bf16 %v397_v39  ;;  %v394_v44 = vld [vmem:[%s6008_s0 + $0x140] sm:$0xff] }
  0x94   :  { %1361 = vmatprep.mubr.bf16.mxu1 %v465_v45  ;;  %v396_v45 = vld [vmem:[%s6008_s0 + $0x150] sm:$0xff]  ;;  %v498_v46 = vunpack.c.l.s8.bf16 %v394_v44 }
  0x95   :  { %v500_v47 = vunpack.c.l.s8.bf16 %v396_v45 }
  0x9a   :  { %1009 = vmatmul.mubr.bf16.gmra.mxu0 %v462_v50  ;;  %v399_v50 = vld [vmem:[%s6008_s0 + $0x168] sm:$0xff] }
  0x9b   :  { %1362 = vmatmul.mubr.bf16.gmra.mxu1 %v464_v51  ;;  %1018 = vmatprep.mubr.bf16.mxu0 %v467_v52  ;;  %v401_v51 = vld [vmem:[%s6008_s0 + $0x178] sm:$0xff]  ;;  %v502_v52 = vunpack.c.h.s8.bf16 %v394_v44  ;;  %v507_v54 = vunpack.c.l.s8.bf16 %v399_v50  ;;  %v511_v60 = vunpack.c.h.s8.bf16 %v399_v50 }
  0x9c   :  { %1371 = vmatprep.mubr.bf16.mxu1 %v469_v53  ;;  %v504_v53 = vunpack.c.h.s8.bf16 %v396_v45  ;;  %v509_v55 = vunpack.c.l.s8.bf16 %v401_v51  ;;  %v513_v61 = vunpack.c.h.s8.bf16 %v401_v51 }
  0xa2   :  { %1019 = vmatmul.mubr.bf16.gmra.mxu0 %v466_v56  ;;  %v398_v56 = vld [vmem:[%s6008_s0 + $0x160] sm:$0xff] }
  0xa3   :  { %1372 = vmatmul.mubr.bf16.gmra.mxu1 %v468_v57  ;;  %1028 = vmatprep.mubr.bf16.mxu0 %v471_v58  ;;  %v400_v57 = vld [vmem:[%s6008_s0 + $0x170] sm:$0xff]  ;;  %v506_v58 = vunpack.c.l.s8.bf16 %v398_v56  ;;  %v510_v0 = vunpack.c.h.s8.bf16 %v398_v56 }
  0xa4   :  { %1381 = vmatprep.mubr.bf16.mxu1 %v473_v59  ;;  %v508_v59 = vunpack.c.l.s8.bf16 %v400_v57  ;;  %v512_v1 = vunpack.c.h.s8.bf16 %v400_v57 }
  0xaa   :  { %1029 = vmatmul.mubr.bf16.gmra.mxu0 %v470_v2  ;;  %v515_v2 = vunpack.c.l.s8.bf16 %v403_v62 }
  0xab   :  { %1382 = vmatmul.mubr.bf16.gmra.mxu1 %v472_v3  ;;  %1038 = vmatprep.mubr.bf16.mxu0 %v475_v4  ;;  %v517_v3 = vunpack.c.l.s8.bf16 %v405_v63  ;;  %v402_v4 = vld [vmem:[%s6008_s0 + $0x180] sm:$0xff] }
  0xac   :  { %1391 = vmatprep.mubr.bf16.mxu1 %v477_v5  ;;  %v404_v5 = vld [vmem:[%s6008_s0 + $0x190] sm:$0xff]  ;;  %v514_v6 = vunpack.c.l.s8.bf16 %v402_v4 }
  0xad   :  { %v516_v7 = vunpack.c.l.s8.bf16 %v404_v5 }
  0xb2   :  { %1039 = vmatmul.mubr.bf16.gmra.mxu0 %v474_v8  ;;  %v519_v8 = vunpack.c.h.s8.bf16 %v403_v62 }
  0xb3   :  { %1392 = vmatmul.mubr.bf16.gmra.mxu1 %v476_v9  ;;  %1048 = vmatprep.mubr.bf16.mxu0 %v479_v10  ;;  %v521_v9 = vunpack.c.h.s8.bf16 %v405_v63 }
  0xb4   :  { %1401 = vmatprep.mubr.bf16.mxu1 %v481_v11 }
  0xba   :  { %1049 = vmatmul.mubr.bf16.gmra.mxu0 %v478_v16 }
  0xbb   :  { %1402 = vmatmul.mubr.bf16.gmra.mxu1 %v480_v17  ;;  %1058 = vmatprep.mubr.bf16.mxu0 %v483_v18  ;;  %v518_v18 = vunpack.c.h.s8.bf16 %v402_v4 }
  0xbc   :  { %1411 = vmatprep.mubr.bf16.mxu1 %v485_v19  ;;  %v520_v19 = vunpack.c.h.s8.bf16 %v404_v5 }
  0xc2   :  { %1059 = vmatmul.mubr.bf16.gmra.mxu0 %v482_v22 }
  0xc3   :  { %1412 = vmatmul.mubr.bf16.gmra.mxu1 %v484_v23  ;;  %1068 = vmatprep.mubr.bf16.mxu0 %v487_v24 }
  0xc4   :  { %1421 = vmatprep.mubr.bf16.mxu1 %v489_v25 }
  0xca   :  { %1069 = vmatmul.mubr.bf16.gmra.mxu0 %v486_v28 }
  0xcb   :  { %1422 = vmatmul.mubr.bf16.gmra.mxu1 %v488_v29  ;;  %1078 = vmatprep.mubr.bf16.mxu0 %v491_v30 }
  0xcc   :  { %1431 = vmatprep.mubr.bf16.mxu1 %v493_v31 }
  0xd2   :  { %1079 = vmatmul.mubr.bf16.gmra.mxu0 %v490_v34  ;;  %v527_v34 = vunpack.c.h.s8.bf16 %v407_v14 }
  0xd3   :  { %1432 = vmatmul.mubr.bf16.gmra.mxu1 %v492_v35  ;;  %1088 = vmatprep.mubr.bf16.mxu0 %v495_v36  ;;  %v529_v35 = vunpack.c.h.s8.bf16 %v409_v15 }
  0xd4   :  { %1441 = vmatprep.mubr.bf16.mxu1 %v497_v37 }
  0xda   :  { %1089 = vmatmul.mubr.bf16.gmra.mxu0 %v494_v40 }
  0xdb   :  { %1442 = vmatmul.mubr.bf16.gmra.mxu1 %v496_v41  ;;  %1098 = vmatprep.mubr.bf16.mxu0 %v499_v42  ;;  %v411_v42 = vld [vmem:[%s6008_s0 + $0x1c8] sm:$0xff] }
  0xdc   :  { %1451 = vmatprep.mubr.bf16.mxu1 %v501_v43  ;;  %v413_v43 = vld [vmem:[%s6008_s0 + $0x1d8] sm:$0xff]  ;;  %v535_v62 = vunpack.c.h.s8.bf16 %v411_v42 }
  0xdd   :  { %v537_v63 = vunpack.c.h.s8.bf16 %v413_v43 }
  0xe2   :  { %1099 = vmatmul.mubr.bf16.gmra.mxu0 %v498_v46  ;;  %v526_v46 = vunpack.c.h.s8.bf16 %v406_v26 }
  0xe3   :  { %1452 = vmatmul.mubr.bf16.gmra.mxu1 %v500_v47  ;;  %1108 = vmatprep.mubr.bf16.mxu0 %v503_v48  ;;  %v528_v47 = vunpack.c.h.s8.bf16 %v408_v27  ;;  %v531_v48 = vunpack.c.l.s8.bf16 %v411_v42 }
  0xe4   :  { %1461 = vmatprep.mubr.bf16.mxu1 %v505_v49  ;;  %v533_v49 = vunpack.c.l.s8.bf16 %v413_v43 }
  0xea   :  { %1109 = vmatmul.mubr.bf16.gmra.mxu0 %v502_v52 }
  0xeb   :  { %1462 = vmatmul.mubr.bf16.gmra.mxu1 %v504_v53  ;;  %1118 = vmatprep.mubr.bf16.mxu0 %v507_v54  ;;  %v410_v54 = vld [vmem:[%s6008_s0 + $0x1c0] sm:$0xff] }
  0xec   :  { %1471 = vmatprep.mubr.bf16.mxu1 %v509_v55  ;;  %v412_v55 = vld [vmem:[%s6008_s0 + $0x1d0] sm:$0xff]  ;;  %v534_v14 = vunpack.c.h.s8.bf16 %v410_v54 }
  0xed   :  { %v536_v15 = vunpack.c.h.s8.bf16 %v412_v55 }
  0xf2   :  { %1119 = vmatmul.mubr.bf16.gmra.mxu0 %v506_v58 }
  0xf3   :  { %1472 = vmatmul.mubr.bf16.gmra.mxu1 %v508_v59  ;;  %1128 = vmatprep.mubr.bf16.mxu0 %v511_v60  ;;  %v530_v60 = vunpack.c.l.s8.bf16 %v410_v54 }
  0xf4   :  { %1481 = vmatprep.mubr.bf16.mxu1 %v513_v61  ;;  %v532_v61 = vunpack.c.l.s8.bf16 %v412_v55 }
  0xfa   :  { %1129 = vmatmul.mubr.bf16.gmra.mxu0 %v510_v0 }
  0xfb   :  { %1482 = vmatmul.mubr.bf16.gmra.mxu1 %v512_v1  ;;  %1138 = vmatprep.mubr.bf16.mxu0 %v515_v2 }
  0xfc   :  { %1491 = vmatprep.mubr.bf16.mxu1 %v517_v3 }
 0x102   :  { %v4556_v10 = vpop.f32.mrf.mxu0  ;;  %1139 = vmatmul.mubr.bf16.gmra.mxu0 %v514_v6  ;;  %v415_v6 = vld [vmem:[%s6008_s0 + $0x1e8] sm:$0xff] }
 0x103   :  { %v4558_v11 = vpop.f32.mrf.mxu1  ;;  %1492 = vmatmul.mubr.bf16.gmra.mxu1 %v516_v7  ;;  %1148 = vmatprep.mubr.bf16.mxu0 %v519_v8  ;;  %v417_v7 = vld [vmem:[%s6008_s0 + $0x1f8] sm:$0xff] }
 0x104   :  { %1501 = vmatprep.mubr.bf16.mxu1 %v521_v9  ;;  %v4560_v12 = vpop.f32.mrf.mxu0 }
 0x105   :  { %v4562_v13 = vpop.f32.mrf.mxu1 }
 0x106   :  { %v4570_v16 = vpop.f32.mrf.mxu0 }
 0x107   :  { %v4572_v17 = vpop.f32.mrf.mxu1 }
 0x108   :  { %v4574_v22 = vpop.f32.mrf.mxu0 }
 0x109   :  { %v4576_v23 = vpop.f32.mrf.mxu1 }
 0x10a   :  { %v4578_v24 = vpop.f32.mrf.mxu0  ;;  %1149 = vmatmul.mubr.bf16.gmra.mxu0 %v518_v18  ;;  %v539_v18 = vunpack.c.l.s8.bf16 %v415_v6 }
 0x10b   :  { %v4580_v25 = vpop.f32.mrf.mxu1  ;;  %1502 = vmatmul.mubr.bf16.gmra.mxu1 %v520_v19  ;;  %1158 = vmatprep.mubr.bf16.mxu0 %v523_v20  ;;  %v541_v19 = vunpack.c.l.s8.bf16 %v417_v7 }
 0x10c   :  { %1511 = vmatprep.mubr.bf16.mxu1 %v525_v21  ;;  %v4588_v28 = vpop.f32.mrf.mxu0 }
 0x10d   :  { %v4590_v29 = vpop.f32.mrf.mxu1 }
 0x10e   :  { %v4592_v30 = vpop.f32.mrf.mxu0 }
 0x10f   :  { %v4594_v31 = vpop.f32.mrf.mxu1 }
 0x110   :  { %v4596_v36 = vpop.f32.mrf.mxu0 }
 0x111   :  { %v4598_v37 = vpop.f32.mrf.mxu1 }
 0x112   :  { %v4600_v38 = vpop.f32.mrf.mxu0  ;;  %1159 = vmatmul.mubr.bf16.gmra.mxu0 %v522_v32  ;;  %v414_v32 = vld [vmem:[%s6008_s0 + $0x1e0] sm:$0xff] }
 0x113   :  { %v4602_v39 = vpop.f32.mrf.mxu1  ;;  %1512 = vmatmul.mubr.bf16.gmra.mxu1 %v524_v33  ;;  %1168 = vmatprep.mubr.bf16.mxu0 %v527_v34  ;;  %v416_v33 = vld [vmem:[%s6008_s0 + $0x1f0] sm:$0xff] }
 0x114   :  { %1521 = vmatprep.mubr.bf16.mxu1 %v529_v35  ;;  %v4604_v40 = vpop.f32.mrf.mxu0 }
 0x115   :  { %v4606_v41 = vpop.f32.mrf.mxu1 }
 0x116   :  { %v4614_v44 = vpop.f32.mrf.mxu0 }
 0x117   :  { %v4616_v45 = vpop.f32.mrf.mxu1 }
 0x118   :  { %v4618_v50 = vpop.f32.mrf.mxu0 }
 0x119   :  { %v4620_v51 = vpop.f32.mrf.mxu1 }
 0x11a   :  { %v4622_v52 = vpop.f32.mrf.mxu0  ;;  %1169 = vmatmul.mubr.bf16.gmra.mxu0 %v526_v46  ;;  %v538_v46 = vunpack.c.l.s8.bf16 %v414_v32 }
 0x11b   :  { %v4624_v53 = vpop.f32.mrf.mxu1  ;;  %1522 = vmatmul.mubr.bf16.gmra.mxu1 %v528_v47  ;;  %1178 = vmatprep.mubr.bf16.mxu0 %v531_v48  ;;  %v540_v47 = vunpack.c.l.s8.bf16 %v416_v33  ;;  %v543_v48 = vunpack.c.h.s8.bf16 %v415_v6  ;;  %v1260_v6 = vadd.f32 %v4576_v23, %v4574_v22  ;;  %v6014_v22 = vmov 0  }
 0x11c   :  { %1531 = vmatprep.mubr.bf16.mxu1 %v533_v49  ;;  %v4632_v56 = vpop.f32.mrf.mxu0  ;;  %v545_v49 = vunpack.c.h.s8.bf16 %v417_v7  ;;  %v1258_v23 = vadd.f32 %v4572_v17, %v4570_v16  ;;  %v1266_v16 = vadd.f32 %v4590_v29, %v4588_v28  ;;  %v1280_v29 = vadd.f32 %v4620_v51, %v4618_v50 }
 0x11d   :  { %v4634_v57 = vpop.f32.mrf.mxu1 }
 0x11e   :  { %v4636_v58 = vpop.f32.mrf.mxu0 }
 0x11f   :  { %v4638_v59 = vpop.f32.mrf.mxu1 }
 0x120   :  { %v4640_v0 = vpop.f32.mrf.mxu0 }
 0x121   :  { %v4642_v1 = vpop.f32.mrf.mxu1 }
 0x122   :  { %v4644_v2 = vpop.f32.mrf.mxu0  ;;  %1179 = vmatmul.mubr.bf16.gmra.mxu0 %v530_v60 }
 0x123   :  { %v4646_v3 = vpop.f32.mrf.mxu1  ;;  %1532 = vmatmul.mubr.bf16.gmra.mxu1 %v532_v61  ;;  %1188 = vmatprep.mubr.bf16.mxu0 %v535_v62 }
 0x124   :  { %1541 = vmatprep.mubr.bf16.mxu1 %v537_v63  ;;  %v4648_v4 = vpop.f32.mrf.mxu0 }
 0x125   :  { %v4650_v5 = vpop.f32.mrf.mxu1 }
 0x126   :  { %v4658_v8 = vpop.f32.mrf.mxu0 }
 0x127   :  { %v4660_v9 = vpop.f32.mrf.mxu1 }
 0x128   :  { %v4662_v20 = vpop.f32.mrf.mxu0 }
 0x129   :  { %v4664_v21 = vpop.f32.mrf.mxu1 }
 0x12a   :  { %v4666_v26 = vpop.f32.mrf.mxu0  ;;  %1189 = vmatmul.mubr.bf16.gmra.mxu0 %v534_v14 }
 0x12b   :  { %v4668_v27 = vpop.f32.mrf.mxu1  ;;  %1542 = vmatmul.mubr.bf16.gmra.mxu1 %v536_v15  ;;  %1198 = vmatprep.mubr.bf16.mxu0 %v539_v18  ;;  %v542_v15 = vunpack.c.h.s8.bf16 %v414_v32  ;;  %v544_v18 = vunpack.c.h.s8.bf16 %v416_v33  ;;  %v1254_v33 = vadd.f32 %v4558_v11, %v4556_v10  ;;  %v1268_v11 = vadd.f32 %v4594_v31, %v4592_v30 }
 0x12c   :  { %1551 = vmatprep.mubr.bf16.mxu1 %v541_v19  ;;  %v4676_v34 = vpop.f32.mrf.mxu0  ;;  %v1256_v19 = vadd.f32 %v4562_v13, %v4560_v12  ;;  %v1270_v13 = vadd.f32 %v4598_v37, %v4596_v36  ;;  %v1276_v30 = vadd.f32 %v4606_v41, %v4604_v40  ;;  %v1290_v41 = vadd.f32 %v4642_v1, %v4640_v0 }
 0x12d   :  { %v4678_v35 = vpop.f32.mrf.mxu1  ;;  %v2039_v17 = vpack.c.bf16 %v1258_v23, %v1254_v33  ;;  %v1264_v23 = vadd.f32 %v4580_v25, %v4578_v24  ;;  %v1278_v25 = vadd.f32 %v4616_v45, %v4614_v44  ;;  %v1286_v44 = vadd.f32 %v4634_v57, %v4632_v56 }
 0x12e   :  { %v4680_v42 = vpop.f32.mrf.mxu0  ;;  %v2042_v36 = vpack.c.bf16 %v1270_v13, %v1266_v16  ;;  %v2044_v50 = vpack.c.bf16 %v1280_v29, %v1276_v30  ;;  %v1300_v57 = vadd.f32 %v4664_v21, %v4662_v20 }
 0x12f   :  { %v4682_v43 = vpop.f32.mrf.mxu1  ;;  %v2041_v31 = vpack.c.bf16 %v1268_v11, %v1264_v23  ;;  %v1274_v11 = vadd.f32 %v4602_v39, %v4600_v38  ;;  %v2046_v0 = vpack.c.bf16 %v1290_v41, %v1286_v44  ;;  %v1288_v39 = vadd.f32 %v4638_v59, %v4636_v58 }
 0x130   :  { %v4684_v54 = vpop.f32.mrf.mxu0  ;;  %v1296_v58 = vadd.f32 %v4650_v5, %v4648_v4 }
 0x131   :  { %v4686_v55 = vpop.f32.mrf.mxu1  ;;  %v2043_v45 = vpack.c.bf16 %v1278_v25, %v1274_v11  ;;  %v1284_v25 = vadd.f32 %v4624_v53, %v4622_v52  ;;  %v1298_v53 = vadd.f32 %v4660_v9, %v4658_v8  ;;  %v1306_v8 = vadd.f32 %v4678_v35, %v4676_v34 }
 0x132   :  { %v4688_v60 = vpop.f32.mrf.mxu0  ;;  %1199 = vmatmul.mubr.bf16.gmra.mxu0 %v538_v46  ;;  %v2048_v20 = vpack.c.bf16 %v1300_v57, %v1296_v58  ;;  %v1310_v5 = vadd.f32 %v4686_v55, %v4684_v54 }
 0x133   :  { %v4690_v61 = vpop.f32.mrf.mxu1  ;;  %1552 = vmatmul.mubr.bf16.gmra.mxu1 %v540_v47  ;;  %1208 = vmatprep.mubr.bf16.mxu0 %v543_v48  ;;  %v2040_v48 = vpack.c.bf16 %v1260_v6, %v1256_v19  ;;  %v2045_v59 = vpack.c.bf16 %v1288_v39, %v1284_v25  ;;  %v1294_v39 = vadd.f32 %v4646_v3, %v4644_v2 }
 0x134   :  { %6016 = vst [vmem:[#allocation3_spill] sm:$0xff] %v4690_v61  ;;  %1561 = vmatprep.mubr.bf16.mxu1 %v545_v49  ;;  %v4692_v62 = vpop.f32.mrf.mxu0  ;;  %v2050_v54 = vpack.c.bf16 %v1310_v5, %v1306_v8  ;;  %v1308_v3 = vadd.f32 %v4682_v43, %v4680_v42 }
 0x135   :  { %v4694_v63 = vpop.f32.mrf.mxu1  ;;  %v2047_v9 = vpack.c.bf16 %v1298_v53, %v1294_v39  ;;  %v1304_v53 = vadd.f32 %v4668_v27, %v4666_v26 }
 0x136   :  { %v4698_v7 = vpop.f32.mrf.mxu0  ;;  %v1316_v42 = vadd.f32 %v4694_v63, %v4692_v62 }
 0x137   :  { %v4700_v14 = vpop.f32.mrf.mxu1  ;;  %v2049_v43 = vpack.c.bf16 %v1308_v3, %v1304_v53 }
 0x138   :  { %v4704_v46 = vpop.f32.mrf.mxu0  ;;  %v1318_v27 = vadd.f32 %v4700_v14, %v4698_v7 }
 0x139   :  { %v4706_v47 = vpop.f32.mrf.mxu1 }
 0x13a   :  { %v4708_v49 = vpop.f32.mrf.mxu0  ;;  %1209 = vmatmul.mubr.bf16.gmra.mxu0 %v542_v15  ;;  %v1320_v35 = vadd.f32 %v4706_v47, %v4704_v46 }
 0x13b   :  { %v4710_v61 = vpop.f32.mrf.mxu1  ;;  %1562 = vmatmul.mubr.bf16.gmra.mxu1 %v544_v18  ;;  %2327 = vmatprep.mubr.bf16.mxu0 %v2040_v48  ;;  %v3988_v18 = vld [vmem:[%s6011_s2] sm:$0xff]   ;;  %v6019_v3 = vld [vmem:[#allocation3_spill] sm:$0xff] }
 0x13c   :  { %6017 = vst [vmem:[#allocation4_spill] sm:$0xff] %v4710_v61  ;;  %2952 = vmatprep.mubr.bf16.mxu1 %v6014_v22  ;;  %v4715_v32 = vpop.f32.mrf.mxu0  ;;  %v2052_v46 = vpack.c.bf16 %v1320_v35, %v1316_v42  ;;  %v1314_v35 = vadd.f32 %v6019_v3, %v4688_v60 }
 0x13d   :  { %v4717_v12 = vpop.f32.mrf.mxu1 }
 0x13e   :  { %v4723_v6 = vpop.f32.mrf.mxu0  ;;  %v1326_v7 = vadd.f32 %v4717_v12, %v4715_v32  ;;  %v2051_v14 = vpack.c.bf16 %v1318_v27, %v1314_v35 }
 0x13f   :  { %v4725_v15 = vpop.f32.mrf.mxu1 }
 0x140   :  { %v4732_v19 = vpop.f32.mrf.mxu0  ;;  %v1328_v3 = vadd.f32 %v4725_v15, %v4723_v6 }
 0x141   :  { %v4734_v48 = vpop.f32.mrf.mxu1 }
 0x142   :  { %v4736_v37 = vpop.f32.mrf.mxu0  ;;  %2328 = vmatmul.mubr.bf16.vlgmr.msra.gmra.mxu0 %v2039_v17  ;;  %v1330_v63 = vadd.f32 %v4734_v48, %v4732_v19 }
 0x143   :  { %v4738_v10 = vpop.f32.mrf.mxu1  ;;  %2953 = vmatmul.mubr.bf16.vlgmr.msra.gmra.mxu1 %v3988_v18  ;;  %2337 = vmatprep.mubr.bf16.mxu0 %v2042_v36  ;;  %v3989_v18 = vld [vmem:[%s6011_s2 + $0x8] sm:$0xff]   ;;  %v6021_v27 = vld [vmem:[#allocation4_spill] sm:$0xff] }
 0x144   :  { %2962 = vmatprep.mubr.bf16.mxu1 %v6014_v22  ;;  %v4743_v61 = vpop.f32.mrf.mxu0  ;;  %v2054_v19 = vpack.c.bf16 %v1330_v63, %v1326_v7  ;;  %v1324_v63 = vadd.f32 %v6021_v27, %v4708_v49 }
 0x145   :  { %v4745_v28 = vpop.f32.mrf.mxu1 }
 0x146   :  { %v4751_v13 = vpop.f32.mrf.mxu0  ;;  %v1336_v6 = vadd.f32 %v4745_v28, %v4743_v61  ;;  %v2053_v15 = vpack.c.bf16 %v1328_v3, %v1324_v63  ;;  %v1334_v3 = vadd.f32 %v4738_v10, %v4736_v37 }
 0x147   :  { %v4753_v33 = vpop.f32.mrf.mxu1 }
 0x148   :  { %v4760_v16 = vpop.f32.mrf.mxu0  ;;  %v1338_v27 = vadd.f32 %v4753_v33, %v4751_v13 }
 0x149   :  { %v4762_v17 = vpop.f32.mrf.mxu1 }
 0x14a   :  { %v4764_v51 = vpop.f32.mrf.mxu0  ;;  %2338 = vmatmul.mubr.bf16.gmra.mxu0 %v2041_v31  ;;  %v1340_v12 = vadd.f32 %v4762_v17, %v4760_v16  ;;  %v2055_v33 = vpack.c.bf16 %v1338_v27, %v1334_v3 }
 0x14b   :  { %v4766_v24 = vpop.f32.mrf.mxu1  ;;  %2963 = vmatmul.mubr.bf16.gmra.mxu1 %v3989_v18  ;;  %2347 = vmatprep.mubr.bf16.mxu0 %v2044_v50  ;;  %v3990_v18 = vld [vmem:[%s6011_s2 + $0x10] sm:$0xff]  }
 0x14c   :  { %2972 = vmatprep.mubr.bf16.mxu1 %v6014_v22  ;;  %v4771_v36 = vpop.f32.mrf.mxu0  ;;  %v2056_v16 = vpack.c.bf16 %v1340_v12, %v1336_v6  ;;  %v1344_v27 = vadd.f32 %v4766_v24, %v4764_v51 }
 0x14d   :  { %v4773_v40 = vpop.f32.mrf.mxu1 }
 0x14e   :  { %v4779_v29 = vpop.f32.mrf.mxu0  ;;  %v1346_v13 = vadd.f32 %v4773_v40, %v4771_v36 }
 0x14f   :  { %v4781_v23 = vpop.f32.mrf.mxu1 }
 0x150   :  { %v4788_v30 = vpop.f32.mrf.mxu0  ;;  %v1348_v10 = vadd.f32 %v4781_v23, %v4779_v29 }
 0x151   :  { %v4790_v31 = vpop.f32.mrf.mxu1 }
 0x152   :  { %v4792_v1 = vpop.f32.mrf.mxu0  ;;  %2348 = vmatmul.mubr.bf16.gmra.mxu0 %v2043_v45  ;;  %v1350_v28 = vadd.f32 %v4790_v31, %v4788_v30  ;;  %v2057_v23 = vpack.c.bf16 %v1348_v10, %v1344_v27 }
 0x153   :  { %v4794_v38 = vpop.f32.mrf.mxu1  ;;  %2973 = vmatmul.mubr.bf16.gmra.mxu1 %v3990_v18  ;;  %2357 = vmatprep.mubr.bf16.mxu0 %v2046_v0  ;;  %v3991_v18 = vld [vmem:[%s6011_s2 + $0x18] sm:$0xff]  }
 0x154   :  { %2982 = vmatprep.mubr.bf16.mxu1 %v6014_v22  ;;  %v4799_v50 = vpop.f32.mrf.mxu0  ;;  %v2058_v30 = vpack.c.bf16 %v1350_v28, %v1346_v13  ;;  %v1354_v10 = vadd.f32 %v4794_v38, %v4792_v1 }
 0x155   :  { %v4801_v56 = vpop.f32.mrf.mxu1 }
 0x156   :  { %v4807_v41 = vpop.f32.mrf.mxu0  ;;  %v1356_v29 = vadd.f32 %v4801_v56, %v4799_v50 }
 0x157   :  { %v4809_v11 = vpop.f32.mrf.mxu1 }
 0x158   :  { %v4816_v44 = vpop.f32.mrf.mxu0  ;;  %v1358_v24 = vadd.f32 %v4809_v11, %v4807_v41 }
 0x159   :  { %v4818_v45 = vpop.f32.mrf.mxu1 }
 0x15a   :  { %v4820_v21 = vpop.f32.mrf.mxu0  ;;  %2358 = vmatmul.mubr.bf16.gmra.mxu0 %v2045_v59  ;;  %v1360_v40 = vadd.f32 %v4818_v45, %v4816_v44  ;;  %v2059_v11 = vpack.c.bf16 %v1358_v24, %v1354_v10 }
 0x15b   :  { %v4822_v52 = vpop.f32.mrf.mxu1  ;;  %2983 = vmatmul.mubr.bf16.gmra.mxu1 %v3991_v18  ;;  %2367 = vmatprep.mubr.bf16.mxu0 %v2048_v20  ;;  %v3992_v18 = vld [vmem:[%s6011_s2 + $0x20] sm:$0xff]  }
 0x15c   :  { %2992 = vmatprep.mubr.bf16.mxu1 %v6014_v22  ;;  %v4827_v0 = vpop.f32.mrf.mxu0  ;;  %v2060_v44 = vpack.c.bf16 %v1360_v40, %v1356_v29  ;;  %v1364_v24 = vadd.f32 %v4822_v52, %v4820_v21 }
 0x15d   :  { %v4829_v4 = vpop.f32.mrf.mxu1 }
 0x15e   :  { %v4835_v57 = vpop.f32.mrf.mxu0  ;;  %v1366_v41 = vadd.f32 %v4829_v4, %v4827_v0 }
 0x15f   :  { %v4837_v25 = vpop.f32.mrf.mxu1 }
 0x160   :  { %v4844_v58 = vpop.f32.mrf.mxu0  ;;  %v1368_v38 = vadd.f32 %v4837_v25, %v4835_v57 }
 0x161   :  { %v4846_v59 = vpop.f32.mrf.mxu1 }
 0x162   :  { %v4848_v55 = vpop.f32.mrf.mxu0  ;;  %2368 = vmatmul.mubr.bf16.gmra.mxu0 %v2047_v9  ;;  %v1370_v56 = vadd.f32 %v4846_v59, %v4844_v58  ;;  %v2061_v25 = vpack.c.bf16 %v1368_v38, %v1364_v24 }
 0x163   :  { %v4850_v2 = vpop.f32.mrf.mxu1  ;;  %2993 = vmatmul.mubr.bf16.gmra.mxu1 %v3992_v18  ;;  %2377 = vmatprep.mubr.bf16.mxu0 %v2050_v54  ;;  %v3993_v18 = vld [vmem:[%s6011_s2 + $0x28] sm:$0xff]  }
 0x164   :  { %3002 = vmatprep.mubr.bf16.mxu1 %v6014_v22  ;;  %v4855_v20 = vpop.f32.mrf.mxu0  ;;  %v2062_v58 = vpack.c.bf16 %v1370_v56, %v1366_v41  ;;  %v1374_v38 = vadd.f32 %v4850_v2, %v4848_v55 }
 0x165   :  { %v4857_v34 = vpop.f32.mrf.mxu1 }
 0x166   :  { %v4863_v5 = vpop.f32.mrf.mxu0  ;;  %v1376_v57 = vadd.f32 %v4857_v34, %v4855_v20 }
 0x167   :  { %v4865_v39 = vpop.f32.mrf.mxu1 }
 0x168   :  { %v4872_v8 = vpop.f32.mrf.mxu0  ;;  %v1378_v52 = vadd.f32 %v4865_v39, %v4863_v5 }
 0x169   :  { %v4874_v9 = vpop.f32.mrf.mxu1 }
 0x16a   :  { %v4876_v47 = vpop.f32.mrf.mxu0  ;;  %2378 = vmatmul.mubr.bf16.gmra.mxu0 %v2049_v43  ;;  %v1380_v4 = vadd.f32 %v4874_v9, %v4872_v8  ;;  %v2063_v39 = vpack.c.bf16 %v1378_v52, %v1374_v38 }
 0x16b   :  { %v4878_v26 = vpop.f32.mrf.mxu1  ;;  %3003 = vmatmul.mubr.bf16.gmra.mxu1 %v3993_v18  ;;  %2387 = vmatprep.mubr.bf16.mxu0 %v2052_v46  ;;  %v3994_v18 = vld [vmem:[%s6011_s2 + $0x30] sm:$0xff]  }
 0x16c   :  { %6018 = vst [vmem:[#allocation5_spill] sm:$0xff] %v4878_v26  ;;  %3012 = vmatprep.mubr.bf16.mxu1 %v6014_v22  ;;  %v4883_v54 = vpop.f32.mrf.mxu0  ;;  %v2064_v8 = vpack.c.bf16 %v1380_v4, %v1376_v57 }
 0x16d   :  { %v4885_v62 = vpop.f32.mrf.mxu1 }
 0x16e   :  { %v4891_v53 = vpop.f32.mrf.mxu0  ;;  %v1386_v5 = vadd.f32 %v4885_v62, %v4883_v54 }
 0x16f   :  { %v4893_v42 = vpop.f32.mrf.mxu1 }
 0x170   :  { %v4900_v43 = vpop.f32.mrf.mxu0  ;;  %v1388_v2 = vadd.f32 %v4893_v42, %v4891_v53 }
 0x171   :  { %v4902_v46 = vpop.f32.mrf.mxu1 }
 0x172   :  { %v4904_v48 = vpop.f32.mrf.mxu0  ;;  %2388 = vmatmul.mubr.bf16.gmra.mxu0 %v2051_v14  ;;  %v1390_v34 = vadd.f32 %v4902_v46, %v4900_v43 }
 0x173   :  { %v4906_v60 = vpop.f32.mrf.mxu1  ;;  %3013 = vmatmul.mubr.bf16.gmra.mxu1 %v3994_v18  ;;  %2397 = vmatprep.mubr.bf16.mxu0 %v2054_v19  ;;  %v3995_v18 = vld [vmem:[%s6011_s2 + $0x38] sm:$0xff]  }
 0x174   :  { %6020 = vst [vmem:[#allocation3_spill] sm:$0xff] %v4906_v60  ;;  %3022 = vmatprep.mubr.bf16.mxu1 %v6014_v22  ;;  %v4911_v26 = vpop.f32.mrf.mxu0  ;;  %v2066_v43 = vpack.c.bf16 %v1390_v34, %v1386_v5  ;;  %v6023_v52 = vld [vmem:[#allocation5_spill] sm:$0xff] }
 0x175   :  { %v4913_v32 = vpop.f32.mrf.mxu1  ;;  %v1384_v34 = vadd.f32 %v6023_v52, %v4876_v47 }
 0x176   :  { %v4919_v35 = vpop.f32.mrf.mxu0  ;;  %v1396_v53 = vadd.f32 %v4913_v32, %v4911_v26 }
 0x177   :  { %v4921_v7 = vpop.f32.mrf.mxu1  ;;  %v2065_v42 = vpack.c.bf16 %v1388_v2, %v1384_v34 }
 0x178   :  { %v4928_v14 = vpop.f32.mrf.mxu0  ;;  %v1398_v52 = vadd.f32 %v4921_v7, %v4919_v35 }
 0x179   :  { %v4930_v19 = vpop.f32.mrf.mxu1 }
 0x17a   :  { %v4932_v17 = vpop.f32.mrf.mxu0  ;;  %2398 = vmatmul.mubr.bf16.gmra.mxu0 %v2053_v15  ;;  %v1400_v62 = vadd.f32 %v4930_v19, %v4928_v14 }
 0x17b   :  { %v4934_v49 = vpop.f32.mrf.mxu1  ;;  %3023 = vmatmul.mubr.bf16.gmra.mxu1 %v3995_v18  ;;  %2407 = vmatprep.mubr.bf16.mxu0 %v2056_v16  ;;  %v3996_v18 = vld [vmem:[%s6011_s2 + $0x40] sm:$0xff]   ;;  %v6025_v2 = vld [vmem:[#allocation3_spill] sm:$0xff] }
 0x17c   :  { %3032 = vmatprep.mubr.bf16.mxu1 %v6014_v22  ;;  %v4939_v60 = vpop.f32.mrf.mxu0  ;;  %v2068_v14 = vpack.c.bf16 %v1400_v62, %v1396_v53  ;;  %v1394_v62 = vadd.f32 %v6025_v2, %v4904_v48 }
 0x17d   :  { %v4941_v61 = vpop.f32.mrf.mxu1 }
 0x17e   :  { %v4947_v12 = vpop.f32.mrf.mxu0  ;;  %v1406_v35 = vadd.f32 %v4941_v61, %v4939_v60  ;;  %v2067_v7 = vpack.c.bf16 %v1398_v52, %v1394_v62  ;;  %v1404_v52 = vadd.f32 %v4934_v49, %v4932_v17 }
 0x17f   :  { %v4949_v63 = vpop.f32.mrf.mxu1 }
 0x180   :  { %v4956_v6 = vpop.f32.mrf.mxu0  ;;  %v1408_v2 = vadd.f32 %v4949_v63, %v4947_v12 }
 0x181   :  { %v4958_v15 = vpop.f32.mrf.mxu1 }
 0x182   :  { %v4960_v31 = vpop.f32.mrf.mxu0  ;;  %2408 = vmatmul.mubr.bf16.gmra.mxu0 %v2055_v33  ;;  %v1410_v32 = vadd.f32 %v4958_v15, %v4956_v6  ;;  %v2069_v63 = vpack.c.bf16 %v1408_v2, %v1404_v52 }
 0x183   :  { %v4962_v37 = vpop.f32.mrf.mxu1  ;;  %3033 = vmatmul.mubr.bf16.gmra.mxu1 %v3996_v18  ;;  %2417 = vmatprep.mubr.bf16.mxu0 %v2058_v30  ;;  %v3997_v18 = vld [vmem:[%s6011_s2 + $0x48] sm:$0xff]  }
 0x184   :  { %3042 = vmatprep.mubr.bf16.mxu1 %v6014_v22  ;;  %v4967_v16 = vpop.f32.mrf.mxu0  ;;  %v2070_v6 = vpack.c.bf16 %v1410_v32, %v1406_v35  ;;  %v1414_v2 = vadd.f32 %v4962_v37, %v4960_v31 }
 0x185   :  { %v4969_v36 = vpop.f32.mrf.mxu1 }
 0x186   :  { %v4975_v28 = vpop.f32.mrf.mxu0  ;;  %v1416_v12 = vadd.f32 %v4969_v36, %v4967_v16 }
 0x187   :  { %v4977_v3 = vpop.f32.mrf.mxu1 }
 0x188   :  { %v4984_v13 = vpop.f32.mrf.mxu0  ;;  %v1418_v49 = vadd.f32 %v4977_v3, %v4975_v28 }
 0x189   :  { %v4986_v33 = vpop.f32.mrf.mxu1 }
 0x18a   :  { %v4988_v45 = vpop.f32.mrf.mxu0  ;;  %2418 = vmatmul.mubr.bf16.gmra.mxu0 %v2057_v23  ;;  %v1420_v61 = vadd.f32 %v4986_v33, %v4984_v13  ;;  %v2071_v3 = vpack.c.bf16 %v1418_v49, %v1414_v2 }
 0x18b   :  { %v4990_v51 = vpop.f32.mrf.mxu1  ;;  %3043 = vmatmul.mubr.bf16.gmra.mxu1 %v3997_v18  ;;  %2427 = vmatprep.mubr.bf16.mxu0 %v2060_v44  ;;  %v3998_v18 = vld [vmem:[%s6011_s2 + $0x50] sm:$0xff]  }
 0x18c   :  { %3052 = vmatprep.mubr.bf16.mxu1 %v6014_v22  ;;  %v4995_v30 = vpop.f32.mrf.mxu0  ;;  %v2072_v13 = vpack.c.bf16 %v1420_v61, %v1416_v12  ;;  %v1424_v49 = vadd.f32 %v4990_v51, %v4988_v45 }
 0x18d   :  { %v4997_v50 = vpop.f32.mrf.mxu1 }
 0x18e   :  { %v5003_v40 = vpop.f32.mrf.mxu0  ;;  %v1426_v28 = vadd.f32 %v4997_v50, %v4995_v30 }
 0x18f   :  { %v5005_v27 = vpop.f32.mrf.mxu1 }
 0x190   :  { %v5012_v29 = vpop.f32.mrf.mxu0  ;;  %v1428_v37 = vadd.f32 %v5005_v27, %v5003_v40 }
 0x191   :  { %v5014_v23 = vpop.f32.mrf.mxu1 }
 0x192   :  { %v5016_v59 = vpop.f32.mrf.mxu0  ;;  %2428 = vmatmul.mubr.bf16.gmra.mxu0 %v2059_v11  ;;  %v1430_v36 = vadd.f32 %v5014_v23, %v5012_v29  ;;  %v2073_v27 = vpack.c.bf16 %v1428_v37, %v1424_v49 }
 0x193   :  { %v5018_v1 = vpop.f32.mrf.mxu1  ;;  %3053 = vmatmul.mubr.bf16.gmra.mxu1 %v3998_v18  ;;  %2437 = vmatprep.mubr.bf16.mxu0 %v2062_v58  ;;  %v3999_v18 = vld [vmem:[%s6011_s2 + $0x58] sm:$0xff]  }
 0x194   :  { %3062 = vmatprep.mubr.bf16.mxu1 %v6014_v22  ;;  %v5023_v44 = vpop.f32.mrf.mxu0  ;;  %v2074_v29 = vpack.c.bf16 %v1430_v36, %v1426_v28  ;;  %v1434_v37 = vadd.f32 %v5018_v1, %v5016_v59 }
 0x195   :  { %v5025_v0 = vpop.f32.mrf.mxu1 }
 0x196   :  { %v5031_v56 = vpop.f32.mrf.mxu0  ;;  %v1436_v40 = vadd.f32 %v5025_v0, %v5023_v44 }
 0x197   :  { %v5033_v10 = vpop.f32.mrf.mxu1 }
 0x198   :  { %v5040_v41 = vpop.f32.mrf.mxu0  ;;  %v1438_v51 = vadd.f32 %v5033_v10, %v5031_v56 }
 0x199   :  { %v5042_v11 = vpop.f32.mrf.mxu1 }
 0x19a   :  { %v5044_v9 = vpop.f32.mrf.mxu0  ;;  %2438 = vmatmul.mubr.bf16.gmra.mxu0 %v2061_v25  ;;  %v1440_v50 = vadd.f32 %v5042_v11, %v5040_v41  ;;  %v2075_v10 = vpack.c.bf16 %v1438_v51, %v1434_v37 }
 0x19b   :  { %v5046_v21 = vpop.f32.mrf.mxu1  ;;  %3063 = vmatmul.mubr.bf16.gmra.mxu1 %v3999_v18  ;;  %2447 = vmatprep.mubr.bf16.mxu0 %v2064_v8  ;;  %v4000_v18 = vld [vmem:[%s6011_s2 + $0x60] sm:$0xff]  }
 0x19c   :  { %3072 = vmatprep.mubr.bf16.mxu1 %v6014_v22  ;;  %v5051_v58 = vpop.f32.mrf.mxu0  ;;  %v2076_v41 = vpack.c.bf16 %v1440_v50, %v1436_v40  ;;  %v1444_v51 = vadd.f32 %v5046_v21, %v5044_v9 }
 0x19d   :  { %v5053_v20 = vpop.f32.mrf.mxu1 }
 0x19e   :  { %v5059_v4 = vpop.f32.mrf.mxu0  ;;  %v1446_v56 = vadd.f32 %v5053_v20, %v5051_v58 }
 0x19f   :  { %v5061_v24 = vpop.f32.mrf.mxu1 }
 0x1a0   :  { %v5068_v57 = vpop.f32.mrf.mxu0  ;;  %v1448_v1 = vadd.f32 %v5061_v24, %v5059_v4 }
 0x1a1   :  { %v5070_v25 = vpop.f32.mrf.mxu1 }
 0x1a2   :  { %v5072_v46 = vpop.f32.mrf.mxu0  ;;  %2448 = vmatmul.mubr.bf16.gmra.mxu0 %v2063_v39  ;;  %v1450_v0 = vadd.f32 %v5070_v25, %v5068_v57  ;;  %v2077_v24 = vpack.c.bf16 %v1448_v1, %v1444_v51 }
 0x1a3   :  { %v5074_v55 = vpop.f32.mrf.mxu1  ;;  %3073 = vmatmul.mubr.bf16.gmra.mxu1 %v4000_v18  ;;  %2457 = vmatprep.mubr.bf16.mxu0 %v2066_v43  ;;  %v4001_v18 = vld [vmem:[%s6011_s2 + $0x68] sm:$0xff]  }
 0x1a4   :  { %6022 = vst [vmem:[#allocation4_spill] sm:$0xff] %v5074_v55  ;;  %3082 = vmatprep.mubr.bf16.mxu1 %v6014_v22  ;;  %v5079_v8 = vpop.f32.mrf.mxu0  ;;  %v2078_v57 = vpack.c.bf16 %v1450_v0, %v1446_v56 }
 0x1a5   :  { %v5081_v54 = vpop.f32.mrf.mxu1 }
 0x1a6   :  { %v5087_v38 = vpop.f32.mrf.mxu0  ;;  %v1456_v4 = vadd.f32 %v5081_v54, %v5079_v8 }
 0x1a7   :  { %v5089_v5 = vpop.f32.mrf.mxu1 }
 0x1a8   :  { %v5096_v39 = vpop.f32.mrf.mxu0  ;;  %v1458_v21 = vadd.f32 %v5089_v5, %v5087_v38 }
 0x1a9   :  { %v5098_v43 = vpop.f32.mrf.mxu1 }
 0x1aa   :  { %v5100_v19 = vpop.f32.mrf.mxu0  ;;  %2458 = vmatmul.mubr.bf16.gmra.mxu0 %v2065_v42  ;;  %v1460_v20 = vadd.f32 %v5098_v43, %v5096_v39 }
 0x1ab   :  { %v5102_v47 = vpop.f32.mrf.mxu1  ;;  %3083 = vmatmul.mubr.bf16.gmra.mxu1 %v4001_v18  ;;  %2467 = vmatprep.mubr.bf16.mxu0 %v2068_v14  ;;  %v4002_v18 = vld [vmem:[%s6011_s2 + $0x70] sm:$0xff]  }
 0x1ac   :  { %6024 = vst [vmem:[#allocation5_spill] sm:$0xff] %v5102_v47  ;;  %3092 = vmatprep.mubr.bf16.mxu1 %v6014_v22  ;;  %v5107_v55 = vpop.f32.mrf.mxu0  ;;  %v2080_v39 = vpack.c.bf16 %v1460_v20, %v1456_v4  ;;  %v6027_v1 = vld [vmem:[#allocation4_spill] sm:$0xff] }
 0x1ad   :  { %v5109_v26 = vpop.f32.mrf.mxu1  ;;  %v1454_v20 = vadd.f32 %v6027_v1, %v5072_v46 }
 0x1ae   :  { %v5115_v34 = vpop.f32.mrf.mxu0  ;;  %v1466_v38 = vadd.f32 %v5109_v26, %v5107_v55 }
 0x1af   :  { %v5117_v53 = vpop.f32.mrf.mxu1  ;;  %v2079_v5 = vpack.c.bf16 %v1458_v21, %v1454_v20 }
 0x1b0   :  { %v5124_v42 = vpop.f32.mrf.mxu0  ;;  %v1468_v1 = vadd.f32 %v5117_v53, %v5115_v34 }
 0x1b1   :  { %v5126_v14 = vpop.f32.mrf.mxu1 }
 0x1b2   :  { %v5128_v15 = vpop.f32.mrf.mxu0  ;;  %2468 = vmatmul.mubr.bf16.gmra.mxu0 %v2067_v7  ;;  %v1470_v54 = vadd.f32 %v5126_v14, %v5124_v42 }
 0x1b3   :  { %v5130_v48 = vpop.f32.mrf.mxu1  ;;  %3093 = vmatmul.mubr.bf16.gmra.mxu1 %v4002_v18  ;;  %2477 = vmatprep.mubr.bf16.mxu0 %v2070_v6  ;;  %v4003_v18 = vld [vmem:[%s6011_s2 + $0x78] sm:$0xff]  }
 0x1b4   :  { %3102 = vmatprep.mubr.bf16.mxu1 %v6014_v22  ;;  %v5135_v47 = vpop.f32.mrf.mxu0  ;;  %v2082_v42 = vpack.c.bf16 %v1470_v54, %v1466_v38  ;;  %v6029_v21 = vld [vmem:[#allocation5_spill] sm:$0xff] }
 0x1b5   :  { %v5137_v60 = vpop.f32.mrf.mxu1  ;;  %v1464_v54 = vadd.f32 %v6029_v21, %v5100_v19 }
 0x1b6   :  { %v5143_v32 = vpop.f32.mrf.mxu0  ;;  %v1476_v34 = vadd.f32 %v5137_v60, %v5135_v47 }
 0x1b7   :  { %v5145_v62 = vpop.f32.mrf.mxu1  ;;  %v2081_v53 = vpack.c.bf16 %v1468_v1, %v1464_v54  ;;  %v1474_v1 = vadd.f32 %v5130_v48, %v5128_v15 }
 0x1b8   :  { %v5152_v35 = vpop.f32.mrf.mxu0  ;;  %v1478_v21 = vadd.f32 %v5145_v62, %v5143_v32 }
 0x1b9   :  { %v5154_v7 = vpop.f32.mrf.mxu1 }
 0x1ba   :  { %v5156_v33 = vpop.f32.mrf.mxu0  ;;  %2478 = vmatmul.mubr.bf16.gmra.mxu0 %v2069_v63  ;;  %v1480_v26 = vadd.f32 %v5154_v7, %v5152_v35  ;;  %v2083_v62 = vpack.c.bf16 %v1478_v21, %v1474_v1  ;;  %v3275_v21 = vlaneseq }
 0x1bb   :  { %v5158_v17 = vpop.f32.mrf.mxu1  ;;  %3103 = vmatmul.mubr.bf16.gmra.mxu1 %v4003_v18  ;;  %2487 = vmatprep.mubr.bf16.mxu0 %v2072_v13  ;;  %v4004_v18 = vld [vmem:[%s6011_s2 + $0x80] sm:$0xff]  }
 0x1bc   :  { %3112 = vmatprep.mubr.bf16.mxu1 %v6014_v22  ;;  %v5163_v6 = vpop.f32.mrf.mxu0  ;;  %v2084_v35 = vpack.c.bf16 %v1480_v26, %v1476_v34 }
 0x1bd   :  { %v5165_v16 = vpop.f32.mrf.mxu1 }
 0x1be   :  { %v5171_v61 = vpop.f32.mrf.mxu0  ;;  %v1486_v32 = vadd.f32 %v5165_v16, %v5163_v6 }
 0x1bf   :  { %v5173_v52 = vpop.f32.mrf.mxu1 }
 0x1c0   :  { %v5180_v12 = vpop.f32.mrf.mxu0  ;;  %v1488_v48 = vadd.f32 %v5173_v52, %v5171_v61 }
 0x1c1   :  { %v5182_v63 = vpop.f32.mrf.mxu1 }
 0x1c2   :  { %v5184_v23 = vpop.f32.mrf.mxu0  ;;  %2488 = vmatmul.mubr.bf16.gmra.mxu0 %v2071_v3  ;;  %v1490_v60 = vadd.f32 %v5182_v63, %v5180_v12 }
 0x1c3   :  { %v5186_v31 = vpop.f32.mrf.mxu1  ;;  %3113 = vmatmul.mubr.bf16.gmra.mxu1 %v4004_v18  ;;  %2497 = vmatprep.mubr.bf16.mxu0 %v2074_v29  ;;  %v4005_v18 = vld [vmem:[%s6011_s2 + $0x88] sm:$0xff]  }
 0x1c4   :  { %3122 = vmatprep.mubr.bf16.mxu1 %v6014_v22  ;;  %v5191_v13 = vpop.f32.mrf.mxu0  ;;  %v2086_v12 = vpack.c.bf16 %v1490_v60, %v1486_v32  ;;  %v1484_v60 = vadd.f32 %v5158_v17, %v5156_v33  ;;  %v4011_v32 = vld [vmem:[%s6011_s2 + $0xb8] sm:$0xff]   ;;  %v6033_v17 = vmov 0  }
 0x1c5   :  { %v5193_v30 = vpop.f32.mrf.mxu1 }
 0x1c6   :  { %v5199_v36 = vpop.f32.mrf.mxu0  ;;  %v1496_v61 = vadd.f32 %v5193_v30, %v5191_v13  ;;  %v2085_v52 = vpack.c.bf16 %v1488_v48, %v1484_v60 }
 0x1c7   :  { %v5201_v2 = vpop.f32.mrf.mxu1 }
 0x1c8   :  { %v5208_v28 = vpop.f32.mrf.mxu0 }
 0x1c9   :  { %v5210_v3 = vpop.f32.mrf.mxu1 }
 0x1ca   :  { %v5212_v11 = vpop.f32.mrf.mxu0  ;;  %2498 = vmatmul.mubr.bf16.gmra.mxu0 %v2073_v27  ;;  %v1500_v16 = vadd.f32 %v5210_v3, %v5208_v28  ;;  %v3276_v3 = vshrl.u32 %v3275_v21, 7  ;;  %v1494_v21 = vadd.f32 %v5186_v31, %v5184_v23 }
 0x1cb   :  { %v5214_v45 = vpop.f32.mrf.mxu1  ;;  %3123 = vmatmul.mubr.bf16.gmra.mxu1 %v4005_v18  ;;  %2507 = vmatprep.mubr.bf16.mxu0 %v2076_v41  ;;  %v4006_v18 = vld [vmem:[%s6011_s2 + $0x90] sm:$0xff]  }
 0x1cc   :  { %3132 = vmatprep.mubr.bf16.mxu1 %v6014_v22  ;;  %v5219_v29 = vpop.f32.mrf.mxu0  ;;  %v2088_v28 = vpack.c.bf16 %v1500_v16, %v1496_v61  ;;  %v3277_v16 = vsub.s32 0, %v3276_v3  ;;  %v3273_v61 = vld [vmem:[%s6012_s5] sm:$0x3] }
 0x1cd   :  { %v5221_v44 = vpop.f32.mrf.mxu1 }
 0x1ce   :  { %v5227_v50 = vpop.f32.mrf.mxu0 }
 0x1cf   :  { %v5229_v49 = vpop.f32.mrf.mxu1 }
 0x1d0   :  { %v5236_v40 = vpop.f32.mrf.mxu0 }
 0x1d1   :  { %v5238_v27 = vpop.f32.mrf.mxu1 }
 0x1d2   :  { %v5240_v25 = vpop.f32.mrf.mxu0  ;;  %2508 = vmatmul.mubr.bf16.gmra.mxu0 %v2075_v10  ;;  %v1510_v48 = vadd.f32 %v5238_v27, %v5236_v40  ;;  %v3281_v40 = vsub.s32 1, %v3276_v3 }
 0x1d3   :  { %v5242_v59 = vpop.f32.mrf.mxu1  ;;  %3133 = vmatmul.mubr.bf16.gmra.mxu1 %v4006_v18  ;;  %2517 = vmatprep.mubr.bf16.mxu0 %v2078_v57  ;;  %v4007_v18 = vld [vmem:[%s6011_s2 + $0x98] sm:$0xff]  }
 0x1d4   :  { %3142 = vmatprep.mubr.bf16.mxu1 %v6014_v22  ;;  %v5247_v41 = vpop.f32.mrf.mxu0 }
 0x1d5   :  { %v5249_v58 = vpop.f32.mrf.mxu1 }
 0x1d6   :  { %v5255_v0 = vpop.f32.mrf.mxu0 }
 0x1d7   :  { %v5257_v37 = vpop.f32.mrf.mxu1 }
 0x1d8   :  { %v5264_v56 = vpop.f32.mrf.mxu0 }
 0x1d9   :  { %v5266_v10 = vpop.f32.mrf.mxu1 }
 0x1da   :  { %v5268_v43 = vpop.f32.mrf.mxu0  ;;  %2518 = vmatmul.mubr.bf16.gmra.mxu0 %v2077_v24  ;;  %v1520_v3 = vadd.f32 %v5266_v10, %v5264_v56 }
 0x1db   :  { %v5270_v9 = vpop.f32.mrf.mxu1  ;;  %3143 = vmatmul.mubr.bf16.gmra.mxu1 %v4007_v18  ;;  %2527 = vmatprep.mubr.bf16.mxu0 %v2080_v39  ;;  %v4008_v18 = vld [vmem:[%s6011_s2 + $0xa0] sm:$0xff]  }
 0x1dc   :  { %6026 = vst [vmem:[#allocation3_spill] sm:$0xff] %v5270_v9  ;;  %3152 = vmatprep.mubr.bf16.mxu1 %v6014_v22  ;;  %v5275_v57 = vpop.f32.mrf.mxu0 }
 0x1dd   :  { %v5277_v8 = vpop.f32.mrf.mxu1 }
 0x1de   :  { %v5283_v51 = vpop.f32.mrf.mxu0 }
 0x1df   :  { %v5285_v4 = vpop.f32.mrf.mxu1 }
 0x1e0   :  { %v5292_v24 = vpop.f32.mrf.mxu0 }
 0x1e1   :  { %v5294_v39 = vpop.f32.mrf.mxu1 }
 0x1e2   :  { %v5296_v14 = vpop.f32.mrf.mxu0  ;;  %2528 = vmatmul.mubr.bf16.gmra.mxu0 %v2079_v5 }
 0x1e3   :  { %v5298_v46 = vpop.f32.mrf.mxu1  ;;  %3153 = vmatmul.mubr.bf16.gmra.mxu1 %v4008_v18  ;;  %2537 = vmatprep.mubr.bf16.mxu0 %v2082_v42  ;;  %v4009_v18 = vld [vmem:[%s6011_s2 + $0xa8] sm:$0xff]  }
 0x1e4   :  { %6028 = vst [vmem:[#allocation4_spill] sm:$0xff] %v5298_v46  ;;  %3162 = vmatprep.mubr.bf16.mxu1 %v6014_v22  ;;  %v5303_v9 = vpop.f32.mrf.mxu0 }
 0x1e5   :  { %v5305_v55 = vpop.f32.mrf.mxu1 }
 0x1e6   :  { %v5311_v20 = vpop.f32.mrf.mxu0 }
 0x1e7   :  { %v5313_v38 = vpop.f32.mrf.mxu1 }
 0x1e8   :  { %v5320_v5 = vpop.f32.mrf.mxu0 }
 0x1e9   :  { %v5322_v42 = vpop.f32.mrf.mxu1 }
 0x1ea   :  { %v5324_v7 = vpop.f32.mrf.mxu0  ;;  %2538 = vmatmul.mubr.bf16.gmra.mxu0 %v2081_v53 }
 0x1eb   :  { %v5326_v19 = vpop.f32.mrf.mxu1  ;;  %3163 = vmatmul.mubr.bf16.gmra.mxu1 %v4009_v18  ;;  %2547 = vmatprep.mubr.bf16.mxu0 %v2084_v35  ;;  %v4010_v18 = vld [vmem:[%s6011_s2 + $0xb0] sm:$0xff]  }
 0x1ec   :  { %3172 = vmatprep.mubr.bf16.mxu1 %v6014_v22  ;;  %v5331_v46 = vpop.f32.mrf.mxu0 }
 0x1ed   :  { %v5333_v47 = vpop.f32.mrf.mxu1 }
 0x1ee   :  { %v5339_v26 = vpop.f32.mrf.mxu0 }
 0x1ef   :  { %v5341_v54 = vpop.f32.mrf.mxu1 }
 0x1f0   :  { %v5348_v34 = vpop.f32.mrf.mxu0 }
 0x1f1   :  { %v5350_v53 = vpop.f32.mrf.mxu1 }
 0x1f2   :  { %v5352_v63 = vpop.f32.mrf.mxu0  ;;  %2548 = vmatmul.mubr.bf16.gmra.mxu0 %v2083_v62 }
 0x1f3   :  { %v5354_v15 = vpop.f32.mrf.mxu1  ;;  %3173 = vmatmul.mubr.bf16.gmra.mxu1 %v4010_v18  ;;  %2557 = vmatprep.mubr.bf16.mxu0 %v2086_v12 }
 0x1f4   :  { %6030 = vst [vmem:[#allocation5_spill] sm:$0xff] %v5354_v15  ;;  %3182 = vmatprep.mubr.bf16.mxu1 %v6014_v22  ;;  %v5359_v35 = vpop.f32.mrf.mxu0  ;;  %v1498_v15 = vadd.f32 %v5201_v2, %v5199_v36  ;;  %v4012_v36 = vld [vmem:[%s6011_s2 + $0xc0] sm:$0xff]   ;;  %v1506_v2 = vadd.f32 %v5221_v44, %v5219_v29  ;;  %v1508_v29 = vadd.f32 %v5229_v49, %v5227_v50 }
 0x1f5   :  { %v5361_v6 = vpop.f32.mrf.mxu1  ;;  %v1516_v50 = vadd.f32 %v5249_v58, %v5247_v41 }
 0x1f6   :  { %v5367_v1 = vpop.f32.mrf.mxu0  ;;  %v2087_v27 = vpack.c.bf16 %v1498_v15, %v1494_v21  ;;  %v2090_v31 = vpack.c.bf16 %v1510_v48, %v1506_v2  ;;  %v1504_v21 = vadd.f32 %v5214_v45, %v5212_v11 }
 0x1f7   :  { %v5369_v18 = vpop.f32.mrf.mxu1 }
 0x1f8   :  { %v5376_v62 = vpop.f32.mrf.mxu0  ;;  %v2089_v56 = vpack.c.bf16 %v1508_v29, %v1504_v21 }
 0x1f9   :  { %v5378_v12 = vpop.f32.mrf.mxu1 }
 0x1fa   :  { %v5380_v22 = vpop.f32.mrf.mxu0  ;;  %2558 = vmatmul.mubr.bf16.gmra.mxu0 %v2085_v52 }
 0x1fb   :  { %6031 = vst [vmem:[#allocation6_spill] sm:$0xff] %v5380_v22  ;;  %v5382_v33 = vpop.f32.mrf.mxu1  ;;  %3183 = vmatmul.mubr.bf16.gmra.mxu1 %v4011_v32  ;;  %2567 = vmatprep.mubr.bf16.mxu0 %v2088_v28  ;;  %v5411_v28 = vrot.slane %v3273_v61, %v3277_v16 }
 0x1fc   :  { %6032 = vst [vmem:[#allocation7_spill] sm:$0xff] %v5382_v33  ;;  %3192 = vmatprep.mubr.bf16.mxu1 %v6033_v17  ;;  %v5387_v13 = vpop.f32.mrf.mxu0 }
 0x1fd   :  { %v5389_v30 = vpop.f32.mrf.mxu1 }
 0x1fe   :  { %v5395_v60 = vpop.f32.mrf.mxu0 }
 0x1ff   :  { %6034 = vst [vmem:[#allocation8_spill] sm:$0xff] %v5395_v60  ;;  %v5397_v32 = vpop.f32.mrf.mxu1  ;;  %v5413_v60 = vrot.slane %v3273_v61, %v3281_v40  ;;  %v4013_v61 = vld [vmem:[%s6011_s2 + $0xc8] sm:$0xff]   ;;  %v2092_v40 = vpack.c.bf16 %v1520_v3, %v1516_v50 }
 0x200   :  { %6035 = vst [vmem:[#allocation9_spill] sm:$0xff] %v5397_v32  ;;  %v5407_v52 = vpop.f32.mrf.mxu0 }
 0x201   :  { %v5409_v23 = vpop.f32.mrf.mxu1 }
 0x202   :  { %v2329_v33 = vpop.f32.mrf.mxu0  ;;  %2568 = vmatmul.mubr.bf16.gmra.mxu0 %v2087_v27 }
 0x203   :  { %v2954_v22 = vpop.f32.mrf.mxu1  ;;  %3193 = vmatmul.mubr.bf16.gmra.mxu1 %v4012_v36  ;;  %2577 = vmatprep.mubr.bf16.mxu0 %v2090_v31 }
 0x204   :  { %v2955_v32 = vadd.f32 %v2954_v22, %v2329_v33  ;;  %3202 = vmatprep.mubr.bf16.mxu1 %v6033_v17  ;;  %v2331_v44 = vpop.f32.mrf.mxu0 }
 0x205   :  { %v2956_v15 = vpop.f32.mrf.mxu1 }
 0x206   :  { %v3285_v48 = vadd.f32 %v5411_v28, %v2955_v32  ;;  %v2957_v16 = vadd.f32 %v2956_v15, %v2331_v44  ;;  %v2333_v22 = vpop.f32.mrf.mxu0  ;;  %v1518_v15 = vadd.f32 %v5257_v37, %v5255_v0  ;;  %v4014_v0 = vld [vmem:[%s6011_s2 + $0xd0] sm:$0xff]   ;;  %v1526_v37 = vadd.f32 %v5277_v8, %v5275_v57 }
 0x207   :  { %v2958_v33 = vpop.f32.mrf.mxu1 }
 0x208   :  { %v3413_v49 = vmax.f32 %v3285_v48, 0.0  ;;  %v3286_v36 = vadd.f32 %v5413_v60, %v2957_v16  ;;  %v2959_v2 = vadd.f32 %v2958_v33, %v2333_v22  ;;  %v2335_v10 = vpop.f32.mrf.mxu0  ;;  %v1530_v16 = vadd.f32 %v5294_v39, %v5292_v24 }
 0x209   :  { %v2960_v32 = vpop.f32.mrf.mxu1 }
 0x20a   :  { %3541 = vst [vmem:[%s6013_s6] sm:$0xff] %v3413_v49  ;;  %v3414_v11 = vmax.f32 %v3286_v36, 0.0  ;;  %v3287_v45 = vadd.f32 %v5411_v28, %v2959_v2  ;;  %v2961_v27 = vadd.f32 %v2960_v32, %v2335_v10  ;;  %v2339_v31 = vpop.f32.mrf.mxu0  ;;  %2578 = vmatmul.mubr.bf16.gmra.mxu0 %v2089_v56 }
 0x20b   :  { %v2964_v44 = vpop.f32.mrf.mxu1  ;;  %3203 = vmatmul.mubr.bf16.gmra.mxu1 %v4013_v61  ;;  %2587 = vmatprep.mubr.bf16.mxu0 %v2092_v40  ;;  %v1514_v61 = vadd.f32 %v5242_v59, %v5240_v25  ;;  %v2094_v59 = vpack.c.bf16 %v1530_v16, %v1526_v37 }
 0x20c   :  { %3542 = vst [vmem:[%s6013_s6 + $0x8] sm:$0xff] %v3414_v11  ;;  %v3415_v41 = vmax.f32 %v3287_v45, 0.0  ;;  %v3288_v58 = vadd.f32 %v5413_v60, %v2961_v27  ;;  %v2965_v29 = vadd.f32 %v2964_v44, %v2339_v31  ;;  %3212 = vmatprep.mubr.bf16.mxu1 %v6033_v17  ;;  %v2341_v3 = vpop.f32.mrf.mxu0  ;;  %v1528_v31 = vadd.f32 %v5285_v4, %v5283_v51  ;;  %v4015_v51 = vld [vmem:[%s6011_s2 + $0xd8] sm:$0xff]  }
 0x20d   :  { %v2966_v48 = vpop.f32.mrf.mxu1  ;;  %v2091_v2 = vpack.c.bf16 %v1518_v15, %v1514_v61  ;;  %v1536_v4 = vadd.f32 %v5305_v55, %v5303_v9 }
 0x20e   :  { %3543 = vst [vmem:[%s6013_s6 + $0x10] sm:$0xff] %v3415_v41  ;;  %v3416_v21 = vmax.f32 %v3288_v58, 0.0  ;;  %v3289_v22 = vadd.f32 %v5411_v28, %v2965_v29  ;;  %v2967_v33 = vadd.f32 %v2966_v48, %v2341_v3  ;;  %v2343_v50 = vpop.f32.mrf.mxu0  ;;  %v1540_v58 = vadd.f32 %v5322_v42, %v5320_v5  ;;  %v6036_v48 = vld [vmem:[#allocation3_spill] sm:$0xff] }
 0x20f   :  { %v2968_v49 = vpop.f32.mrf.mxu1  ;;  %v1524_v16 = vadd.f32 %v6036_v48, %v5268_v43 }
 0x210   :  { %3544 = vst [vmem:[%s6013_s6 + $0x18] sm:$0xff] %v3416_v21  ;;  %v3417_v24 = vmax.f32 %v3289_v22, 0.0  ;;  %v3290_v39 = vadd.f32 %v5413_v60, %v2967_v33  ;;  %v2969_v36 = vadd.f32 %v2968_v49, %v2343_v50  ;;  %v2345_v56 = vpop.f32.mrf.mxu0  ;;  %v2096_v49 = vpack.c.bf16 %v1540_v58, %v1536_v4 }
 0x211   :  { %v2970_v25 = vpop.f32.mrf.mxu1  ;;  %v2093_v61 = vpack.c.bf16 %v1528_v31, %v1524_v16 }
 0x212   :  { %3545 = vst [vmem:[%s6013_s6 + $0x20] sm:$0xff] %v3417_v24  ;;  %v3418_v10 = vmax.f32 %v3290_v39, 0.0  ;;  %v3291_v32 = vadd.f32 %v5411_v28, %v2969_v36  ;;  %v2971_v57 = vadd.f32 %v2970_v25, %v2345_v56  ;;  %v2349_v8 = vpop.f32.mrf.mxu0  ;;  %2588 = vmatmul.mubr.bf16.gmra.mxu0 %v2091_v2  ;;  %v1538_v56 = vadd.f32 %v5313_v38, %v5311_v20  ;;  %v4016_v20 = vld [vmem:[%s6011_s2 + $0xe0] sm:$0xff]  }
 0x213   :  { %v2974_v40 = vpop.f32.mrf.mxu1  ;;  %3213 = vmatmul.mubr.bf16.gmra.mxu1 %v4014_v0  ;;  %2597 = vmatprep.mubr.bf16.mxu0 %v2094_v59  ;;  %v1546_v38 = vadd.f32 %v5333_v47, %v5331_v46 }
 0x214   :  { %3546 = vst [vmem:[%s6013_s6 + $0x28] sm:$0xff] %v3418_v10  ;;  %v3419_v11 = vmax.f32 %v3291_v32, 0.0  ;;  %v3292_v45 = vadd.f32 %v5413_v60, %v2971_v57  ;;  %v2975_v27 = vadd.f32 %v2974_v40, %v2349_v8  ;;  %3222 = vmatprep.mubr.bf16.mxu1 %v6033_v17  ;;  %v2351_v44 = vpop.f32.mrf.mxu0  ;;  %v1550_v10 = vadd.f32 %v5350_v53, %v5348_v34  ;;  %v6037_v40 = vld [vmem:[#allocation4_spill] sm:$0xff] }
 0x215   :  { %v2976_v41 = vpop.f32.mrf.mxu1 }
 0x216   :  { %3547 = vst [vmem:[%s6013_s6 + $0x30] sm:$0xff] %v3419_v11  ;;  %v3420_v29 = vmax.f32 %v3292_v45, 0.0  ;;  %v3293_v15 = vadd.f32 %v5411_v28, %v2975_v27  ;;  %v2977_v3 = vadd.f32 %v2976_v41, %v2351_v44  ;;  %v2353_v21 = vpop.f32.mrf.mxu0  ;;  %v1534_v11 = vadd.f32 %v6037_v40, %v5296_v14 }
 0x217   :  { %v2978_v22 = vpop.f32.mrf.mxu1  ;;  %v2098_v58 = vpack.c.bf16 %v1550_v10, %v1546_v38 }
 0x218   :  { %3548 = vst [vmem:[%s6013_s6 + $0x38] sm:$0xff] %v3420_v29  ;;  %v3421_v5 = vmax.f32 %v3293_v15, 0.0  ;;  %v3294_v42 = vadd.f32 %v5413_v60, %v2977_v3  ;;  %v2979_v33 = vadd.f32 %v2978_v22, %v2353_v21  ;;  %v2355_v50 = vpop.f32.mrf.mxu0  ;;  %v2095_v44 = vpack.c.bf16 %v1538_v56, %v1534_v11  ;;  %v6038_v11 = vld [vmem:[#allocation5_spill] sm:$0xff] }
 0x219   :  { %v2980_v43 = vpop.f32.mrf.mxu1  ;;  %v1548_v22 = vadd.f32 %v5341_v54, %v5339_v26  ;;  %v4017_v26 = vld [vmem:[%s6011_s2 + $0xe8] sm:$0xff]   ;;  %v1556_v54 = vadd.f32 %v5361_v6, %v5359_v35 }
 0x21a   :  { %3549 = vst [vmem:[%s6013_s6 + $0x40] sm:$0xff] %v3421_v5  ;;  %v3422_v0 = vmax.f32 %v3294_v42, 0.0  ;;  %v3295_v37 = vadd.f32 %v5411_v28, %v2979_v33  ;;  %v2981_v9 = vadd.f32 %v2980_v43, %v2355_v50  ;;  %v2359_v55 = vpop.f32.mrf.mxu0  ;;  %2598 = vmatmul.mubr.bf16.gmra.mxu0 %v2093_v61  ;;  %v1560_v5 = vadd.f32 %v5378_v12, %v5376_v62 }
 0x21b   :  { %v2984_v24 = vpop.f32.mrf.mxu1  ;;  %3223 = vmatmul.mubr.bf16.gmra.mxu1 %v4015_v51  ;;  %2607 = vmatprep.mubr.bf16.mxu0 %v2096_v49  ;;  %v1544_v50 = vadd.f32 %v5326_v19, %v5324_v7 }
 0x21c   :  { %3550 = vst [vmem:[%s6013_s6 + $0x48] sm:$0xff] %v3422_v0  ;;  %v3423_v39 = vmax.f32 %v3295_v37, 0.0  ;;  %v3296_v36 = vadd.f32 %v5413_v60, %v2981_v9  ;;  %v2985_v2 = vadd.f32 %v2984_v24, %v2359_v55  ;;  %3232 = vmatprep.mubr.bf16.mxu1 %v6033_v17  ;;  %v2361_v25 = vpop.f32.mrf.mxu0  ;;  %v2100_v19 = vpack.c.bf16 %v1560_v5, %v1556_v54  ;;  %v6042_v5 = vld [vmem:[#allocation7_spill] sm:$0xff] }
 0x21d   :  { %v2986_v59 = vpop.f32.mrf.mxu1  ;;  %v2097_v37 = vpack.c.bf16 %v1548_v22, %v1544_v50 }
 0x21e   :  { %3551 = vst [vmem:[%s6013_s6 + $0x50] sm:$0xff] %v3423_v39  ;;  %v3424_v32 = vmax.f32 %v3296_v36, 0.0  ;;  %v3297_v57 = vadd.f32 %v5411_v28, %v2985_v2  ;;  %v2987_v8 = vadd.f32 %v2986_v59, %v2361_v25  ;;  %v2363_v45 = vpop.f32.mrf.mxu0  ;;  %v1558_v25 = vadd.f32 %v5369_v18, %v5367_v1  ;;  %v4018_v1 = vld [vmem:[%s6011_s2 + $0xf0] sm:$0xff]  }
 0x21f   :  { %v2988_v27 = vpop.f32.mrf.mxu1  ;;  %v1566_v18 = vadd.f32 %v5389_v30, %v5387_v13 }
 0x220   :  { %3552 = vst [vmem:[%s6013_s6 + $0x58] sm:$0xff] %v3424_v32  ;;  %v3425_v34 = vmax.f32 %v3297_v57, 0.0  ;;  %v3298_v53 = vadd.f32 %v5413_v60, %v2987_v8  ;;  %v2989_v31 = vadd.f32 %v2988_v27, %v2363_v45  ;;  %v2365_v41 = vpop.f32.mrf.mxu0  ;;  %v1570_v32 = vadd.f32 %v5409_v23, %v5407_v52 }
 0x221   :  { %v2990_v14 = vpop.f32.mrf.mxu1  ;;  %v1554_v45 = vadd.f32 %v6038_v11, %v5352_v63 }
 0x222   :  { %3553 = vst [vmem:[%s6013_s6 + $0x60] sm:$0xff] %v3425_v34  ;;  %v3426_v29 = vmax.f32 %v3298_v53, 0.0  ;;  %v3299_v15 = vadd.f32 %v5411_v28, %v2989_v31  ;;  %v2991_v46 = vadd.f32 %v2990_v14, %v2365_v41  ;;  %v2369_v47 = vpop.f32.mrf.mxu0  ;;  %2608 = vmatmul.mubr.bf16.gmra.mxu0 %v2095_v44  ;;  %v2102_v31 = vpack.c.bf16 %v1570_v32, %v1566_v18 }
 0x223   :  { %v2994_v3 = vpop.f32.mrf.mxu1  ;;  %3233 = vmatmul.mubr.bf16.gmra.mxu1 %v4016_v20  ;;  %2617 = vmatprep.mubr.bf16.mxu0 %v2098_v58  ;;  %v2099_v34 = vpack.c.bf16 %v1558_v25, %v1554_v45 }
 0x224   :  { %3554 = vst [vmem:[%s6013_s6 + $0x68] sm:$0xff] %v3426_v29  ;;  %v3427_v48 = vmax.f32 %v3299_v15, 0.0  ;;  %v3300_v16 = vadd.f32 %v5413_v60, %v2991_v46  ;;  %v2995_v21 = vadd.f32 %v2994_v3, %v2369_v47  ;;  %3242 = vmatprep.mubr.bf16.mxu1 %v6033_v17  ;;  %v2371_v51 = vpop.f32.mrf.mxu0  ;;  %v6039_v46 = vld [vmem:[#allocation8_spill] sm:$0xff]  ;;  %v6040_v47 = vld [vmem:[#allocation9_spill] sm:$0xff] }
 0x225   :  { %v2996_v4 = vpop.f32.mrf.mxu1  ;;  %v1568_v3 = vadd.f32 %v6040_v47, %v6039_v46 }
 0x226   :  { %3555 = vst [vmem:[%s6013_s6 + $0x70] sm:$0xff] %v3427_v48  ;;  %v3428_v42 = vmax.f32 %v3300_v16, 0.0  ;;  %v3301_v33 = vadd.f32 %v5411_v28, %v2995_v21  ;;  %v2997_v61 = vadd.f32 %v2996_v4, %v2371_v51  ;;  %v2373_v43 = vpop.f32.mrf.mxu0  ;;  %v6041_v4 = vld [vmem:[#allocation6_spill] sm:$0xff] }
 0x227   :  { %v2998_v49 = vpop.f32.mrf.mxu1 }
 0x228   :  { %3556 = vst [vmem:[%s6013_s6 + $0x78] sm:$0xff] %v3428_v42  ;;  %v3429_v62 = vmax.f32 %v3301_v33, 0.0  ;;  %v3302_v12 = vadd.f32 %v5413_v60, %v2997_v61  ;;  %v2999_v0 = vadd.f32 %v2998_v49, %v2373_v43  ;;  %v2375_v9 = vpop.f32.mrf.mxu0  ;;  %v1564_v42 = vadd.f32 %v6042_v5, %v6041_v4 }
 0x229   :  { %v3000_v7 = vpop.f32.mrf.mxu1 }
 0x22a   :  { %3557 = vst [vmem:[%s6013_s6 + $0x80] sm:$0xff] %v3429_v62  ;;  %v3430_v55 = vmax.f32 %v3302_v12, 0.0  ;;  %v3303_v24 = vadd.f32 %v5411_v28, %v2999_v0  ;;  %v3001_v35 = vadd.f32 %v3000_v7, %v2375_v9  ;;  %v2379_v6 = vpop.f32.mrf.mxu0  ;;  %2618 = vmatmul.mubr.bf16.gmra.mxu0 %v2097_v37 }
 0x22b   :  { %v3004_v39 = vpop.f32.mrf.mxu1  ;;  %3243 = vmatmul.mubr.bf16.gmra.mxu1 %v4017_v26  ;;  %2627 = vmatprep.mubr.bf16.mxu0 %v2100_v19  ;;  %v2101_v26 = vpack.c.bf16 %v1568_v3, %v1564_v42 }
 0x22c   :  { %3558 = vst [vmem:[%s6013_s6 + $0x88] sm:$0xff] %v3430_v55  ;;  %v3431_v36 = vmax.f32 %v3303_v24, 0.0  ;;  %v3304_v2 = vadd.f32 %v5413_v60, %v3001_v35  ;;  %v3005_v56 = vadd.f32 %v3004_v39, %v2379_v6  ;;  %3252 = vmatprep.mubr.bf16.mxu1 %v6033_v17  ;;  %v2381_v59 = vpop.f32.mrf.mxu0 }
 0x22d   :  { %v3006_v10 = vpop.f32.mrf.mxu1 }
 0x22e   :  { %3559 = vst [vmem:[%s6013_s6 + $0x90] sm:$0xff] %v3431_v36  ;;  %v3432_v57 = vmax.f32 %v3304_v2, 0.0  ;;  %v3305_v8 = vadd.f32 %v5411_v28, %v3005_v56  ;;  %v3007_v40 = vadd.f32 %v3006_v10, %v2381_v59  ;;  %v2383_v27 = vpop.f32.mrf.mxu0 }
 0x22f   :  { %v3008_v20 = vpop.f32.mrf.mxu1 }
 0x230   :  { %3560 = vst [vmem:[%s6013_s6 + $0x98] sm:$0xff] %v3432_v57  ;;  %v3433_v52 = vmax.f32 %v3305_v8, 0.0  ;;  %v3306_v23 = vadd.f32 %v5413_v60, %v3007_v40  ;;  %v3009_v38 = vadd.f32 %v3008_v20, %v2383_v27  ;;  %v2385_v53 = vpop.f32.mrf.mxu0 }
 0x231   :  { %v3010_v63 = vpop.f32.mrf.mxu1 }
 0x232   :  { %3561 = vst [vmem:[%s6013_s6 + $0xa0] sm:$0xff] %v3433_v52  ;;  %v3434_v44 = vmax.f32 %v3306_v23, 0.0  ;;  %v3307_v41 = vadd.f32 %v5411_v28, %v3009_v38  ;;  %v3011_v13 = vadd.f32 %v3010_v63, %v2385_v53  ;;  %v2389_v30 = vpop.f32.mrf.mxu0  ;;  %2628 = vmatmul.mubr.bf16.gmra.mxu0 %v2099_v34 }
 0x233   :  { %v3014_v14 = vpop.f32.mrf.mxu1  ;;  %3253 = vmatmul.mubr.bf16.gmra.mxu1 %v4018_v1  ;;  %2637 = vmatprep.mubr.bf16.mxu0 %v2102_v31 }
 0x234   :  { %3562 = vst [vmem:[%s6013_s6 + $0xa8] sm:$0xff] %v3434_v44  ;;  %v3435_v58 = vmax.f32 %v3307_v41, 0.0  ;;  %v3308_v29 = vadd.f32 %v5413_v60, %v3011_v13  ;;  %v3015_v15 = vadd.f32 %v3014_v14, %v2389_v30  ;;  %3262 = vmatprep.mubr.bf16.mxu1 %v6033_v17  ;;  %v2391_v48 = vpop.f32.mrf.mxu0  ;;  %v4019_v17 = vld [vmem:[%s6011_s2 + $0xf8] sm:$0xff]  }
 0x235   :  { %v3016_v16 = vpop.f32.mrf.mxu1 }
 0x236   :  { %3563 = vst [vmem:[%s6013_s6 + $0xb0] sm:$0xff] %v3435_v58  ;;  %v3436_v21 = vmax.f32 %v3308_v29, 0.0  ;;  %v3309_v22 = vadd.f32 %v5411_v28, %v3015_v15  ;;  %v3017_v51 = vadd.f32 %v3016_v16, %v2391_v48  ;;  %v2393_v33 = vpop.f32.mrf.mxu0 }
 0x237   :  { %v3018_v61 = vpop.f32.mrf.mxu1 }
 0x238   :  { %3564 = vst [vmem:[%s6013_s6 + $0xb8] sm:$0xff] %v3436_v21  ;;  %v3437_v50 = vmax.f32 %v3309_v22, 0.0  ;;  %v3310_v43 = vadd.f32 %v5413_v60, %v3017_v51  ;;  %v3019_v49 = vadd.f32 %v3018_v61, %v2393_v33  ;;  %v2395_v54 = vpop.f32.mrf.mxu0 }
 0x239   :  { %v3020_v62 = vpop.f32.mrf.mxu1 }
 0x23a   :  { %3565 = vst [vmem:[%s6013_s6 + $0xc0] sm:$0xff] %v3437_v50  ;;  %v3438_v12 = vmax.f32 %v3310_v43, 0.0  ;;  %v3311_v0 = vadd.f32 %v5411_v28, %v3019_v49  ;;  %v3021_v37 = vadd.f32 %v3020_v62, %v2395_v54  ;;  %v2399_v9 = vpop.f32.mrf.mxu0  ;;  %2638 = vmatmul.mubr.bf16.gmra.mxu0 %v2101_v26 }
 0x23b   :  { %v3024_v7 = vpop.f32.mrf.mxu1  ;;  %3263 = vmatmul.mubr.bf16.gmra.mxu1 %v4019_v17 }
 0x23c   :  { %3566 = vst [vmem:[%s6013_s6 + $0xc8] sm:$0xff] %v3438_v12  ;;  %v3439_v19 = vmax.f32 %v3311_v0, 0.0  ;;  %v3312_v55 = vadd.f32 %v5413_v60, %v3021_v37  ;;  %v3025_v24 = vadd.f32 %v3024_v7, %v2399_v9  ;;  %v2401_v35 = vpop.f32.mrf.mxu0 }
 0x23d   :  { %v3026_v6 = vpop.f32.mrf.mxu1 }
 0x23e   :  { %3567 = vst [vmem:[%s6013_s6 + $0xd0] sm:$0xff] %v3439_v19  ;;  %v3440_v39 = vmax.f32 %v3312_v55, 0.0  ;;  %v3313_v36 = vadd.f32 %v5411_v28, %v3025_v24  ;;  %v3027_v2 = vadd.f32 %v3026_v6, %v2401_v35  ;;  %v2403_v56 = vpop.f32.mrf.mxu0 }
 0x23f   :  { %v3028_v25 = vpop.f32.mrf.mxu1 }
 0x240   :  { %3568 = vst [vmem:[%s6013_s6 + $0xd8] sm:$0xff] %v3440_v39  ;;  %v3441_v59 = vmax.f32 %v3313_v36, 0.0  ;;  %v3314_v10 = vadd.f32 %v5413_v60, %v3027_v2  ;;  %v3029_v32 = vadd.f32 %v3028_v25, %v2403_v56  ;;  %v2405_v57 = vpop.f32.mrf.mxu0 }
 0x241   :  { %v3030_v8 = vpop.f32.mrf.mxu1 }
 0x242   :  { %3569 = vst [vmem:[%s6013_s6 + $0xe0] sm:$0xff] %v3441_v59  ;;  %v3442_v40 = vmax.f32 %v3314_v10, 0.0  ;;  %v3315_v11 = vadd.f32 %v5411_v28, %v3029_v32  ;;  %v3031_v45 = vadd.f32 %v3030_v8, %v2405_v57  ;;  %v2409_v27 = vpop.f32.mrf.mxu0 }
 0x243   :  { %v3034_v20 = vpop.f32.mrf.mxu1 }
 0x244   :  { %3570 = vst [vmem:[%s6013_s6 + $0xe8] sm:$0xff] %v3442_v40  ;;  %v3443_v1 = vmax.f32 %v3315_v11, 0.0  ;;  %v3316_v18 = vadd.f32 %v5413_v60, %v3031_v45  ;;  %v3035_v52 = vadd.f32 %v3034_v20, %v2409_v27  ;;  %v2411_v23 = vpop.f32.mrf.mxu0 }
 0x245   :  { %v3036_v38 = vpop.f32.mrf.mxu1 }
 0x246   :  { %3571 = vst [vmem:[%s6013_s6 + $0xf0] sm:$0xff] %v3443_v1  ;;  %v3444_v34 = vmax.f32 %v3316_v18, 0.0  ;;  %v3317_v53 = vadd.f32 %v5411_v28, %v3035_v52  ;;  %v3037_v63 = vadd.f32 %v3036_v38, %v2411_v23  ;;  %v2413_v31 = vpop.f32.mrf.mxu0 }
 0x247   :  { %v3038_v44 = vpop.f32.mrf.mxu1 }
 0x248   :  { %3572 = vst [vmem:[%s6013_s6 + $0xf8] sm:$0xff] %v3444_v34  ;;  %v3445_v41 = vmax.f32 %v3317_v53, 0.0  ;;  %v3318_v13 = vadd.f32 %v5413_v60, %v3037_v63  ;;  %v3039_v30 = vadd.f32 %v3038_v44, %v2413_v31  ;;  %v2415_v14 = vpop.f32.mrf.mxu0 }
 0x249   :  { %v3040_v58 = vpop.f32.mrf.mxu1 }
 0x24a   :  { %3573 = vst [vmem:[%s6013_s6 + $0x100] sm:$0xff] %v3445_v41  ;;  %v3446_v29 = vmax.f32 %v3318_v13, 0.0  ;;  %v3319_v15 = vadd.f32 %v5411_v28, %v3039_v30  ;;  %v3041_v46 = vadd.f32 %v3040_v58, %v2415_v14  ;;  %v2419_v47 = vpop.f32.mrf.mxu0 }
 0x24b   :  { %v3044_v3 = vpop.f32.mrf.mxu1 }
 0x24c   :  { %3574 = vst [vmem:[%s6013_s6 + $0x108] sm:$0xff] %v3446_v29  ;;  %v3447_v48 = vmax.f32 %v3319_v15, 0.0  ;;  %v3320_v16 = vadd.f32 %v5413_v60, %v3041_v46  ;;  %v3045_v21 = vadd.f32 %v3044_v3, %v2419_v47  ;;  %v2421_v22 = vpop.f32.mrf.mxu0 }
 0x24d   :  { %v3046_v51 = vpop.f32.mrf.mxu1 }
 0x24e   :  { %3575 = vst [vmem:[%s6013_s6 + $0x110] sm:$0xff] %v3447_v48  ;;  %v3448_v4 = vmax.f32 %v3320_v16, 0.0  ;;  %v3321_v5 = vadd.f32 %v5411_v28, %v3045_v21  ;;  %v3047_v42 = vadd.f32 %v3046_v51, %v2421_v22  ;;  %v2423_v33 = vpop.f32.mrf.mxu0 }
 0x24f   :  { %v3048_v61 = vpop.f32.mrf.mxu1 }
 0x250   :  { %3576 = vst [vmem:[%s6013_s6 + $0x118] sm:$0xff] %v3448_v4  ;;  %v3449_v17 = vmax.f32 %v3321_v5, 0.0  ;;  %v3322_v50 = vadd.f32 %v5413_v60, %v3047_v42  ;;  %v3049_v43 = vadd.f32 %v3048_v61, %v2423_v33  ;;  %v2425_v49 = vpop.f32.mrf.mxu0 }
 0x251   :  { %v3050_v26 = vpop.f32.mrf.mxu1 }
 0x252   :  { %3577 = vst [vmem:[%s6013_s6 + $0x120] sm:$0xff] %v3449_v17  ;;  %v3450_v54 = vmax.f32 %v3322_v50, 0.0  ;;  %v3323_v62 = vadd.f32 %v5411_v28, %v3049_v43  ;;  %v3051_v12 = vadd.f32 %v3050_v26, %v2425_v49  ;;  %v2429_v0 = vpop.f32.mrf.mxu0 }
 0x253   :  { %v3054_v37 = vpop.f32.mrf.mxu1 }
 0x254   :  { %3578 = vst [vmem:[%s6013_s6 + $0x128] sm:$0xff] %v3450_v54  ;;  %v3451_v9 = vmax.f32 %v3323_v62, 0.0  ;;  %v3324_v7 = vadd.f32 %v5413_v60, %v3051_v12  ;;  %v3055_v19 = vadd.f32 %v3054_v37, %v2429_v0  ;;  %v2431_v55 = vpop.f32.mrf.mxu0 }
 0x255   :  { %v3056_v24 = vpop.f32.mrf.mxu1 }
 0x256   :  { %3579 = vst [vmem:[%s6013_s6 + $0x130] sm:$0xff] %v3451_v9  ;;  %v3452_v35 = vmax.f32 %v3324_v7, 0.0  ;;  %v3325_v6 = vadd.f32 %v5411_v28, %v3055_v19  ;;  %v3057_v39 = vadd.f32 %v3056_v24, %v2431_v55  ;;  %v2433_v36 = vpop.f32.mrf.mxu0 }
 0x257   :  { %v3058_v2 = vpop.f32.mrf.mxu1 }
 0x258   :  { %3580 = vst [vmem:[%s6013_s6 + $0x138] sm:$0xff] %v3452_v35  ;;  %v3453_v56 = vmax.f32 %v3325_v6, 0.0  ;;  %v3326_v25 = vadd.f32 %v5413_v60, %v3057_v39  ;;  %v3059_v59 = vadd.f32 %v3058_v2, %v2433_v36  ;;  %v2435_v10 = vpop.f32.mrf.mxu0 }
 0x259   :  { %v3060_v32 = vpop.f32.mrf.mxu1 }
 0x25a   :  { %3581 = vst [vmem:[%s6013_s6 + $0x140] sm:$0xff] %v3453_v56  ;;  %v3454_v57 = vmax.f32 %v3326_v25, 0.0  ;;  %v3327_v8 = vadd.f32 %v5411_v28, %v3059_v59  ;;  %v3061_v40 = vadd.f32 %v3060_v32, %v2435_v10  ;;  %v2439_v11 = vpop.f32.mrf.mxu0 }
 0x25b   :  { %v3064_v45 = vpop.f32.mrf.mxu1 }
 0x25c   :  { %3582 = vst [vmem:[%s6013_s6 + $0x148] sm:$0xff] %v3454_v57  ;;  %v3455_v27 = vmax.f32 %v3327_v8, 0.0  ;;  %v3328_v20 = vadd.f32 %v5413_v60, %v3061_v40  ;;  %v3065_v1 = vadd.f32 %v3064_v45, %v2439_v11  ;;  %v2441_v18 = vpop.f32.mrf.mxu0 }
 0x25d   :  { %v3066_v52 = vpop.f32.mrf.mxu1 }
 0x25e   :  { %3583 = vst [vmem:[%s6013_s6 + $0x150] sm:$0xff] %v3455_v27  ;;  %v3456_v23 = vmax.f32 %v3328_v20, 0.0  ;;  %v3329_v38 = vadd.f32 %v5411_v28, %v3065_v1  ;;  %v3067_v34 = vadd.f32 %v3066_v52, %v2441_v18  ;;  %v2443_v53 = vpop.f32.mrf.mxu0 }
 0x25f   :  { %v3068_v63 = vpop.f32.mrf.mxu1 }
 0x260   :  { %3584 = vst [vmem:[%s6013_s6 + $0x158] sm:$0xff] %v3456_v23  ;;  %v3457_v31 = vmax.f32 %v3329_v38, 0.0  ;;  %v3330_v44 = vadd.f32 %v5413_v60, %v3067_v34  ;;  %v3069_v41 = vadd.f32 %v3068_v63, %v2443_v53  ;;  %v2445_v13 = vpop.f32.mrf.mxu0 }
 0x261   :  { %v3070_v30 = vpop.f32.mrf.mxu1 }
 0x262   :  { %3585 = vst [vmem:[%s6013_s6 + $0x160] sm:$0xff] %v3457_v31  ;;  %v3458_v14 = vmax.f32 %v3330_v44, 0.0  ;;  %v3331_v58 = vadd.f32 %v5411_v28, %v3069_v41  ;;  %v3071_v29 = vadd.f32 %v3070_v30, %v2445_v13  ;;  %v2449_v15 = vpop.f32.mrf.mxu0 }
 0x263   :  { %v3074_v46 = vpop.f32.mrf.mxu1 }
 0x264   :  { %3586 = vst [vmem:[%s6013_s6 + $0x168] sm:$0xff] %v3458_v14  ;;  %v3459_v47 = vmax.f32 %v3331_v58, 0.0  ;;  %v3332_v3 = vadd.f32 %v5413_v60, %v3071_v29  ;;  %v3075_v48 = vadd.f32 %v3074_v46, %v2449_v15  ;;  %v2451_v16 = vpop.f32.mrf.mxu0 }
 0x265   :  { %v3076_v21 = vpop.f32.mrf.mxu1 }
 0x266   :  { %3587 = vst [vmem:[%s6013_s6 + $0x170] sm:$0xff] %v3459_v47  ;;  %v3460_v22 = vmax.f32 %v3332_v3, 0.0  ;;  %v3333_v51 = vadd.f32 %v5411_v28, %v3075_v48  ;;  %v3077_v4 = vadd.f32 %v3076_v21, %v2451_v16  ;;  %v2453_v5 = vpop.f32.mrf.mxu0 }
 0x267   :  { %v3078_v42 = vpop.f32.mrf.mxu1 }
 0x268   :  { %3588 = vst [vmem:[%s6013_s6 + $0x178] sm:$0xff] %v3460_v22  ;;  %v3461_v33 = vmax.f32 %v3333_v51, 0.0  ;;  %v3334_v61 = vadd.f32 %v5413_v60, %v3077_v4  ;;  %v3079_v17 = vadd.f32 %v3078_v42, %v2453_v5  ;;  %v2455_v50 = vpop.f32.mrf.mxu0 }
 0x269   :  { %v3080_v43 = vpop.f32.mrf.mxu1 }
 0x26a   :  { %3589 = vst [vmem:[%s6013_s6 + $0x180] sm:$0xff] %v3461_v33  ;;  %v3462_v49 = vmax.f32 %v3334_v61, 0.0  ;;  %v3335_v26 = vadd.f32 %v5411_v28, %v3079_v17  ;;  %v3081_v54 = vadd.f32 %v3080_v43, %v2455_v50  ;;  %v2459_v62 = vpop.f32.mrf.mxu0 }
 0x26b   :  { %v3084_v12 = vpop.f32.mrf.mxu1 }
 0x26c   :  { %3590 = vst [vmem:[%s6013_s6 + $0x188] sm:$0xff] %v3462_v49  ;;  %v3463_v0 = vmax.f32 %v3335_v26, 0.0  ;;  %v3336_v37 = vadd.f32 %v5413_v60, %v3081_v54  ;;  %v3085_v9 = vadd.f32 %v3084_v12, %v2459_v62  ;;  %v2461_v7 = vpop.f32.mrf.mxu0 }
 0x26d   :  { %v3086_v19 = vpop.f32.mrf.mxu1 }
 0x26e   :  { %3591 = vst [vmem:[%s6013_s6 + $0x190] sm:$0xff] %v3463_v0  ;;  %v3464_v55 = vmax.f32 %v3336_v37, 0.0  ;;  %v3337_v24 = vadd.f32 %v5411_v28, %v3085_v9  ;;  %v3087_v35 = vadd.f32 %v3086_v19, %v2461_v7  ;;  %v2463_v6 = vpop.f32.mrf.mxu0 }
 0x26f   :  { %v3088_v39 = vpop.f32.mrf.mxu1 }
 0x270   :  { %3592 = vst [vmem:[%s6013_s6 + $0x198] sm:$0xff] %v3464_v55  ;;  %v3465_v36 = vmax.f32 %v3337_v24, 0.0  ;;  %v3338_v2 = vadd.f32 %v5413_v60, %v3087_v35  ;;  %v3089_v56 = vadd.f32 %v3088_v39, %v2463_v6  ;;  %v2465_v25 = vpop.f32.mrf.mxu0 }
 0x271   :  { %v3090_v59 = vpop.f32.mrf.mxu1 }
 0x272   :  { %3593 = vst [vmem:[%s6013_s6 + $0x1a0] sm:$0xff] %v3465_v36  ;;  %v3466_v10 = vmax.f32 %v3338_v2, 0.0  ;;  %v3339_v32 = vadd.f32 %v5411_v28, %v3089_v56  ;;  %v3091_v57 = vadd.f32 %v3090_v59, %v2465_v25  ;;  %v2469_v8 = vpop.f32.mrf.mxu0 }
 0x273   :  { %v3094_v40 = vpop.f32.mrf.mxu1 }
 0x274   :  { %3594 = vst [vmem:[%s6013_s6 + $0x1a8] sm:$0xff] %v3466_v10  ;;  %v3467_v11 = vmax.f32 %v3339_v32, 0.0  ;;  %v3340_v45 = vadd.f32 %v5413_v60, %v3091_v57  ;;  %v3095_v27 = vadd.f32 %v3094_v40, %v2469_v8  ;;  %v2471_v20 = vpop.f32.mrf.mxu0 }
 0x275   :  { %v3096_v1 = vpop.f32.mrf.mxu1 }
 0x276   :  { %3595 = vst [vmem:[%s6013_s6 + $0x1b0] sm:$0xff] %v3467_v11  ;;  %v3468_v18 = vmax.f32 %v3340_v45, 0.0  ;;  %v3341_v52 = vadd.f32 %v5411_v28, %v3095_v27  ;;  %v3097_v23 = vadd.f32 %v3096_v1, %v2471_v20  ;;  %v2473_v38 = vpop.f32.mrf.mxu0 }
 0x277   :  { %v3098_v34 = vpop.f32.mrf.mxu1 }
 0x278   :  { %3596 = vst [vmem:[%s6013_s6 + $0x1b8] sm:$0xff] %v3468_v18  ;;  %v3469_v53 = vmax.f32 %v3341_v52, 0.0  ;;  %v3342_v63 = vadd.f32 %v5413_v60, %v3097_v23  ;;  %v3099_v31 = vadd.f32 %v3098_v34, %v2473_v38  ;;  %v2475_v44 = vpop.f32.mrf.mxu0 }
 0x279   :  { %v3100_v41 = vpop.f32.mrf.mxu1 }
 0x27a   :  { %3597 = vst [vmem:[%s6013_s6 + $0x1c0] sm:$0xff] %v3469_v53  ;;  %v3470_v13 = vmax.f32 %v3342_v63, 0.0  ;;  %v3343_v30 = vadd.f32 %v5411_v28, %v3099_v31  ;;  %v3101_v14 = vadd.f32 %v3100_v41, %v2475_v44  ;;  %v2479_v58 = vpop.f32.mrf.mxu0 }
 0x27b   :  { %v3104_v29 = vpop.f32.mrf.mxu1 }
 0x27c   :  { %3598 = vst [vmem:[%s6013_s6 + $0x1c8] sm:$0xff] %v3470_v13  ;;  %v3471_v15 = vmax.f32 %v3343_v30, 0.0  ;;  %v3344_v46 = vadd.f32 %v5413_v60, %v3101_v14  ;;  %v3105_v47 = vadd.f32 %v3104_v29, %v2479_v58  ;;  %v2481_v3 = vpop.f32.mrf.mxu0 }
 0x27d   :  { %v3106_v48 = vpop.f32.mrf.mxu1 }
 0x27e   :  { %3599 = vst [vmem:[%s6013_s6 + $0x1d0] sm:$0xff] %v3471_v15  ;;  %v3472_v16 = vmax.f32 %v3344_v46, 0.0  ;;  %v3345_v21 = vadd.f32 %v5411_v28, %v3105_v47  ;;  %v3107_v22 = vadd.f32 %v3106_v48, %v2481_v3  ;;  %v2483_v51 = vpop.f32.mrf.mxu0 }
 0x27f   :  { %v3108_v4 = vpop.f32.mrf.mxu1 }
 0x280   :  { %3600 = vst [vmem:[%s6013_s6 + $0x1d8] sm:$0xff] %v3472_v16  ;;  %v3473_v5 = vmax.f32 %v3345_v21, 0.0  ;;  %v3346_v42 = vadd.f32 %v5413_v60, %v3107_v22  ;;  %v3109_v33 = vadd.f32 %v3108_v4, %v2483_v51  ;;  %v2485_v61 = vpop.f32.mrf.mxu0 }
 0x281   :  { %v3110_v17 = vpop.f32.mrf.mxu1 }
 0x282   :  { %3601 = vst [vmem:[%s6013_s6 + $0x1e0] sm:$0xff] %v3473_v5  ;;  %v3474_v50 = vmax.f32 %v3346_v42, 0.0  ;;  %v3347_v43 = vadd.f32 %v5411_v28, %v3109_v33  ;;  %v3111_v49 = vadd.f32 %v3110_v17, %v2485_v61  ;;  %v2489_v26 = vpop.f32.mrf.mxu0 }
 0x283   :  { %v3114_v54 = vpop.f32.mrf.mxu1 }
 0x284   :  { %3602 = vst [vmem:[%s6013_s6 + $0x1e8] sm:$0xff] %v3474_v50  ;;  %v3475_v62 = vmax.f32 %v3347_v43, 0.0  ;;  %v3348_v12 = vadd.f32 %v5413_v60, %v3111_v49  ;;  %v3115_v0 = vadd.f32 %v3114_v54, %v2489_v26  ;;  %v2491_v37 = vpop.f32.mrf.mxu0 }
 0x285   :  { %v3116_v9 = vpop.f32.mrf.mxu1 }
 0x286   :  { %3603 = vst [vmem:[%s6013_s6 + $0x1f0] sm:$0xff] %v3475_v62  ;;  %v3476_v7 = vmax.f32 %v3348_v12, 0.0  ;;  %v3349_v19 = vadd.f32 %v5411_v28, %v3115_v0  ;;  %v3117_v55 = vadd.f32 %v3116_v9, %v2491_v37  ;;  %v2493_v24 = vpop.f32.mrf.mxu0 }
 0x287   :  { %v3118_v35 = vpop.f32.mrf.mxu1 }
 0x288   :  { %3604 = vst [vmem:[%s6013_s6 + $0x1f8] sm:$0xff] %v3476_v7  ;;  %v3477_v6 = vmax.f32 %v3349_v19, 0.0  ;;  %v3350_v39 = vadd.f32 %v5413_v60, %v3117_v55  ;;  %v3119_v36 = vadd.f32 %v3118_v35, %v2493_v24  ;;  %v2495_v2 = vpop.f32.mrf.mxu0 }
 0x289   :  { %v3120_v56 = vpop.f32.mrf.mxu1 }
 0x28a   :  { %3605 = vst [vmem:[%s6013_s6 + $0x200] sm:$0xff] %v3477_v6  ;;  %v3478_v25 = vmax.f32 %v3350_v39, 0.0  ;;  %v3351_v59 = vadd.f32 %v5411_v28, %v3119_v36  ;;  %v3121_v10 = vadd.f32 %v3120_v56, %v2495_v2  ;;  %v2499_v32 = vpop.f32.mrf.mxu0 }
 0x28b   :  { %v3124_v57 = vpop.f32.mrf.mxu1 }
 0x28c   :  { %3606 = vst [vmem:[%s6013_s6 + $0x208] sm:$0xff] %v3478_v25  ;;  %v3479_v8 = vmax.f32 %v3351_v59, 0.0  ;;  %v3352_v40 = vadd.f32 %v5413_v60, %v3121_v10  ;;  %v3125_v11 = vadd.f32 %v3124_v57, %v2499_v32  ;;  %v2501_v45 = vpop.f32.mrf.mxu0 }
 0x28d   :  { %v3126_v27 = vpop.f32.mrf.mxu1 }
 0x28e   :  { %3607 = vst [vmem:[%s6013_s6 + $0x210] sm:$0xff] %v3479_v8  ;;  %v3480_v20 = vmax.f32 %v3352_v40, 0.0  ;;  %v3353_v1 = vadd.f32 %v5411_v28, %v3125_v11  ;;  %v3127_v18 = vadd.f32 %v3126_v27, %v2501_v45  ;;  %v2503_v52 = vpop.f32.mrf.mxu0 }
 0x28f   :  { %v3128_v23 = vpop.f32.mrf.mxu1 }
 0x290   :  { %3608 = vst [vmem:[%s6013_s6 + $0x218] sm:$0xff] %v3480_v20  ;;  %v3481_v38 = vmax.f32 %v3353_v1, 0.0  ;;  %v3354_v34 = vadd.f32 %v5413_v60, %v3127_v18  ;;  %v3129_v53 = vadd.f32 %v3128_v23, %v2503_v52  ;;  %v2505_v63 = vpop.f32.mrf.mxu0 }
 0x291   :  { %v3130_v31 = vpop.f32.mrf.mxu1 }
 0x292   :  { %3609 = vst [vmem:[%s6013_s6 + $0x220] sm:$0xff] %v3481_v38  ;;  %v3482_v44 = vmax.f32 %v3354_v34, 0.0  ;;  %v3355_v41 = vadd.f32 %v5411_v28, %v3129_v53  ;;  %v3131_v13 = vadd.f32 %v3130_v31, %v2505_v63  ;;  %v2509_v30 = vpop.f32.mrf.mxu0 }
 0x293   :  { %v3134_v14 = vpop.f32.mrf.mxu1 }
 0x294   :  { %3610 = vst [vmem:[%s6013_s6 + $0x228] sm:$0xff] %v3482_v44  ;;  %v3483_v58 = vmax.f32 %v3355_v41, 0.0  ;;  %v3356_v29 = vadd.f32 %v5413_v60, %v3131_v13  ;;  %v3135_v15 = vadd.f32 %v3134_v14, %v2509_v30  ;;  %v2511_v46 = vpop.f32.mrf.mxu0 }
 0x295   :  { %v3136_v47 = vpop.f32.mrf.mxu1 }
 0x296   :  { %3611 = vst [vmem:[%s6013_s6 + $0x230] sm:$0xff] %v3483_v58  ;;  %v3484_v3 = vmax.f32 %v3356_v29, 0.0  ;;  %v3357_v48 = vadd.f32 %v5411_v28, %v3135_v15  ;;  %v3137_v16 = vadd.f32 %v3136_v47, %v2511_v46  ;;  %v2513_v21 = vpop.f32.mrf.mxu0 }
 0x297   :  { %v3138_v22 = vpop.f32.mrf.mxu1 }
 0x298   :  { %3612 = vst [vmem:[%s6013_s6 + $0x238] sm:$0xff] %v3484_v3  ;;  %v3485_v51 = vmax.f32 %v3357_v48, 0.0  ;;  %v3358_v4 = vadd.f32 %v5413_v60, %v3137_v16  ;;  %v3139_v5 = vadd.f32 %v3138_v22, %v2513_v21  ;;  %v2515_v42 = vpop.f32.mrf.mxu0 }
 0x299   :  { %v3140_v33 = vpop.f32.mrf.mxu1 }
 0x29a   :  { %3613 = vst [vmem:[%s6013_s6 + $0x240] sm:$0xff] %v3485_v51  ;;  %v3486_v61 = vmax.f32 %v3358_v4, 0.0  ;;  %v3359_v17 = vadd.f32 %v5411_v28, %v3139_v5  ;;  %v3141_v50 = vadd.f32 %v3140_v33, %v2515_v42  ;;  %v2519_v43 = vpop.f32.mrf.mxu0 }
 0x29b   :  { %v3144_v49 = vpop.f32.mrf.mxu1 }
 0x29c   :  { %3614 = vst [vmem:[%s6013_s6 + $0x248] sm:$0xff] %v3486_v61  ;;  %v3487_v26 = vmax.f32 %v3359_v17, 0.0  ;;  %v3360_v54 = vadd.f32 %v5413_v60, %v3141_v50  ;;  %v3145_v62 = vadd.f32 %v3144_v49, %v2519_v43  ;;  %v2521_v12 = vpop.f32.mrf.mxu0 }
 0x29d   :  { %v3146_v0 = vpop.f32.mrf.mxu1 }
 0x29e   :  { %3615 = vst [vmem:[%s6013_s6 + $0x250] sm:$0xff] %v3487_v26  ;;  %v3488_v37 = vmax.f32 %v3360_v54, 0.0  ;;  %v3361_v9 = vadd.f32 %v5411_v28, %v3145_v62  ;;  %v3147_v7 = vadd.f32 %v3146_v0, %v2521_v12  ;;  %v2523_v19 = vpop.f32.mrf.mxu0 }
 0x29f   :  { %v3148_v55 = vpop.f32.mrf.mxu1 }
 0x2a0   :  { %3616 = vst [vmem:[%s6013_s6 + $0x258] sm:$0xff] %v3488_v37  ;;  %v3489_v24 = vmax.f32 %v3361_v9, 0.0  ;;  %v3362_v35 = vadd.f32 %v5413_v60, %v3147_v7  ;;  %v3149_v6 = vadd.f32 %v3148_v55, %v2523_v19  ;;  %v2525_v39 = vpop.f32.mrf.mxu0 }
 0x2a1   :  { %v3150_v36 = vpop.f32.mrf.mxu1 }
 0x2a2   :  { %3617 = vst [vmem:[%s6013_s6 + $0x260] sm:$0xff] %v3489_v24  ;;  %v3490_v2 = vmax.f32 %v3362_v35, 0.0  ;;  %v3363_v56 = vadd.f32 %v5411_v28, %v3149_v6  ;;  %v3151_v25 = vadd.f32 %v3150_v36, %v2525_v39  ;;  %v2529_v59 = vpop.f32.mrf.mxu0 }
 0x2a3   :  { %v3154_v10 = vpop.f32.mrf.mxu1 }
 0x2a4   :  { %3618 = vst [vmem:[%s6013_s6 + $0x268] sm:$0xff] %v3490_v2  ;;  %v3491_v32 = vmax.f32 %v3363_v56, 0.0  ;;  %v3364_v57 = vadd.f32 %v5413_v60, %v3151_v25  ;;  %v3155_v8 = vadd.f32 %v3154_v10, %v2529_v59  ;;  %v2531_v40 = vpop.f32.mrf.mxu0 }
 0x2a5   :  { %v3156_v11 = vpop.f32.mrf.mxu1 }
 0x2a6   :  { %3619 = vst [vmem:[%s6013_s6 + $0x270] sm:$0xff] %v3491_v32  ;;  %v3492_v45 = vmax.f32 %v3364_v57, 0.0  ;;  %v3365_v27 = vadd.f32 %v5411_v28, %v3155_v8  ;;  %v3157_v20 = vadd.f32 %v3156_v11, %v2531_v40  ;;  %v2533_v1 = vpop.f32.mrf.mxu0 }
 0x2a7   :  { %v3158_v18 = vpop.f32.mrf.mxu1 }
 0x2a8   :  { %3620 = vst [vmem:[%s6013_s6 + $0x278] sm:$0xff] %v3492_v45  ;;  %v3493_v52 = vmax.f32 %v3365_v27, 0.0  ;;  %v3366_v23 = vadd.f32 %v5413_v60, %v3157_v20  ;;  %v3159_v38 = vadd.f32 %v3158_v18, %v2533_v1  ;;  %v2535_v34 = vpop.f32.mrf.mxu0 }
 0x2a9   :  { %v3160_v53 = vpop.f32.mrf.mxu1 }
 0x2aa   :  { %3621 = vst [vmem:[%s6013_s6 + $0x280] sm:$0xff] %v3493_v52  ;;  %v3494_v63 = vmax.f32 %v3366_v23, 0.0  ;;  %v3367_v31 = vadd.f32 %v5411_v28, %v3159_v38  ;;  %v3161_v44 = vadd.f32 %v3160_v53, %v2535_v34  ;;  %v2539_v41 = vpop.f32.mrf.mxu0 }
 0x2ab   :  { %v3164_v13 = vpop.f32.mrf.mxu1 }
 0x2ac   :  { %3622 = vst [vmem:[%s6013_s6 + $0x288] sm:$0xff] %v3494_v63  ;;  %v3495_v30 = vmax.f32 %v3367_v31, 0.0  ;;  %v3368_v14 = vadd.f32 %v5413_v60, %v3161_v44  ;;  %v3165_v58 = vadd.f32 %v3164_v13, %v2539_v41  ;;  %v2541_v29 = vpop.f32.mrf.mxu0 }
 0x2ad   :  { %v3166_v15 = vpop.f32.mrf.mxu1 }
 0x2ae   :  { %3623 = vst [vmem:[%s6013_s6 + $0x290] sm:$0xff] %v3495_v30  ;;  %v3496_v46 = vmax.f32 %v3368_v14, 0.0  ;;  %v3369_v47 = vadd.f32 %v5411_v28, %v3165_v58  ;;  %v3167_v3 = vadd.f32 %v3166_v15, %v2541_v29  ;;  %v2543_v48 = vpop.f32.mrf.mxu0 }
 0x2af   :  { %v3168_v16 = vpop.f32.mrf.mxu1 }
 0x2b0   :  { %3624 = vst [vmem:[%s6013_s6 + $0x298] sm:$0xff] %v3496_v46  ;;  %v3497_v21 = vmax.f32 %v3369_v47, 0.0  ;;  %v3370_v22 = vadd.f32 %v5413_v60, %v3167_v3  ;;  %v3169_v51 = vadd.f32 %v3168_v16, %v2543_v48  ;;  %v2545_v4 = vpop.f32.mrf.mxu0 }
 0x2b1   :  { %v3170_v5 = vpop.f32.mrf.mxu1 }
 0x2b2   :  { %3625 = vst [vmem:[%s6013_s6 + $0x2a0] sm:$0xff] %v3497_v21  ;;  %v3498_v42 = vmax.f32 %v3370_v22, 0.0  ;;  %v3371_v33 = vadd.f32 %v5411_v28, %v3169_v51  ;;  %v3171_v61 = vadd.f32 %v3170_v5, %v2545_v4  ;;  %v2549_v17 = vpop.f32.mrf.mxu0 }
 0x2b3   :  { %v3174_v50 = vpop.f32.mrf.mxu1 }
 0x2b4   :  { %3626 = vst [vmem:[%s6013_s6 + $0x2a8] sm:$0xff] %v3498_v42  ;;  %v3499_v43 = vmax.f32 %v3371_v33, 0.0  ;;  %v3372_v49 = vadd.f32 %v5413_v60, %v3171_v61  ;;  %v3175_v26 = vadd.f32 %v3174_v50, %v2549_v17  ;;  %v2551_v54 = vpop.f32.mrf.mxu0 }
 0x2b5   :  { %v3176_v62 = vpop.f32.mrf.mxu1 }
 0x2b6   :  { %3627 = vst [vmem:[%s6013_s6 + $0x2b0] sm:$0xff] %v3499_v43  ;;  %v3500_v12 = vmax.f32 %v3372_v49, 0.0  ;;  %v3373_v0 = vadd.f32 %v5411_v28, %v3175_v26  ;;  %v3177_v37 = vadd.f32 %v3176_v62, %v2551_v54  ;;  %v2553_v9 = vpop.f32.mrf.mxu0 }
 0x2b7   :  { %v3178_v7 = vpop.f32.mrf.mxu1 }
 0x2b8   :  { %3628 = vst [vmem:[%s6013_s6 + $0x2b8] sm:$0xff] %v3500_v12  ;;  %v3501_v19 = vmax.f32 %v3373_v0, 0.0  ;;  %v3374_v55 = vadd.f32 %v5413_v60, %v3177_v37  ;;  %v3179_v24 = vadd.f32 %v3178_v7, %v2553_v9  ;;  %v2555_v35 = vpop.f32.mrf.mxu0 }
 0x2b9   :  { %v3180_v6 = vpop.f32.mrf.mxu1 }
 0x2ba   :  { %3629 = vst [vmem:[%s6013_s6 + $0x2c0] sm:$0xff] %v3501_v19  ;;  %v3502_v39 = vmax.f32 %v3374_v55, 0.0  ;;  %v3375_v36 = vadd.f32 %v5411_v28, %v3179_v24  ;;  %v3181_v2 = vadd.f32 %v3180_v6, %v2555_v35  ;;  %v2559_v56 = vpop.f32.mrf.mxu0 }
 0x2bb   :  { %v3184_v25 = vpop.f32.mrf.mxu1 }
 0x2bc   :  { %3630 = vst [vmem:[%s6013_s6 + $0x2c8] sm:$0xff] %v3502_v39  ;;  %v3503_v59 = vmax.f32 %v3375_v36, 0.0  ;;  %v3376_v10 = vadd.f32 %v5413_v60, %v3181_v2  ;;  %v3185_v32 = vadd.f32 %v3184_v25, %v2559_v56  ;;  %v2561_v57 = vpop.f32.mrf.mxu0 }
 0x2bd   :  { %v3186_v8 = vpop.f32.mrf.mxu1 }
 0x2be   :  { %3631 = vst [vmem:[%s6013_s6 + $0x2d0] sm:$0xff] %v3503_v59  ;;  %v3504_v40 = vmax.f32 %v3376_v10, 0.0  ;;  %v3377_v11 = vadd.f32 %v5411_v28, %v3185_v32  ;;  %v3187_v45 = vadd.f32 %v3186_v8, %v2561_v57  ;;  %v2563_v27 = vpop.f32.mrf.mxu0 }
 0x2bf   :  { %v3188_v20 = vpop.f32.mrf.mxu1 }
 0x2c0   :  { %3632 = vst [vmem:[%s6013_s6 + $0x2d8] sm:$0xff] %v3504_v40  ;;  %v3505_v1 = vmax.f32 %v3377_v11, 0.0  ;;  %v3378_v18 = vadd.f32 %v5413_v60, %v3187_v45  ;;  %v3189_v52 = vadd.f32 %v3188_v20, %v2563_v27  ;;  %v2565_v23 = vpop.f32.mrf.mxu0 }
 0x2c1   :  { %v3190_v38 = vpop.f32.mrf.mxu1 }
 0x2c2   :  { %3633 = vst [vmem:[%s6013_s6 + $0x2e0] sm:$0xff] %v3505_v1  ;;  %v3506_v34 = vmax.f32 %v3378_v18, 0.0  ;;  %v3379_v53 = vadd.f32 %v5411_v28, %v3189_v52  ;;  %v3191_v63 = vadd.f32 %v3190_v38, %v2565_v23  ;;  %v2569_v31 = vpop.f32.mrf.mxu0 }
 0x2c3   :  { %v3194_v44 = vpop.f32.mrf.mxu1 }
 0x2c4   :  { %3634 = vst [vmem:[%s6013_s6 + $0x2e8] sm:$0xff] %v3506_v34  ;;  %v3507_v41 = vmax.f32 %v3379_v53, 0.0  ;;  %v3380_v13 = vadd.f32 %v5413_v60, %v3191_v63  ;;  %v3195_v30 = vadd.f32 %v3194_v44, %v2569_v31  ;;  %v2571_v14 = vpop.f32.mrf.mxu0 }
 0x2c5   :  { %v3196_v58 = vpop.f32.mrf.mxu1 }
 0x2c6   :  { %3635 = vst [vmem:[%s6013_s6 + $0x2f0] sm:$0xff] %v3507_v41  ;;  %v3508_v29 = vmax.f32 %v3380_v13, 0.0  ;;  %v3381_v15 = vadd.f32 %v5411_v28, %v3195_v30  ;;  %v3197_v46 = vadd.f32 %v3196_v58, %v2571_v14  ;;  %v2573_v47 = vpop.f32.mrf.mxu0 }
 0x2c7   :  { %v3198_v3 = vpop.f32.mrf.mxu1 }
 0x2c8   :  { %3636 = vst [vmem:[%s6013_s6 + $0x2f8] sm:$0xff] %v3508_v29  ;;  %v3509_v48 = vmax.f32 %v3381_v15, 0.0  ;;  %v3382_v16 = vadd.f32 %v5413_v60, %v3197_v46  ;;  %v3199_v21 = vadd.f32 %v3198_v3, %v2573_v47  ;;  %v2575_v22 = vpop.f32.mrf.mxu0 }
 0x2c9   :  { %v3200_v51 = vpop.f32.mrf.mxu1 }
 0x2ca   :  { %3637 = vst [vmem:[%s6013_s6 + $0x300] sm:$0xff] %v3509_v48  ;;  %v3510_v4 = vmax.f32 %v3382_v16, 0.0  ;;  %v3383_v5 = vadd.f32 %v5411_v28, %v3199_v21  ;;  %v3201_v42 = vadd.f32 %v3200_v51, %v2575_v22  ;;  %v2579_v33 = vpop.f32.mrf.mxu0 }
 0x2cb   :  { %v3204_v61 = vpop.f32.mrf.mxu1 }
 0x2cc   :  { %3638 = vst [vmem:[%s6013_s6 + $0x308] sm:$0xff] %v3510_v4  ;;  %v3511_v17 = vmax.f32 %v3383_v5, 0.0  ;;  %v3384_v50 = vadd.f32 %v5413_v60, %v3201_v42  ;;  %v3205_v43 = vadd.f32 %v3204_v61, %v2579_v33  ;;  %v2581_v49 = vpop.f32.mrf.mxu0 }
 0x2cd   :  { %v3206_v26 = vpop.f32.mrf.mxu1 }
 0x2ce   :  { %3639 = vst [vmem:[%s6013_s6 + $0x310] sm:$0xff] %v3511_v17  ;;  %v3512_v54 = vmax.f32 %v3384_v50, 0.0  ;;  %v3385_v62 = vadd.f32 %v5411_v28, %v3205_v43  ;;  %v3207_v12 = vadd.f32 %v3206_v26, %v2581_v49  ;;  %v2583_v0 = vpop.f32.mrf.mxu0 }
 0x2cf   :  { %v3208_v37 = vpop.f32.mrf.mxu1 }
 0x2d0   :  { %3640 = vst [vmem:[%s6013_s6 + $0x318] sm:$0xff] %v3512_v54  ;;  %v3513_v9 = vmax.f32 %v3385_v62, 0.0  ;;  %v3386_v7 = vadd.f32 %v5413_v60, %v3207_v12  ;;  %v3209_v19 = vadd.f32 %v3208_v37, %v2583_v0  ;;  %v2585_v55 = vpop.f32.mrf.mxu0 }
 0x2d1   :  { %v3210_v24 = vpop.f32.mrf.mxu1 }
 0x2d2   :  { %3641 = vst [vmem:[%s6013_s6 + $0x320] sm:$0xff] %v3513_v9  ;;  %v3514_v35 = vmax.f32 %v3386_v7, 0.0  ;;  %v3387_v6 = vadd.f32 %v5411_v28, %v3209_v19  ;;  %v3211_v39 = vadd.f32 %v3210_v24, %v2585_v55  ;;  %v2589_v36 = vpop.f32.mrf.mxu0 }
 0x2d3   :  { %v3214_v2 = vpop.f32.mrf.mxu1 }
 0x2d4   :  { %3642 = vst [vmem:[%s6013_s6 + $0x328] sm:$0xff] %v3514_v35  ;;  %v3515_v56 = vmax.f32 %v3387_v6, 0.0  ;;  %v3388_v25 = vadd.f32 %v5413_v60, %v3211_v39  ;;  %v3215_v59 = vadd.f32 %v3214_v2, %v2589_v36  ;;  %v2591_v10 = vpop.f32.mrf.mxu0 }
 0x2d5   :  { %v3216_v32 = vpop.f32.mrf.mxu1 }
 0x2d6   :  { %3643 = vst [vmem:[%s6013_s6 + $0x330] sm:$0xff] %v3515_v56  ;;  %v3516_v57 = vmax.f32 %v3388_v25, 0.0  ;;  %v3389_v8 = vadd.f32 %v5411_v28, %v3215_v59  ;;  %v3217_v40 = vadd.f32 %v3216_v32, %v2591_v10  ;;  %v2593_v11 = vpop.f32.mrf.mxu0 }
 0x2d7   :  { %v3218_v45 = vpop.f32.mrf.mxu1 }
 0x2d8   :  { %3644 = vst [vmem:[%s6013_s6 + $0x338] sm:$0xff] %v3516_v57  ;;  %v3517_v27 = vmax.f32 %v3389_v8, 0.0  ;;  %v3390_v20 = vadd.f32 %v5413_v60, %v3217_v40  ;;  %v3219_v1 = vadd.f32 %v3218_v45, %v2593_v11  ;;  %v2595_v18 = vpop.f32.mrf.mxu0 }
 0x2d9   :  { %v3220_v52 = vpop.f32.mrf.mxu1 }
 0x2da   :  { %3645 = vst [vmem:[%s6013_s6 + $0x340] sm:$0xff] %v3517_v27  ;;  %v3518_v23 = vmax.f32 %v3390_v20, 0.0  ;;  %v3391_v38 = vadd.f32 %v5411_v28, %v3219_v1  ;;  %v3221_v34 = vadd.f32 %v3220_v52, %v2595_v18  ;;  %v2599_v53 = vpop.f32.mrf.mxu0 }
 0x2db   :  { %v3224_v63 = vpop.f32.mrf.mxu1 }
 0x2dc   :  { %3646 = vst [vmem:[%s6013_s6 + $0x348] sm:$0xff] %v3518_v23  ;;  %v3519_v31 = vmax.f32 %v3391_v38, 0.0  ;;  %v3392_v44 = vadd.f32 %v5413_v60, %v3221_v34  ;;  %v3225_v41 = vadd.f32 %v3224_v63, %v2599_v53  ;;  %v2601_v13 = vpop.f32.mrf.mxu0 }
 0x2dd   :  { %v3226_v30 = vpop.f32.mrf.mxu1 }
 0x2de   :  { %3647 = vst [vmem:[%s6013_s6 + $0x350] sm:$0xff] %v3519_v31  ;;  %v3520_v14 = vmax.f32 %v3392_v44, 0.0  ;;  %v3393_v58 = vadd.f32 %v5411_v28, %v3225_v41  ;;  %v3227_v29 = vadd.f32 %v3226_v30, %v2601_v13  ;;  %v2603_v15 = vpop.f32.mrf.mxu0 }
 0x2df   :  { %v3228_v46 = vpop.f32.mrf.mxu1 }
 0x2e0   :  { %3648 = vst [vmem:[%s6013_s6 + $0x358] sm:$0xff] %v3520_v14  ;;  %v3521_v47 = vmax.f32 %v3393_v58, 0.0  ;;  %v3394_v3 = vadd.f32 %v5413_v60, %v3227_v29  ;;  %v3229_v48 = vadd.f32 %v3228_v46, %v2603_v15  ;;  %v2605_v16 = vpop.f32.mrf.mxu0 }
 0x2e1   :  { %v3230_v21 = vpop.f32.mrf.mxu1 }
 0x2e2   :  { %3649 = vst [vmem:[%s6013_s6 + $0x360] sm:$0xff] %v3521_v47  ;;  %v3522_v22 = vmax.f32 %v3394_v3, 0.0  ;;  %v3395_v51 = vadd.f32 %v5411_v28, %v3229_v48  ;;  %v3231_v4 = vadd.f32 %v3230_v21, %v2605_v16  ;;  %v2609_v5 = vpop.f32.mrf.mxu0 }
 0x2e3   :  { %v3234_v42 = vpop.f32.mrf.mxu1 }
 0x2e4   :  { %3650 = vst [vmem:[%s6013_s6 + $0x368] sm:$0xff] %v3522_v22  ;;  %v3523_v33 = vmax.f32 %v3395_v51, 0.0  ;;  %v3396_v61 = vadd.f32 %v5413_v60, %v3231_v4  ;;  %v3235_v17 = vadd.f32 %v3234_v42, %v2609_v5  ;;  %v2611_v50 = vpop.f32.mrf.mxu0 }
 0x2e5   :  { %v3236_v43 = vpop.f32.mrf.mxu1 }
 0x2e6   :  { %3651 = vst [vmem:[%s6013_s6 + $0x370] sm:$0xff] %v3523_v33  ;;  %v3524_v49 = vmax.f32 %v3396_v61, 0.0  ;;  %v3397_v26 = vadd.f32 %v5411_v28, %v3235_v17  ;;  %v3237_v54 = vadd.f32 %v3236_v43, %v2611_v50  ;;  %v2613_v62 = vpop.f32.mrf.mxu0 }
 0x2e7   :  { %v3238_v12 = vpop.f32.mrf.mxu1 }
 0x2e8   :  { %3652 = vst [vmem:[%s6013_s6 + $0x378] sm:$0xff] %v3524_v49  ;;  %v3525_v0 = vmax.f32 %v3397_v26, 0.0  ;;  %v3398_v37 = vadd.f32 %v5413_v60, %v3237_v54  ;;  %v3239_v9 = vadd.f32 %v3238_v12, %v2613_v62  ;;  %v2615_v7 = vpop.f32.mrf.mxu0 }
 0x2e9   :  { %v3240_v19 = vpop.f32.mrf.mxu1 }
 0x2ea   :  { %3653 = vst [vmem:[%s6013_s6 + $0x380] sm:$0xff] %v3525_v0  ;;  %v3526_v55 = vmax.f32 %v3398_v37, 0.0  ;;  %v3399_v24 = vadd.f32 %v5411_v28, %v3239_v9  ;;  %v3241_v35 = vadd.f32 %v3240_v19, %v2615_v7  ;;  %v2619_v6 = vpop.f32.mrf.mxu0 }
 0x2eb   :  { %v3244_v39 = vpop.f32.mrf.mxu1 }
 0x2ec   :  { %3654 = vst [vmem:[%s6013_s6 + $0x388] sm:$0xff] %v3526_v55  ;;  %v3527_v36 = vmax.f32 %v3399_v24, 0.0  ;;  %v3400_v2 = vadd.f32 %v5413_v60, %v3241_v35  ;;  %v3245_v56 = vadd.f32 %v3244_v39, %v2619_v6  ;;  %v2621_v25 = vpop.f32.mrf.mxu0 }
 0x2ed   :  { %v3246_v59 = vpop.f32.mrf.mxu1 }
 0x2ee   :  { %3655 = vst [vmem:[%s6013_s6 + $0x390] sm:$0xff] %v3527_v36  ;;  %v3528_v10 = vmax.f32 %v3400_v2, 0.0  ;;  %v3401_v32 = vadd.f32 %v5411_v28, %v3245_v56  ;;  %v3247_v57 = vadd.f32 %v3246_v59, %v2621_v25  ;;  %v2623_v8 = vpop.f32.mrf.mxu0 }
 0x2ef   :  { %v3248_v40 = vpop.f32.mrf.mxu1 }
 0x2f0   :  { %3656 = vst [vmem:[%s6013_s6 + $0x398] sm:$0xff] %v3528_v10  ;;  %v3529_v11 = vmax.f32 %v3401_v32, 0.0  ;;  %v3402_v45 = vadd.f32 %v5413_v60, %v3247_v57  ;;  %v3249_v27 = vadd.f32 %v3248_v40, %v2623_v8  ;;  %v2625_v20 = vpop.f32.mrf.mxu0 }
 0x2f1   :  { %v3250_v1 = vpop.f32.mrf.mxu1 }
 0x2f2   :  { %3657 = vst [vmem:[%s6013_s6 + $0x3a0] sm:$0xff] %v3529_v11  ;;  %v3530_v18 = vmax.f32 %v3402_v45, 0.0  ;;  %v3403_v52 = vadd.f32 %v5411_v28, %v3249_v27  ;;  %v3251_v23 = vadd.f32 %v3250_v1, %v2625_v20  ;;  %v2629_v38 = vpop.f32.mrf.mxu0 }
 0x2f3   :  { %v3254_v34 = vpop.f32.mrf.mxu1 }
 0x2f4   :  { %3658 = vst [vmem:[%s6013_s6 + $0x3a8] sm:$0xff] %v3530_v18  ;;  %v3531_v53 = vmax.f32 %v3403_v52, 0.0  ;;  %v3404_v63 = vadd.f32 %v5413_v60, %v3251_v23  ;;  %v3255_v31 = vadd.f32 %v3254_v34, %v2629_v38  ;;  %v2631_v44 = vpop.f32.mrf.mxu0 }
 0x2f5   :  { %v3256_v41 = vpop.f32.mrf.mxu1 }
 0x2f6   :  { %3659 = vst [vmem:[%s6013_s6 + $0x3b0] sm:$0xff] %v3531_v53  ;;  %v3532_v13 = vmax.f32 %v3404_v63, 0.0  ;;  %v3405_v30 = vadd.f32 %v5411_v28, %v3255_v31  ;;  %v3257_v14 = vadd.f32 %v3256_v41, %v2631_v44  ;;  %v2633_v58 = vpop.f32.mrf.mxu0 }
 0x2f7   :  { %v3258_v29 = vpop.f32.mrf.mxu1 }
 0x2f8   :  { %3660 = vst [vmem:[%s6013_s6 + $0x3b8] sm:$0xff] %v3532_v13  ;;  %v3533_v15 = vmax.f32 %v3405_v30, 0.0  ;;  %v3406_v46 = vadd.f32 %v5413_v60, %v3257_v14  ;;  %v3259_v47 = vadd.f32 %v3258_v29, %v2633_v58  ;;  %v2635_v3 = vpop.f32.mrf.mxu0 }
 0x2f9   :  { %v3260_v48 = vpop.f32.mrf.mxu1 }
 0x2fa   :  { %3661 = vst [vmem:[%s6013_s6 + $0x3c0] sm:$0xff] %v3533_v15  ;;  %v3534_v16 = vmax.f32 %v3406_v46, 0.0  ;;  %v3407_v21 = vadd.f32 %v5411_v28, %v3259_v47  ;;  %v3261_v22 = vadd.f32 %v3260_v48, %v2635_v3  ;;  %v2639_v51 = vpop.f32.mrf.mxu0 }
 0x2fb   :  { %v3264_v4 = vpop.f32.mrf.mxu1 }
 0x2fc   :  { %3662 = vst [vmem:[%s6013_s6 + $0x3c8] sm:$0xff] %v3534_v16  ;;  %v3535_v5 = vmax.f32 %v3407_v21, 0.0  ;;  %v3408_v42 = vadd.f32 %v5413_v60, %v3261_v22  ;;  %v3265_v33 = vadd.f32 %v3264_v4, %v2639_v51  ;;  %v2641_v61 = vpop.f32.mrf.mxu0 }
 0x2fd   :  { %v3266_v17 = vpop.f32.mrf.mxu1 }
 0x2fe   :  { %3663 = vst [vmem:[%s6013_s6 + $0x3d0] sm:$0xff] %v3535_v5  ;;  %v3536_v50 = vmax.f32 %v3408_v42, 0.0  ;;  %v3409_v43 = vadd.f32 %v5411_v28, %v3265_v33  ;;  %v3267_v49 = vadd.f32 %v3266_v17, %v2641_v61  ;;  %v2643_v26 = vpop.f32.mrf.mxu0 }
 0x2ff   :  { %v3268_v54 = vpop.f32.mrf.mxu1 }
 0x300   :  { %3664 = vst [vmem:[%s6013_s6 + $0x3d8] sm:$0xff] %v3536_v50  ;;  %v3537_v62 = vmax.f32 %v3409_v43, 0.0  ;;  %v3410_v12 = vadd.f32 %v5413_v60, %v3267_v49  ;;  %v3269_v0 = vadd.f32 %v3268_v54, %v2643_v26  ;;  %v2645_v37 = vpop.f32.mrf.mxu0 }
 0x301   :  { %v3270_v9 = vpop.f32.mrf.mxu1 }
 0x302   :  { %3665 = vst [vmem:[%s6013_s6 + $0x3e0] sm:$0xff] %v3537_v62  ;;  %v3538_v7 = vmax.f32 %v3410_v12, 0.0  ;;  %v3411_v19 = vadd.f32 %v5411_v28, %v3269_v0  ;;  %v3271_v55 = vadd.f32 %v3270_v9, %v2645_v37 }
 0x304   :  { %3666 = vst [vmem:[%s6013_s6 + $0x3e8] sm:$0xff] %v3538_v7  ;;  %v3539_v24 = vmax.f32 %v3411_v19, 0.0  ;;  %v3412_v35 = vadd.f32 %v5413_v60, %v3271_v55 }
 0x306   :  { %3667 = vst [vmem:[%s6013_s6 + $0x3f0] sm:$0xff] %v3539_v24  ;;  %v3540_v6 = vmax.f32 %v3412_v35, 0.0 }
 0x308   :  { %3668 = vst [vmem:[%s6013_s6 + $0x3f8] sm:$0xff] %v3540_v6 }

// kernel: mpnn_encode.4
= control target key start
LH: loop header
LB: loop body
LE: loop exit
PB: predicated region body
PF: predicated region fallthrough
CT: control target
= control target key end

     0   :  { %s5089_s1 = inlined_call_operand.vmem [shape: bf16[512,256], index: 1, kind: input, shape index: {}, may-alias: {1,2}]   ;;  %s5090_s0 = inlined_call_operand.vmem [shape: s8[512,512], index: 0, kind: input, shape index: {}]   ;;  %s5091_s3 = inlined_call_operand.vmem [shape: bf16[256,256], index: 3, kind: input, shape index: {}]   ;;  %s5092_s2 = inlined_call_operand.vmem [shape: bf16[512,256], index: 2, kind: input, shape index: {}, may-alias: {1,2}]   ;;  %s5093_s4 = inlined_call_operand.vmem [shape: bf16[512,256], index: 4, kind: output, shape index: {}]  }
   0x1   :  { %v3719_v0 = vld [vmem:[%s5089_s1 + $0x74] ss:$8 sps:$4 sm:$0xff]   ;;  %v3721_v1 = vld [vmem:[%s5089_s1 + $0x70] ss:$8 sps:$4 sm:$0xff]   ;;  %v3722_v2 = vld [vmem:[%s5089_s1 + $0x64] ss:$8 sps:$4 sm:$0xff]  }
   0x2   :  { %3687 = vmatprep.subr.bf16.mxu1 %v3719_v0  ;;  %859 = vmatprep.subr.bf16.mxu0 %v3719_v0  ;;  %v3724_v3 = vld [vmem:[%s5089_s1 + $0x60] ss:$8 sps:$4 sm:$0xff]   ;;  %v3725_v4 = vld [vmem:[%s5089_s1 + $0x54] ss:$8 sps:$4 sm:$0xff]   ;;  %v3727_v5 = vld [vmem:[%s5089_s1 + $0x50] ss:$8 sps:$4 sm:$0xff]  }
   0x3   :  { %3703 = vmatpush1.bf16.msra.mxu1 %v3721_v1  ;;  %860 = vmatpush1.bf16.msra.mxu0 %v3721_v1  ;;  %v3728_v6 = vld [vmem:[%s5089_s1 + $0x44] ss:$8 sps:$4 sm:$0xff]   ;;  %v3730_v7 = vld [vmem:[%s5089_s1 + $0x40] ss:$8 sps:$4 sm:$0xff]   ;;  %v3731_v8 = vld [vmem:[%s5089_s1 + $0x34] ss:$8 sps:$4 sm:$0xff]  }
   0x4   :  { %3688 = vmatprep.subr.bf16.mxu1 %v3722_v2  ;;  %861 = vmatprep.subr.bf16.mxu0 %v3722_v2  ;;  %v3733_v9 = vld [vmem:[%s5089_s1 + $0x30] ss:$8 sps:$4 sm:$0xff]   ;;  %v3734_v10 = vld [vmem:[%s5089_s1 + $0x24] ss:$8 sps:$4 sm:$0xff]   ;;  %v3736_v11 = vld [vmem:[%s5089_s1 + $0x20] ss:$8 sps:$4 sm:$0xff]  }
   0x5   :  { %v3737_v12 = vld [vmem:[%s5089_s1 + $0x14] ss:$8 sps:$4 sm:$0xff]   ;;  %v3930_v13 = vld [vmem:[%s5090_s0 + $0x108] sm:$0xff]  ;;  %v3739_v15 = vld [vmem:[%s5089_s1 + $0x10] ss:$8 sps:$4 sm:$0xff]  }
   0x6   :  { %v476_v14 = vunpack.c.l.s8.bf16 %v3930_v13  ;;  %v3740_v16 = vld [vmem:[%s5089_s1 + $0x4] ss:$8 sps:$4 sm:$0xff]   ;;  %v3742_v17 = vld [vmem:[%s5089_s1] ss:$8 sps:$4 sm:$0xff]   ;;  %v3743_v18 = vld [vmem:[%s5089_s1 + $0xf4] ss:$8 sps:$4 sm:$0xff]   ;;  %v480_v41 = vunpack.c.h.s8.bf16 %v3930_v13 }
   0x7   :  { %3704 = vmatpush1.bf16.msra.mxu1 %v3724_v3  ;;  %862 = vmatpush1.bf16.msra.mxu0 %v3724_v3  ;;  %v3745_v19 = vld [vmem:[%s5089_s1 + $0xf0] ss:$8 sps:$4 sm:$0xff]   ;;  %v3746_v20 = vld [vmem:[%s5089_s1 + $0xe4] ss:$8 sps:$4 sm:$0xff]   ;;  %v3748_v21 = vld [vmem:[%s5089_s1 + $0xe0] ss:$8 sps:$4 sm:$0xff]  }
   0x8   :  { %3689 = vmatprep.subr.bf16.mxu1 %v3725_v4  ;;  %863 = vmatprep.subr.bf16.mxu0 %v3725_v4  ;;  %v3749_v22 = vld [vmem:[%s5089_s1 + $0xd4] ss:$8 sps:$4 sm:$0xff]   ;;  %v3751_v23 = vld [vmem:[%s5089_s1 + $0xd0] ss:$8 sps:$4 sm:$0xff]   ;;  %v3752_v24 = vld [vmem:[%s5089_s1 + $0xc4] ss:$8 sps:$4 sm:$0xff]  }
   0x9   :  { %1051 = vmatprep.mubr.bf16.mxu1 %v476_v14  ;;  %v3754_v25 = vld [vmem:[%s5089_s1 + $0xc0] ss:$8 sps:$4 sm:$0xff]   ;;  %v3755_v26 = vld [vmem:[%s5089_s1 + $0xb4] ss:$8 sps:$4 sm:$0xff]   ;;  %v3757_v27 = vld [vmem:[%s5089_s1 + $0xb0] ss:$8 sps:$4 sm:$0xff]  }
   0xa   :  { %v3758_v28 = vld [vmem:[%s5089_s1 + $0xa4] ss:$8 sps:$4 sm:$0xff]   ;;  %v3760_v29 = vld [vmem:[%s5089_s1 + $0xa0] ss:$8 sps:$4 sm:$0xff]   ;;  %v3761_v30 = vld [vmem:[%s5089_s1 + $0x94] ss:$8 sps:$4 sm:$0xff]  }
   0xb   :  { %3705 = vmatpush1.bf16.msra.mxu1 %v3727_v5  ;;  %864 = vmatpush1.bf16.msra.mxu0 %v3727_v5  ;;  %v3763_v31 = vld [vmem:[%s5089_s1 + $0x90] ss:$8 sps:$4 sm:$0xff]   ;;  %v3764_v32 = vld [vmem:[%s5089_s1 + $0x84] ss:$8 sps:$4 sm:$0xff]   ;;  %v3766_v35 = vld [vmem:[%s5089_s1 + $0x80] ss:$8 sps:$4 sm:$0xff]  }
   0xc   :  { %3690 = vmatprep.subr.bf16.mxu1 %v3728_v6  ;;  %865 = vmatprep.subr.bf16.mxu0 %v3728_v6  ;;  %v348_v33 = vld [vmem:[%s5090_s0 + $0x8] sm:$0xff]  ;;  %v379_v36 = vld [vmem:[%s5090_s0 + $0x100] sm:$0xff]  ;;  %v3769_v38 = vld [vmem:[%s5089_s1 + $0x174] ss:$8 sps:$4 sm:$0xff]  }
   0xd   :  { %v412_v34 = vunpack.c.l.s8.bf16 %v348_v33  ;;  %v347_v37 = vld [vmem:[%s5090_s0] sm:$0xff]  ;;  %v475_v39 = vunpack.c.l.s8.bf16 %v379_v36  ;;  %v3767_v42 = vld [vmem:[%s5089_s1 + $0x170] ss:$8 sps:$4 sm:$0xff]   ;;  %v416_v44 = vunpack.c.h.s8.bf16 %v348_v33  ;;  %v384_v46 = vld [vmem:[%s5090_s0 + $0x128] sm:$0xff]  ;;  %v479_v48 = vunpack.c.h.s8.bf16 %v379_v36 }
   0xe   :  { %v411_v40 = vunpack.c.l.s8.bf16 %v347_v37  ;;  %v3772_v43 = vld [vmem:[%s5089_s1 + $0x164] ss:$8 sps:$4 sm:$0xff]   ;;  %v3770_v45 = vld [vmem:[%s5089_s1 + $0x160] ss:$8 sps:$4 sm:$0xff]   ;;  %v3775_v47 = vld [vmem:[%s5089_s1 + $0x154] ss:$8 sps:$4 sm:$0xff]   ;;  %v415_v49 = vunpack.c.h.s8.bf16 %v347_v37  ;;  %v484_v50 = vunpack.c.l.s8.bf16 %v384_v46  ;;  %v488_v61 = vunpack.c.h.s8.bf16 %v384_v46 }
   0xf   :  { %3706 = vmatpush1.bf16.msra.mxu1 %v3730_v7  ;;  %866 = vmatpush1.bf16.msra.mxu0 %v3730_v7  ;;  %v3773_v51 = vld [vmem:[%s5089_s1 + $0x150] ss:$8 sps:$4 sm:$0xff]   ;;  %v3778_v52 = vld [vmem:[%s5089_s1 + $0x144] ss:$8 sps:$4 sm:$0xff]   ;;  %v3776_v56 = vld [vmem:[%s5089_s1 + $0x140] ss:$8 sps:$4 sm:$0xff]  }
  0x10   :  { %3691 = vmatprep.subr.bf16.mxu1 %v3731_v8  ;;  %867 = vmatprep.subr.bf16.mxu0 %v3731_v8  ;;  %v352_v53 = vld [vmem:[%s5090_s0 + $0x28] sm:$0xff]  ;;  %v383_v55 = vld [vmem:[%s5090_s0 + $0x120] sm:$0xff]  ;;  %v3781_v58 = vld [vmem:[%s5089_s1 + $0x134] ss:$8 sps:$4 sm:$0xff]  }
  0x11   :  { %891 = vmatprep.mubr.bf16.mxu0 %v412_v34  ;;  %v420_v54 = vunpack.c.l.s8.bf16 %v352_v53  ;;  %v351_v57 = vld [vmem:[%s5090_s0 + $0x20] sm:$0xff]  ;;  %v483_v59 = vunpack.c.l.s8.bf16 %v383_v55  ;;  %v3779_v62 = vld [vmem:[%s5089_s1 + $0x130] ss:$8 sps:$4 sm:$0xff]   ;;  %v424_v0 = vunpack.c.h.s8.bf16 %v352_v53  ;;  %v388_v2 = vld [vmem:[%s5090_s0 + $0x148] sm:$0xff]  ;;  %v487_v4 = vunpack.c.h.s8.bf16 %v383_v55 }
  0x12   :  { %v419_v60 = vunpack.c.l.s8.bf16 %v351_v57  ;;  %v3784_v63 = vld [vmem:[%s5089_s1 + $0x124] ss:$8 sps:$4 sm:$0xff]   ;;  %v3782_v1 = vld [vmem:[%s5089_s1 + $0x120] ss:$8 sps:$4 sm:$0xff]   ;;  %v3787_v3 = vld [vmem:[%s5089_s1 + $0x114] ss:$8 sps:$4 sm:$0xff]   ;;  %v423_v5 = vunpack.c.h.s8.bf16 %v351_v57  ;;  %v492_v6 = vunpack.c.l.s8.bf16 %v388_v2 }
  0x13   :  { %3707 = vmatpush1.bf16.msra.mxu1 %v3733_v9  ;;  %868 = vmatpush1.bf16.msra.mxu0 %v3733_v9  ;;  %v3785_v7 = vld [vmem:[%s5089_s1 + $0x110] ss:$8 sps:$4 sm:$0xff]   ;;  %v3790_v8 = vld [vmem:[%s5089_s1 + $0x104] ss:$8 sps:$4 sm:$0xff]   ;;  %v3793_v14 = vld [vmem:[%s5089_s1 + $0x1f4] ss:$8 sps:$4 sm:$0xff]  }
  0x14   :  { %3692 = vmatprep.subr.bf16.mxu1 %v3734_v10  ;;  %869 = vmatprep.subr.bf16.mxu0 %v3734_v10  ;;  %v356_v9 = vld [vmem:[%s5090_s0 + $0x48] sm:$0xff]  ;;  %v355_v13 = vld [vmem:[%s5090_s0 + $0x40] sm:$0xff]  ;;  %v3805_v34 = vld [vmem:[%s5089_s1 + $0x1b4] ss:$8 sps:$4 sm:$0xff]  }
  0x15   :  { %v428_v10 = vunpack.c.l.s8.bf16 %v356_v9  ;;  %v359_v33 = vld [vmem:[%s5090_s0 + $0x60] sm:$0xff] }
  0x16   :  { %v435_v36 = vunpack.c.l.s8.bf16 %v359_v33  ;;  %v363_v53 = vld [vmem:[%s5090_s0 + $0x80] sm:$0xff] }
  0x17   :  { %3708 = vmatpush1.bf16.msra.mxu1 %v3736_v11  ;;  %870 = vmatpush1.bf16.msra.mxu0 %v3736_v11  ;;  %v387_v11 = vld [vmem:[%s5090_s0 + $0x140] sm:$0xff]  ;;  %v443_v55 = vunpack.c.l.s8.bf16 %v363_v53 }
  0x18   :  { %3693 = vmatprep.subr.bf16.mxu1 %v3737_v12  ;;  %871 = vmatprep.subr.bf16.mxu0 %v3737_v12  ;;  %v3788_v12 = vld [vmem:[%s5089_s1 + $0x100] ss:$8 sps:$4 sm:$0xff]  }
  0x1b   :  { %3709 = vmatpush1.bf16.msra.mxu1 %v3739_v15  ;;  %872 = vmatpush1.bf16.msra.mxu0 %v3739_v15  ;;  %v491_v15 = vunpack.c.l.s8.bf16 %v387_v11 }
  0x1c   :  { %3694 = vmatprep.subr.bf16.mxu1 %v3740_v16  ;;  %873 = vmatprep.subr.bf16.mxu0 %v3740_v16  ;;  %v427_v16 = vunpack.c.l.s8.bf16 %v355_v13 }
  0x1f   :  { %3710 = vmatpush1.bf16.msra.mxu1 %v3742_v17  ;;  %874 = vmatpush1.bf16.msra.mxu0 %v3742_v17  ;;  %v496_v17 = vunpack.c.h.s8.bf16 %v388_v2 }
  0x20   :  { %3695 = vmatprep.subr.bf16.mxu1 %v3743_v18  ;;  %875 = vmatprep.subr.bf16.mxu0 %v3743_v18  ;;  %v3791_v18 = vld [vmem:[%s5089_s1 + $0x1f0] ss:$8 sps:$4 sm:$0xff]  }
  0x23   :  { %3711 = vmatpush2.bf16.msra.mxu1 %v3745_v19  ;;  %876 = vmatpush2.bf16.msra.mxu0 %v3745_v19  ;;  %v3796_v19 = vld [vmem:[%s5089_s1 + $0x1e4] ss:$8 sps:$4 sm:$0xff]  }
  0x24   :  { %3696 = vmatprep.subr.bf16.mxu1 %v3746_v20  ;;  %877 = vmatprep.subr.bf16.mxu0 %v3746_v20  ;;  %v432_v20 = vunpack.c.h.s8.bf16 %v356_v9 }
  0x27   :  { %3712 = vmatpush2.bf16.msra.mxu1 %v3748_v21  ;;  %878 = vmatpush2.bf16.msra.mxu0 %v3748_v21  ;;  %v3794_v21 = vld [vmem:[%s5089_s1 + $0x1e0] ss:$8 sps:$4 sm:$0xff]  }
  0x28   :  { %3697 = vmatprep.subr.bf16.mxu1 %v3749_v22  ;;  %879 = vmatprep.subr.bf16.mxu0 %v3749_v22  ;;  %v392_v22 = vld [vmem:[%s5090_s0 + $0x168] sm:$0xff] }
  0x29   :  { %v504_v37 = vunpack.c.h.s8.bf16 %v392_v22 }
  0x2b   :  { %3713 = vmatpush2.bf16.msra.mxu1 %v3751_v23  ;;  %880 = vmatpush2.bf16.msra.mxu0 %v3751_v23  ;;  %v3799_v23 = vld [vmem:[%s5089_s1 + $0x1d4] ss:$8 sps:$4 sm:$0xff]  }
  0x2c   :  { %3698 = vmatprep.subr.bf16.mxu1 %v3752_v24  ;;  %881 = vmatprep.subr.bf16.mxu0 %v3752_v24  ;;  %v495_v24 = vunpack.c.h.s8.bf16 %v387_v11  ;;  %v3818_v11 = vld [vmem:[%s5091_s3 + $0x60] ss:$8 sps:$4 sm:$0xff]  }
  0x2f   :  { %3714 = vmatpush2.bf16.msra.mxu1 %v3754_v25  ;;  %882 = vmatpush2.bf16.msra.mxu0 %v3754_v25  ;;  %v431_v25 = vunpack.c.h.s8.bf16 %v355_v13 }
  0x30   :  { %3699 = vmatprep.subr.bf16.mxu1 %v3755_v26  ;;  %883 = vmatprep.subr.bf16.mxu0 %v3755_v26  ;;  %v500_v26 = vunpack.c.l.s8.bf16 %v392_v22 }
  0x33   :  { %3715 = vmatpush2.bf16.msra.mxu1 %v3757_v27  ;;  %884 = vmatpush2.bf16.msra.mxu0 %v3757_v27  ;;  %v3797_v27 = vld [vmem:[%s5089_s1 + $0x1d0] ss:$8 sps:$4 sm:$0xff]  }
  0x34   :  { %3700 = vmatprep.subr.bf16.mxu1 %v3758_v28  ;;  %885 = vmatprep.subr.bf16.mxu0 %v3758_v28  ;;  %v3802_v28 = vld [vmem:[%s5089_s1 + $0x1c4] ss:$8 sps:$4 sm:$0xff]  }
  0x37   :  { %3716 = vmatpush2.bf16.msra.mxu1 %v3760_v29  ;;  %886 = vmatpush2.bf16.msra.mxu0 %v3760_v29  ;;  %v360_v29 = vld [vmem:[%s5090_s0 + $0x68] sm:$0xff] }
  0x38   :  { %3701 = vmatprep.subr.bf16.mxu1 %v3761_v30  ;;  %887 = vmatprep.subr.bf16.mxu0 %v3761_v30  ;;  %v436_v30 = vunpack.c.l.s8.bf16 %v360_v29 }
  0x3b   :  { %3717 = vmatpush2.bf16.msra.mxu1 %v3763_v31  ;;  %888 = vmatpush2.bf16.msra.mxu0 %v3763_v31  ;;  %v391_v31 = vld [vmem:[%s5090_s0 + $0x160] sm:$0xff] }
  0x3c   :  { %3702 = vmatprep.subr.bf16.mxu1 %v3764_v32  ;;  %889 = vmatprep.subr.bf16.mxu0 %v3764_v32  ;;  %v3800_v32 = vld [vmem:[%s5089_s1 + $0x1c0] ss:$8 sps:$4 sm:$0xff]  }
  0x3f   :  { %3718 = vmatpush2.bf16.msra.mxu1 %v3766_v35  ;;  %890 = vmatpush2.bf16.msra.mxu0 %v3766_v35  ;;  %v499_v35 = vunpack.c.l.s8.bf16 %v391_v31 }
  0x40   :  { %1212 = vmatprep.subr.bf16.mxu1 %v3769_v38  ;;  %v3803_v38 = vld [vmem:[%s5089_s1 + $0x1b0] ss:$8 sps:$4 sm:$0xff]  }
  0x42   :  { %1052 = vmatmul.mubr.bf16.vlgmr.msra.gmra.mxu1 %v475_v39  ;;  %892 = vmatmul.mubr.bf16.vlgmr.msra.gmra.mxu0 %v411_v40  ;;  %v3808_v39 = vld [vmem:[%s5089_s1 + $0x1a4] ss:$8 sps:$4 sm:$0xff]   ;;  %v440_v40 = vunpack.c.h.s8.bf16 %v360_v29 }
  0x43   :  { %1213 = vmatpush1.bf16.msra.mxu1 %v3767_v42  ;;  %1061 = vmatprep.mubr.bf16.mxu1 %v480_v41  ;;  %v3806_v41 = vld [vmem:[%s5089_s1 + $0x1a0] ss:$8 sps:$4 sm:$0xff]  }
  0x44   :  { %1214 = vmatprep.subr.bf16.mxu1 %v3772_v43  ;;  %901 = vmatprep.mubr.bf16.mxu0 %v416_v44  ;;  %v396_v42 = vld [vmem:[%s5090_s0 + $0x188] sm:$0xff]  ;;  %v3811_v43 = vld [vmem:[%s5089_s1 + $0x194] ss:$8 sps:$4 sm:$0xff]   ;;  %v503_v44 = vunpack.c.h.s8.bf16 %v391_v31 }
  0x45   :  { %v508_v46 = vunpack.c.l.s8.bf16 %v396_v42 }
  0x47   :  { %1215 = vmatpush1.bf16.msra.mxu1 %v3770_v45  ;;  %v439_v45 = vunpack.c.h.s8.bf16 %v359_v33  ;;  %v375_v33 = vld [vmem:[%s5090_s0 + $0xe0] sm:$0xff] }
  0x48   :  { %1216 = vmatprep.subr.bf16.mxu1 %v3775_v47  ;;  %v3809_v47 = vld [vmem:[%s5089_s1 + $0x190] ss:$8 sps:$4 sm:$0xff]  }
  0x4a   :  { %1062 = vmatmul.mubr.bf16.gmra.mxu1 %v479_v48  ;;  %902 = vmatmul.mubr.bf16.gmra.mxu0 %v415_v49  ;;  %v3814_v48 = vld [vmem:[%s5089_s1 + $0x184] ss:$8 sps:$4 sm:$0xff]  }
  0x4b   :  { %1071 = vmatprep.mubr.bf16.mxu1 %v484_v50  ;;  %1217 = vmatpush1.bf16.msra.mxu1 %v3773_v51  ;;  %v364_v49 = vld [vmem:[%s5090_s0 + $0x88] sm:$0xff]  ;;  %v395_v51 = vld [vmem:[%s5090_s0 + $0x180] sm:$0xff] }
  0x4c   :  { %1218 = vmatprep.subr.bf16.mxu1 %v3778_v52  ;;  %911 = vmatprep.mubr.bf16.mxu0 %v420_v54  ;;  %v444_v50 = vunpack.c.l.s8.bf16 %v364_v49  ;;  %v3812_v52 = vld [vmem:[%s5089_s1 + $0x180] ss:$8 sps:$4 sm:$0xff]   ;;  %v507_v54 = vunpack.c.l.s8.bf16 %v395_v51  ;;  %v448_v57 = vunpack.c.h.s8.bf16 %v364_v49  ;;  %v3835_v49 = vld [vmem:[%s5091_s3 + $0x14] ss:$8 sps:$4 sm:$0xff]  }
  0x4f   :  { %1219 = vmatpush1.bf16.msra.mxu1 %v3776_v56  ;;  %v512_v56 = vunpack.c.h.s8.bf16 %v396_v42  ;;  %v471_v42 = vunpack.c.h.s8.bf16 %v375_v33 }
  0x50   :  { %1220 = vmatprep.subr.bf16.mxu1 %v3781_v58  ;;  %v400_v58 = vld [vmem:[%s5090_s0 + $0x1a8] sm:$0xff] }
  0x52   :  { %1072 = vmatmul.mubr.bf16.gmra.mxu1 %v483_v59  ;;  %912 = vmatmul.mubr.bf16.gmra.mxu0 %v419_v60  ;;  %v511_v59 = vunpack.c.h.s8.bf16 %v395_v51  ;;  %v447_v60 = vunpack.c.h.s8.bf16 %v363_v53  ;;  %v354_v51 = vld [vmem:[%s5090_s0 + $0x38] sm:$0xff]  ;;  %v3836_v53 = vld [vmem:[%s5091_s3] ss:$8 sps:$4 sm:$0xff]  }
  0x53   :  { %1081 = vmatprep.mubr.bf16.mxu1 %v488_v61  ;;  %1221 = vmatpush1.bf16.msra.mxu1 %v3779_v62  ;;  %v516_v61 = vunpack.c.l.s8.bf16 %v400_v58  ;;  %v368_v62 = vld [vmem:[%s5090_s0 + $0xa8] sm:$0xff] }
  0x54   :  { %1222 = vmatprep.subr.bf16.mxu1 %v3784_v63  ;;  %921 = vmatprep.mubr.bf16.mxu0 %v424_v0  ;;  %v452_v63 = vunpack.c.l.s8.bf16 %v368_v62  ;;  %v399_v0 = vld [vmem:[%s5090_s0 + $0x1a0] sm:$0xff] }
  0x55   :  { %v515_v2 = vunpack.c.l.s8.bf16 %v399_v0  ;;  %v519_v9 = vunpack.c.h.s8.bf16 %v399_v0  ;;  %v3844_v0 = vld [vmem:[%s5091_s3 + $0xe4] ss:$8 sps:$4 sm:$0xff]  }
  0x57   :  { %1223 = vmatpush1.bf16.msra.mxu1 %v3782_v1  ;;  %v367_v1 = vld [vmem:[%s5090_s0 + $0xa0] sm:$0xff] }
  0x58   :  { %1224 = vmatprep.subr.bf16.mxu1 %v3787_v3  ;;  %v451_v3 = vunpack.c.l.s8.bf16 %v367_v1 }
  0x5a   :  { %1082 = vmatmul.mubr.bf16.gmra.mxu1 %v487_v4  ;;  %922 = vmatmul.mubr.bf16.gmra.mxu0 %v423_v5  ;;  %v520_v4 = vunpack.c.h.s8.bf16 %v400_v58  ;;  %v3815_v5 = vld [vmem:[%s5091_s3 + $0x70] ss:$8 sps:$4 sm:$0xff]  }
  0x5b   :  { %1091 = vmatprep.mubr.bf16.mxu1 %v492_v6  ;;  %1225 = vmatpush1.bf16.msra.mxu1 %v3785_v7  ;;  %v3817_v6 = vld [vmem:[%s5091_s3 + $0x74] ss:$8 sps:$4 sm:$0xff]   ;;  %v456_v7 = vunpack.c.h.s8.bf16 %v368_v62  ;;  %v3839_v58 = vld [vmem:[%s5091_s3 + $0xf0] ss:$8 sps:$4 sm:$0xff]  }
  0x5c   :  { %1226 = vmatprep.subr.bf16.mxu1 %v3790_v8  ;;  %931 = vmatprep.mubr.bf16.mxu0 %v428_v10  ;;  %v404_v8 = vld [vmem:[%s5090_s0 + $0x1c8] sm:$0xff]  ;;  %v455_v10 = vunpack.c.h.s8.bf16 %v367_v1 }
  0x5d   :  { %2400 = vmatprep.subr.bf16.mxu0 %v3817_v6  ;;  %v524_v13 = vunpack.c.l.s8.bf16 %v404_v8  ;;  %v528_v22 = vunpack.c.h.s8.bf16 %v404_v8 }
  0x5e   :  { %2401 = vmatpush1.bf16.msra.mxu0 %v3815_v5  ;;  %v3847_v5 = vld [vmem:[%s5091_s3 + $0xd4] ss:$8 sps:$4 sm:$0xff]  }
  0x5f   :  { %1227 = vmatpush1.bf16.msra.mxu1 %v3788_v12  ;;  %v3820_v12 = vld [vmem:[%s5091_s3 + $0x64] ss:$8 sps:$4 sm:$0xff]  }
  0x60   :  { %1228 = vmatprep.subr.bf16.mxu1 %v3793_v14  ;;  %2402 = vmatprep.subr.bf16.mxu0 %v3820_v12  ;;  %v372_v14 = vld [vmem:[%s5090_s0 + $0xc8] sm:$0xff]  ;;  %v361_v12 = vld [vmem:[%s5090_s0 + $0x70] sm:$0xff] }
  0x62   :  { %1092 = vmatmul.mubr.bf16.gmra.mxu1 %v491_v15  ;;  %932 = vmatmul.mubr.bf16.gmra.mxu0 %v427_v16  ;;  %v403_v15 = vld [vmem:[%s5090_s0 + $0x1c0] sm:$0xff]  ;;  %v460_v16 = vunpack.c.l.s8.bf16 %v372_v14 }
  0x63   :  { %1101 = vmatprep.mubr.bf16.mxu1 %v496_v17  ;;  %1229 = vmatpush2.bf16.msra.mxu1 %v3791_v18  ;;  %v371_v17 = vld [vmem:[%s5090_s0 + $0xc0] sm:$0xff]  ;;  %v523_v18 = vunpack.c.l.s8.bf16 %v403_v15 }
  0x64   :  { %1230 = vmatprep.subr.bf16.mxu1 %v3796_v19  ;;  %941 = vmatprep.mubr.bf16.mxu0 %v432_v20  ;;  %v459_v19 = vunpack.c.l.s8.bf16 %v371_v17  ;;  %v3821_v20 = vld [vmem:[%s5091_s3 + $0x50] ss:$8 sps:$4 sm:$0xff]  }
  0x65   :  { %2403 = vmatpush1.bf16.msra.mxu0 %v3818_v11 }
  0x67   :  { %1231 = vmatpush2.bf16.msra.mxu1 %v3794_v21  ;;  %v3823_v21 = vld [vmem:[%s5091_s3 + $0x54] ss:$8 sps:$4 sm:$0xff]  }
  0x68   :  { %1232 = vmatprep.subr.bf16.mxu1 %v3799_v23  ;;  %2404 = vmatprep.subr.bf16.mxu0 %v3823_v21  ;;  %v464_v23 = vunpack.c.h.s8.bf16 %v372_v14  ;;  %v3851_v14 = vld [vmem:[%s5091_s3 + $0xb0] ss:$8 sps:$4 sm:$0xff]  }
  0x69   :  { %2405 = vmatpush1.bf16.msra.mxu0 %v3821_v20  ;;  %v3856_v20 = vld [vmem:[%s5091_s3 + $0xa4] ss:$8 sps:$4 sm:$0xff]  }
  0x6a   :  { %1102 = vmatmul.mubr.bf16.gmra.mxu1 %v495_v24  ;;  %942 = vmatmul.mubr.bf16.gmra.mxu0 %v431_v25  ;;  %v408_v24 = vld [vmem:[%s5090_s0 + $0x1e8] sm:$0xff]  ;;  %v527_v25 = vunpack.c.h.s8.bf16 %v403_v15  ;;  %v3853_v15 = vld [vmem:[%s5091_s3 + $0xb4] ss:$8 sps:$4 sm:$0xff]  }
  0x6b   :  { %1111 = vmatprep.mubr.bf16.mxu1 %v500_v26  ;;  %1233 = vmatpush2.bf16.msra.mxu1 %v3797_v27  ;;  %v463_v26 = vunpack.c.h.s8.bf16 %v371_v17  ;;  %v3824_v27 = vld [vmem:[%s5091_s3 + $0x40] ss:$8 sps:$4 sm:$0xff]   ;;  %v532_v29 = vunpack.c.l.s8.bf16 %v408_v24  ;;  %v366_v17 = vld [vmem:[%s5090_s0 + $0x98] sm:$0xff] }
  0x6c   :  { %1234 = vmatprep.subr.bf16.mxu1 %v3802_v28  ;;  %951 = vmatprep.mubr.bf16.mxu0 %v436_v30  ;;  %v3826_v28 = vld [vmem:[%s5091_s3 + $0x44] ss:$8 sps:$4 sm:$0xff]   ;;  %v446_v21 = vunpack.c.l.s8.bf16 %v366_v17 }
  0x6d   :  { %2406 = vmatprep.subr.bf16.mxu0 %v3826_v28  ;;  %v376_v30 = vld [vmem:[%s5090_s0 + $0xe8] sm:$0xff] }
  0x6e   :  { %2407 = vmatpush1.bf16.msra.mxu0 %v3824_v27  ;;  %v468_v31 = vunpack.c.l.s8.bf16 %v376_v30 }
  0x6f   :  { %1235 = vmatpush2.bf16.msra.mxu1 %v3800_v32  ;;  %v407_v32 = vld [vmem:[%s5090_s0 + $0x1e0] sm:$0xff] }
  0x70   :  { %1236 = vmatprep.subr.bf16.mxu1 %v3805_v34  ;;  %v531_v34 = vunpack.c.l.s8.bf16 %v407_v32 }
  0x72   :  { %1112 = vmatmul.mubr.bf16.gmra.mxu1 %v499_v35  ;;  %952 = vmatmul.mubr.bf16.gmra.mxu0 %v435_v36  ;;  %v467_v35 = vunpack.c.l.s8.bf16 %v375_v33  ;;  %v3827_v36 = vld [vmem:[%s5091_s3 + $0x30] ss:$8 sps:$4 sm:$0xff]  }
  0x73   :  { %1121 = vmatprep.mubr.bf16.mxu1 %v504_v37  ;;  %1237 = vmatpush2.bf16.msra.mxu1 %v3803_v38  ;;  %v3829_v37 = vld [vmem:[%s5091_s3 + $0x34] ss:$8 sps:$4 sm:$0xff]   ;;  %v536_v38 = vunpack.c.h.s8.bf16 %v408_v24  ;;  %v3857_v24 = vld [vmem:[%s5091_s3 + $0x90] ss:$8 sps:$4 sm:$0xff]  }
  0x74   :  { %1238 = vmatprep.subr.bf16.mxu1 %v3808_v39  ;;  %961 = vmatprep.mubr.bf16.mxu0 %v440_v40  ;;  %v472_v39 = vunpack.c.h.s8.bf16 %v376_v30  ;;  %v350_v40 = vld [vmem:[%s5090_s0 + $0x18] sm:$0xff] }
  0x75   :  { %2408 = vmatprep.subr.bf16.mxu0 %v3829_v37  ;;  %v3860_v37 = vld [vmem:[%s5091_s3 + $0x80] ss:$8 sps:$4 sm:$0xff]  }
  0x76   :  { %2409 = vmatpush1.bf16.msra.mxu0 %v3827_v36  ;;  %v3862_v36 = vld [vmem:[%s5091_s3 + $0x84] ss:$8 sps:$4 sm:$0xff]  }
  0x77   :  { %1239 = vmatpush2.bf16.msra.mxu1 %v3806_v41  ;;  %v535_v41 = vunpack.c.h.s8.bf16 %v407_v32 }
  0x78   :  { %1240 = vmatprep.subr.bf16.mxu1 %v3811_v43  ;;  %v3830_v43 = vld [vmem:[%s5091_s3 + $0x20] ss:$8 sps:$4 sm:$0xff]  }
  0x7a   :  { %1122 = vmatmul.mubr.bf16.gmra.mxu1 %v503_v44  ;;  %962 = vmatmul.mubr.bf16.gmra.mxu0 %v439_v45  ;;  %v3832_v44 = vld [vmem:[%s5091_s3 + $0x24] ss:$8 sps:$4 sm:$0xff]   ;;  %v414_v45 = vunpack.c.l.s8.bf16 %v350_v40 }
  0x7b   :  { %1131 = vmatprep.mubr.bf16.mxu1 %v508_v46  ;;  %1241 = vmatpush2.bf16.msra.mxu1 %v3809_v47  ;;  %v349_v46 = vld [vmem:[%s5090_s0 + $0x10] sm:$0xff] }
  0x7c   :  { %1242 = vmatprep.subr.bf16.mxu1 %v3814_v48  ;;  %971 = vmatprep.mubr.bf16.mxu0 %v444_v50  ;;  %v413_v47 = vunpack.c.l.s8.bf16 %v349_v46  ;;  %v3833_v48 = vld [vmem:[%s5091_s3 + $0x10] ss:$8 sps:$4 sm:$0xff]   ;;  %v418_v50 = vunpack.c.h.s8.bf16 %v350_v40 }
  0x7d   :  { %2410 = vmatprep.subr.bf16.mxu0 %v3832_v44 }
  0x7e   :  { %2411 = vmatpush1.bf16.msra.mxu0 %v3830_v43 }
  0x7f   :  { %1243 = vmatpush2.bf16.msra.mxu1 %v3812_v52  ;;  %2412 = vmatprep.subr.bf16.mxu0 %v3835_v49  ;;  %v417_v52 = vunpack.c.h.s8.bf16 %v349_v46  ;;  %v374_v49 = vld [vmem:[%s5090_s0 + $0xd8] sm:$0xff] }
  0x82   :  { %1132 = vmatmul.mubr.bf16.gmra.mxu1 %v507_v54  ;;  %972 = vmatmul.mubr.bf16.gmra.mxu0 %v443_v55  ;;  %v3838_v54 = vld [vmem:[%s5091_s3 + $0x4] ss:$8 sps:$4 sm:$0xff]   ;;  %v422_v55 = vunpack.c.l.s8.bf16 %v354_v51 }
  0x83   :  { %1141 = vmatprep.mubr.bf16.mxu1 %v512_v56  ;;  %981 = vmatprep.mubr.bf16.mxu0 %v448_v57  ;;  %v353_v56 = vld [vmem:[%s5090_s0 + $0x30] sm:$0xff] }
  0x84   :  { %2413 = vmatpush1.bf16.msra.mxu0 %v3833_v48  ;;  %v421_v57 = vunpack.c.l.s8.bf16 %v353_v56  ;;  %v425_v62 = vunpack.c.h.s8.bf16 %v353_v56 }
  0x85   :  { %2414 = vmatprep.subr.bf16.mxu0 %v3838_v54 }
  0x88   :  { %2415 = vmatpush1.bf16.msra.mxu0 %v3836_v53  ;;  %v462_v53 = vunpack.c.l.s8.bf16 %v374_v49 }
  0x8a   :  { %1142 = vmatmul.mubr.bf16.gmra.mxu1 %v511_v59  ;;  %982 = vmatmul.mubr.bf16.gmra.mxu0 %v447_v60  ;;  %v3841_v59 = vld [vmem:[%s5091_s3 + $0xf4] ss:$8 sps:$4 sm:$0xff]   ;;  %v426_v60 = vunpack.c.h.s8.bf16 %v354_v51 }
  0x8b   :  { %1151 = vmatprep.mubr.bf16.mxu1 %v516_v61  ;;  %991 = vmatprep.mubr.bf16.mxu0 %v452_v63  ;;  %v358_v61 = vld [vmem:[%s5090_s0 + $0x58] sm:$0xff]  ;;  %v3842_v63 = vld [vmem:[%s5091_s3 + $0xe0] ss:$8 sps:$4 sm:$0xff]  }
  0x8c   :  { %2416 = vmatprep.subr.bf16.mxu0 %v3841_v59  ;;  %v430_v1 = vunpack.c.l.s8.bf16 %v358_v61  ;;  %v434_v6 = vunpack.c.h.s8.bf16 %v358_v61 }
  0x8d   :  { %2417 = vmatpush2.bf16.msra.mxu0 %v3839_v58 }
  0x8e   :  { %2418 = vmatprep.subr.bf16.mxu0 %v3844_v0 }
  0x91   :  { %2419 = vmatpush2.bf16.msra.mxu0 %v3842_v63 }
  0x92   :  { %1152 = vmatmul.mubr.bf16.gmra.mxu1 %v515_v2  ;;  %992 = vmatmul.mubr.bf16.gmra.mxu0 %v451_v3  ;;  %v357_v2 = vld [vmem:[%s5090_s0 + $0x50] sm:$0xff] }
  0x93   :  { %1161 = vmatprep.mubr.bf16.mxu1 %v520_v4  ;;  %1001 = vmatprep.mubr.bf16.mxu0 %v456_v7  ;;  %v429_v3 = vunpack.c.l.s8.bf16 %v357_v2  ;;  %v3845_v4 = vld [vmem:[%s5091_s3 + $0xd0] ss:$8 sps:$4 sm:$0xff]   ;;  %v433_v8 = vunpack.c.h.s8.bf16 %v357_v2 }
  0x94   :  { %2420 = vmatprep.subr.bf16.mxu0 %v3847_v5  ;;  %v362_v7 = vld [vmem:[%s5090_s0 + $0x78] sm:$0xff] }
  0x95   :  { %2421 = vmatpush2.bf16.msra.mxu0 %v3845_v4  ;;  %v438_v11 = vunpack.c.l.s8.bf16 %v362_v7 }
  0x9a   :  { %1162 = vmatmul.mubr.bf16.gmra.mxu1 %v519_v9  ;;  %1002 = vmatmul.mubr.bf16.gmra.mxu0 %v455_v10  ;;  %v3848_v9 = vld [vmem:[%s5091_s3 + $0xc0] ss:$8 sps:$4 sm:$0xff]   ;;  %v3850_v10 = vld [vmem:[%s5091_s3 + $0xc4] ss:$8 sps:$4 sm:$0xff]  }
  0x9b   :  { %1171 = vmatprep.mubr.bf16.mxu1 %v524_v13  ;;  %1011 = vmatprep.mubr.bf16.mxu0 %v460_v16  ;;  %v437_v13 = vunpack.c.l.s8.bf16 %v361_v12  ;;  %v442_v16 = vunpack.c.h.s8.bf16 %v362_v7 }
  0x9c   :  { %2422 = vmatprep.subr.bf16.mxu0 %v3850_v10 }
  0x9d   :  { %2423 = vmatpush2.bf16.msra.mxu0 %v3848_v9 }
  0x9e   :  { %2424 = vmatprep.subr.bf16.mxu0 %v3853_v15 }
  0xa1   :  { %2425 = vmatpush2.bf16.msra.mxu0 %v3851_v14 }
  0xa2   :  { %1172 = vmatmul.mubr.bf16.gmra.mxu1 %v523_v18  ;;  %1012 = vmatmul.mubr.bf16.gmra.mxu0 %v459_v19  ;;  %v441_v18 = vunpack.c.h.s8.bf16 %v361_v12  ;;  %v3854_v19 = vld [vmem:[%s5091_s3 + $0xa0] ss:$8 sps:$4 sm:$0xff]  }
  0xa3   :  { %1181 = vmatprep.mubr.bf16.mxu1 %v528_v22  ;;  %1021 = vmatprep.mubr.bf16.mxu0 %v464_v23  ;;  %v365_v22 = vld [vmem:[%s5090_s0 + $0x90] sm:$0xff] }
  0xa4   :  { %2426 = vmatprep.subr.bf16.mxu0 %v3856_v20  ;;  %v445_v23 = vunpack.c.l.s8.bf16 %v365_v22  ;;  %v449_v32 = vunpack.c.h.s8.bf16 %v365_v22 }
  0xa5   :  { %2427 = vmatpush2.bf16.msra.mxu0 %v3854_v19 }
  0xaa   :  { %1182 = vmatmul.mubr.bf16.gmra.mxu1 %v527_v25  ;;  %1022 = vmatmul.mubr.bf16.gmra.mxu0 %v463_v26  ;;  %v3859_v25 = vld [vmem:[%s5091_s3 + $0x94] ss:$8 sps:$4 sm:$0xff]   ;;  %v450_v26 = vunpack.c.h.s8.bf16 %v366_v17 }
  0xab   :  { %1191 = vmatprep.mubr.bf16.mxu1 %v532_v29  ;;  %1031 = vmatprep.mubr.bf16.mxu0 %v468_v31  ;;  %v370_v29 = vld [vmem:[%s5090_s0 + $0xb8] sm:$0xff] }
  0xac   :  { %2428 = vmatprep.subr.bf16.mxu0 %v3859_v25  ;;  %v454_v33 = vunpack.c.l.s8.bf16 %v370_v29  ;;  %v458_v44 = vunpack.c.h.s8.bf16 %v370_v29 }
  0xad   :  { %2429 = vmatpush2.bf16.msra.mxu0 %v3857_v24 }
  0xae   :  { %2430 = vmatprep.subr.bf16.mxu0 %v3862_v36 }
  0xb1   :  { %2431 = vmatpush2.bf16.msra.mxu0 %v3860_v37 }
  0xb2   :  { %1192 = vmatmul.mubr.bf16.gmra.mxu1 %v531_v34  ;;  %1032 = vmatmul.mubr.bf16.gmra.mxu0 %v467_v35 }
  0xb3   :  { %1201 = vmatprep.mubr.bf16.mxu1 %v536_v38  ;;  %1041 = vmatprep.mubr.bf16.mxu0 %v472_v39  ;;  %v369_v39 = vld [vmem:[%s5090_s0 + $0xb0] sm:$0xff] }
  0xb4   :  { %v453_v43 = vunpack.c.l.s8.bf16 %v369_v39 }
  0xba   :  { %1202 = vmatmul.mubr.bf16.gmra.mxu1 %v535_v41  ;;  %1042 = vmatmul.mubr.bf16.gmra.mxu0 %v471_v42 }
  0xbb   :  { %1244 = vmatprep.mubr.bf16.mxu1 %v414_v45 }
  0xc2   :  { %1245 = vmatmul.mubr.bf16.vlgmr.msra.gmra.mxu1 %v413_v47 }
  0xc3   :  { %1254 = vmatprep.mubr.bf16.mxu1 %v418_v50 }
  0xca   :  { %1255 = vmatmul.mubr.bf16.gmra.mxu1 %v417_v52  ;;  %v457_v52 = vunpack.c.h.s8.bf16 %v369_v39 }
  0xcb   :  { %1264 = vmatprep.mubr.bf16.mxu1 %v422_v55 }
  0xd2   :  { %1265 = vmatmul.mubr.bf16.gmra.mxu1 %v421_v57  ;;  %v373_v57 = vld [vmem:[%s5090_s0 + $0xd0] sm:$0xff] }
  0xd3   :  { %1274 = vmatprep.mubr.bf16.mxu1 %v426_v60  ;;  %v461_v61 = vunpack.c.l.s8.bf16 %v373_v57 }
  0xda   :  { %1275 = vmatmul.mubr.bf16.gmra.mxu1 %v425_v62  ;;  %v466_v62 = vunpack.c.h.s8.bf16 %v374_v49 }
  0xdb   :  { %1284 = vmatprep.mubr.bf16.mxu1 %v430_v1 }
  0xe2   :  { %1285 = vmatmul.mubr.bf16.gmra.mxu1 %v429_v3  ;;  %v378_v3 = vld [vmem:[%s5090_s0 + $0xf8] sm:$0xff] }
  0xe3   :  { %1294 = vmatprep.mubr.bf16.mxu1 %v434_v6  ;;  %v465_v6 = vunpack.c.h.s8.bf16 %v373_v57  ;;  %v470_v7 = vunpack.c.l.s8.bf16 %v378_v3 }
  0xea   :  { %1295 = vmatmul.mubr.bf16.gmra.mxu1 %v433_v8 }
  0xeb   :  { %1304 = vmatprep.mubr.bf16.mxu1 %v438_v11  ;;  %v377_v11 = vld [vmem:[%s5090_s0 + $0xf0] sm:$0xff] }
  0xec   :  { %v469_v15 = vunpack.c.l.s8.bf16 %v377_v11  ;;  %v473_v24 = vunpack.c.h.s8.bf16 %v377_v11 }
  0xf2   :  { %1305 = vmatmul.mubr.bf16.gmra.mxu1 %v437_v13 }
  0xf3   :  { %1314 = vmatprep.mubr.bf16.mxu1 %v442_v16  ;;  %v474_v16 = vunpack.c.h.s8.bf16 %v378_v3 }
  0xfa   :  { %1315 = vmatmul.mubr.bf16.gmra.mxu1 %v441_v18 }
  0xfb   :  { %1324 = vmatprep.mubr.bf16.mxu1 %v446_v21  ;;  %v382_v21 = vld [vmem:[%s5090_s0 + $0x118] sm:$0xff] }
  0xfc   :  { %v478_v25 = vunpack.c.l.s8.bf16 %v382_v21 }
 0x102   :  { %v4300_v27 = vpop.f32.mrf.mxu1  ;;  %1325 = vmatmul.mubr.bf16.gmra.mxu1 %v445_v23  ;;  %v4307_v30 = vpop.f32.mrf.mxu0 }
 0x103   :  { %1334 = vmatprep.mubr.bf16.mxu1 %v450_v26 }
 0x104   :  { %v4302_v28 = vpop.f32.mrf.mxu1  ;;  %v4313_v35 = vpop.f32.mrf.mxu0 }
 0x106   :  { %v4309_v31 = vpop.f32.mrf.mxu1  ;;  %v4328_v41 = vpop.f32.mrf.mxu0 }
 0x108   :  { %v4311_v34 = vpop.f32.mrf.mxu1  ;;  %v4334_v46 = vpop.f32.mrf.mxu0 }
 0x10a   :  { %v4321_v38 = vpop.f32.mrf.mxu1  ;;  %1335 = vmatmul.mubr.bf16.gmra.mxu1 %v449_v32  ;;  %v4343_v50 = vpop.f32.mrf.mxu0 }
 0x10b   :  { %1344 = vmatprep.mubr.bf16.mxu1 %v454_v33  ;;  %v381_v33 = vld [vmem:[%s5090_s0 + $0x110] sm:$0xff] }
 0x10c   :  { %v4326_v40 = vpop.f32.mrf.mxu1  ;;  %v4349_v55 = vpop.f32.mrf.mxu0 }
 0x10e   :  { %v4330_v42 = vpop.f32.mrf.mxu1  ;;  %v4358_v59 = vpop.f32.mrf.mxu0 }
 0x110   :  { %v4332_v45 = vpop.f32.mrf.mxu1  ;;  %v4364_v0 = vpop.f32.mrf.mxu0 }
 0x112   :  { %v4336_v47 = vpop.f32.mrf.mxu1  ;;  %1345 = vmatmul.mubr.bf16.gmra.mxu1 %v453_v43  ;;  %v4373_v4 = vpop.f32.mrf.mxu0  ;;  %v477_v43 = vunpack.c.l.s8.bf16 %v381_v33 }
 0x113   :  { %1354 = vmatprep.mubr.bf16.mxu1 %v458_v44  ;;  %v482_v44 = vunpack.c.h.s8.bf16 %v382_v21  ;;  %v385_v21 = vld [vmem:[%s5090_s0 + $0x130] sm:$0xff] }
 0x114   :  { %v4338_v48 = vpop.f32.mrf.mxu1  ;;  %v4379_v9 = vpop.f32.mrf.mxu0 }
 0x116   :  { %v4345_v51 = vpop.f32.mrf.mxu1  ;;  %v4388_v13 = vpop.f32.mrf.mxu0 }
 0x118   :  { %v4347_v54 = vpop.f32.mrf.mxu1  ;;  %v4394_v18 = vpop.f32.mrf.mxu0 }
 0x11a   :  { %v4351_v56 = vpop.f32.mrf.mxu1  ;;  %1355 = vmatmul.mubr.bf16.gmra.mxu1 %v457_v52  ;;  %v4403_v22 = vpop.f32.mrf.mxu0 }
 0x11b   :  { %5094 = vst [vmem:[#allocation3_spill] sm:$0xff] %v4351_v56  ;;  %1364 = vmatprep.mubr.bf16.mxu1 %v462_v53 }
 0x11c   :  { %v4356_v58 = vpop.f32.mrf.mxu1  ;;  %v4409_v29 = vpop.f32.mrf.mxu0 }
 0x11e   :  { %v4360_v60 = vpop.f32.mrf.mxu1  ;;  %v4418_v37 = vpop.f32.mrf.mxu0 }
 0x120   :  { %v4362_v63 = vpop.f32.mrf.mxu1  ;;  %v4424_v52 = vpop.f32.mrf.mxu0 }
 0x121   :  { %5095 = vst [vmem:[#allocation4_spill] sm:$0xff] %v4362_v63 }
 0x122   :  { %v4366_v1 = vpop.f32.mrf.mxu1  ;;  %1365 = vmatmul.mubr.bf16.gmra.mxu1 %v461_v61  ;;  %v386_v61 = vld [vmem:[%s5090_s0 + $0x138] sm:$0xff] }
 0x123   :  { %5096 = vst [vmem:[#allocation5_spill] sm:$0xff] %v4366_v1  ;;  %1374 = vmatprep.mubr.bf16.mxu1 %v466_v62  ;;  %v4433_v62 = vpop.f32.mrf.mxu0 }
 0x124   :  { %v4368_v2 = vpop.f32.mrf.mxu1 }
 0x125   :  { %5097 = vst [vmem:[#allocation6_spill] sm:$0xff] %v4368_v2 }
 0x126   :  { %v4375_v5 = vpop.f32.mrf.mxu1 }
 0x127   :  { %5098 = vst [vmem:[#allocation7_spill] sm:$0xff] %v4375_v5 }
 0x128   :  { %v4377_v8 = vpop.f32.mrf.mxu1 }
 0x129   :  { %5099 = vst [vmem:[#allocation8_spill] sm:$0xff] %v4377_v8 }
 0x12a   :  { %v4381_v10 = vpop.f32.mrf.mxu1  ;;  %1375 = vmatmul.mubr.bf16.gmra.mxu1 %v465_v6  ;;  %v481_v6 = vunpack.c.h.s8.bf16 %v381_v33  ;;  %v485_v33 = vunpack.c.l.s8.bf16 %v385_v21 }
 0x12b   :  { %5100 = vst [vmem:[#allocation9_spill] sm:$0xff] %v4381_v10  ;;  %1384 = vmatprep.mubr.bf16.mxu1 %v470_v7  ;;  %v486_v7 = vunpack.c.l.s8.bf16 %v386_v61 }
 0x12c   :  { %v4386_v12 = vpop.f32.mrf.mxu1 }
 0x12d   :  { %5101 = vst [vmem:[#allocation10_spill] sm:$0xff] %v4386_v12 }
 0x12e   :  { %v4390_v14 = vpop.f32.mrf.mxu1 }
 0x12f   :  { %5102 = vst [vmem:[#allocation11_spill] sm:$0xff] %v4390_v14 }
 0x130   :  { %v4392_v17 = vpop.f32.mrf.mxu1 }
 0x131   :  { %5103 = vst [vmem:[#allocation12_spill] sm:$0xff] %v4392_v17 }
 0x132   :  { %v4396_v19 = vpop.f32.mrf.mxu1  ;;  %1385 = vmatmul.mubr.bf16.gmra.mxu1 %v469_v15  ;;  %v4439_v15 = vpop.f32.mrf.mxu0 }
 0x133   :  { %5104 = vst [vmem:[#allocation13_spill] sm:$0xff] %v4396_v19  ;;  %1394 = vmatprep.mubr.bf16.mxu1 %v474_v16 }
 0x134   :  { %v4398_v20 = vpop.f32.mrf.mxu1 }
 0x135   :  { %5105 = vst [vmem:[#allocation14_spill] sm:$0xff] %v4398_v20 }
 0x136   :  { %v4405_v23 = vpop.f32.mrf.mxu1 }
 0x137   :  { %5106 = vst [vmem:[#allocation15_spill] sm:$0xff] %v4405_v23 }
 0x138   :  { %v4407_v26 = vpop.f32.mrf.mxu1 }
 0x139   :  { %5107 = vst [vmem:[#allocation16_spill] sm:$0xff] %v4407_v26 }
 0x13a   :  { %v4411_v32 = vpop.f32.mrf.mxu1  ;;  %1395 = vmatmul.mubr.bf16.gmra.mxu1 %v473_v24 }
 0x13b   :  { %5108 = vst [vmem:[#allocation17_spill] sm:$0xff] %v4411_v32  ;;  %1404 = vmatprep.mubr.bf16.mxu1 %v478_v25  ;;  %v4448_v25 = vpop.f32.mrf.mxu0 }
 0x13c   :  { %v4416_v36 = vpop.f32.mrf.mxu1 }
 0x13d   :  { %5109 = vst [vmem:[#allocation18_spill] sm:$0xff] %v4416_v36 }
 0x13e   :  { %v4420_v39 = vpop.f32.mrf.mxu1 }
 0x13f   :  { %5110 = vst [vmem:[#allocation19_spill] sm:$0xff] %v4420_v39 }
 0x140   :  { %v4422_v49 = vpop.f32.mrf.mxu1 }
 0x141   :  { %5111 = vst [vmem:[#allocation20_spill] sm:$0xff] %v4422_v49 }
 0x142   :  { %v4426_v53 = vpop.f32.mrf.mxu1  ;;  %1405 = vmatmul.mubr.bf16.gmra.mxu1 %v477_v43 }
 0x143   :  { %5112 = vst [vmem:[#allocation21_spill] sm:$0xff] %v4426_v53  ;;  %1414 = vmatprep.mubr.bf16.mxu1 %v482_v44  ;;  %v490_v44 = vunpack.c.h.s8.bf16 %v386_v61 }
 0x144   :  { %v4428_v57 = vpop.f32.mrf.mxu1 }
 0x145   :  { %5113 = vst [vmem:[#allocation22_spill] sm:$0xff] %v4428_v57 }
 0x146   :  { %v4435_v3 = vpop.f32.mrf.mxu1 }
 0x147   :  { %5114 = vst [vmem:[#allocation23_spill] sm:$0xff] %v4435_v3 }
 0x148   :  { %v4437_v11 = vpop.f32.mrf.mxu1 }
 0x149   :  { %5115 = vst [vmem:[#allocation24_spill] sm:$0xff] %v4437_v11  ;;  %v4454_v11 = vpop.f32.mrf.mxu0 }
 0x14a   :  { %v4441_v16 = vpop.f32.mrf.mxu1  ;;  %1415 = vmatmul.mubr.bf16.gmra.mxu1 %v481_v6 }
 0x14b   :  { %5116 = vst [vmem:[#allocation25_spill] sm:$0xff] %v4441_v16  ;;  %1424 = vmatprep.mubr.bf16.mxu1 %v486_v7  ;;  %v390_v7 = vld [vmem:[%s5090_s0 + $0x158] sm:$0xff]  ;;  %v4463_v16 = vpop.f32.mrf.mxu0 }
 0x14c   :  { %v4446_v24 = vpop.f32.mrf.mxu1  ;;  %v494_v61 = vunpack.c.l.s8.bf16 %v390_v7 }
 0x14d   :  { %5117 = vst [vmem:[#allocation26_spill] sm:$0xff] %v4446_v24 }
 0x14e   :  { %v4450_v43 = vpop.f32.mrf.mxu1 }
 0x14f   :  { %5118 = vst [vmem:[#allocation27_spill] sm:$0xff] %v4450_v43  ;;  %v489_v43 = vunpack.c.h.s8.bf16 %v385_v21 }
 0x150   :  { %v4452_v53 = vpop.f32.mrf.mxu1 }
 0x151   :  { %5119 = vst [vmem:[#allocation28_spill] sm:$0xff] %v4452_v53  ;;  %v4469_v53 = vpop.f32.mrf.mxu0 }
 0x152   :  { %v4456_v57 = vpop.f32.mrf.mxu1  ;;  %1425 = vmatmul.mubr.bf16.gmra.mxu1 %v485_v33  ;;  %v389_v33 = vld [vmem:[%s5090_s0 + $0x150] sm:$0xff] }
 0x153   :  { %5120 = vst [vmem:[#allocation29_spill] sm:$0xff] %v4456_v57  ;;  %1434 = vmatprep.mubr.bf16.mxu1 %v490_v44  ;;  %v4478_v57 = vpop.f32.mrf.mxu0  ;;  %v493_v21 = vunpack.c.l.s8.bf16 %v389_v33 }
 0x154   :  { %v4458_v6 = vpop.f32.mrf.mxu1 }
 0x155   :  { %5121 = vst [vmem:[#allocation30_spill] sm:$0xff] %v4458_v6 }
 0x156   :  { %v4465_v24 = vpop.f32.mrf.mxu1 }
 0x157   :  { %5122 = vst [vmem:[#allocation31_spill] sm:$0xff] %v4465_v24  ;;  %v498_v24 = vunpack.c.h.s8.bf16 %v390_v7 }
 0x158   :  { %v4467_v3 = vpop.f32.mrf.mxu1 }
 0x159   :  { %5123 = vst [vmem:[#allocation32_spill] sm:$0xff] %v4467_v3  ;;  %v4484_v3 = vpop.f32.mrf.mxu0 }
 0x15a   :  { %v4471_v32 = vpop.f32.mrf.mxu1  ;;  %1435 = vmatmul.mubr.bf16.gmra.mxu1 %v489_v43 }
 0x15b   :  { %5124 = vst [vmem:[#allocation33_spill] sm:$0xff] %v4471_v32  ;;  %1444 = vmatprep.mubr.bf16.mxu1 %v494_v61  ;;  %v394_v61 = vld [vmem:[%s5090_s0 + $0x178] sm:$0xff]  ;;  %v4493_v32 = vpop.f32.mrf.mxu0 }
 0x15c   :  { %v4476_v44 = vpop.f32.mrf.mxu1  ;;  %v502_v7 = vunpack.c.l.s8.bf16 %v394_v61 }
 0x15d   :  { %5125 = vst [vmem:[#allocation34_spill] sm:$0xff] %v4476_v44 }
 0x15e   :  { %v4480_v6 = vpop.f32.mrf.mxu1 }
 0x15f   :  { %5126 = vst [vmem:[#allocation35_spill] sm:$0xff] %v4480_v6  ;;  %v497_v6 = vunpack.c.h.s8.bf16 %v389_v33 }
 0x160   :  { %v4482_v49 = vpop.f32.mrf.mxu1 }
 0x161   :  { %5127 = vst [vmem:[#allocation36_spill] sm:$0xff] %v4482_v49  ;;  %v4499_v49 = vpop.f32.mrf.mxu0 }
 0x162   :  { %v4486_v36 = vpop.f32.mrf.mxu1  ;;  %1445 = vmatmul.mubr.bf16.gmra.mxu1 %v493_v21 }
 0x163   :  { %5128 = vst [vmem:[#allocation37_spill] sm:$0xff] %v4486_v36  ;;  %1454 = vmatprep.mubr.bf16.mxu1 %v498_v24  ;;  %v393_v24 = vld [vmem:[%s5090_s0 + $0x170] sm:$0xff]  ;;  %v4508_v36 = vpop.f32.mrf.mxu0 }
 0x164   :  { %v4488_v43 = vpop.f32.mrf.mxu1  ;;  %v501_v33 = vunpack.c.l.s8.bf16 %v393_v24 }
 0x165   :  { %5129 = vst [vmem:[#allocation38_spill] sm:$0xff] %v4488_v43 }
 0x166   :  { %v4495_v44 = vpop.f32.mrf.mxu1 }
 0x167   :  { %5130 = vst [vmem:[#allocation39_spill] sm:$0xff] %v4495_v44  ;;  %v506_v44 = vunpack.c.h.s8.bf16 %v394_v61 }
 0x168   :  { %v4497_v39 = vpop.f32.mrf.mxu1 }
 0x169   :  { %5131 = vst [vmem:[#allocation40_spill] sm:$0xff] %v4497_v39  ;;  %v4514_v39 = vpop.f32.mrf.mxu0 }
 0x16a   :  { %v4501_v19 = vpop.f32.mrf.mxu1  ;;  %1455 = vmatmul.mubr.bf16.gmra.mxu1 %v497_v6 }
 0x16b   :  { %5132 = vst [vmem:[#allocation41_spill] sm:$0xff] %v4501_v19  ;;  %1464 = vmatprep.mubr.bf16.mxu1 %v502_v7  ;;  %v398_v7 = vld [vmem:[%s5090_s0 + $0x198] sm:$0xff]  ;;  %v4523_v19 = vpop.f32.mrf.mxu0 }
 0x16c   :  { %v4506_v21 = vpop.f32.mrf.mxu1  ;;  %v510_v61 = vunpack.c.l.s8.bf16 %v398_v7 }
 0x16d   :  { %5133 = vst [vmem:[#allocation42_spill] sm:$0xff] %v4506_v21 }
 0x16e   :  { %v4510_v43 = vpop.f32.mrf.mxu1 }
 0x16f   :  { %5134 = vst [vmem:[#allocation43_spill] sm:$0xff] %v4510_v43  ;;  %v505_v43 = vunpack.c.h.s8.bf16 %v393_v24 }
 0x170   :  { %v4512_v26 = vpop.f32.mrf.mxu1 }
 0x171   :  { %5135 = vst [vmem:[#allocation44_spill] sm:$0xff] %v4512_v26  ;;  %v4529_v26 = vpop.f32.mrf.mxu0 }
 0x172   :  { %v4516_v20 = vpop.f32.mrf.mxu1  ;;  %1465 = vmatmul.mubr.bf16.gmra.mxu1 %v501_v33 }
 0x173   :  { %5136 = vst [vmem:[#allocation45_spill] sm:$0xff] %v4516_v20  ;;  %1474 = vmatprep.mubr.bf16.mxu1 %v506_v44  ;;  %v397_v44 = vld [vmem:[%s5090_s0 + $0x190] sm:$0xff]  ;;  %v4538_v20 = vpop.f32.mrf.mxu0 }
 0x174   :  { %v4518_v6 = vpop.f32.mrf.mxu1  ;;  %v509_v24 = vunpack.c.l.s8.bf16 %v397_v44  ;;  %v513_v14 = vunpack.c.h.s8.bf16 %v397_v44  ;;  %v401_v44 = vld [vmem:[%s5090_s0 + $0x1b0] sm:$0xff] }
 0x175   :  { %5137 = vst [vmem:[#allocation46_spill] sm:$0xff] %v4518_v6 }
 0x176   :  { %v4525_v21 = vpop.f32.mrf.mxu1 }
 0x177   :  { %5138 = vst [vmem:[#allocation47_spill] sm:$0xff] %v4525_v21  ;;  %v514_v21 = vunpack.c.h.s8.bf16 %v398_v7 }
 0x178   :  { %v4527_v23 = vpop.f32.mrf.mxu1 }
 0x179   :  { %5139 = vst [vmem:[#allocation48_spill] sm:$0xff] %v4527_v23  ;;  %v4544_v23 = vpop.f32.mrf.mxu0 }
 0x17a   :  { %v4531_v10 = vpop.f32.mrf.mxu1  ;;  %1475 = vmatmul.mubr.bf16.gmra.mxu1 %v505_v43 }
 0x17b   :  { %5140 = vst [vmem:[#allocation49_spill] sm:$0xff] %v4531_v10  ;;  %1484 = vmatprep.mubr.bf16.mxu1 %v510_v61  ;;  %v402_v61 = vld [vmem:[%s5090_s0 + $0x1b8] sm:$0xff]  ;;  %v4549_v10 = vpop.f32.mrf.mxu0 }
 0x17c   :  { %v4536_v33 = vpop.f32.mrf.mxu1  ;;  %v518_v1 = vunpack.c.l.s8.bf16 %v402_v61 }
 0x17d   :  { %5141 = vst [vmem:[#allocation50_spill] sm:$0xff] %v4536_v33  ;;  %v4552_v8 = vpop.f32.mrf.mxu0 }
 0x17e   :  { %v4540_v6 = vpop.f32.mrf.mxu1 }
 0x17f   :  { %5142 = vst [vmem:[#allocation51_spill] sm:$0xff] %v4540_v6 }
 0x180   :  { %v4542_v17 = vpop.f32.mrf.mxu1 }
 0x181   :  { %5143 = vst [vmem:[#allocation52_spill] sm:$0xff] %v4542_v17 }
 0x182   :  { %v1246_v12 = vpop.f32.mrf.mxu1  ;;  %1485 = vmatmul.mubr.bf16.gmra.mxu1 %v509_v24 }
 0x183   :  { %1494 = vmatprep.mubr.bf16.mxu1 %v514_v21  ;;  %v1247_v21 = vadd.f32 %v1246_v12, %v4307_v30 }
 0x184   :  { %v1248_v43 = vpop.f32.mrf.mxu1 }
 0x185   :  { %v1249_v17 = vadd.f32 %v1248_v43, %v4313_v35  ;;  %v517_v35 = vunpack.c.l.s8.bf16 %v401_v44  ;;  %v522_v43 = vunpack.c.h.s8.bf16 %v402_v61 }
 0x186   :  { %v1250_v33 = vpop.f32.mrf.mxu1 }
 0x187   :  { %v1251_v6 = vadd.f32 %v1250_v33, %v4328_v41  ;;  %v4560_v41 = vpop.f32.mrf.mxu0 }
 0x188   :  { %v1252_v7 = vpop.f32.mrf.mxu1 }
 0x189   :  { %v1253_v24 = vadd.f32 %v1252_v7, %v4334_v46  ;;  %v1952_v56 = vpack.c.bf16 %v1251_v6, %v1247_v21  ;;  %v4563_v12 = vpop.f32.mrf.mxu0 }
 0x18a   :  { %v1256_v2 = vpop.f32.mrf.mxu1  ;;  %1495 = vmatmul.mubr.bf16.gmra.mxu1 %v513_v14 }
 0x18b   :  { %v1953_v5 = vpack.c.bf16 %v1253_v24, %v1249_v17  ;;  %1504 = vmatprep.mubr.bf16.mxu1 %v518_v1  ;;  %v1257_v17 = vadd.f32 %v1256_v2, %v4343_v50 }
 0x18c   :  { %v1258_v63 = vpop.f32.mrf.mxu1 }
 0x18d   :  { %2432 = vmatprep.mubr.bf16.mxu0 %v1953_v5  ;;  %v1259_v1 = vadd.f32 %v1258_v63, %v4349_v55  ;;  %v521_v55 = vunpack.c.h.s8.bf16 %v401_v44  ;;  %v405_v44 = vld [vmem:[%s5090_s0 + $0x1d0] sm:$0xff] }
 0x18e   :  { %v1260_v33 = vpop.f32.mrf.mxu1  ;;  %2433 = vmatmul.mubr.bf16.vlgmr.msra.gmra.mxu0 %v1952_v56  ;;  %v406_v56 = vld [vmem:[%s5090_s0 + $0x1d8] sm:$0xff] }
 0x18f   :  { %v1261_v46 = vadd.f32 %v1260_v33, %v4358_v59  ;;  %v4571_v59 = vpop.f32.mrf.mxu0  ;;  %v526_v63 = vunpack.c.l.s8.bf16 %v406_v56 }
 0x190   :  { %v1262_v30 = vpop.f32.mrf.mxu1 }
 0x191   :  { %v1263_v14 = vadd.f32 %v1262_v30, %v4364_v0  ;;  %v1954_v5 = vpack.c.bf16 %v1261_v46, %v1257_v17  ;;  %v4574_v2 = vpop.f32.mrf.mxu0  ;;  %v530_v17 = vunpack.c.h.s8.bf16 %v406_v56  ;;  %v410_v56 = vld [vmem:[%s5090_s0 + $0x1f8] sm:$0xff] }
 0x192   :  { %v1266_v6 = vpop.f32.mrf.mxu1  ;;  %1505 = vmatmul.mubr.bf16.gmra.mxu1 %v517_v35 }
 0x193   :  { %v1955_v7 = vpack.c.bf16 %v1263_v14, %v1259_v1  ;;  %1514 = vmatprep.mubr.bf16.mxu1 %v522_v43  ;;  %v1267_v35 = vadd.f32 %v1266_v6, %v4373_v4 }
 0x194   :  { %v1268_v24 = vpop.f32.mrf.mxu1 }
 0x195   :  { %2442 = vmatprep.mubr.bf16.mxu0 %v1955_v7  ;;  %v1269_v21 = vadd.f32 %v1268_v24, %v4379_v9  ;;  %v525_v9 = vunpack.c.l.s8.bf16 %v405_v44 }
 0x196   :  { %v1270_v61 = vpop.f32.mrf.mxu1  ;;  %2443 = vmatmul.mubr.bf16.gmra.mxu0 %v1954_v5 }
 0x197   :  { %v1271_v0 = vadd.f32 %v1270_v61, %v4388_v13  ;;  %v4582_v13 = vpop.f32.mrf.mxu0 }
 0x198   :  { %v1272_v50 = vpop.f32.mrf.mxu1 }
 0x199   :  { %v1273_v33 = vadd.f32 %v1272_v50, %v4394_v18  ;;  %v1956_v30 = vpack.c.bf16 %v1271_v0, %v1267_v35  ;;  %v4585_v6 = vpop.f32.mrf.mxu0 }
 0x19a   :  { %v1276_v43 = vpop.f32.mrf.mxu1  ;;  %1515 = vmatmul.mubr.bf16.gmra.mxu1 %v521_v55 }
 0x19b   :  { %v1957_v46 = vpack.c.bf16 %v1273_v33, %v1269_v21  ;;  %1524 = vmatprep.mubr.bf16.mxu1 %v526_v63  ;;  %v1277_v24 = vadd.f32 %v1276_v43, %v4403_v22  ;;  %v534_v21 = vunpack.c.l.s8.bf16 %v410_v56 }
 0x19c   :  { %v1278_v1 = vpop.f32.mrf.mxu1 }
 0x19d   :  { %2452 = vmatprep.mubr.bf16.mxu0 %v1957_v46  ;;  %v1279_v7 = vadd.f32 %v1278_v1, %v4409_v29  ;;  %v529_v29 = vunpack.c.h.s8.bf16 %v405_v44  ;;  %v409_v44 = vld [vmem:[%s5090_s0 + $0x1f0] sm:$0xff] }
 0x19e   :  { %v1280_v14 = vpop.f32.mrf.mxu1  ;;  %2453 = vmatmul.mubr.bf16.gmra.mxu0 %v1956_v30 }
 0x19f   :  { %v1281_v18 = vadd.f32 %v1280_v14, %v4418_v37  ;;  %v4593_v37 = vpop.f32.mrf.mxu0 }
 0x1a0   :  { %v1282_v4 = vpop.f32.mrf.mxu1 }
 0x1a1   :  { %v1283_v5 = vadd.f32 %v1282_v4, %v4424_v52  ;;  %v1958_v63 = vpack.c.bf16 %v1281_v18, %v1277_v24  ;;  %v4596_v33 = vpop.f32.mrf.mxu0  ;;  %v538_v18 = vunpack.c.h.s8.bf16 %v410_v56 }
 0x1a2   :  { %v1286_v61 = vpop.f32.mrf.mxu1  ;;  %1525 = vmatmul.mubr.bf16.gmra.mxu1 %v525_v9 }
 0x1a3   :  { %v1959_v55 = vpack.c.bf16 %v1283_v5, %v1279_v7  ;;  %1534 = vmatprep.mubr.bf16.mxu1 %v530_v17  ;;  %v1287_v46 = vadd.f32 %v1286_v61, %v4433_v62 }
 0x1a4   :  { %v1288_v0 = vpop.f32.mrf.mxu1 }
 0x1a5   :  { %2462 = vmatprep.mubr.bf16.mxu0 %v1959_v55  ;;  %v1289_v35 = vadd.f32 %v1288_v0, %v4439_v15  ;;  %v533_v15 = vunpack.c.l.s8.bf16 %v409_v44 }
 0x1a6   :  { %v1290_v50 = vpop.f32.mrf.mxu1  ;;  %2463 = vmatmul.mubr.bf16.gmra.mxu0 %v1958_v63 }
 0x1a7   :  { %v1291_v52 = vadd.f32 %v1290_v50, %v4448_v25  ;;  %v4604_v25 = vpop.f32.mrf.mxu0 }
 0x1a8   :  { %v1292_v22 = vpop.f32.mrf.mxu1 }
 0x1a9   :  { %v1293_v43 = vadd.f32 %v1292_v22, %v4454_v11  ;;  %v1960_v14 = vpack.c.bf16 %v1291_v52, %v1287_v46  ;;  %v4607_v4 = vpop.f32.mrf.mxu0 }
 0x1aa   :  { %v1296_v30 = vpop.f32.mrf.mxu1  ;;  %1535 = vmatmul.mubr.bf16.gmra.mxu1 %v529_v29 }
 0x1ab   :  { %v1961_v1 = vpack.c.bf16 %v1293_v43, %v1289_v35  ;;  %1544 = vmatprep.mubr.bf16.mxu1 %v534_v21  ;;  %v1297_v24 = vadd.f32 %v1296_v30, %v4463_v16  ;;  %v4612_v50 = vpop.f32.mrf.mxu0 }
 0x1ac   :  { %v1298_v9 = vpop.f32.mrf.mxu1 }
 0x1ad   :  { %2472 = vmatprep.mubr.bf16.mxu0 %v1961_v1  ;;  %v1299_v7 = vadd.f32 %v1298_v9, %v4469_v53  ;;  %v4615_v53 = vpop.f32.mrf.mxu0 }
 0x1ae   :  { %v1300_v17 = vpop.f32.mrf.mxu1  ;;  %2473 = vmatmul.mubr.bf16.gmra.mxu0 %v1960_v14 }
 0x1af   :  { %v1301_v11 = vadd.f32 %v1300_v17, %v4478_v57  ;;  %v537_v57 = vunpack.c.h.s8.bf16 %v409_v44  ;;  %v1007_v30 = vpop.f32.mrf.mxu0 }
 0x1b0   :  { %v1302_v62 = vpop.f32.mrf.mxu1 }
 0x1b1   :  { %v1303_v5 = vadd.f32 %v1302_v62, %v4484_v3  ;;  %v1962_v63 = vpack.c.bf16 %v1301_v11, %v1297_v24  ;;  %v1009_v14 = vpop.f32.mrf.mxu0 }
 0x1b2   :  { %v1306_v61 = vpop.f32.mrf.mxu1  ;;  %1545 = vmatmul.mubr.bf16.gmra.mxu1 %v533_v15 }
 0x1b3   :  { %v1963_v55 = vpack.c.bf16 %v1303_v5, %v1299_v7  ;;  %1554 = vmatprep.mubr.bf16.mxu1 %v538_v18  ;;  %v1307_v52 = vadd.f32 %v1306_v61, %v4493_v32  ;;  %v4624_v11 = vpop.f32.mrf.mxu0 }
 0x1b4   :  { %v1308_v0 = vpop.f32.mrf.mxu1 }
 0x1b5   :  { %2482 = vmatprep.mubr.bf16.mxu0 %v1963_v55  ;;  %v1309_v3 = vadd.f32 %v1308_v0, %v4499_v49  ;;  %v1015_v5 = vpop.f32.mrf.mxu0 }
 0x1b6   :  { %v1310_v56 = vpop.f32.mrf.mxu1  ;;  %2483 = vmatmul.mubr.bf16.gmra.mxu0 %v1962_v63 }
 0x1b7   :  { %v1311_v29 = vadd.f32 %v1310_v56, %v4508_v36  ;;  %v1017_v0 = vpop.f32.mrf.mxu0 }
 0x1b8   :  { %v1312_v21 = vpop.f32.mrf.mxu1 }
 0x1b9   :  { %v1313_v16 = vadd.f32 %v1312_v21, %v4514_v39  ;;  %v1964_v43 = vpack.c.bf16 %v1311_v29, %v1307_v52 }
 0x1ba   :  { %v1316_v22 = vpop.f32.mrf.mxu1  ;;  %1555 = vmatmul.mubr.bf16.gmra.mxu1 %v537_v57 }
 0x1bb   :  { %v1965_v35 = vpack.c.bf16 %v1313_v16, %v1309_v3  ;;  %v1317_v39 = vadd.f32 %v1316_v22, %v4523_v19 }
 0x1bc   :  { %v1318_v46 = vpop.f32.mrf.mxu1 }
 0x1bd   :  { %2492 = vmatprep.mubr.bf16.mxu0 %v1965_v35  ;;  %v1319_v9 = vadd.f32 %v1318_v46, %v4529_v26 }
 0x1be   :  { %v1320_v1 = vpop.f32.mrf.mxu1  ;;  %2493 = vmatmul.mubr.bf16.gmra.mxu0 %v1964_v43 }
 0x1bf   :  { %v1321_v36 = vadd.f32 %v1320_v1, %v4538_v20 }
 0x1c0   :  { %v1322_v44 = vpop.f32.mrf.mxu1 }
 0x1c1   :  { %v1323_v49 = vadd.f32 %v1322_v44, %v4544_v23  ;;  %v1966_v15 = vpack.c.bf16 %v1321_v36, %v1317_v39 }
 0x1c2   :  { %v1326_v32 = vpop.f32.mrf.mxu1 }
 0x1c3   :  { %v1967_v17 = vpack.c.bf16 %v1323_v49, %v1319_v9  ;;  %v1327_v23 = vadd.f32 %v1326_v32, %v4549_v10 }
 0x1c4   :  { %v1328_v18 = vpop.f32.mrf.mxu1 }
 0x1c5   :  { %2502 = vmatprep.mubr.bf16.mxu0 %v1967_v17  ;;  %v1329_v24 = vadd.f32 %v1328_v18, %v4552_v8 }
 0x1c6   :  { %v1330_v62 = vpop.f32.mrf.mxu1  ;;  %2503 = vmatmul.mubr.bf16.gmra.mxu0 %v1966_v15 }
 0x1c7   :  { %v1331_v7 = vadd.f32 %v1330_v62, %v4560_v41  ;;  %v1019_v41 = vpop.f32.mrf.mxu0 }
 0x1c8   :  { %v1332_v20 = vpop.f32.mrf.mxu1 }
 0x1c9   :  { %v1333_v26 = vadd.f32 %v1332_v20, %v4563_v12  ;;  %v1968_v55 = vpack.c.bf16 %v1331_v7, %v1327_v23  ;;  %v1023_v22 = vpop.f32.mrf.mxu0 }
 0x1ca   :  { %v1336_v19 = vpop.f32.mrf.mxu1 }
 0x1cb   :  { %v1969_v61 = vpack.c.bf16 %v1333_v26, %v1329_v24  ;;  %v1337_v12 = vadd.f32 %v1336_v19, %v4571_v59 }
 0x1cc   :  { %v1338_v63 = vpop.f32.mrf.mxu1 }
 0x1cd   :  { %2512 = vmatprep.mubr.bf16.mxu0 %v1969_v61  ;;  %v1339_v21 = vadd.f32 %v1338_v63, %v4574_v2 }
 0x1ce   :  { %v1340_v56 = vpop.f32.mrf.mxu1  ;;  %2513 = vmatmul.mubr.bf16.gmra.mxu0 %v1968_v55 }
 0x1cf   :  { %v1341_v57 = vadd.f32 %v1340_v56, %v4582_v13  ;;  %v1025_v13 = vpop.f32.mrf.mxu0 }
 0x1d0   :  { %v1342_v29 = vpop.f32.mrf.mxu1 }
 0x1d1   :  { %v1343_v8 = vadd.f32 %v1342_v29, %v4585_v6  ;;  %v1970_v16 = vpack.c.bf16 %v1341_v57, %v1337_v12  ;;  %v1027_v49 = vpop.f32.mrf.mxu0 }
 0x1d2   :  { %v1346_v3 = vpop.f32.mrf.mxu1 }
 0x1d3   :  { %v1971_v10 = vpack.c.bf16 %v1343_v8, %v1339_v21  ;;  %v1347_v6 = vadd.f32 %v1346_v3, %v4593_v37  ;;  %v1029_v15 = vpop.f32.mrf.mxu0 }
 0x1d4   :  { %v1348_v52 = vpop.f32.mrf.mxu1 }
 0x1d5   :  { %2522 = vmatprep.mubr.bf16.mxu0 %v1971_v10  ;;  %v1349_v1 = vadd.f32 %v1348_v52, %v4596_v33  ;;  %v1033_v20 = vpop.f32.mrf.mxu0 }
 0x1d6   :  { %v1350_v35 = vpop.f32.mrf.mxu1  ;;  %2523 = vmatmul.mubr.bf16.gmra.mxu0 %v1970_v16 }
 0x1d7   :  { %v1351_v43 = vadd.f32 %v1350_v35, %v4604_v25  ;;  %v1035_v19 = vpop.f32.mrf.mxu0 }
 0x1d8   :  { %v1352_v46 = vpop.f32.mrf.mxu1 }
 0x1d9   :  { %v1353_v2 = vadd.f32 %v1352_v46, %v4607_v4  ;;  %v1972_v44 = vpack.c.bf16 %v1351_v43, %v1347_v6 }
 0x1da   :  { %v1356_v36 = vpop.f32.mrf.mxu1 }
 0x1db   :  { %v1973_v59 = vpack.c.bf16 %v1353_v2, %v1349_v1  ;;  %v1357_v33 = vadd.f32 %v1356_v36, %v4612_v50  ;;  %v1037_v50 = vpop.f32.mrf.mxu0 }
 0x1dc   :  { %v1358_v9 = vpop.f32.mrf.mxu1 }
 0x1dd   :  { %2532 = vmatprep.mubr.bf16.mxu0 %v1973_v59  ;;  %v1359_v25 = vadd.f32 %v1358_v9, %v4615_v53  ;;  %v1039_v8 = vpop.f32.mrf.mxu0 }
 0x1de   :  { %v1360_v39 = vpop.f32.mrf.mxu1  ;;  %2533 = vmatmul.mubr.bf16.gmra.mxu0 %v1972_v44 }
 0x1df   :  { %v1361_v32 = vadd.f32 %v1360_v39, %v1007_v30  ;;  %v1043_v52 = vpop.f32.mrf.mxu0 }
 0x1e0   :  { %v1362_v17 = vpop.f32.mrf.mxu1 }
 0x1e1   :  { %v1363_v18 = vadd.f32 %v1362_v17, %v1009_v14  ;;  %v1974_v7 = vpack.c.bf16 %v1361_v32, %v1357_v33  ;;  %v1045_v43 = vpop.f32.mrf.mxu0 }
 0x1e2   :  { %v1366_v62 = vpop.f32.mrf.mxu1 }
 0x1e3   :  { %v1975_v4 = vpack.c.bf16 %v1363_v18, %v1359_v25  ;;  %v1367_v55 = vadd.f32 %v1366_v62, %v4624_v11 }
 0x1e4   :  { %v1368_v37 = vpop.f32.mrf.mxu1 }
 0x1e5   :  { %2542 = vmatprep.mubr.bf16.mxu0 %v1975_v4  ;;  %v1369_v61 = vadd.f32 %v1368_v37, %v1015_v5 }
 0x1e6   :  { %v1370_v24 = vpop.f32.mrf.mxu1  ;;  %2543 = vmatmul.mubr.bf16.gmra.mxu0 %v1974_v7 }
 0x1e7   :  { %v1371_v26 = vadd.f32 %v1370_v24, %v1017_v0 }
 0x1e8   :  { %v1372_v23 = vpop.f32.mrf.mxu1 }
 0x1e9   :  { %v1373_v30 = vadd.f32 %v1372_v23, %v1019_v41  ;;  %v1976_v14 = vpack.c.bf16 %v1371_v26, %v1367_v55 }
 0x1ea   :  { %v1376_v63 = vpop.f32.mrf.mxu1 }
 0x1eb   :  { %v1977_v53 = vpack.c.bf16 %v1373_v30, %v1369_v61  ;;  %v1377_v0 = vadd.f32 %v1376_v63, %v1023_v22 }
 0x1ec   :  { %v1378_v56 = vpop.f32.mrf.mxu1 }
 0x1ed   :  { %2552 = vmatprep.mubr.bf16.mxu0 %v1977_v53  ;;  %v1379_v12 = vadd.f32 %v1378_v56, %v1025_v13  ;;  %v1047_v13 = vpop.f32.mrf.mxu0 }
 0x1ee   :  { %v1380_v57 = vpop.f32.mrf.mxu1  ;;  %2553 = vmatmul.mubr.bf16.gmra.mxu0 %v1976_v14 }
 0x1ef   :  { %v1381_v29 = vadd.f32 %v1380_v57, %v1027_v49  ;;  %v1049_v49 = vpop.f32.mrf.mxu0 }
 0x1f0   :  { %v1382_v21 = vpop.f32.mrf.mxu1 }
 0x1f1   :  { %v1383_v3 = vadd.f32 %v1382_v21, %v1029_v15  ;;  %v1978_v5 = vpack.c.bf16 %v1381_v29, %v1377_v0 }
 0x1f2   :  { %v1386_v10 = vpop.f32.mrf.mxu1 }
 0x1f3   :  { %v1979_v16 = vpack.c.bf16 %v1383_v3, %v1379_v12  ;;  %v1387_v6 = vadd.f32 %v1386_v10, %v1033_v20 }
 0x1f4   :  { %v1388_v41 = vpop.f32.mrf.mxu1 }
 0x1f5   :  { %2562 = vmatprep.mubr.bf16.mxu0 %v1979_v16  ;;  %v1389_v1 = vadd.f32 %v1388_v41, %v1035_v19 }
 0x1f6   :  { %v1390_v11 = vpop.f32.mrf.mxu1  ;;  %2563 = vmatmul.mubr.bf16.gmra.mxu0 %v1978_v5 }
 0x1f7   :  { %v1391_v35 = vadd.f32 %v1390_v11, %v1037_v50  ;;  %v5145_v11 = vld [vmem:[#allocation3_spill] sm:$0xff] }
 0x1f8   :  { %v1392_v46 = vpop.f32.mrf.mxu1 }
 0x1f9   :  { %v1393_v2 = vadd.f32 %v1392_v46, %v1039_v8  ;;  %v1980_v44 = vpack.c.bf16 %v1391_v35, %v1387_v6 }
 0x1fa   :  { %v1396_v36 = vpop.f32.mrf.mxu1 }
 0x1fb   :  { %v1981_v59 = vpack.c.bf16 %v1393_v2, %v1389_v1  ;;  %v1397_v25 = vadd.f32 %v1396_v36, %v1043_v52  ;;  %v5146_v1 = vld [vmem:[#allocation7_spill] sm:$0xff]  ;;  %v5147_v36 = vld [vmem:[#allocation6_spill] sm:$0xff] }
 0x1fc   :  { %v1398_v9 = vpop.f32.mrf.mxu1 }
 0x1fd   :  { %2572 = vmatprep.mubr.bf16.mxu0 %v1981_v59  ;;  %v1399_v17 = vadd.f32 %v1398_v9, %v1045_v43 }
 0x1fe   :  { %v1400_v22 = vpop.f32.mrf.mxu1  ;;  %2573 = vmatmul.mubr.bf16.gmra.mxu0 %v1980_v44 }
 0x1ff   :  { %v1401_v39 = vadd.f32 %v1400_v22, %v1047_v13  ;;  %v5149_v13 = vld [vmem:[#allocation5_spill] sm:$0xff] }
 0x200   :  { %v1402_v32 = vpop.f32.mrf.mxu1 }
 0x201   :  { %v1403_v15 = vadd.f32 %v1402_v32, %v1049_v49  ;;  %v1982_v62 = vpack.c.bf16 %v1401_v39, %v1397_v25 }
 0x202   :  { %v1406_v18 = vpop.f32.mrf.mxu1 }
 0x203   :  { %v1983_v33 = vpack.c.bf16 %v1403_v15, %v1399_v17  ;;  %v1407_v23 = vadd.f32 %v1406_v18, %v4300_v27  ;;  %v5150_v17 = vld [vmem:[#allocation11_spill] sm:$0xff]  ;;  %v5151_v18 = vld [vmem:[#allocation10_spill] sm:$0xff] }
 0x204   :  { %v1408_v4 = vpop.f32.mrf.mxu1 }
 0x205   :  { %2582 = vmatprep.mubr.bf16.mxu0 %v1983_v33  ;;  %v1409_v24 = vadd.f32 %v1408_v4, %v4302_v28 }
 0x206   :  { %v1410_v7 = vpop.f32.mrf.mxu1  ;;  %2583 = vmatmul.mubr.bf16.gmra.mxu0 %v1982_v62  ;;  %v5152_v62 = vld [vmem:[#allocation12_spill] sm:$0xff] }
 0x207   :  { %v1411_v37 = vadd.f32 %v1410_v7, %v4309_v31  ;;  %v5153_v7 = vld [vmem:[#allocation9_spill] sm:$0xff] }
 0x208   :  { %v1412_v20 = vpop.f32.mrf.mxu1 }
 0x209   :  { %v1413_v26 = vadd.f32 %v1412_v20, %v4311_v34  ;;  %v1984_v30 = vpack.c.bf16 %v1411_v37, %v1407_v23 }
 0x20a   :  { %v1416_v19 = vpop.f32.mrf.mxu1 }
 0x20b   :  { %v1985_v61 = vpack.c.bf16 %v1413_v26, %v1409_v24  ;;  %v1417_v28 = vadd.f32 %v1416_v19, %v4321_v38 }
 0x20c   :  { %v1418_v55 = vpop.f32.mrf.mxu1 }
 0x20d   :  { %2592 = vmatprep.mubr.bf16.mxu0 %v1985_v61  ;;  %v1419_v56 = vadd.f32 %v1418_v55, %v4326_v40  ;;  %v5154_v61 = vld [vmem:[#allocation15_spill] sm:$0xff] }
 0x20e   :  { %v1420_v63 = vpop.f32.mrf.mxu1  ;;  %2593 = vmatmul.mubr.bf16.gmra.mxu0 %v1984_v30 }
 0x20f   :  { %v1421_v53 = vadd.f32 %v1420_v63, %v4330_v42  ;;  %v5155_v63 = vld [vmem:[#allocation14_spill] sm:$0xff] }
 0x210   :  { %v1422_v14 = vpop.f32.mrf.mxu1 }
 0x211   :  { %v1423_v31 = vadd.f32 %v1422_v14, %v4332_v45  ;;  %v1986_v57 = vpack.c.bf16 %v1421_v53, %v1417_v28  ;;  %v5156_v14 = vld [vmem:[#allocation16_spill] sm:$0xff] }
 0x212   :  { %v1426_v50 = vpop.f32.mrf.mxu1 }
 0x213   :  { %v1987_v34 = vpack.c.bf16 %v1423_v31, %v1419_v56  ;;  %v1427_v40 = vadd.f32 %v1426_v50, %v4336_v47  ;;  %v5157_v31 = vld [vmem:[#allocation13_spill] sm:$0xff] }
 0x214   :  { %v1428_v27 = vpop.f32.mrf.mxu1 }
 0x215   :  { %2602 = vmatprep.mubr.bf16.mxu0 %v1987_v34  ;;  %v1429_v12 = vadd.f32 %v1428_v27, %v4338_v48 }
 0x216   :  { %v1430_v29 = vpop.f32.mrf.mxu1  ;;  %2603 = vmatmul.mubr.bf16.gmra.mxu0 %v1986_v57 }
 0x217   :  { %v1431_v21 = vadd.f32 %v1430_v29, %v4345_v51  ;;  %v5144_v51 = vld [vmem:[#allocation4_spill] sm:$0xff] }
 0x218   :  { %v1432_v8 = vpop.f32.mrf.mxu1 }
 0x219   :  { %v1433_v42 = vadd.f32 %v1432_v8, %v4347_v54  ;;  %v1988_v0 = vpack.c.bf16 %v1431_v21, %v1427_v40  ;;  %v5158_v21 = vld [vmem:[#allocation19_spill] sm:$0xff] }
 0x21a   :  { %v1436_v3 = vpop.f32.mrf.mxu1 }
 0x21b   :  { %v1989_v45 = vpack.c.bf16 %v1433_v42, %v1429_v12  ;;  %v1437_v48 = vadd.f32 %v1436_v3, %v5145_v11  ;;  %v5159_v42 = vld [vmem:[#allocation18_spill] sm:$0xff]  ;;  %v5160_v3 = vld [vmem:[#allocation20_spill] sm:$0xff] }
 0x21c   :  { %v1438_v38 = vpop.f32.mrf.mxu1 }
 0x21d   :  { %2612 = vmatprep.mubr.bf16.mxu0 %v1989_v45  ;;  %v1439_v41 = vadd.f32 %v1438_v38, %v4356_v58 }
 0x21e   :  { %v1440_v10 = vpop.f32.mrf.mxu1  ;;  %2613 = vmatmul.mubr.bf16.gmra.mxu0 %v1988_v0  ;;  %v5161_v0 = vld [vmem:[#allocation17_spill] sm:$0xff] }
 0x21f   :  { %v1441_v16 = vadd.f32 %v1440_v10, %v4360_v60  ;;  %v5148_v60 = vld [vmem:[#allocation8_spill] sm:$0xff] }
 0x220   :  { %v1442_v5 = vpop.f32.mrf.mxu1 }
 0x221   :  { %v1443_v52 = vadd.f32 %v1442_v5, %v5144_v51  ;;  %v1990_v43 = vpack.c.bf16 %v1441_v16, %v1437_v48 }
 0x222   :  { %v1446_v35 = vpop.f32.mrf.mxu1 }
 0x223   :  { %v1991_v54 = vpack.c.bf16 %v1443_v52, %v1439_v41  ;;  %v1447_v58 = vadd.f32 %v1446_v35, %v5149_v13  ;;  %v5162_v52 = vld [vmem:[#allocation23_spill] sm:$0xff]  ;;  %v2016_v35 = vld [vmem:[%s5092_s2] sm:$0xff] }
 0x224   :  { %v1448_v47 = vpop.f32.mrf.mxu1  ;;  %v2017_v13 = vld [vmem:[%s5092_s2 + $0x8] sm:$0xff] }
 0x225   :  { %2622 = vmatprep.mubr.bf16.mxu0 %v1991_v54  ;;  %v1449_v59 = vadd.f32 %v1448_v47, %v5147_v36  ;;  %v5163_v54 = vld [vmem:[#allocation22_spill] sm:$0xff]  ;;  %v5164_v47 = vld [vmem:[#allocation24_spill] sm:$0xff] }
 0x226   :  { %v1450_v46 = vpop.f32.mrf.mxu1  ;;  %2623 = vmatmul.mubr.bf16.gmra.mxu0 %v1990_v43 }
 0x227   :  { %v1451_v2 = vadd.f32 %v1450_v46, %v5146_v1  ;;  %v5165_v1 = vld [vmem:[#allocation21_spill] sm:$0xff] }
 0x228   :  { %v1452_v6 = vpop.f32.mrf.mxu1 }
 0x229   :  { %v1453_v44 = vadd.f32 %v1452_v6, %v5148_v60  ;;  %v1992_v49 = vpack.c.bf16 %v1451_v2, %v1447_v58  ;;  %v2081_v58 = vunpack.c.h.bf16 %v2016_v35 }
 0x22a   :  { %v1456_v9 = vpop.f32.mrf.mxu1 }
 0x22b   :  { %v1993_v22 = vpack.c.bf16 %v1453_v44, %v1449_v59  ;;  %v1457_v37 = vadd.f32 %v1456_v9, %v5153_v7  ;;  %v2080_v59 = vunpack.c.l.bf16 %v2016_v35 }
 0x22c   :  { %v1458_v39 = vpop.f32.mrf.mxu1 }
 0x22d   :  { %2632 = vmatprep.mubr.bf16.mxu0 %v1993_v22  ;;  %v1459_v33 = vadd.f32 %v1458_v39, %v5151_v18  ;;  %v2082_v39 = vunpack.c.l.bf16 %v2017_v13  ;;  %v5167_v18 = vld [vmem:[#allocation26_spill] sm:$0xff] }
 0x22e   :  { %v1460_v32 = vpop.f32.mrf.mxu1  ;;  %2633 = vmatmul.mubr.bf16.gmra.mxu0 %v1992_v49 }
 0x22f   :  { %v1461_v15 = vadd.f32 %v1460_v32, %v5150_v17  ;;  %v5166_v32 = vld [vmem:[#allocation27_spill] sm:$0xff] }
 0x230   :  { %v1462_v25 = vpop.f32.mrf.mxu1 }
 0x231   :  { %v1463_v4 = vadd.f32 %v1462_v25, %v5152_v62  ;;  %v1994_v26 = vpack.c.bf16 %v1461_v15, %v1457_v37  ;;  %v5168_v62 = vld [vmem:[#allocation28_spill] sm:$0xff]  ;;  %v2083_v37 = vunpack.c.h.bf16 %v2017_v13 }
 0x232   :  { %v1466_v20 = vpop.f32.mrf.mxu1 }
 0x233   :  { %v1995_v24 = vpack.c.bf16 %v1463_v4, %v1459_v33  ;;  %v1467_v28 = vadd.f32 %v1466_v20, %v5157_v31  ;;  %v2018_v20 = vld [vmem:[%s5092_s2 + $0x10] sm:$0xff] }
 0x234   :  { %v1468_v23 = vpop.f32.mrf.mxu1  ;;  %v2084_v31 = vunpack.c.l.bf16 %v2018_v20 }
 0x235   :  { %2642 = vmatprep.mubr.bf16.mxu0 %v1995_v24  ;;  %v1469_v53 = vadd.f32 %v1468_v23, %v5155_v63  ;;  %v5169_v24 = vld [vmem:[#allocation25_spill] sm:$0xff] }
 0x236   :  { %v1470_v19 = vpop.f32.mrf.mxu1  ;;  %2643 = vmatmul.mubr.bf16.gmra.mxu0 %v1994_v26 }
 0x237   :  { %v1471_v30 = vadd.f32 %v1470_v19, %v5154_v61 }
 0x238   :  { %v1472_v55 = vpop.f32.mrf.mxu1 }
 0x239   :  { %v1473_v56 = vadd.f32 %v1472_v55, %v5156_v14  ;;  %v1996_v57 = vpack.c.bf16 %v1471_v30, %v1467_v28  ;;  %v2019_v28 = vld [vmem:[%s5092_s2 + $0x18] sm:$0xff] }
 0x23a   :  { %v1476_v50 = vpop.f32.mrf.mxu1 }
 0x23b   :  { %v1997_v34 = vpack.c.bf16 %v1473_v56, %v1469_v53  ;;  %v1477_v38 = vadd.f32 %v1476_v50, %v5161_v0 }
 0x23c   :  { %v1478_v27 = vpop.f32.mrf.mxu1 }
 0x23d   :  { %2652 = vmatprep.mubr.bf16.mxu0 %v1997_v34  ;;  %v1479_v40 = vadd.f32 %v1478_v27, %v5159_v42  ;;  %v5170_v42 = vld [vmem:[#allocation31_spill] sm:$0xff] }
 0x23e   :  { %v1480_v29 = vpop.f32.mrf.mxu1  ;;  %2653 = vmatmul.mubr.bf16.gmra.mxu0 %v1996_v57 }
 0x23f   :  { %v1481_v8 = vadd.f32 %v1480_v29, %v5158_v21  ;;  %v2085_v29 = vunpack.c.h.bf16 %v2018_v20  ;;  %v5176_v20 = vld [vmem:[#allocation36_spill] sm:$0xff] }
 0x240   :  { %v1482_v12 = vpop.f32.mrf.mxu1 }
 0x241   :  { %v1483_v45 = vadd.f32 %v1482_v12, %v5160_v3  ;;  %v1998_v5 = vpack.c.bf16 %v1481_v8, %v1477_v38  ;;  %v2086_v12 = vunpack.c.l.bf16 %v2019_v28  ;;  %v5171_v38 = vld [vmem:[#allocation30_spill] sm:$0xff] }
 0x242   :  { %v1486_v10 = vpop.f32.mrf.mxu1 }
 0x243   :  { %v1999_v16 = vpack.c.bf16 %v1483_v45, %v1479_v40  ;;  %v1487_v2 = vadd.f32 %v1486_v10, %v5165_v1 }
 0x244   :  { %v1488_v41 = vpop.f32.mrf.mxu1 }
 0x245   :  { %2662 = vmatprep.mubr.bf16.mxu0 %v1999_v16  ;;  %v1489_v43 = vadd.f32 %v1488_v41, %v5163_v54 }
 0x246   :  { %v1490_v51 = vpop.f32.mrf.mxu1  ;;  %2663 = vmatmul.mubr.bf16.gmra.mxu0 %v1998_v5  ;;  %v5172_v5 = vld [vmem:[#allocation32_spill] sm:$0xff] }
 0x247   :  { %v1491_v11 = vadd.f32 %v1490_v51, %v5162_v52  ;;  %v2087_v51 = vunpack.c.h.bf16 %v2019_v28  ;;  %v2020_v52 = vld [vmem:[%s5092_s2 + $0x20] sm:$0xff] }
 0x248   :  { %v1492_v48 = vpop.f32.mrf.mxu1 }
 0x249   :  { %v1493_v46 = vadd.f32 %v1492_v48, %v5164_v47  ;;  %v2000_v60 = vpack.c.bf16 %v1491_v11, %v1487_v2  ;;  %v5173_v11 = vld [vmem:[#allocation29_spill] sm:$0xff] }
 0x24a   :  { %v1496_v6 = vpop.f32.mrf.mxu1 }
 0x24b   :  { %v2001_v36 = vpack.c.bf16 %v1493_v46, %v1489_v43  ;;  %v1497_v26 = vadd.f32 %v1496_v6, %v5169_v24 }
 0x24c   :  { %v1498_v44 = vpop.f32.mrf.mxu1 }
 0x24d   :  { %2672 = vmatprep.mubr.bf16.mxu0 %v2001_v36  ;;  %v1499_v33 = vadd.f32 %v1498_v44, %v5167_v18  ;;  %v2021_v44 = vld [vmem:[%s5092_s2 + $0x28] sm:$0xff] }
 0x24e   :  { %v1500_v9 = vpop.f32.mrf.mxu1  ;;  %v2434_v22 = vpop.f32.mrf.mxu0  ;;  %2673 = vmatmul.mubr.bf16.gmra.mxu0 %v2000_v60  ;;  %v2088_v60 = vunpack.c.l.bf16 %v2020_v52 }
 0x24f   :  { %v2753_v49 = vadd.f32 %v2434_v22, %v2080_v59  ;;  %v1501_v17 = vadd.f32 %v1500_v9, %v5166_v32 }
 0x250   :  { %v1502_v15 = vpop.f32.mrf.mxu1  ;;  %v2436_v25 = vpop.f32.mrf.mxu0 }
 0x251   :  { %v1503_v4 = vadd.f32 %v1502_v15, %v5168_v62  ;;  %v2754_v7 = vadd.f32 %v2436_v25, %v2081_v58  ;;  %v2881_v61 = vmax.f32 %v2753_v49, 0.0  ;;  %v2002_v53 = vpack.c.bf16 %v1501_v17, %v1497_v26  ;;  %v5174_v15 = vld [vmem:[#allocation35_spill] sm:$0xff] }
 0x252   :  { %v1506_v23 = vpop.f32.mrf.mxu1  ;;  %v2438_v19 = vpop.f32.mrf.mxu0  ;;  %v2089_v49 = vunpack.c.h.bf16 %v2020_v52  ;;  %v2090_v17 = vunpack.c.l.bf16 %v2021_v44  ;;  %v2091_v26 = vunpack.c.h.bf16 %v2021_v44 }
 0x253   :  { %v2003_v30 = vpack.c.bf16 %v1503_v4, %v1499_v33  ;;  %v2882_v55 = vmax.f32 %v2754_v7, 0.0  ;;  %v2755_v63 = vadd.f32 %v2438_v19, %v2082_v39  ;;  %v1507_v48 = vadd.f32 %v1506_v23, %v5173_v11  ;;  %v5175_v4 = vld [vmem:[#allocation34_spill] sm:$0xff]  ;;  %v2022_v23 = vld [vmem:[%s5092_s2 + $0x30] sm:$0xff]  ;;  %v5177_v19 = vld [vmem:[#allocation33_spill] sm:$0xff] }
 0x254   :  { %v1508_v14 = vpop.f32.mrf.mxu1  ;;  %v2440_v56 = vpop.f32.mrf.mxu0  ;;  %v5180_v11 = vld [vmem:[#allocation40_spill] sm:$0xff] }
 0x255   :  { %v3623_v50 = vpack.c.bf16 %v2882_v55, %v2881_v61  ;;  %v2756_v34 = vadd.f32 %v2440_v56, %v2083_v37  ;;  %2682 = vmatprep.mubr.bf16.mxu0 %v2003_v30  ;;  %v2883_v21 = vmax.f32 %v2755_v63, 0.0  ;;  %v1509_v10 = vadd.f32 %v1508_v14, %v5171_v38 }
 0x256   :  { %v1510_v57 = vpop.f32.mrf.mxu1  ;;  %v2444_v27 = vpop.f32.mrf.mxu0  ;;  %2683 = vmatmul.mubr.bf16.gmra.mxu0 %v2002_v53 }
 0x257   :  { %3393 = vst [vmem:[%s5093_s4] sm:$0xff] %v3623_v50  ;;  %v2884_v8 = vmax.f32 %v2756_v34, 0.0  ;;  %v1511_v40 = vadd.f32 %v1510_v57, %v5170_v42  ;;  %v2757_v3 = vadd.f32 %v2444_v27, %v2084_v31  ;;  %v2092_v57 = vunpack.c.l.bf16 %v2022_v23  ;;  %v2023_v27 = vld [vmem:[%s5092_s2 + $0x38] sm:$0xff] }
 0x258   :  { %v1512_v45 = vpop.f32.mrf.mxu1  ;;  %v2446_v0 = vpop.f32.mrf.mxu0  ;;  %v2093_v42 = vunpack.c.h.bf16 %v2022_v23 }
 0x259   :  { %v3624_v16 = vpack.c.bf16 %v2884_v8, %v2883_v21  ;;  %v1513_v41 = vadd.f32 %v1512_v45, %v5172_v5  ;;  %v2758_v35 = vadd.f32 %v2446_v0, %v2085_v29  ;;  %v2004_v1 = vpack.c.bf16 %v1511_v40, %v1507_v48  ;;  %v5178_v0 = vld [vmem:[#allocation39_spill] sm:$0xff] }
 0x25a   :  { %v1516_v54 = vpop.f32.mrf.mxu1  ;;  %v2448_v43 = vpop.f32.mrf.mxu0  ;;  %v2885_v2 = vmax.f32 %v2757_v3, 0.0  ;;  %v2094_v45 = vunpack.c.l.bf16 %v2023_v27 }
 0x25b   :  { %3394 = vst [vmem:[%s5093_s4 + $0x8] sm:$0xff] %v3624_v16  ;;  %v2005_v47 = vpack.c.bf16 %v1513_v41, %v1509_v10  ;;  %v2759_v46 = vadd.f32 %v2448_v43, %v2086_v12  ;;  %v2886_v6 = vmax.f32 %v2758_v35, 0.0  ;;  %v1517_v61 = vadd.f32 %v1516_v54, %v5177_v19  ;;  %v5179_v41 = vld [vmem:[#allocation38_spill] sm:$0xff]  ;;  %v5181_v43 = vld [vmem:[#allocation37_spill] sm:$0xff]  ;;  %v5184_v19 = vld [vmem:[#allocation44_spill] sm:$0xff] }
 0x25c   :  { %v1518_v36 = vpop.f32.mrf.mxu1  ;;  %v2450_v59 = vpop.f32.mrf.mxu0  ;;  %v2095_v35 = vunpack.c.h.bf16 %v2023_v27  ;;  %v2024_v54 = vld [vmem:[%s5092_s2 + $0x40] sm:$0xff] }
 0x25d   :  { %v2760_v13 = vadd.f32 %v2450_v59, %v2087_v51  ;;  %2692 = vmatprep.mubr.bf16.mxu0 %v2005_v47  ;;  %v3625_v58 = vpack.c.bf16 %v2886_v6, %v2885_v2  ;;  %v2887_v39 = vmax.f32 %v2759_v46, 0.0  ;;  %v1519_v7 = vadd.f32 %v1518_v36, %v5175_v4 }
 0x25e   :  { %v1520_v9 = vpop.f32.mrf.mxu1  ;;  %v2454_v22 = vpop.f32.mrf.mxu0  ;;  %2693 = vmatmul.mubr.bf16.gmra.mxu0 %v2004_v1 }
 0x25f   :  { %v2888_v32 = vmax.f32 %v2760_v13, 0.0  ;;  %3395 = vst [vmem:[%s5093_s4 + $0x10] sm:$0xff] %v3625_v58  ;;  %v1521_v25 = vadd.f32 %v1520_v9, %v5174_v15  ;;  %v2761_v18 = vadd.f32 %v2454_v22, %v2088_v60  ;;  %v2096_v9 = vunpack.c.l.bf16 %v2024_v54  ;;  %v2025_v22 = vld [vmem:[%s5092_s2 + $0x48] sm:$0xff] }
 0x260   :  { %v1522_v33 = vpop.f32.mrf.mxu1  ;;  %v2456_v62 = vpop.f32.mrf.mxu0  ;;  %v2097_v15 = vunpack.c.h.bf16 %v2024_v54 }
 0x261   :  { %v3626_v37 = vpack.c.bf16 %v2888_v32, %v2887_v39  ;;  %v1523_v24 = vadd.f32 %v1522_v33, %v5176_v20  ;;  %v2762_v30 = vadd.f32 %v2456_v62, %v2089_v49  ;;  %v2006_v56 = vpack.c.bf16 %v1521_v25, %v1517_v61  ;;  %v5182_v62 = vld [vmem:[#allocation43_spill] sm:$0xff] }
 0x262   :  { %v1526_v55 = vpop.f32.mrf.mxu1  ;;  %v2458_v63 = vpop.f32.mrf.mxu0  ;;  %v2889_v31 = vmax.f32 %v2761_v18, 0.0  ;;  %v2098_v33 = vunpack.c.l.bf16 %v2025_v22 }
 0x263   :  { %3396 = vst [vmem:[%s5093_s4 + $0x18] sm:$0xff] %v3626_v37  ;;  %v2007_v53 = vpack.c.bf16 %v1523_v24, %v1519_v7  ;;  %v2763_v14 = vadd.f32 %v2458_v63, %v2090_v17  ;;  %v2890_v28 = vmax.f32 %v2762_v30, 0.0  ;;  %v1527_v47 = vadd.f32 %v1526_v55, %v5181_v43  ;;  %v5183_v24 = vld [vmem:[#allocation42_spill] sm:$0xff]  ;;  %v2026_v55 = vld [vmem:[%s5092_s2 + $0x50] sm:$0xff]  ;;  %v5185_v63 = vld [vmem:[#allocation41_spill] sm:$0xff] }
 0x264   :  { %v1528_v50 = vpop.f32.mrf.mxu1  ;;  %v2460_v34 = vpop.f32.mrf.mxu0  ;;  %v2099_v30 = vunpack.c.h.bf16 %v2025_v22  ;;  %v5188_v43 = vld [vmem:[#allocation48_spill] sm:$0xff] }
 0x265   :  { %v2764_v29 = vadd.f32 %v2460_v34, %v2091_v26  ;;  %2702 = vmatprep.mubr.bf16.mxu0 %v2007_v53  ;;  %v3627_v21 = vpack.c.bf16 %v2890_v28, %v2889_v31  ;;  %v2891_v40 = vmax.f32 %v2763_v14, 0.0  ;;  %v1529_v51 = vadd.f32 %v1528_v50, %v5179_v41 }
 0x266   :  { %v1530_v8 = vpop.f32.mrf.mxu1  ;;  %v2464_v12 = vpop.f32.mrf.mxu0  ;;  %2703 = vmatmul.mubr.bf16.gmra.mxu0 %v2006_v56 }
 0x267   :  { %v2892_v3 = vmax.f32 %v2764_v29, 0.0  ;;  %3397 = vst [vmem:[%s5093_s4 + $0x20] sm:$0xff] %v3627_v21  ;;  %v1531_v38 = vadd.f32 %v1530_v8, %v5178_v0  ;;  %v2765_v10 = vadd.f32 %v2464_v12, %v2092_v57  ;;  %v2100_v8 = vunpack.c.l.bf16 %v2026_v55  ;;  %v2027_v12 = vld [vmem:[%s5092_s2 + $0x58] sm:$0xff] }
 0x268   :  { %v1532_v16 = vpop.f32.mrf.mxu1  ;;  %v2466_v5 = vpop.f32.mrf.mxu0  ;;  %v2101_v0 = vunpack.c.h.bf16 %v2026_v55 }
 0x269   :  { %v3628_v52 = vpack.c.bf16 %v2892_v3, %v2891_v40  ;;  %v1533_v48 = vadd.f32 %v1532_v16, %v5180_v11  ;;  %v2766_v46 = vadd.f32 %v2466_v5, %v2093_v42  ;;  %v2008_v59 = vpack.c.bf16 %v1531_v38, %v1527_v47  ;;  %v5186_v5 = vld [vmem:[#allocation47_spill] sm:$0xff] }
 0x26a   :  { %v1536_v1 = vpop.f32.mrf.mxu1  ;;  %v2468_v2 = vpop.f32.mrf.mxu0  ;;  %v2893_v60 = vmax.f32 %v2765_v10, 0.0  ;;  %v2102_v16 = vunpack.c.l.bf16 %v2027_v12 }
 0x26b   :  { %3398 = vst [vmem:[%s5093_s4 + $0x28] sm:$0xff] %v3628_v52  ;;  %v2009_v6 = vpack.c.bf16 %v1533_v48, %v1529_v51  ;;  %v2767_v36 = vadd.f32 %v2468_v2, %v2094_v45  ;;  %v2894_v44 = vmax.f32 %v2766_v46, 0.0  ;;  %v1537_v53 = vadd.f32 %v1536_v1, %v5185_v63  ;;  %v5187_v48 = vld [vmem:[#allocation46_spill] sm:$0xff]  ;;  %v5189_v2 = vld [vmem:[#allocation45_spill] sm:$0xff] }
 0x26c   :  { %v1538_v13 = vpop.f32.mrf.mxu1  ;;  %v2470_v58 = vpop.f32.mrf.mxu0  ;;  %v2103_v46 = vunpack.c.h.bf16 %v2027_v12  ;;  %v2028_v1 = vld [vmem:[%s5092_s2 + $0x60] sm:$0xff] }
 0x26d   :  { %v2768_v49 = vadd.f32 %v2470_v58, %v2095_v35  ;;  %2712 = vmatprep.mubr.bf16.mxu0 %v2009_v6  ;;  %v3629_v39 = vpack.c.bf16 %v2894_v44, %v2893_v60  ;;  %v2895_v25 = vmax.f32 %v2767_v36, 0.0  ;;  %v1539_v26 = vadd.f32 %v1538_v13, %v5183_v24 }
 0x26e   :  { %v1540_v32 = vpop.f32.mrf.mxu1  ;;  %v2474_v17 = vpop.f32.mrf.mxu0  ;;  %2713 = vmatmul.mubr.bf16.gmra.mxu0 %v2008_v59 }
 0x26f   :  { %v2896_v18 = vmax.f32 %v2768_v49, 0.0  ;;  %3399 = vst [vmem:[%s5093_s4 + $0x30] sm:$0xff] %v3629_v39  ;;  %v1541_v4 = vadd.f32 %v1540_v32, %v5182_v62  ;;  %v2769_v7 = vadd.f32 %v2474_v17, %v2096_v9  ;;  %v2104_v32 = vunpack.c.l.bf16 %v2028_v1  ;;  %v2029_v17 = vld [vmem:[%s5092_s2 + $0x68] sm:$0xff] }
 0x270   :  { %v1542_v37 = vpop.f32.mrf.mxu1  ;;  %v2476_v20 = vpop.f32.mrf.mxu0  ;;  %v2105_v62 = vunpack.c.h.bf16 %v2028_v1 }
 0x271   :  { %v3630_v23 = vpack.c.bf16 %v2896_v18, %v2895_v25  ;;  %v1543_v61 = vadd.f32 %v1542_v37, %v5184_v19  ;;  %v2770_v14 = vadd.f32 %v2476_v20, %v2097_v15  ;;  %v2010_v34 = vpack.c.bf16 %v1541_v4, %v1537_v53  ;;  %v5190_v20 = vld [vmem:[#allocation51_spill] sm:$0xff]  ;;  %v5192_v53 = vld [vmem:[#allocation52_spill] sm:$0xff] }
 0x272   :  { %v1546_v56 = vpop.f32.mrf.mxu1  ;;  %v2478_v31 = vpop.f32.mrf.mxu0  ;;  %v2897_v57 = vmax.f32 %v2769_v7, 0.0  ;;  %v2106_v37 = vunpack.c.l.bf16 %v2029_v17 }
 0x273   :  { %3400 = vst [vmem:[%s5093_s4 + $0x38] sm:$0xff] %v3630_v23  ;;  %v2011_v28 = vpack.c.bf16 %v1543_v61, %v1539_v26  ;;  %v2771_v50 = vadd.f32 %v2478_v31, %v2098_v33  ;;  %v2898_v27 = vmax.f32 %v2770_v14, 0.0  ;;  %v1547_v6 = vadd.f32 %v1546_v56, %v5189_v2  ;;  %v2030_v61 = vld [vmem:[%s5092_s2 + $0x70] sm:$0xff]  ;;  %v5193_v31 = vld [vmem:[#allocation49_spill] sm:$0xff] }
 0x274   :  { %v1548_v29 = vpop.f32.mrf.mxu1  ;;  %v2480_v21 = vpop.f32.mrf.mxu0  ;;  %v2107_v56 = vunpack.c.h.bf16 %v2029_v17 }
 0x275   :  { %v2772_v42 = vadd.f32 %v2480_v21, %v2099_v30  ;;  %2722 = vmatprep.mubr.bf16.mxu0 %v2011_v28  ;;  %v3631_v40 = vpack.c.bf16 %v2898_v27, %v2897_v57  ;;  %v2899_v38 = vmax.f32 %v2771_v50, 0.0  ;;  %v1549_v35 = vadd.f32 %v1548_v29, %v5187_v48  ;;  %v5191_v30 = vld [vmem:[#allocation50_spill] sm:$0xff] }
 0x276   :  { %v1550_v3 = vpop.f32.mrf.mxu1  ;;  %v2484_v45 = vpop.f32.mrf.mxu0  ;;  %2723 = vmatmul.mubr.bf16.gmra.mxu0 %v2010_v34  ;;  %v2108_v29 = vunpack.c.l.bf16 %v2030_v61 }
 0x277   :  { %v2900_v10 = vmax.f32 %v2772_v42, 0.0  ;;  %3401 = vst [vmem:[%s5093_s4 + $0x40] sm:$0xff] %v3631_v40  ;;  %v1551_v41 = vadd.f32 %v1550_v3, %v5186_v5  ;;  %v2773_v51 = vadd.f32 %v2484_v45, %v2100_v8  ;;  %v2031_v40 = vld [vmem:[%s5092_s2 + $0x78] sm:$0xff]  ;;  %v2109_v45 = vunpack.c.h.bf16 %v2030_v61 }
 0x278   :  { %v1552_v52 = vpop.f32.mrf.mxu1  ;;  %v2486_v11 = vpop.f32.mrf.mxu0 }
 0x279   :  { %v3632_v54 = vpack.c.bf16 %v2900_v10, %v2899_v38  ;;  %v1553_v47 = vadd.f32 %v1552_v52, %v5188_v43  ;;  %v2774_v36 = vadd.f32 %v2486_v11, %v2101_v0  ;;  %v2012_v58 = vpack.c.bf16 %v1551_v41, %v1547_v6  ;;  %v2032_v52 = vld [vmem:[%s5092_s2 + $0x80] sm:$0xff]  ;;  %v2033_v6 = vld [vmem:[%s5092_s2 + $0x88] sm:$0xff] }
 0x27a   :  { %v1556_v59 = vpop.f32.mrf.mxu1  ;;  %v2488_v60 = vpop.f32.mrf.mxu0  ;;  %v2901_v9 = vmax.f32 %v2773_v51, 0.0  ;;  %v2110_v41 = vunpack.c.l.bf16 %v2031_v40  ;;  %v2112_v1 = vunpack.c.l.bf16 %v2032_v52 }
 0x27b   :  { %3402 = vst [vmem:[%s5093_s4 + $0x48] sm:$0xff] %v3632_v54  ;;  %v2013_v44 = vpack.c.bf16 %v1553_v47, %v1549_v35  ;;  %v2775_v13 = vadd.f32 %v2488_v60, %v2102_v16  ;;  %v2902_v22 = vmax.f32 %v2774_v36, 0.0  ;;  %v1557_v28 = vadd.f32 %v1556_v59, %v5193_v31 }
 0x27c   :  { %v1558_v49 = vpop.f32.mrf.mxu1  ;;  %v2490_v39 = vpop.f32.mrf.mxu0  ;;  %v2111_v35 = vunpack.c.h.bf16 %v2031_v40  ;;  %v2113_v60 = vunpack.c.h.bf16 %v2032_v52 }
 0x27d   :  { %v2776_v15 = vadd.f32 %v2490_v39, %v2103_v46  ;;  %2732 = vmatprep.mubr.bf16.mxu0 %v2013_v44  ;;  %v3633_v25 = vpack.c.bf16 %v2902_v22, %v2901_v9  ;;  %v2903_v4 = vmax.f32 %v2775_v13, 0.0  ;;  %v1559_v55 = vadd.f32 %v1558_v49, %v5191_v30  ;;  %v2034_v39 = vld [vmem:[%s5092_s2 + $0x90] sm:$0xff] }
 0x27e   :  { %v1560_v18 = vpop.f32.mrf.mxu1  ;;  %v2494_v33 = vpop.f32.mrf.mxu0  ;;  %2733 = vmatmul.mubr.bf16.gmra.mxu0 %v2012_v58  ;;  %v2114_v22 = vunpack.c.l.bf16 %v2033_v6 }
 0x27f   :  { %v2904_v7 = vmax.f32 %v2776_v15, 0.0  ;;  %3403 = vst [vmem:[%s5093_s4 + $0x50] sm:$0xff] %v3633_v25  ;;  %v1561_v24 = vadd.f32 %v1560_v18, %v5190_v20  ;;  %v2777_v26 = vadd.f32 %v2494_v33, %v2104_v32  ;;  %v2115_v15 = vunpack.c.h.bf16 %v2033_v6 }
 0x280   :  { %v1562_v23 = vpop.f32.mrf.mxu1  ;;  %v2496_v19 = vpop.f32.mrf.mxu0 }
 0x281   :  { %v3634_v63 = vpack.c.bf16 %v2904_v7, %v2903_v4  ;;  %v1563_v14 = vadd.f32 %v1562_v23, %v5192_v53  ;;  %v2778_v50 = vadd.f32 %v2496_v19, %v2105_v62  ;;  %v2014_v21 = vpack.c.bf16 %v1561_v24, %v1557_v28  ;;  %v2036_v53 = vld [vmem:[%s5092_s2 + $0xa0] sm:$0xff] }
 0x282   :  { %v2498_v34 = vpop.f32.mrf.mxu0  ;;  %v2905_v8 = vmax.f32 %v2777_v26, 0.0  ;;  %v2116_v4 = vunpack.c.l.bf16 %v2034_v39  ;;  %v2117_v26 = vunpack.c.h.bf16 %v2034_v39 }
 0x283   :  { %3404 = vst [vmem:[%s5093_s4 + $0x58] sm:$0xff] %v3634_v63  ;;  %v2015_v57 = vpack.c.bf16 %v1563_v14, %v1559_v55  ;;  %v2779_v27 = vadd.f32 %v2498_v34, %v2106_v37  ;;  %v2906_v12 = vmax.f32 %v2778_v50, 0.0  ;;  %v2035_v37 = vld [vmem:[%s5092_s2 + $0x98] sm:$0xff] }
 0x284   :  { %v2500_v42 = vpop.f32.mrf.mxu0  ;;  %v2118_v55 = vunpack.c.l.bf16 %v2035_v37  ;;  %v2119_v31 = vunpack.c.h.bf16 %v2035_v37 }
 0x285   :  { %v2780_v3 = vadd.f32 %v2500_v42, %v2107_v56  ;;  %2742 = vmatprep.mubr.bf16.mxu0 %v2015_v57  ;;  %v3635_v0 = vpack.c.bf16 %v2906_v12, %v2905_v8  ;;  %v2907_v10 = vmax.f32 %v2779_v27, 0.0  ;;  %v2120_v27 = vunpack.c.l.bf16 %v2036_v53 }
 0x286   :  { %v2504_v38 = vpop.f32.mrf.mxu0  ;;  %2743 = vmatmul.mubr.bf16.gmra.mxu0 %v2014_v21  ;;  %v2037_v21 = vld [vmem:[%s5092_s2 + $0xa8] sm:$0xff]  ;;  %v2121_v42 = vunpack.c.h.bf16 %v2036_v53 }
 0x287   :  { %v2908_v16 = vmax.f32 %v2780_v3, 0.0  ;;  %v2781_v5 = vadd.f32 %v2504_v38, %v2108_v29  ;;  %3405 = vst [vmem:[%s5093_s4 + $0x60] sm:$0xff] %v3635_v0  ;;  %v2122_v38 = vunpack.c.l.bf16 %v2037_v21 }
 0x288   :  { %v2506_v51 = vpop.f32.mrf.mxu0 }
 0x289   :  { %v3636_v11 = vpack.c.bf16 %v2908_v16, %v2907_v10  ;;  %v2782_v48 = vadd.f32 %v2506_v51, %v2109_v45  ;;  %v2909_v43 = vmax.f32 %v2781_v5, 0.0  ;;  %v2038_v16 = vld [vmem:[%s5092_s2 + $0xb0] sm:$0xff]  ;;  %v2123_v51 = vunpack.c.h.bf16 %v2037_v21 }
 0x28a   :  { %v2508_v54 = vpop.f32.mrf.mxu0 }
 0x28b   :  { %3406 = vst [vmem:[%s5093_s4 + $0x68] sm:$0xff] %v3636_v11  ;;  %v2910_v47 = vmax.f32 %v2782_v48, 0.0  ;;  %v2783_v46 = vadd.f32 %v2508_v54, %v2110_v41  ;;  %v2124_v54 = vunpack.c.l.bf16 %v2038_v16 }
 0x28c   :  { %v2510_v2 = vpop.f32.mrf.mxu0 }
 0x28d   :  { %v3637_v36 = vpack.c.bf16 %v2910_v47, %v2909_v43  ;;  %v2784_v59 = vadd.f32 %v2510_v2, %v2111_v35  ;;  %v2911_v13 = vmax.f32 %v2783_v46, 0.0  ;;  %v2039_v47 = vld [vmem:[%s5092_s2 + $0xb8] sm:$0xff]  ;;  %v2125_v2 = vunpack.c.h.bf16 %v2038_v16 }
 0x28e   :  { %v2514_v44 = vpop.f32.mrf.mxu0 }
 0x28f   :  { %3407 = vst [vmem:[%s5093_s4 + $0x70] sm:$0xff] %v3637_v36  ;;  %v2912_v58 = vmax.f32 %v2784_v59, 0.0  ;;  %v2785_v9 = vadd.f32 %v2514_v44, %v2112_v1  ;;  %v2126_v44 = vunpack.c.l.bf16 %v2039_v47 }
 0x290   :  { %v2516_v49 = vpop.f32.mrf.mxu0 }
 0x291   :  { %v3638_v32 = vpack.c.bf16 %v2912_v58, %v2911_v13  ;;  %v2786_v17 = vadd.f32 %v2516_v49, %v2113_v60  ;;  %v2913_v18 = vmax.f32 %v2785_v9, 0.0  ;;  %v2040_v58 = vld [vmem:[%s5092_s2 + $0xc0] sm:$0xff]  ;;  %v2127_v49 = vunpack.c.h.bf16 %v2039_v47 }
 0x292   :  { %v2518_v25 = vpop.f32.mrf.mxu0 }
 0x293   :  { %3408 = vst [vmem:[%s5093_s4 + $0x78] sm:$0xff] %v3638_v32  ;;  %v2914_v33 = vmax.f32 %v2786_v17, 0.0  ;;  %v2787_v62 = vadd.f32 %v2518_v25, %v2114_v22  ;;  %v2128_v25 = vunpack.c.l.bf16 %v2040_v58 }
 0x294   :  { %v2520_v7 = vpop.f32.mrf.mxu0 }
 0x295   :  { %v3639_v20 = vpack.c.bf16 %v2914_v33, %v2913_v18  ;;  %v2788_v24 = vadd.f32 %v2520_v7, %v2115_v15  ;;  %v2915_v19 = vmax.f32 %v2787_v62, 0.0  ;;  %v2041_v33 = vld [vmem:[%s5092_s2 + $0xc8] sm:$0xff]  ;;  %v2129_v7 = vunpack.c.h.bf16 %v2040_v58 }
 0x296   :  { %v2524_v23 = vpop.f32.mrf.mxu0 }
 0x297   :  { %3409 = vst [vmem:[%s5093_s4 + $0x80] sm:$0xff] %v3639_v20  ;;  %v2916_v61 = vmax.f32 %v2788_v24, 0.0  ;;  %v2789_v30 = vadd.f32 %v2524_v23, %v2116_v4  ;;  %v2130_v23 = vunpack.c.l.bf16 %v2041_v33 }
 0x298   :  { %v2526_v63 = vpop.f32.mrf.mxu0 }
 0x299   :  { %v3640_v14 = vpack.c.bf16 %v2916_v61, %v2915_v19  ;;  %v2790_v56 = vadd.f32 %v2526_v63, %v2117_v26  ;;  %v2917_v50 = vmax.f32 %v2789_v30, 0.0  ;;  %v2042_v61 = vld [vmem:[%s5092_s2 + $0xd0] sm:$0xff]  ;;  %v2131_v63 = vunpack.c.h.bf16 %v2041_v33 }
 0x29a   :  { %v2528_v28 = vpop.f32.mrf.mxu0 }
 0x29b   :  { %3410 = vst [vmem:[%s5093_s4 + $0x88] sm:$0xff] %v3640_v14  ;;  %v2918_v34 = vmax.f32 %v2790_v56, 0.0  ;;  %v2791_v57 = vadd.f32 %v2528_v28, %v2118_v55  ;;  %v2132_v28 = vunpack.c.l.bf16 %v2042_v61 }
 0x29c   :  { %v2530_v29 = vpop.f32.mrf.mxu0 }
 0x29d   :  { %v3641_v8 = vpack.c.bf16 %v2918_v34, %v2917_v50  ;;  %v2792_v12 = vadd.f32 %v2530_v29, %v2119_v31  ;;  %v2919_v3 = vmax.f32 %v2791_v57, 0.0  ;;  %v2043_v34 = vld [vmem:[%s5092_s2 + $0xd8] sm:$0xff]  ;;  %v2133_v29 = vunpack.c.h.bf16 %v2042_v61 }
 0x29e   :  { %v2534_v40 = vpop.f32.mrf.mxu0 }
 0x29f   :  { %3411 = vst [vmem:[%s5093_s4 + $0x90] sm:$0xff] %v3641_v8  ;;  %v2920_v45 = vmax.f32 %v2792_v12, 0.0  ;;  %v2793_v0 = vadd.f32 %v2534_v40, %v2120_v27  ;;  %v2134_v40 = vunpack.c.l.bf16 %v2043_v34 }
 0x2a0   :  { %v2536_v10 = vpop.f32.mrf.mxu0 }
 0x2a1   :  { %v3642_v5 = vpack.c.bf16 %v2920_v45, %v2919_v3  ;;  %v2794_v41 = vadd.f32 %v2536_v10, %v2121_v42  ;;  %v2921_v11 = vmax.f32 %v2793_v0, 0.0  ;;  %v2044_v45 = vld [vmem:[%s5092_s2 + $0xe0] sm:$0xff]  ;;  %v2135_v10 = vunpack.c.h.bf16 %v2043_v34 }
 0x2a2   :  { %v2538_v52 = vpop.f32.mrf.mxu0 }
 0x2a3   :  { %3412 = vst [vmem:[%s5093_s4 + $0x98] sm:$0xff] %v3642_v5  ;;  %v2922_v48 = vmax.f32 %v2794_v41, 0.0  ;;  %v2795_v35 = vadd.f32 %v2538_v52, %v2122_v38  ;;  %v2136_v52 = vunpack.c.l.bf16 %v2044_v45 }
 0x2a4   :  { %v2540_v43 = vpop.f32.mrf.mxu0 }
 0x2a5   :  { %v3643_v46 = vpack.c.bf16 %v2922_v48, %v2921_v11  ;;  %v2796_v1 = vadd.f32 %v2540_v43, %v2123_v51  ;;  %v2923_v36 = vmax.f32 %v2795_v35, 0.0  ;;  %v2045_v48 = vld [vmem:[%s5092_s2 + $0xe8] sm:$0xff]  ;;  %v2137_v43 = vunpack.c.h.bf16 %v2044_v45 }
 0x2a6   :  { %v2544_v6 = vpop.f32.mrf.mxu0 }
 0x2a7   :  { %3413 = vst [vmem:[%s5093_s4 + $0xa0] sm:$0xff] %v3643_v46  ;;  %v2924_v59 = vmax.f32 %v2796_v1, 0.0  ;;  %v2797_v60 = vadd.f32 %v2544_v6, %v2124_v54  ;;  %v2138_v6 = vunpack.c.l.bf16 %v2045_v48 }
 0x2a8   :  { %v2546_v13 = vpop.f32.mrf.mxu0 }
 0x2a9   :  { %v3644_v9 = vpack.c.bf16 %v2924_v59, %v2923_v36  ;;  %v2798_v22 = vadd.f32 %v2546_v13, %v2125_v2  ;;  %v2925_v32 = vmax.f32 %v2797_v60, 0.0  ;;  %v2046_v59 = vld [vmem:[%s5092_s2 + $0xf0] sm:$0xff]  ;;  %v2139_v13 = vunpack.c.h.bf16 %v2045_v48 }
 0x2aa   :  { %v2548_v39 = vpop.f32.mrf.mxu0 }
 0x2ab   :  { %3414 = vst [vmem:[%s5093_s4 + $0xa8] sm:$0xff] %v3644_v9  ;;  %v2926_v17 = vmax.f32 %v2798_v22, 0.0  ;;  %v2799_v15 = vadd.f32 %v2548_v39, %v2126_v44  ;;  %v2140_v39 = vunpack.c.l.bf16 %v2046_v59 }
 0x2ac   :  { %v2550_v18 = vpop.f32.mrf.mxu0 }
 0x2ad   :  { %v3645_v62 = vpack.c.bf16 %v2926_v17, %v2925_v32  ;;  %v2800_v4 = vadd.f32 %v2550_v18, %v2127_v49  ;;  %v2927_v20 = vmax.f32 %v2799_v15, 0.0  ;;  %v2047_v17 = vld [vmem:[%s5092_s2 + $0xf8] sm:$0xff]  ;;  %v2141_v18 = vunpack.c.h.bf16 %v2046_v59 }
 0x2ae   :  { %v2554_v37 = vpop.f32.mrf.mxu0 }
 0x2af   :  { %3415 = vst [vmem:[%s5093_s4 + $0xb0] sm:$0xff] %v3645_v62  ;;  %v2928_v24 = vmax.f32 %v2800_v4, 0.0  ;;  %v2801_v26 = vadd.f32 %v2554_v37, %v2128_v25  ;;  %v2142_v37 = vunpack.c.l.bf16 %v2047_v17 }
 0x2b0   :  { %v2556_v19 = vpop.f32.mrf.mxu0 }
 0x2b1   :  { %v3646_v30 = vpack.c.bf16 %v2928_v24, %v2927_v20  ;;  %v2802_v55 = vadd.f32 %v2556_v19, %v2129_v7  ;;  %v2929_v14 = vmax.f32 %v2801_v26, 0.0  ;;  %v2048_v24 = vld [vmem:[%s5092_s2 + $0x100] sm:$0xff]  ;;  %v2143_v19 = vunpack.c.h.bf16 %v2047_v17 }
 0x2b2   :  { %v2558_v53 = vpop.f32.mrf.mxu0 }
 0x2b3   :  { %3416 = vst [vmem:[%s5093_s4 + $0xb8] sm:$0xff] %v3646_v30  ;;  %v2930_v56 = vmax.f32 %v2802_v55, 0.0  ;;  %v2803_v31 = vadd.f32 %v2558_v53, %v2130_v23  ;;  %v2144_v53 = vunpack.c.l.bf16 %v2048_v24 }
 0x2b4   :  { %v2560_v50 = vpop.f32.mrf.mxu0 }
 0x2b5   :  { %v3647_v57 = vpack.c.bf16 %v2930_v56, %v2929_v14  ;;  %v2804_v27 = vadd.f32 %v2560_v50, %v2131_v63  ;;  %v2931_v8 = vmax.f32 %v2803_v31, 0.0  ;;  %v2049_v56 = vld [vmem:[%s5092_s2 + $0x108] sm:$0xff]  ;;  %v2145_v50 = vunpack.c.h.bf16 %v2048_v24 }
 0x2b6   :  { %v2564_v21 = vpop.f32.mrf.mxu0 }
 0x2b7   :  { %3417 = vst [vmem:[%s5093_s4 + $0xc0] sm:$0xff] %v3647_v57  ;;  %v2932_v12 = vmax.f32 %v2804_v27, 0.0  ;;  %v2805_v42 = vadd.f32 %v2564_v21, %v2132_v28  ;;  %v2146_v21 = vunpack.c.l.bf16 %v2049_v56 }
 0x2b8   :  { %v2566_v3 = vpop.f32.mrf.mxu0 }
 0x2b9   :  { %v3648_v0 = vpack.c.bf16 %v2932_v12, %v2931_v8  ;;  %v2806_v38 = vadd.f32 %v2566_v3, %v2133_v29  ;;  %v2933_v5 = vmax.f32 %v2805_v42, 0.0  ;;  %v2050_v12 = vld [vmem:[%s5092_s2 + $0x110] sm:$0xff]  ;;  %v2147_v3 = vunpack.c.h.bf16 %v2049_v56 }
 0x2ba   :  { %v2568_v16 = vpop.f32.mrf.mxu0 }
 0x2bb   :  { %3418 = vst [vmem:[%s5093_s4 + $0xc8] sm:$0xff] %v3648_v0  ;;  %v2934_v41 = vmax.f32 %v2806_v38, 0.0  ;;  %v2807_v51 = vadd.f32 %v2568_v16, %v2134_v40  ;;  %v2148_v16 = vunpack.c.l.bf16 %v2050_v12 }
 0x2bc   :  { %v2570_v11 = vpop.f32.mrf.mxu0 }
 0x2bd   :  { %v3649_v35 = vpack.c.bf16 %v2934_v41, %v2933_v5  ;;  %v2808_v54 = vadd.f32 %v2570_v11, %v2135_v10  ;;  %v2935_v46 = vmax.f32 %v2807_v51, 0.0  ;;  %v2051_v41 = vld [vmem:[%s5092_s2 + $0x118] sm:$0xff]  ;;  %v2149_v11 = vunpack.c.h.bf16 %v2050_v12 }
 0x2be   :  { %v2574_v47 = vpop.f32.mrf.mxu0 }
 0x2bf   :  { %3419 = vst [vmem:[%s5093_s4 + $0xd0] sm:$0xff] %v3649_v35  ;;  %v2936_v1 = vmax.f32 %v2808_v54, 0.0  ;;  %v2809_v2 = vadd.f32 %v2574_v47, %v2136_v52  ;;  %v2150_v47 = vunpack.c.l.bf16 %v2051_v41 }
 0x2c0   :  { %v2576_v36 = vpop.f32.mrf.mxu0 }
 0x2c1   :  { %v3650_v60 = vpack.c.bf16 %v2936_v1, %v2935_v46  ;;  %v2810_v44 = vadd.f32 %v2576_v36, %v2137_v43  ;;  %v2937_v9 = vmax.f32 %v2809_v2, 0.0  ;;  %v2052_v1 = vld [vmem:[%s5092_s2 + $0x120] sm:$0xff]  ;;  %v2151_v36 = vunpack.c.h.bf16 %v2051_v41 }
 0x2c2   :  { %v2578_v58 = vpop.f32.mrf.mxu0 }
 0x2c3   :  { %3420 = vst [vmem:[%s5093_s4 + $0xd8] sm:$0xff] %v3650_v60  ;;  %v2938_v22 = vmax.f32 %v2810_v44, 0.0  ;;  %v2811_v49 = vadd.f32 %v2578_v58, %v2138_v6  ;;  %v2152_v58 = vunpack.c.l.bf16 %v2052_v1 }
 0x2c4   :  { %v2580_v32 = vpop.f32.mrf.mxu0 }
 0x2c5   :  { %v3651_v15 = vpack.c.bf16 %v2938_v22, %v2937_v9  ;;  %v2812_v25 = vadd.f32 %v2580_v32, %v2139_v13  ;;  %v2939_v62 = vmax.f32 %v2811_v49, 0.0  ;;  %v2053_v22 = vld [vmem:[%s5092_s2 + $0x128] sm:$0xff]  ;;  %v2153_v32 = vunpack.c.h.bf16 %v2052_v1 }
 0x2c6   :  { %v2584_v33 = vpop.f32.mrf.mxu0 }
 0x2c7   :  { %3421 = vst [vmem:[%s5093_s4 + $0xe0] sm:$0xff] %v3651_v15  ;;  %v2940_v4 = vmax.f32 %v2812_v25, 0.0  ;;  %v2813_v7 = vadd.f32 %v2584_v33, %v2140_v39  ;;  %v2154_v33 = vunpack.c.l.bf16 %v2053_v22 }
 0x2c8   :  { %v2586_v20 = vpop.f32.mrf.mxu0 }
 0x2c9   :  { %v3652_v26 = vpack.c.bf16 %v2940_v4, %v2939_v62  ;;  %v2814_v23 = vadd.f32 %v2586_v20, %v2141_v18  ;;  %v2941_v30 = vmax.f32 %v2813_v7, 0.0  ;;  %v2054_v4 = vld [vmem:[%s5092_s2 + $0x130] sm:$0xff]  ;;  %v2155_v20 = vunpack.c.h.bf16 %v2053_v22 }
 0x2ca   :  { %v2588_v61 = vpop.f32.mrf.mxu0 }
 0x2cb   :  { %3422 = vst [vmem:[%s5093_s4 + $0xe8] sm:$0xff] %v3652_v26  ;;  %v2942_v55 = vmax.f32 %v2814_v23, 0.0  ;;  %v2815_v63 = vadd.f32 %v2588_v61, %v2142_v37  ;;  %v2156_v61 = vunpack.c.l.bf16 %v2054_v4 }
 0x2cc   :  { %v2590_v14 = vpop.f32.mrf.mxu0 }
 0x2cd   :  { %v3653_v31 = vpack.c.bf16 %v2942_v55, %v2941_v30  ;;  %v2816_v28 = vadd.f32 %v2590_v14, %v2143_v19  ;;  %v2943_v57 = vmax.f32 %v2815_v63, 0.0  ;;  %v2055_v55 = vld [vmem:[%s5092_s2 + $0x138] sm:$0xff]  ;;  %v2157_v14 = vunpack.c.h.bf16 %v2054_v4 }
 0x2ce   :  { %v2594_v34 = vpop.f32.mrf.mxu0 }
 0x2cf   :  { %3423 = vst [vmem:[%s5093_s4 + $0xf0] sm:$0xff] %v3653_v31  ;;  %v2944_v27 = vmax.f32 %v2816_v28, 0.0  ;;  %v2817_v29 = vadd.f32 %v2594_v34, %v2144_v53  ;;  %v2158_v34 = vunpack.c.l.bf16 %v2055_v55 }
 0x2d0   :  { %v2596_v8 = vpop.f32.mrf.mxu0 }
 0x2d1   :  { %v3654_v42 = vpack.c.bf16 %v2944_v27, %v2943_v57  ;;  %v2818_v40 = vadd.f32 %v2596_v8, %v2145_v50  ;;  %v2945_v0 = vmax.f32 %v2817_v29, 0.0  ;;  %v2056_v27 = vld [vmem:[%s5092_s2 + $0x140] sm:$0xff]  ;;  %v2159_v8 = vunpack.c.h.bf16 %v2055_v55 }
 0x2d2   :  { %v2598_v45 = vpop.f32.mrf.mxu0 }
 0x2d3   :  { %3424 = vst [vmem:[%s5093_s4 + $0xf8] sm:$0xff] %v3654_v42  ;;  %v2946_v38 = vmax.f32 %v2818_v40, 0.0  ;;  %v2819_v10 = vadd.f32 %v2598_v45, %v2146_v21  ;;  %v2160_v45 = vunpack.c.l.bf16 %v2056_v27 }
 0x2d4   :  { %v2600_v5 = vpop.f32.mrf.mxu0 }
 0x2d5   :  { %v3655_v51 = vpack.c.bf16 %v2946_v38, %v2945_v0  ;;  %v2820_v52 = vadd.f32 %v2600_v5, %v2147_v3  ;;  %v2947_v35 = vmax.f32 %v2819_v10, 0.0  ;;  %v2057_v38 = vld [vmem:[%s5092_s2 + $0x148] sm:$0xff]  ;;  %v2161_v5 = vunpack.c.h.bf16 %v2056_v27 }
 0x2d6   :  { %v2604_v48 = vpop.f32.mrf.mxu0 }
 0x2d7   :  { %3425 = vst [vmem:[%s5093_s4 + $0x100] sm:$0xff] %v3655_v51  ;;  %v2948_v54 = vmax.f32 %v2820_v52, 0.0  ;;  %v2821_v43 = vadd.f32 %v2604_v48, %v2148_v16  ;;  %v2162_v48 = vunpack.c.l.bf16 %v2057_v38 }
 0x2d8   :  { %v2606_v46 = vpop.f32.mrf.mxu0 }
 0x2d9   :  { %v3656_v2 = vpack.c.bf16 %v2948_v54, %v2947_v35  ;;  %v2822_v6 = vadd.f32 %v2606_v46, %v2149_v11  ;;  %v2949_v60 = vmax.f32 %v2821_v43, 0.0  ;;  %v2058_v54 = vld [vmem:[%s5092_s2 + $0x150] sm:$0xff]  ;;  %v2163_v46 = vunpack.c.h.bf16 %v2057_v38 }
 0x2da   :  { %v2608_v59 = vpop.f32.mrf.mxu0 }
 0x2db   :  { %3426 = vst [vmem:[%s5093_s4 + $0x108] sm:$0xff] %v3656_v2  ;;  %v2950_v44 = vmax.f32 %v2822_v6, 0.0  ;;  %v2823_v13 = vadd.f32 %v2608_v59, %v2150_v47  ;;  %v2164_v59 = vunpack.c.l.bf16 %v2058_v54 }
 0x2dc   :  { %v2610_v9 = vpop.f32.mrf.mxu0 }
 0x2dd   :  { %v3657_v49 = vpack.c.bf16 %v2950_v44, %v2949_v60  ;;  %v2824_v39 = vadd.f32 %v2610_v9, %v2151_v36  ;;  %v2951_v15 = vmax.f32 %v2823_v13, 0.0  ;;  %v2059_v44 = vld [vmem:[%s5092_s2 + $0x158] sm:$0xff]  ;;  %v2165_v9 = vunpack.c.h.bf16 %v2058_v54 }
 0x2de   :  { %v2614_v17 = vpop.f32.mrf.mxu0 }
 0x2df   :  { %3427 = vst [vmem:[%s5093_s4 + $0x110] sm:$0xff] %v3657_v49  ;;  %v2952_v25 = vmax.f32 %v2824_v39, 0.0  ;;  %v2825_v18 = vadd.f32 %v2614_v17, %v2152_v58  ;;  %v2166_v17 = vunpack.c.l.bf16 %v2059_v44 }
 0x2e0   :  { %v2616_v62 = vpop.f32.mrf.mxu0 }
 0x2e1   :  { %v3658_v7 = vpack.c.bf16 %v2952_v25, %v2951_v15  ;;  %v2826_v37 = vadd.f32 %v2616_v62, %v2153_v32  ;;  %v2953_v26 = vmax.f32 %v2825_v18, 0.0  ;;  %v2060_v25 = vld [vmem:[%s5092_s2 + $0x160] sm:$0xff]  ;;  %v2167_v62 = vunpack.c.h.bf16 %v2059_v44 }
 0x2e2   :  { %v2618_v24 = vpop.f32.mrf.mxu0 }
 0x2e3   :  { %3428 = vst [vmem:[%s5093_s4 + $0x118] sm:$0xff] %v3658_v7  ;;  %v2954_v23 = vmax.f32 %v2826_v37, 0.0  ;;  %v2827_v19 = vadd.f32 %v2618_v24, %v2154_v33  ;;  %v2168_v24 = vunpack.c.l.bf16 %v2060_v25 }
 0x2e4   :  { %v2620_v30 = vpop.f32.mrf.mxu0 }
 0x2e5   :  { %v3659_v63 = vpack.c.bf16 %v2954_v23, %v2953_v26  ;;  %v2828_v53 = vadd.f32 %v2620_v30, %v2155_v20  ;;  %v2955_v31 = vmax.f32 %v2827_v19, 0.0  ;;  %v2061_v23 = vld [vmem:[%s5092_s2 + $0x168] sm:$0xff]  ;;  %v2169_v30 = vunpack.c.h.bf16 %v2060_v25 }
 0x2e6   :  { %v2624_v56 = vpop.f32.mrf.mxu0 }
 0x2e7   :  { %3429 = vst [vmem:[%s5093_s4 + $0x120] sm:$0xff] %v3659_v63  ;;  %v2956_v28 = vmax.f32 %v2828_v53, 0.0  ;;  %v2829_v50 = vadd.f32 %v2624_v56, %v2156_v61  ;;  %v2170_v56 = vunpack.c.l.bf16 %v2061_v23 }
 0x2e8   :  { %v2626_v57 = vpop.f32.mrf.mxu0 }
 0x2e9   :  { %v3660_v29 = vpack.c.bf16 %v2956_v28, %v2955_v31  ;;  %v2830_v21 = vadd.f32 %v2626_v57, %v2157_v14  ;;  %v2957_v42 = vmax.f32 %v2829_v50, 0.0  ;;  %v2062_v28 = vld [vmem:[%s5092_s2 + $0x170] sm:$0xff]  ;;  %v2171_v57 = vunpack.c.h.bf16 %v2061_v23 }
 0x2ea   :  { %v2628_v12 = vpop.f32.mrf.mxu0 }
 0x2eb   :  { %3430 = vst [vmem:[%s5093_s4 + $0x128] sm:$0xff] %v3660_v29  ;;  %v2958_v40 = vmax.f32 %v2830_v21, 0.0  ;;  %v2831_v3 = vadd.f32 %v2628_v12, %v2158_v34  ;;  %v2172_v12 = vunpack.c.l.bf16 %v2062_v28 }
 0x2ec   :  { %v2630_v0 = vpop.f32.mrf.mxu0 }
 0x2ed   :  { %v3661_v10 = vpack.c.bf16 %v2958_v40, %v2957_v42  ;;  %v2832_v16 = vadd.f32 %v2630_v0, %v2159_v8  ;;  %v2959_v51 = vmax.f32 %v2831_v3, 0.0  ;;  %v2063_v40 = vld [vmem:[%s5092_s2 + $0x178] sm:$0xff]  ;;  %v2173_v0 = vunpack.c.h.bf16 %v2062_v28 }
 0x2ee   :  { %v2634_v41 = vpop.f32.mrf.mxu0 }
 0x2ef   :  { %3431 = vst [vmem:[%s5093_s4 + $0x130] sm:$0xff] %v3661_v10  ;;  %v2960_v52 = vmax.f32 %v2832_v16, 0.0  ;;  %v2833_v11 = vadd.f32 %v2634_v41, %v2160_v45  ;;  %v2174_v41 = vunpack.c.l.bf16 %v2063_v40 }
 0x2f0   :  { %v2636_v35 = vpop.f32.mrf.mxu0 }
 0x2f1   :  { %v3662_v43 = vpack.c.bf16 %v2960_v52, %v2959_v51  ;;  %v2834_v47 = vadd.f32 %v2636_v35, %v2161_v5  ;;  %v2961_v2 = vmax.f32 %v2833_v11, 0.0  ;;  %v2064_v52 = vld [vmem:[%s5092_s2 + $0x180] sm:$0xff]  ;;  %v2175_v35 = vunpack.c.h.bf16 %v2063_v40 }
 0x2f2   :  { %v2638_v1 = vpop.f32.mrf.mxu0 }
 0x2f3   :  { %3432 = vst [vmem:[%s5093_s4 + $0x138] sm:$0xff] %v3662_v43  ;;  %v2962_v6 = vmax.f32 %v2834_v47, 0.0  ;;  %v2835_v36 = vadd.f32 %v2638_v1, %v2162_v48  ;;  %v2176_v1 = vunpack.c.l.bf16 %v2064_v52 }
 0x2f4   :  { %v2640_v60 = vpop.f32.mrf.mxu0 }
 0x2f5   :  { %v3663_v13 = vpack.c.bf16 %v2962_v6, %v2961_v2  ;;  %v2836_v58 = vadd.f32 %v2640_v60, %v2163_v46  ;;  %v2963_v49 = vmax.f32 %v2835_v36, 0.0  ;;  %v2065_v6 = vld [vmem:[%s5092_s2 + $0x188] sm:$0xff]  ;;  %v2177_v60 = vunpack.c.h.bf16 %v2064_v52 }
 0x2f6   :  { %v2644_v22 = vpop.f32.mrf.mxu0 }
 0x2f7   :  { %3433 = vst [vmem:[%s5093_s4 + $0x140] sm:$0xff] %v3663_v13  ;;  %v2964_v39 = vmax.f32 %v2836_v58, 0.0  ;;  %v2837_v32 = vadd.f32 %v2644_v22, %v2164_v59  ;;  %v2178_v22 = vunpack.c.l.bf16 %v2065_v6 }
 0x2f8   :  { %v2646_v15 = vpop.f32.mrf.mxu0 }
 0x2f9   :  { %v3664_v18 = vpack.c.bf16 %v2964_v39, %v2963_v49  ;;  %v2838_v33 = vadd.f32 %v2646_v15, %v2165_v9  ;;  %v2965_v7 = vmax.f32 %v2837_v32, 0.0  ;;  %v2066_v39 = vld [vmem:[%s5092_s2 + $0x190] sm:$0xff]  ;;  %v2179_v15 = vunpack.c.h.bf16 %v2065_v6 }
 0x2fa   :  { %v2648_v4 = vpop.f32.mrf.mxu0 }
 0x2fb   :  { %3434 = vst [vmem:[%s5093_s4 + $0x148] sm:$0xff] %v3664_v18  ;;  %v2966_v37 = vmax.f32 %v2838_v33, 0.0  ;;  %v2839_v20 = vadd.f32 %v2648_v4, %v2166_v17  ;;  %v2180_v4 = vunpack.c.l.bf16 %v2066_v39 }
 0x2fc   :  { %v2650_v26 = vpop.f32.mrf.mxu0 }
 0x2fd   :  { %v3665_v19 = vpack.c.bf16 %v2966_v37, %v2965_v7  ;;  %v2840_v61 = vadd.f32 %v2650_v26, %v2167_v62  ;;  %v2967_v63 = vmax.f32 %v2839_v20, 0.0  ;;  %v2067_v37 = vld [vmem:[%s5092_s2 + $0x198] sm:$0xff]  ;;  %v2181_v26 = vunpack.c.h.bf16 %v2066_v39 }
 0x2fe   :  { %v2654_v55 = vpop.f32.mrf.mxu0 }
 0x2ff   :  { %3435 = vst [vmem:[%s5093_s4 + $0x150] sm:$0xff] %v3665_v19  ;;  %v2968_v53 = vmax.f32 %v2840_v61, 0.0  ;;  %v2841_v14 = vadd.f32 %v2654_v55, %v2168_v24  ;;  %v2182_v55 = vunpack.c.l.bf16 %v2067_v37 }
 0x300   :  { %v2656_v31 = vpop.f32.mrf.mxu0 }
 0x301   :  { %v3666_v50 = vpack.c.bf16 %v2968_v53, %v2967_v63  ;;  %v2842_v34 = vadd.f32 %v2656_v31, %v2169_v30  ;;  %v2969_v29 = vmax.f32 %v2841_v14, 0.0  ;;  %v2068_v53 = vld [vmem:[%s5092_s2 + $0x1a0] sm:$0xff]  ;;  %v2183_v31 = vunpack.c.h.bf16 %v2067_v37 }
 0x302   :  { %v2658_v27 = vpop.f32.mrf.mxu0 }
 0x303   :  { %3436 = vst [vmem:[%s5093_s4 + $0x158] sm:$0xff] %v3666_v50  ;;  %v2970_v21 = vmax.f32 %v2842_v34, 0.0  ;;  %v2843_v8 = vadd.f32 %v2658_v27, %v2170_v56  ;;  %v2184_v27 = vunpack.c.l.bf16 %v2068_v53 }
 0x304   :  { %v2660_v42 = vpop.f32.mrf.mxu0 }
 0x305   :  { %v3667_v3 = vpack.c.bf16 %v2970_v21, %v2969_v29  ;;  %v2844_v45 = vadd.f32 %v2660_v42, %v2171_v57  ;;  %v2971_v10 = vmax.f32 %v2843_v8, 0.0  ;;  %v2069_v21 = vld [vmem:[%s5092_s2 + $0x1a8] sm:$0xff]  ;;  %v2185_v42 = vunpack.c.h.bf16 %v2068_v53 }
 0x306   :  { %v2664_v38 = vpop.f32.mrf.mxu0 }
 0x307   :  { %3437 = vst [vmem:[%s5093_s4 + $0x160] sm:$0xff] %v3667_v3  ;;  %v2972_v16 = vmax.f32 %v2844_v45, 0.0  ;;  %v2845_v5 = vadd.f32 %v2664_v38, %v2172_v12  ;;  %v2186_v38 = vunpack.c.l.bf16 %v2069_v21 }
 0x308   :  { %v2666_v51 = vpop.f32.mrf.mxu0 }
 0x309   :  { %v3668_v11 = vpack.c.bf16 %v2972_v16, %v2971_v10  ;;  %v2846_v48 = vadd.f32 %v2666_v51, %v2173_v0  ;;  %v2973_v43 = vmax.f32 %v2845_v5, 0.0  ;;  %v2070_v16 = vld [vmem:[%s5092_s2 + $0x1b0] sm:$0xff]  ;;  %v2187_v51 = vunpack.c.h.bf16 %v2069_v21 }
 0x30a   :  { %v2668_v54 = vpop.f32.mrf.mxu0 }
 0x30b   :  { %3438 = vst [vmem:[%s5093_s4 + $0x168] sm:$0xff] %v3668_v11  ;;  %v2974_v47 = vmax.f32 %v2846_v48, 0.0  ;;  %v2847_v46 = vadd.f32 %v2668_v54, %v2174_v41  ;;  %v2188_v54 = vunpack.c.l.bf16 %v2070_v16 }
 0x30c   :  { %v2670_v2 = vpop.f32.mrf.mxu0 }
 0x30d   :  { %v3669_v36 = vpack.c.bf16 %v2974_v47, %v2973_v43  ;;  %v2848_v59 = vadd.f32 %v2670_v2, %v2175_v35  ;;  %v2975_v13 = vmax.f32 %v2847_v46, 0.0  ;;  %v2071_v47 = vld [vmem:[%s5092_s2 + $0x1b8] sm:$0xff]  ;;  %v2189_v2 = vunpack.c.h.bf16 %v2070_v16 }
 0x30e   :  { %v2674_v44 = vpop.f32.mrf.mxu0 }
 0x30f   :  { %3439 = vst [vmem:[%s5093_s4 + $0x170] sm:$0xff] %v3669_v36  ;;  %v2976_v58 = vmax.f32 %v2848_v59, 0.0  ;;  %v2849_v9 = vadd.f32 %v2674_v44, %v2176_v1  ;;  %v2190_v44 = vunpack.c.l.bf16 %v2071_v47 }
 0x310   :  { %v2676_v49 = vpop.f32.mrf.mxu0 }
 0x311   :  { %v3670_v32 = vpack.c.bf16 %v2976_v58, %v2975_v13  ;;  %v2850_v17 = vadd.f32 %v2676_v49, %v2177_v60  ;;  %v2977_v18 = vmax.f32 %v2849_v9, 0.0  ;;  %v2072_v58 = vld [vmem:[%s5092_s2 + $0x1c0] sm:$0xff]  ;;  %v2191_v49 = vunpack.c.h.bf16 %v2071_v47 }
 0x312   :  { %v2678_v25 = vpop.f32.mrf.mxu0 }
 0x313   :  { %3440 = vst [vmem:[%s5093_s4 + $0x178] sm:$0xff] %v3670_v32  ;;  %v2978_v33 = vmax.f32 %v2850_v17, 0.0  ;;  %v2851_v62 = vadd.f32 %v2678_v25, %v2178_v22  ;;  %v2192_v25 = vunpack.c.l.bf16 %v2072_v58 }
 0x314   :  { %v2680_v7 = vpop.f32.mrf.mxu0 }
 0x315   :  { %v3671_v20 = vpack.c.bf16 %v2978_v33, %v2977_v18  ;;  %v2852_v24 = vadd.f32 %v2680_v7, %v2179_v15  ;;  %v2979_v19 = vmax.f32 %v2851_v62, 0.0  ;;  %v2073_v33 = vld [vmem:[%s5092_s2 + $0x1c8] sm:$0xff]  ;;  %v2193_v7 = vunpack.c.h.bf16 %v2072_v58 }
 0x316   :  { %v2684_v23 = vpop.f32.mrf.mxu0 }
 0x317   :  { %3441 = vst [vmem:[%s5093_s4 + $0x180] sm:$0xff] %v3671_v20  ;;  %v2980_v61 = vmax.f32 %v2852_v24, 0.0  ;;  %v2853_v30 = vadd.f32 %v2684_v23, %v2180_v4  ;;  %v2194_v23 = vunpack.c.l.bf16 %v2073_v33 }
 0x318   :  { %v2686_v63 = vpop.f32.mrf.mxu0 }
 0x319   :  { %v3672_v14 = vpack.c.bf16 %v2980_v61, %v2979_v19  ;;  %v2854_v56 = vadd.f32 %v2686_v63, %v2181_v26  ;;  %v2981_v50 = vmax.f32 %v2853_v30, 0.0  ;;  %v2074_v61 = vld [vmem:[%s5092_s2 + $0x1d0] sm:$0xff]  ;;  %v2195_v63 = vunpack.c.h.bf16 %v2073_v33 }
 0x31a   :  { %v2688_v28 = vpop.f32.mrf.mxu0 }
 0x31b   :  { %3442 = vst [vmem:[%s5093_s4 + $0x188] sm:$0xff] %v3672_v14  ;;  %v2982_v34 = vmax.f32 %v2854_v56, 0.0  ;;  %v2855_v57 = vadd.f32 %v2688_v28, %v2182_v55  ;;  %v2196_v28 = vunpack.c.l.bf16 %v2074_v61 }
 0x31c   :  { %v2690_v29 = vpop.f32.mrf.mxu0 }
 0x31d   :  { %v3673_v8 = vpack.c.bf16 %v2982_v34, %v2981_v50  ;;  %v2856_v12 = vadd.f32 %v2690_v29, %v2183_v31  ;;  %v2983_v3 = vmax.f32 %v2855_v57, 0.0  ;;  %v2075_v34 = vld [vmem:[%s5092_s2 + $0x1d8] sm:$0xff]  ;;  %v2197_v29 = vunpack.c.h.bf16 %v2074_v61 }
 0x31e   :  { %v2694_v40 = vpop.f32.mrf.mxu0 }
 0x31f   :  { %3443 = vst [vmem:[%s5093_s4 + $0x190] sm:$0xff] %v3673_v8  ;;  %v2984_v45 = vmax.f32 %v2856_v12, 0.0  ;;  %v2857_v0 = vadd.f32 %v2694_v40, %v2184_v27  ;;  %v2198_v40 = vunpack.c.l.bf16 %v2075_v34 }
 0x320   :  { %v2696_v10 = vpop.f32.mrf.mxu0 }
 0x321   :  { %v3674_v5 = vpack.c.bf16 %v2984_v45, %v2983_v3  ;;  %v2858_v41 = vadd.f32 %v2696_v10, %v2185_v42  ;;  %v2985_v11 = vmax.f32 %v2857_v0, 0.0  ;;  %v2076_v45 = vld [vmem:[%s5092_s2 + $0x1e0] sm:$0xff]  ;;  %v2199_v10 = vunpack.c.h.bf16 %v2075_v34 }
 0x322   :  { %v2698_v52 = vpop.f32.mrf.mxu0 }
 0x323   :  { %3444 = vst [vmem:[%s5093_s4 + $0x198] sm:$0xff] %v3674_v5  ;;  %v2986_v48 = vmax.f32 %v2858_v41, 0.0  ;;  %v2859_v35 = vadd.f32 %v2698_v52, %v2186_v38  ;;  %v2200_v52 = vunpack.c.l.bf16 %v2076_v45 }
 0x324   :  { %v2700_v43 = vpop.f32.mrf.mxu0 }
 0x325   :  { %v3675_v46 = vpack.c.bf16 %v2986_v48, %v2985_v11  ;;  %v2860_v1 = vadd.f32 %v2700_v43, %v2187_v51  ;;  %v2987_v36 = vmax.f32 %v2859_v35, 0.0  ;;  %v2077_v48 = vld [vmem:[%s5092_s2 + $0x1e8] sm:$0xff]  ;;  %v2201_v43 = vunpack.c.h.bf16 %v2076_v45 }
 0x326   :  { %v2704_v6 = vpop.f32.mrf.mxu0 }
 0x327   :  { %3445 = vst [vmem:[%s5093_s4 + $0x1a0] sm:$0xff] %v3675_v46  ;;  %v2988_v59 = vmax.f32 %v2860_v1, 0.0  ;;  %v2861_v60 = vadd.f32 %v2704_v6, %v2188_v54  ;;  %v2202_v6 = vunpack.c.l.bf16 %v2077_v48 }
 0x328   :  { %v2706_v13 = vpop.f32.mrf.mxu0 }
 0x329   :  { %v3676_v9 = vpack.c.bf16 %v2988_v59, %v2987_v36  ;;  %v2862_v22 = vadd.f32 %v2706_v13, %v2189_v2  ;;  %v2989_v32 = vmax.f32 %v2861_v60, 0.0  ;;  %v2078_v59 = vld [vmem:[%s5092_s2 + $0x1f0] sm:$0xff]  ;;  %v2203_v13 = vunpack.c.h.bf16 %v2077_v48 }
 0x32a   :  { %v2708_v39 = vpop.f32.mrf.mxu0 }
 0x32b   :  { %3446 = vst [vmem:[%s5093_s4 + $0x1a8] sm:$0xff] %v3676_v9  ;;  %v2990_v17 = vmax.f32 %v2862_v22, 0.0  ;;  %v2863_v15 = vadd.f32 %v2708_v39, %v2190_v44  ;;  %v2204_v39 = vunpack.c.l.bf16 %v2078_v59 }
 0x32c   :  { %v2710_v18 = vpop.f32.mrf.mxu0 }
 0x32d   :  { %v3677_v62 = vpack.c.bf16 %v2990_v17, %v2989_v32  ;;  %v2864_v4 = vadd.f32 %v2710_v18, %v2191_v49  ;;  %v2991_v20 = vmax.f32 %v2863_v15, 0.0  ;;  %v2079_v17 = vld [vmem:[%s5092_s2 + $0x1f8] sm:$0xff]  ;;  %v2205_v18 = vunpack.c.h.bf16 %v2078_v59 }
 0x32e   :  { %v2714_v37 = vpop.f32.mrf.mxu0 }
 0x32f   :  { %3447 = vst [vmem:[%s5093_s4 + $0x1b0] sm:$0xff] %v3677_v62  ;;  %v2992_v24 = vmax.f32 %v2864_v4, 0.0  ;;  %v2865_v26 = vadd.f32 %v2714_v37, %v2192_v25  ;;  %v2206_v37 = vunpack.c.l.bf16 %v2079_v17 }
 0x330   :  { %v2716_v19 = vpop.f32.mrf.mxu0 }
 0x331   :  { %v3678_v30 = vpack.c.bf16 %v2992_v24, %v2991_v20  ;;  %v2866_v55 = vadd.f32 %v2716_v19, %v2193_v7  ;;  %v2993_v14 = vmax.f32 %v2865_v26, 0.0 }
 0x332   :  { %v2718_v53 = vpop.f32.mrf.mxu0 }
 0x333   :  { %3448 = vst [vmem:[%s5093_s4 + $0x1b8] sm:$0xff] %v3678_v30  ;;  %v2994_v56 = vmax.f32 %v2866_v55, 0.0  ;;  %v2867_v31 = vadd.f32 %v2718_v53, %v2194_v23  ;;  %v2207_v23 = vunpack.c.h.bf16 %v2079_v17 }
 0x334   :  { %v2720_v50 = vpop.f32.mrf.mxu0 }
 0x335   :  { %v3679_v57 = vpack.c.bf16 %v2994_v56, %v2993_v14  ;;  %v2868_v27 = vadd.f32 %v2720_v50, %v2195_v63  ;;  %v2995_v8 = vmax.f32 %v2867_v31, 0.0 }
 0x336   :  { %v2724_v21 = vpop.f32.mrf.mxu0 }
 0x337   :  { %3449 = vst [vmem:[%s5093_s4 + $0x1c0] sm:$0xff] %v3679_v57  ;;  %v2996_v12 = vmax.f32 %v2868_v27, 0.0  ;;  %v2869_v42 = vadd.f32 %v2724_v21, %v2196_v28 }
 0x338   :  { %v2726_v3 = vpop.f32.mrf.mxu0 }
 0x339   :  { %v3680_v0 = vpack.c.bf16 %v2996_v12, %v2995_v8  ;;  %v2870_v38 = vadd.f32 %v2726_v3, %v2197_v29  ;;  %v2997_v5 = vmax.f32 %v2869_v42, 0.0 }
 0x33a   :  { %v2728_v16 = vpop.f32.mrf.mxu0 }
 0x33b   :  { %3450 = vst [vmem:[%s5093_s4 + $0x1c8] sm:$0xff] %v3680_v0  ;;  %v2998_v41 = vmax.f32 %v2870_v38, 0.0  ;;  %v2871_v51 = vadd.f32 %v2728_v16, %v2198_v40 }
 0x33c   :  { %v2730_v11 = vpop.f32.mrf.mxu0 }
 0x33d   :  { %v3681_v35 = vpack.c.bf16 %v2998_v41, %v2997_v5  ;;  %v2872_v54 = vadd.f32 %v2730_v11, %v2199_v10  ;;  %v2999_v46 = vmax.f32 %v2871_v51, 0.0 }
 0x33e   :  { %v2734_v47 = vpop.f32.mrf.mxu0 }
 0x33f   :  { %3451 = vst [vmem:[%s5093_s4 + $0x1d0] sm:$0xff] %v3681_v35  ;;  %v3000_v1 = vmax.f32 %v2872_v54, 0.0  ;;  %v2873_v2 = vadd.f32 %v2734_v47, %v2200_v52 }
 0x340   :  { %v2736_v36 = vpop.f32.mrf.mxu0 }
 0x341   :  { %v3682_v60 = vpack.c.bf16 %v3000_v1, %v2999_v46  ;;  %v2874_v44 = vadd.f32 %v2736_v36, %v2201_v43  ;;  %v3001_v9 = vmax.f32 %v2873_v2, 0.0 }
 0x342   :  { %v2738_v58 = vpop.f32.mrf.mxu0 }
 0x343   :  { %3452 = vst [vmem:[%s5093_s4 + $0x1d8] sm:$0xff] %v3682_v60  ;;  %v3002_v22 = vmax.f32 %v2874_v44, 0.0  ;;  %v2875_v49 = vadd.f32 %v2738_v58, %v2202_v6 }
 0x344   :  { %v2740_v32 = vpop.f32.mrf.mxu0 }
 0x345   :  { %v3683_v15 = vpack.c.bf16 %v3002_v22, %v3001_v9  ;;  %v2876_v25 = vadd.f32 %v2740_v32, %v2203_v13  ;;  %v3003_v62 = vmax.f32 %v2875_v49, 0.0 }
 0x346   :  { %v2744_v33 = vpop.f32.mrf.mxu0 }
 0x347   :  { %3453 = vst [vmem:[%s5093_s4 + $0x1e0] sm:$0xff] %v3683_v15  ;;  %v3004_v4 = vmax.f32 %v2876_v25, 0.0  ;;  %v2877_v7 = vadd.f32 %v2744_v33, %v2204_v39 }
 0x348   :  { %v2746_v20 = vpop.f32.mrf.mxu0 }
 0x349   :  { %v3684_v24 = vpack.c.bf16 %v3004_v4, %v3003_v62  ;;  %v2878_v26 = vadd.f32 %v2746_v20, %v2205_v18  ;;  %v3005_v61 = vmax.f32 %v2877_v7, 0.0 }
 0x34a   :  { %v2748_v19 = vpop.f32.mrf.mxu0 }
 0x34b   :  { %3454 = vst [vmem:[%s5093_s4 + $0x1e8] sm:$0xff] %v3684_v24  ;;  %v3006_v30 = vmax.f32 %v2878_v26, 0.0  ;;  %v2879_v55 = vadd.f32 %v2748_v19, %v2206_v37 }
 0x34c   :  { %v2750_v63 = vpop.f32.mrf.mxu0 }
 0x34d   :  { %v3685_v53 = vpack.c.bf16 %v3006_v30, %v3005_v61  ;;  %v2880_v14 = vadd.f32 %v2750_v63, %v2207_v23  ;;  %v3007_v56 = vmax.f32 %v2879_v55, 0.0 }
 0x34f   :  { %3455 = vst [vmem:[%s5093_s4 + $0x1f0] sm:$0xff] %v3685_v53  ;;  %v3008_v31 = vmax.f32 %v2880_v14, 0.0 }
 0x351   :  { %v3686_v28 = vpack.c.bf16 %v3008_v31, %v3007_v56 }
 0x353   :  { %3456 = vst [vmem:[%s5093_s4 + $0x1f8] sm:$0xff] %v3686_v28 }

</bundles_post_ra>
